<compile_context>
chip_gen: v7x
topology: tpu7x:2x2x1
jax: 0.10.0
libtpu: 0.0.40
codegen_flags: <defaults>
</compile_context>

<pallas_src>
import functools
import math

import jax
import jax.numpy as jnp
from jax import lax
from jax.experimental import pallas as pl
from jax.experimental.pallas import tpu as pltpu


# ----------------------------------------------------------------------------
# Fused kernel: conv gates (9 K-folded matmuls) + activations + full D scan.
# Grid = (B,)  (parallel).  One invocation handles one batch element.
# ----------------------------------------------------------------------------
def _qrnn_scan_kernel(x_ref, w_ref, b_ref, o_ref, *,
                      hidden, D, H, Wp, Cin_p, reverse):
    """x_ref : (1, (D+2)*Cin_p, Hp*Wp)  depth-padded volume; row = plane*Cin_p+c
               (depth-major channel packing on sublanes), spatially padded and
               flattened with row stride Wp on lanes.
       w_ref : (9, 2*hidden, 3*Cin_p)   per spatial tap (kh,kw); K = (kd, c).
       b_ref : (2*hidden, 1) f32        conv bias.
       o_ref : (1, D, hidden, H*Wp)     h_t for every time step (lane-dense).
    """
    L = H * Wp
    K3 = 3 * Cin_p

    # Weights / bias stay resident for the whole scan (hoisted out of the loop).
    w_taps = [w_ref[i] for i in range(9)]        # 9 x (2*hidden, 3*Cin_p)
    b = b_ref[...]                               # (2*hidden, 1) f32

    def step(t, h):
        d = (D - 1 - t) if reverse else t        # direction is static (Python bool)

        # Stacked depth taps d-1, d, d+1 == padded planes d, d+1, d+2:
        # one aligned dynamic sublane slice (start is a multiple of 8).
        row0 = pl.multiple_of(d * Cin_p, Cin_p)
        slab = x_ref[0, pl.ds(row0, K3), :]      # (3*Cin_p, Hp*Wp)

        # 3x3 spatial conv = 9 lane-shifted matmuls with K = 3*Cin_p,
        # accumulated in f32 (works for bf16 inputs).
        acc = None
        for kh in range(3):
            for kw in range(3):
                s = kh * Wp + kw
                win = slab[:, s:s + L]                          # (K3, L)
                part = jnp.dot(w_taps[kh * 3 + kw], win,
                               preferred_element_type=jnp.float32)
                acc = part if acc is None else acc + part
        gates = acc + b                                          # (2*hidden, L)

        # Sublane-aligned gate split (offset = hidden).
        z = jnp.tanh(gates[:hidden])
        # sigmoid(g) == 0.5*(1 + tanh(g/2)): one EUP op, no exp + divide.
        f = 0.5 * (1.0 + jnp.tanh(0.5 * gates[hidden:]))

        # h0 == 0  =>  f*h + (1-f)*z reduces to (1-f)*z at the first step,
        # exactly matching the PyTorch `state=None` path.
        h = f * h + (1.0 - f) * z
        o_ref[0, d] = h.astype(o_ref.dtype)
        return h

    h0 = jnp.zeros((hidden, L), jnp.float32)
    lax.fori_loop(0, D, step, h0, unroll=(D <= 16))


# ----------------------------------------------------------------------------
# Wrapper: layout plumbing (pad / transpose / flatten) in plain JAX.
# ----------------------------------------------------------------------------
def qrnn3d_layer(x, weight, bias, hidden_channels, reverse=False,
                 compute_dtype=jnp.bfloat16, out_dtype=jnp.float32):
    """x: (B, Cin, D, H, W) f32 (NCDHW).  Returns (B, hidden, D, H, W)."""
    B, Cin, D, H, W = x.shape
    N = 2 * hidden_channels
    Cin_p = -(-Cin // 8) * 8                     # sublane-aligned channel count

    # Row stride: smallest Wp >= W+2 with H*Wp % 128 == 0 (guaranteed
    # lane-dense output stores for any H, W).  Hp = H + 3 keeps every
    # flattened tap window in-bounds.
    m = 128 // math.gcd(H, 128)
    Wp = -(-(W + 2) // m) * m
    Hp = H + 3
    P = Hp * Wp
    L = H * Wp

    # ---- input relayout (single pass, cast to compute_dtype) ----------------
    # (B,Cin,D,H,W) -> (B, (D+2)*Cin_p, Hp*Wp): depth-major channel packing on
    # sublanes, flattened padded plane on lanes.
    # TODO(synk): this padded relayout is still one extra HBM pass; removing it
    # entirely needs memory_space=pl.ANY + manual DMA into a pre-zeroed VMEM
    # slab (per-plane spatial padding done in-kernel).
    xt = jnp.transpose(x, (0, 2, 1, 3, 4))                       # (B,D,Cin,H,W)
    xp = jnp.pad(xt, ((0, 0), (1, 1), (0, Cin_p - Cin),
                      (1, Hp - H - 1), (1, Wp - W - 1)))
    xp = xp.reshape(B, (D + 2) * Cin_p, P).astype(compute_dtype)

    # ---- weight packing: (N,Cin,3,3,3) -> (9, N, 3*Cin_p), tap=(kh,kw) ------
    wt = jnp.transpose(weight, (3, 4, 0, 2, 1))                  # (kh,kw,N,kd,Cin)
    wt = jnp.pad(wt, ((0, 0), (0, 0), (0, 0), (0, 0), (0, Cin_p - Cin)))
    w_packed = wt.reshape(9, N, 3 * Cin_p).astype(compute_dtype)
    b2 = bias.reshape(N, 1).astype(jnp.float32)

    # ---- VMEM budget / cost hints -------------------------------------------
    in_item = jnp.dtype(compute_dtype).itemsize
    out_item = jnp.dtype(out_dtype).itemsize
    in_blk = (D + 2) * Cin_p * P * in_item
    out_blk = D * hidden_channels * L * out_item
    w_bytes = w_packed.size * in_item + b2.size * 4
    vmem_need = 2 * (in_blk + out_blk) + w_bytes + (1 << 20)
    vmem_limit = int(min(64 * 2 ** 20, max(32 * 2 ** 20, vmem_need)))
    # TODO(synk): for volumes where vmem_need approaches v7x's 64 MiB/TC, add a
    # D-chunk "arbitrary" grid axis (1-plane halo) and/or H row tiling, plus a
    # spatial "parallel" axis so B=1 still fills both v7x TensorCores.

    cost = pl.CostEstimate(
        flops=2 * 9 * N * 3 * Cin_p * L * D * B,
        transcendentals=2 * hidden_channels * L * D * B,
        bytes_accessed=xp.size * in_item + w_bytes + B * out_blk,
    )

    out = pl.pallas_call(
        functools.partial(_qrnn_scan_kernel, hidden=hidden_channels, D=D,
                          H=H, Wp=Wp, Cin_p=Cin_p, reverse=reverse),
        out_shape=jax.ShapeDtypeStruct((B, D, hidden_channels, L), out_dtype),
        grid=(B,),
        in_specs=[
            pl.BlockSpec((1, (D + 2) * Cin_p, P), lambda b: (b, 0, 0)),
            pl.BlockSpec((9, N, 3 * Cin_p), lambda b: (0, 0, 0)),
            pl.BlockSpec((N, 1), lambda b: (0, 0)),
        ],
        out_specs=pl.BlockSpec((1, D, hidden_channels, L),
                               lambda b: (b, 0, 0, 0)),
        compiler_params=pltpu.CompilerParams(
            dimension_semantics=("parallel",),
            vmem_limit_bytes=vmem_limit),
        cost_estimate=cost,
    )(xp, w_packed, b2)

    # (B, D, hidden, H*Wp) -> (B, hidden, D, H, W)
    out = out.reshape(B, D, hidden_channels, H, Wp)[..., :W]
    return jnp.transpose(out, (0, 2, 1, 3, 4))
    # TODO(synk): a non-None initial `state` (optional module arg) would simply
    # replace h0 inside the kernel; not exposed here (matches state=None path).


# ----------------------------------------------------------------------------
# Pure-JAX reference (mirrors the PyTorch forward exactly).
# ----------------------------------------------------------------------------
def qrnn3d_reference(x, weight, bias, hidden_channels, reverse=False):
    gates = jax.lax.conv_general_dilated(
        x, weight, window_strides=(1, 1, 1),
        padding=((1, 1), (1, 1), (1, 1)),
        dimension_numbers=('NCDHW', 'OIDHW', 'NCDHW'),
    ) + bias[None, :, None, None, None]
    Z = jnp.tanh(gates[:, :hidden_channels])
    F = jax.nn.sigmoid(gates[:, hidden_channels:])
    D = x.shape[2]
    hs = [None] * D
    h = None
    ts = range(D) if not reverse else range(D - 1, -1, -1)
    for t in ts:
        z = Z[:, :, t]
        f = F[:, :, t]
        h = (1.0 - f) * z if h is None else f * h + (1.0 - f) * z
        hs[t] = h
    return jnp.stack(hs, axis=2)  # (B, hidden, D, H, W)


if __name__ == "__main__":
    B, C_in, hidden, D, H, W = 2, 4, 8, 8, 16, 16

    key = jax.random.PRNGKey(0)
    kx, kw, kb = jax.random.split(key, 3)
    x = jax.random.normal(kx, (B, C_in, D, H, W), dtype=jnp.float32)
    weight = 0.1 * jax.random.normal(kw, (2 * hidden, C_in, 3, 3, 3),
                                     dtype=jnp.float32)
    bias = 0.1 * jax.random.normal(kb, (2 * hidden,), dtype=jnp.float32)

    ok = True
    for rev in (False, True):
        ref = qrnn3d_reference(x, weight, bias, hidden, reverse=rev)

        # f32 path: strict correctness check.
        out_f32 = jax.block_until_ready(
            qrnn3d_layer(x, weight, bias, hidden, reverse=rev,
                         compute_dtype=jnp.float32))
        ok &= out_f32.shape == (B, hidden, D, H, W)
        ok &= bool(jnp.allclose(out_f32, ref, rtol=1e-4, atol=1e-4))

        # bf16-input path (default, halves HBM read traffic): loose check.
        out_bf16 = jax.block_until_ready(
            qrnn3d_layer(x, weight, bias, hidden, reverse=rev))
        ok &= out_bf16.shape == (B, hidden, D, H, W)
        ok &= bool(jnp.allclose(out_bf16, ref, rtol=5e-2, atol=5e-2))

    if ok:
        print("KERNEL_OK")
    else:
        raise SystemExit("mismatch vs reference")
</pallas_src>

<mosaic_0001>
module attributes {stable_mosaic.version = 11 : i64} {
  func.func @_qrnn_scan_kernel(%arg0: i32, %arg1: memref<1x80x456xf32, #tpu.memory_space<vmem>>, %arg2: memref<9x16x24xf32, #tpu.memory_space<vmem>>, %arg3: memref<16x1xf32, #tpu.memory_space<vmem>>, %arg4: memref<1x8x8x384xf32, #tpu.memory_space<vmem>>) attributes {dimension_semantics = [#tpu.dimension_semantics<parallel>], iteration_bounds = array<i64: 2>, scalar_prefetch = 0 : i64, scratch_operands = 0 : i64, tpu.core_type = #tpu.core_type<tc>, window_params = [{transform_indices = @transform_0, window_bounds = array<i64: 1, 80, 456>}, {pipeline_mode = #tpu.pipeline_mode<synchronous>, transform_indices = @transform_1, window_bounds = array<i64: 9, 16, 24>}, {pipeline_mode = #tpu.pipeline_mode<synchronous>, transform_indices = @transform_2, window_bounds = array<i64: 16, 1>}, {transform_indices = @transform_3, window_bounds = array<i64: 1, 8, 8, 384>}]} {
    %c0 = arith.constant 0 : index
    %c0_0 = arith.constant 0 : index
    %c0_1 = arith.constant 0 : index
    %0 = vector.load %arg2[%c0, %c0_0, %c0_1] : memref<9x16x24xf32, #tpu.memory_space<vmem>>, vector<1x16x24xf32>
    %1 = vector.shape_cast %0 : vector<1x16x24xf32> to vector<16x24xf32>
    %c1 = arith.constant 1 : index
    %c0_2 = arith.constant 0 : index
    %c0_3 = arith.constant 0 : index
    %2 = vector.load %arg2[%c1, %c0_2, %c0_3] : memref<9x16x24xf32, #tpu.memory_space<vmem>>, vector<1x16x24xf32>
    %3 = vector.shape_cast %2 : vector<1x16x24xf32> to vector<16x24xf32>
    %c2 = arith.constant 2 : index
    %c0_4 = arith.constant 0 : index
    %c0_5 = arith.constant 0 : index
    %4 = vector.load %arg2[%c2, %c0_4, %c0_5] : memref<9x16x24xf32, #tpu.memory_space<vmem>>, vector<1x16x24xf32>
    %5 = vector.shape_cast %4 : vector<1x16x24xf32> to vector<16x24xf32>
    %c3 = arith.constant 3 : index
    %c0_6 = arith.constant 0 : index
    %c0_7 = arith.constant 0 : index
    %6 = vector.load %arg2[%c3, %c0_6, %c0_7] : memref<9x16x24xf32, #tpu.memory_space<vmem>>, vector<1x16x24xf32>
    %7 = vector.shape_cast %6 : vector<1x16x24xf32> to vector<16x24xf32>
    %c4 = arith.constant 4 : index
    %c0_8 = arith.constant 0 : index
    %c0_9 = arith.constant 0 : index
    %8 = vector.load %arg2[%c4, %c0_8, %c0_9] : memref<9x16x24xf32, #tpu.memory_space<vmem>>, vector<1x16x24xf32>
    %9 = vector.shape_cast %8 : vector<1x16x24xf32> to vector<16x24xf32>
    %c5 = arith.constant 5 : index
    %c0_10 = arith.constant 0 : index
    %c0_11 = arith.constant 0 : index
    %10 = vector.load %arg2[%c5, %c0_10, %c0_11] : memref<9x16x24xf32, #tpu.memory_space<vmem>>, vector<1x16x24xf32>
    %11 = vector.shape_cast %10 : vector<1x16x24xf32> to vector<16x24xf32>
    %c6 = arith.constant 6 : index
    %c0_12 = arith.constant 0 : index
    %c0_13 = arith.constant 0 : index
    %12 = vector.load %arg2[%c6, %c0_12, %c0_13] : memref<9x16x24xf32, #tpu.memory_space<vmem>>, vector<1x16x24xf32>
    %13 = vector.shape_cast %12 : vector<1x16x24xf32> to vector<16x24xf32>
    %c7 = arith.constant 7 : index
    %c0_14 = arith.constant 0 : index
    %c0_15 = arith.constant 0 : index
    %14 = vector.load %arg2[%c7, %c0_14, %c0_15] : memref<9x16x24xf32, #tpu.memory_space<vmem>>, vector<1x16x24xf32>
    %15 = vector.shape_cast %14 : vector<1x16x24xf32> to vector<16x24xf32>
    %c8 = arith.constant 8 : index
    %c0_16 = arith.constant 0 : index
    %c0_17 = arith.constant 0 : index
    %16 = vector.load %arg2[%c8, %c0_16, %c0_17] : memref<9x16x24xf32, #tpu.memory_space<vmem>>, vector<1x16x24xf32>
    %17 = vector.shape_cast %16 : vector<1x16x24xf32> to vector<16x24xf32>
    %c0_18 = arith.constant 0 : index
    %c0_19 = arith.constant 0 : index
    %18 = vector.load %arg3[%c0_18, %c0_19] : memref<16x1xf32, #tpu.memory_space<vmem>>, vector<16x1xf32>
    %cst = arith.constant 0.000000e+00 : f32
    %19 = vector.broadcast %cst : f32 to vector<8x384xf32>
    %c0_i32 = arith.constant 0 : i32
    %c8_i32 = arith.constant 8 : i32
    %20 = arith.muli %c0_i32, %c8_i32 : i32
    %21 = tpu.assume_multiple %20, 8 : i32
    %c0_20 = arith.constant 0 : index
    %22 = arith.index_cast %21 : i32 to index
    %c0_21 = arith.constant 0 : index
    %23 = vector.load %arg1[%c0_20, %22, %c0_21] : memref<1x80x456xf32, #tpu.memory_space<vmem>>, vector<1x24x456xf32>
    %24 = vector.shape_cast %23 : vector<1x24x456xf32> to vector<24x456xf32>
    %25 = vector.extract_strided_slice %24 {offsets = [0, 0], sizes = [24, 384], strides = [1, 1]} : vector<24x456xf32> to vector<24x384xf32>
    %cst_22 = arith.constant dense<0.000000e+00> : vector<16x384xf32>
    %26 = tpu.matmul %1, %25, %cst_22 {dimension_numbers = #tpu.dot_dimension_numbers<[1], [0], [0], [1], [0, 0, 1, 1], [], []>} : vector<16x24xf32>, vector<24x384xf32>, vector<16x384xf32> -> vector<16x384xf32>
    %27 = vector.extract_strided_slice %24 {offsets = [0, 1], sizes = [24, 384], strides = [1, 1]} : vector<24x456xf32> to vector<24x384xf32>
    %cst_23 = arith.constant dense<0.000000e+00> : vector<16x384xf32>
    %28 = tpu.matmul %3, %27, %cst_23 {dimension_numbers = #tpu.dot_dimension_numbers<[1], [0], [0], [1], [0, 0, 1, 1], [], []>} : vector<16x24xf32>, vector<24x384xf32>, vector<16x384xf32> -> vector<16x384xf32>
    %29 = arith.addf %26, %28 : vector<16x384xf32>
    %30 = vector.extract_strided_slice %24 {offsets = [0, 2], sizes = [24, 384], strides = [1, 1]} : vector<24x456xf32> to vector<24x384xf32>
    %cst_24 = arith.constant dense<0.000000e+00> : vector<16x384xf32>
    %31 = tpu.matmul %5, %30, %cst_24 {dimension_numbers = #tpu.dot_dimension_numbers<[1], [0], [0], [1], [0, 0, 1, 1], [], []>} : vector<16x24xf32>, vector<24x384xf32>, vector<16x384xf32> -> vector<16x384xf32>
    %32 = arith.addf %29, %31 : vector<16x384xf32>
    %33 = vector.extract_strided_slice %24 {offsets = [0, 24], sizes = [24, 384], strides = [1, 1]} : vector<24x456xf32> to vector<24x384xf32>
    %cst_25 = arith.constant dense<0.000000e+00> : vector<16x384xf32>
    %34 = tpu.matmul %7, %33, %cst_25 {dimension_numbers = #tpu.dot_dimension_numbers<[1], [0], [0], [1], [0, 0, 1, 1], [], []>} : vector<16x24xf32>, vector<24x384xf32>, vector<16x384xf32> -> vector<16x384xf32>
    %35 = arith.addf %32, %34 : vector<16x384xf32>
    %36 = vector.extract_strided_slice %24 {offsets = [0, 25], sizes = [24, 384], strides = [1, 1]} : vector<24x456xf32> to vector<24x384xf32>
    %cst_26 = arith.constant dense<0.000000e+00> : vector<16x384xf32>
    %37 = tpu.matmul %9, %36, %cst_26 {dimension_numbers = #tpu.dot_dimension_numbers<[1], [0], [0], [1], [0, 0, 1, 1], [], []>} : vector<16x24xf32>, vector<24x384xf32>, vector<16x384xf32> -> vector<16x384xf32>
    %38 = arith.addf %35, %37 : vector<16x384xf32>
    %39 = vector.extract_strided_slice %24 {offsets = [0, 26], sizes = [24, 384], strides = [1, 1]} : vector<24x456xf32> to vector<24x384xf32>
    %cst_27 = arith.constant dense<0.000000e+00> : vector<16x384xf32>
    %40 = tpu.matmul %11, %39, %cst_27 {dimension_numbers = #tpu.dot_dimension_numbers<[1], [0], [0], [1], [0, 0, 1, 1], [], []>} : vector<16x24xf32>, vector<24x384xf32>, vector<16x384xf32> -> vector<16x384xf32>
    %41 = arith.addf %38, %40 : vector<16x384xf32>
    %42 = vector.extract_strided_slice %24 {offsets = [0, 48], sizes = [24, 384], strides = [1, 1]} : vector<24x456xf32> to vector<24x384xf32>
    %cst_28 = arith.constant dense<0.000000e+00> : vector<16x384xf32>
    %43 = tpu.matmul %13, %42, %cst_28 {dimension_numbers = #tpu.dot_dimension_numbers<[1], [0], [0], [1], [0, 0, 1, 1], [], []>} : vector<16x24xf32>, vector<24x384xf32>, vector<16x384xf32> -> vector<16x384xf32>
    %44 = arith.addf %41, %43 : vector<16x384xf32>
    %45 = vector.extract_strided_slice %24 {offsets = [0, 49], sizes = [24, 384], strides = [1, 1]} : vector<24x456xf32> to vector<24x384xf32>
    %cst_29 = arith.constant dense<0.000000e+00> : vector<16x384xf32>
    %46 = tpu.matmul %15, %45, %cst_29 {dimension_numbers = #tpu.dot_dimension_numbers<[1], [0], [0], [1], [0, 0, 1, 1], [], []>} : vector<16x24xf32>, vector<24x384xf32>, vector<16x384xf32> -> vector<16x384xf32>
    %47 = arith.addf %44, %46 : vector<16x384xf32>
    %48 = vector.extract_strided_slice %24 {offsets = [0, 50], sizes = [24, 384], strides = [1, 1]} : vector<24x456xf32> to vector<24x384xf32>
    %cst_30 = arith.constant dense<0.000000e+00> : vector<16x384xf32>
    %49 = tpu.matmul %17, %48, %cst_30 {dimension_numbers = #tpu.dot_dimension_numbers<[1], [0], [0], [1], [0, 0, 1, 1], [], []>} : vector<16x24xf32>, vector<24x384xf32>, vector<16x384xf32> -> vector<16x384xf32>
    %50 = arith.addf %47, %49 : vector<16x384xf32>
    %51 = vector.broadcast %18 : vector<16x1xf32> to vector<16x384xf32>
    %52 = arith.addf %50, %51 : vector<16x384xf32>
    %53 = vector.extract_strided_slice %52 {offsets = [0, 0], sizes = [8, 384], strides = [1, 1]} : vector<16x384xf32> to vector<8x384xf32>
    %54 = math.tanh %53 : vector<8x384xf32>
    %55 = vector.extract_strided_slice %52 {offsets = [8, 0], sizes = [8, 384], strides = [1, 1]} : vector<16x384xf32> to vector<8x384xf32>
    %cst_31 = arith.constant 5.000000e-01 : f32
    %56 = vector.broadcast %cst_31 : f32 to vector<8x384xf32>
    %57 = arith.mulf %56, %55 : vector<8x384xf32>
    %58 = math.tanh %57 : vector<8x384xf32>
    %cst_32 = arith.constant 1.000000e+00 : f32
    %59 = vector.broadcast %cst_32 : f32 to vector<8x384xf32>
    %60 = arith.addf %59, %58 : vector<8x384xf32>
    %cst_33 = arith.constant 5.000000e-01 : f32
    %61 = vector.broadcast %cst_33 : f32 to vector<8x384xf32>
    %62 = arith.mulf %61, %60 : vector<8x384xf32>
    %63 = arith.mulf %62, %19 : vector<8x384xf32>
    %cst_34 = arith.constant 1.000000e+00 : f32
    %64 = vector.broadcast %cst_34 : f32 to vector<8x384xf32>
    %65 = arith.subf %64, %62 : vector<8x384xf32>
    %66 = arith.mulf %65, %54 : vector<8x384xf32>
    %67 = arith.addf %63, %66 : vector<8x384xf32>
    %c0_35 = arith.constant 0 : index
    %68 = arith.index_cast %c0_i32 : i32 to index
    %c0_36 = arith.constant 0 : index
    %c0_37 = arith.constant 0 : index
    %69 = vector.load %arg4[%c0_35, %68, %c0_36, %c0_37] : memref<1x8x8x384xf32, #tpu.memory_space<vmem>>, vector<1x1x8x384xf32>
    %70 = vector.shape_cast %69 : vector<1x1x8x384xf32> to vector<8x384xf32>
    %71 = vector.shape_cast %67 : vector<8x384xf32> to vector<1x1x8x384xf32>
    tpu.vector_store %arg4[%c0_35, %68, %c0_36, %c0_37], %71 {strides = array<i32>} : memref<1x8x8x384xf32, #tpu.memory_space<vmem>>, vector<1x1x8x384xf32>,
    %c1_i32 = arith.constant 1 : i32
    %c8_i32_38 = arith.constant 8 : i32
    %72 = arith.muli %c1_i32, %c8_i32_38 : i32
    %73 = tpu.assume_multiple %72, 8 : i32
    %c0_39 = arith.constant 0 : index
    %74 = arith.index_cast %73 : i32 to index
    %c0_40 = arith.constant 0 : index
    %75 = vector.load %arg1[%c0_39, %74, %c0_40] : memref<1x80x456xf32, #tpu.memory_space<vmem>>, vector<1x24x456xf32>
    %76 = vector.shape_cast %75 : vector<1x24x456xf32> to vector<24x456xf32>
    %77 = vector.extract_strided_slice %76 {offsets = [0, 0], sizes = [24, 384], strides = [1, 1]} : vector<24x456xf32> to vector<24x384xf32>
    %cst_41 = arith.constant dense<0.000000e+00> : vector<16x384xf32>
    %78 = tpu.matmul %1, %77, %cst_41 {dimension_numbers = #tpu.dot_dimension_numbers<[1], [0], [0], [1], [0, 0, 1, 1], [], []>} : vector<16x24xf32>, vector<24x384xf32>, vector<16x384xf32> -> vector<16x384xf32>
    %79 = vector.extract_strided_slice %76 {offsets = [0, 1], sizes = [24, 384], strides = [1, 1]} : vector<24x456xf32> to vector<24x384xf32>
    %cst_42 = arith.constant dense<0.000000e+00> : vector<16x384xf32>
    %80 = tpu.matmul %3, %79, %cst_42 {dimension_numbers = #tpu.dot_dimension_numbers<[1], [0], [0], [1], [0, 0, 1, 1], [], []>} : vector<16x24xf32>, vector<24x384xf32>, vector<16x384xf32> -> vector<16x384xf32>
    %81 = arith.addf %78, %80 : vector<16x384xf32>
    %82 = vector.extract_strided_slice %76 {offsets = [0, 2], sizes = [24, 384], strides = [1, 1]} : vector<24x456xf32> to vector<24x384xf32>
    %cst_43 = arith.constant dense<0.000000e+00> : vector<16x384xf32>
    %83 = tpu.matmul %5, %82, %cst_43 {dimension_numbers = #tpu.dot_dimension_numbers<[1], [0], [0], [1], [0, 0, 1, 1], [], []>} : vector<16x24xf32>, vector<24x384xf32>, vector<16x384xf32> -> vector<16x384xf32>
    %84 = arith.addf %81, %83 : vector<16x384xf32>
    %85 = vector.extract_strided_slice %76 {offsets = [0, 24], sizes = [24, 384], strides = [1, 1]} : vector<24x456xf32> to vector<24x384xf32>
    %cst_44 = arith.constant dense<0.000000e+00> : vector<16x384xf32>
    %86 = tpu.matmul %7, %85, %cst_44 {dimension_numbers = #tpu.dot_dimension_numbers<[1], [0], [0], [1], [0, 0, 1, 1], [], []>} : vector<16x24xf32>, vector<24x384xf32>, vector<16x384xf32> -> vector<16x384xf32>
    %87 = arith.addf %84, %86 : vector<16x384xf32>
    %88 = vector.extract_strided_slice %76 {offsets = [0, 25], sizes = [24, 384], strides = [1, 1]} : vector<24x456xf32> to vector<24x384xf32>
    %cst_45 = arith.constant dense<0.000000e+00> : vector<16x384xf32>
    %89 = tpu.matmul %9, %88, %cst_45 {dimension_numbers = #tpu.dot_dimension_numbers<[1], [0], [0], [1], [0, 0, 1, 1], [], []>} : vector<16x24xf32>, vector<24x384xf32>, vector<16x384xf32> -> vector<16x384xf32>
    %90 = arith.addf %87, %89 : vector<16x384xf32>
    %91 = vector.extract_strided_slice %76 {offsets = [0, 26], sizes = [24, 384], strides = [1, 1]} : vector<24x456xf32> to vector<24x384xf32>
    %cst_46 = arith.constant dense<0.000000e+00> : vector<16x384xf32>
    %92 = tpu.matmul %11, %91, %cst_46 {dimension_numbers = #tpu.dot_dimension_numbers<[1], [0], [0], [1], [0, 0, 1, 1], [], []>} : vector<16x24xf32>, vector<24x384xf32>, vector<16x384xf32> -> vector<16x384xf32>
    %93 = arith.addf %90, %92 : vector<16x384xf32>
    %94 = vector.extract_strided_slice %76 {offsets = [0, 48], sizes = [24, 384], strides = [1, 1]} : vector<24x456xf32> to vector<24x384xf32>
    %cst_47 = arith.constant dense<0.000000e+00> : vector<16x384xf32>
    %95 = tpu.matmul %13, %94, %cst_47 {dimension_numbers = #tpu.dot_dimension_numbers<[1], [0], [0], [1], [0, 0, 1, 1], [], []>} : vector<16x24xf32>, vector<24x384xf32>, vector<16x384xf32> -> vector<16x384xf32>
    %96 = arith.addf %93, %95 : vector<16x384xf32>
    %97 = vector.extract_strided_slice %76 {offsets = [0, 49], sizes = [24, 384], strides = [1, 1]} : vector<24x456xf32> to vector<24x384xf32>
    %cst_48 = arith.constant dense<0.000000e+00> : vector<16x384xf32>
    %98 = tpu.matmul %15, %97, %cst_48 {dimension_numbers = #tpu.dot_dimension_numbers<[1], [0], [0], [1], [0, 0, 1, 1], [], []>} : vector<16x24xf32>, vector<24x384xf32>, vector<16x384xf32> -> vector<16x384xf32>
    %99 = arith.addf %96, %98 : vector<16x384xf32>
    %100 = vector.extract_strided_slice %76 {offsets = [0, 50], sizes = [24, 384], strides = [1, 1]} : vector<24x456xf32> to vector<24x384xf32>
    %cst_49 = arith.constant dense<0.000000e+00> : vector<16x384xf32>
    %101 = tpu.matmul %17, %100, %cst_49 {dimension_numbers = #tpu.dot_dimension_numbers<[1], [0], [0], [1], [0, 0, 1, 1], [], []>} : vector<16x24xf32>, vector<24x384xf32>, vector<16x384xf32> -> vector<16x384xf32>
    %102 = arith.addf %99, %101 : vector<16x384xf32>
    %103 = vector.broadcast %18 : vector<16x1xf32> to vector<16x384xf32>
    %104 = arith.addf %102, %103 : vector<16x384xf32>
    %105 = vector.extract_strided_slice %104 {offsets = [0, 0], sizes = [8, 384], strides = [1, 1]} : vector<16x384xf32> to vector<8x384xf32>
    %106 = math.tanh %105 : vector<8x384xf32>
    %107 = vector.extract_strided_slice %104 {offsets = [8, 0], sizes = [8, 384], strides = [1, 1]} : vector<16x384xf32> to vector<8x384xf32>
    %cst_50 = arith.constant 5.000000e-01 : f32
    %108 = vector.broadcast %cst_50 : f32 to vector<8x384xf32>
    %109 = arith.mulf %108, %107 : vector<8x384xf32>
    %110 = math.tanh %109 : vector<8x384xf32>
    %cst_51 = arith.constant 1.000000e+00 : f32
    %111 = vector.broadcast %cst_51 : f32 to vector<8x384xf32>
    %112 = arith.addf %111, %110 : vector<8x384xf32>
    %cst_52 = arith.constant 5.000000e-01 : f32
    %113 = vector.broadcast %cst_52 : f32 to vector<8x384xf32>
    %114 = arith.mulf %113, %112 : vector<8x384xf32>
    %115 = arith.mulf %114, %67 : vector<8x384xf32>
    %cst_53 = arith.constant 1.000000e+00 : f32
    %116 = vector.broadcast %cst_53 : f32 to vector<8x384xf32>
    %117 = arith.subf %116, %114 : vector<8x384xf32>
    %118 = arith.mulf %117, %106 : vector<8x384xf32>
    %119 = arith.addf %115, %118 : vector<8x384xf32>
    %c0_54 = arith.constant 0 : index
    %120 = arith.index_cast %c1_i32 : i32 to index
    %c0_55 = arith.constant 0 : index
    %c0_56 = arith.constant 0 : index
    %121 = vector.load %arg4[%c0_54, %120, %c0_55, %c0_56] : memref<1x8x8x384xf32, #tpu.memory_space<vmem>>, vector<1x1x8x384xf32>
    %122 = vector.shape_cast %121 : vector<1x1x8x384xf32> to vector<8x384xf32>
    %123 = vector.shape_cast %119 : vector<8x384xf32> to vector<1x1x8x384xf32>
    tpu.vector_store %arg4[%c0_54, %120, %c0_55, %c0_56], %123 {strides = array<i32>} : memref<1x8x8x384xf32, #tpu.memory_space<vmem>>, vector<1x1x8x384xf32>,
    %c2_i32 = arith.constant 2 : i32
    %c8_i32_57 = arith.constant 8 : i32
    %124 = arith.muli %c2_i32, %c8_i32_57 : i32
    %125 = tpu.assume_multiple %124, 8 : i32
    %c0_58 = arith.constant 0 : index
    %126 = arith.index_cast %125 : i32 to index
    %c0_59 = arith.constant 0 : index
    %127 = vector.load %arg1[%c0_58, %126, %c0_59] : memref<1x80x456xf32, #tpu.memory_space<vmem>>, vector<1x24x456xf32>
    %128 = vector.shape_cast %127 : vector<1x24x456xf32> to vector<24x456xf32>
    %129 = vector.extract_strided_slice %128 {offsets = [0, 0], sizes = [24, 384], strides = [1, 1]} : vector<24x456xf32> to vector<24x384xf32>
    %cst_60 = arith.constant dense<0.000000e+00> : vector<16x384xf32>
    %130 = tpu.matmul %1, %129, %cst_60 {dimension_numbers = #tpu.dot_dimension_numbers<[1], [0], [0], [1], [0, 0, 1, 1], [], []>} : vector<16x24xf32>, vector<24x384xf32>, vector<16x384xf32> -> vector<16x384xf32>
    %131 = vector.extract_strided_slice %128 {offsets = [0, 1], sizes = [24, 384], strides = [1, 1]} : vector<24x456xf32> to vector<24x384xf32>
    %cst_61 = arith.constant dense<0.000000e+00> : vector<16x384xf32>
    %132 = tpu.matmul %3, %131, %cst_61 {dimension_numbers = #tpu.dot_dimension_numbers<[1], [0], [0], [1], [0, 0, 1, 1], [], []>} : vector<16x24xf32>, vector<24x384xf32>, vector<16x384xf32> -> vector<16x384xf32>
    %133 = arith.addf %130, %132 : vector<16x384xf32>
    %134 = vector.extract_strided_slice %128 {offsets = [0, 2], sizes = [24, 384], strides = [1, 1]} : vector<24x456xf32> to vector<24x384xf32>
    %cst_62 = arith.constant dense<0.000000e+00> : vector<16x384xf32>
    %135 = tpu.matmul %5, %134, %cst_62 {dimension_numbers = #tpu.dot_dimension_numbers<[1], [0], [0], [1], [0, 0, 1, 1], [], []>} : vector<16x24xf32>, vector<24x384xf32>, vector<16x384xf32> -> vector<16x384xf32>
    %136 = arith.addf %133, %135 : vector<16x384xf32>
    %137 = vector.extract_strided_slice %128 {offsets = [0, 24], sizes = [24, 384], strides = [1, 1]} : vector<24x456xf32> to vector<24x384xf32>
    %cst_63 = arith.constant dense<0.000000e+00> : vector<16x384xf32>
    %138 = tpu.matmul %7, %137, %cst_63 {dimension_numbers = #tpu.dot_dimension_numbers<[1], [0], [0], [1], [0, 0, 1, 1], [], []>} : vector<16x24xf32>, vector<24x384xf32>, vector<16x384xf32> -> vector<16x384xf32>
    %139 = arith.addf %136, %138 : vector<16x384xf32>
    %140 = vector.extract_strided_slice %128 {offsets = [0, 25], sizes = [24, 384], strides = [1, 1]} : vector<24x456xf32> to vector<24x384xf32>
    %cst_64 = arith.constant dense<0.000000e+00> : vector<16x384xf32>
    %141 = tpu.matmul %9, %140, %cst_64 {dimension_numbers = #tpu.dot_dimension_numbers<[1], [0], [0], [1], [0, 0, 1, 1], [], []>} : vector<16x24xf32>, vector<24x384xf32>, vector<16x384xf32> -> vector<16x384xf32>
    %142 = arith.addf %139, %141 : vector<16x384xf32>
    %143 = vector.extract_strided_slice %128 {offsets = [0, 26], sizes = [24, 384], strides = [1, 1]} : vector<24x456xf32> to vector<24x384xf32>
    %cst_65 = arith.constant dense<0.000000e+00> : vector<16x384xf32>
    %144 = tpu.matmul %11, %143, %cst_65 {dimension_numbers = #tpu.dot_dimension_numbers<[1], [0], [0], [1], [0, 0, 1, 1], [], []>} : vector<16x24xf32>, vector<24x384xf32>, vector<16x384xf32> -> vector<16x384xf32>
    %145 = arith.addf %142, %144 : vector<16x384xf32>
    %146 = vector.extract_strided_slice %128 {offsets = [0, 48], sizes = [24, 384], strides = [1, 1]} : vector<24x456xf32> to vector<24x384xf32>
    %cst_66 = arith.constant dense<0.000000e+00> : vector<16x384xf32>
    %147 = tpu.matmul %13, %146, %cst_66 {dimension_numbers = #tpu.dot_dimension_numbers<[1], [0], [0], [1], [0, 0, 1, 1], [], []>} : vector<16x24xf32>, vector<24x384xf32>, vector<16x384xf32> -> vector<16x384xf32>
    %148 = arith.addf %145, %147 : vector<16x384xf32>
    %149 = vector.extract_strided_slice %128 {offsets = [0, 49], sizes = [24, 384], strides = [1, 1]} : vector<24x456xf32> to vector<24x384xf32>
    %cst_67 = arith.constant dense<0.000000e+00> : vector<16x384xf32>
    %150 = tpu.matmul %15, %149, %cst_67 {dimension_numbers = #tpu.dot_dimension_numbers<[1], [0], [0], [1], [0, 0, 1, 1], [], []>} : vector<16x24xf32>, vector<24x384xf32>, vector<16x384xf32> -> vector<16x384xf32>
    %151 = arith.addf %148, %150 : vector<16x384xf32>
    %152 = vector.extract_strided_slice %128 {offsets = [0, 50], sizes = [24, 384], strides = [1, 1]} : vector<24x456xf32> to vector<24x384xf32>
    %cst_68 = arith.constant dense<0.000000e+00> : vector<16x384xf32>
    %153 = tpu.matmul %17, %152, %cst_68 {dimension_numbers = #tpu.dot_dimension_numbers<[1], [0], [0], [1], [0, 0, 1, 1], [], []>} : vector<16x24xf32>, vector<24x384xf32>, vector<16x384xf32> -> vector<16x384xf32>
    %154 = arith.addf %151, %153 : vector<16x384xf32>
    %155 = vector.broadcast %18 : vector<16x1xf32> to vector<16x384xf32>
    %156 = arith.addf %154, %155 : vector<16x384xf32>
    %157 = vector.extract_strided_slice %156 {offsets = [0, 0], sizes = [8, 384], strides = [1, 1]} : vector<16x384xf32> to vector<8x384xf32>
    %158 = math.tanh %157 : vector<8x384xf32>
    %159 = vector.extract_strided_slice %156 {offsets = [8, 0], sizes = [8, 384], strides = [1, 1]} : vector<16x384xf32> to vector<8x384xf32>
    %cst_69 = arith.constant 5.000000e-01 : f32
    %160 = vector.broadcast %cst_69 : f32 to vector<8x384xf32>
    %161 = arith.mulf %160, %159 : vector<8x384xf32>
    %162 = math.tanh %161 : vector<8x384xf32>
    %cst_70 = arith.constant 1.000000e+00 : f32
    %163 = vector.broadcast %cst_70 : f32 to vector<8x384xf32>
    %164 = arith.addf %163, %162 : vector<8x384xf32>
    %cst_71 = arith.constant 5.000000e-01 : f32
    %165 = vector.broadcast %cst_71 : f32 to vector<8x384xf32>
    %166 = arith.mulf %165, %164 : vector<8x384xf32>
    %167 = arith.mulf %166, %119 : vector<8x384xf32>
    %cst_72 = arith.constant 1.000000e+00 : f32
    %168 = vector.broadcast %cst_72 : f32 to vector<8x384xf32>
    %169 = arith.subf %168, %166 : vector<8x384xf32>
    %170 = arith.mulf %169, %158 : vector<8x384xf32>
    %171 = arith.addf %167, %170 : vector<8x384xf32>
    %c0_73 = arith.constant 0 : index
    %172 = arith.index_cast %c2_i32 : i32 to index
    %c0_74 = arith.constant 0 : index
    %c0_75 = arith.constant 0 : index
    %173 = vector.load %arg4[%c0_73, %172, %c0_74, %c0_75] : memref<1x8x8x384xf32, #tpu.memory_space<vmem>>, vector<1x1x8x384xf32>
    %174 = vector.shape_cast %173 : vector<1x1x8x384xf32> to vector<8x384xf32>
    %175 = vector.shape_cast %171 : vector<8x384xf32> to vector<1x1x8x384xf32>
    tpu.vector_store %arg4[%c0_73, %172, %c0_74, %c0_75], %175 {strides = array<i32>} : memref<1x8x8x384xf32, #tpu.memory_space<vmem>>, vector<1x1x8x384xf32>,
    %c3_i32 = arith.constant 3 : i32
    %c8_i32_76 = arith.constant 8 : i32
    %176 = arith.muli %c3_i32, %c8_i32_76 : i32
    %177 = tpu.assume_multiple %176, 8 : i32
    %c0_77 = arith.constant 0 : index
    %178 = arith.index_cast %177 : i32 to index
    %c0_78 = arith.constant 0 : index
    %179 = vector.load %arg1[%c0_77, %178, %c0_78] : memref<1x80x456xf32, #tpu.memory_space<vmem>>, vector<1x24x456xf32>
    %180 = vector.shape_cast %179 : vector<1x24x456xf32> to vector<24x456xf32>
    %181 = vector.extract_strided_slice %180 {offsets = [0, 0], sizes = [24, 384], strides = [1, 1]} : vector<24x456xf32> to vector<24x384xf32>
    %cst_79 = arith.constant dense<0.000000e+00> : vector<16x384xf32>
    %182 = tpu.matmul %1, %181, %cst_79 {dimension_numbers = #tpu.dot_dimension_numbers<[1], [0], [0], [1], [0, 0, 1, 1], [], []>} : vector<16x24xf32>, vector<24x384xf32>, vector<16x384xf32> -> vector<16x384xf32>
    %183 = vector.extract_strided_slice %180 {offsets = [0, 1], sizes = [24, 384], strides = [1, 1]} : vector<24x456xf32> to vector<24x384xf32>
    %cst_80 = arith.constant dense<0.000000e+00> : vector<16x384xf32>
    %184 = tpu.matmul %3, %183, %cst_80 {dimension_numbers = #tpu.dot_dimension_numbers<[1], [0], [0], [1], [0, 0, 1, 1], [], []>} : vector<16x24xf32>, vector<24x384xf32>, vector<16x384xf32> -> vector<16x384xf32>
    %185 = arith.addf %182, %184 : vector<16x384xf32>
    %186 = vector.extract_strided_slice %180 {offsets = [0, 2], sizes = [24, 384], strides = [1, 1]} : vector<24x456xf32> to vector<24x384xf32>
    %cst_81 = arith.constant dense<0.000000e+00> : vector<16x384xf32>
    %187 = tpu.matmul %5, %186, %cst_81 {dimension_numbers = #tpu.dot_dimension_numbers<[1], [0], [0], [1], [0, 0, 1, 1], [], []>} : vector<16x24xf32>, vector<24x384xf32>, vector<16x384xf32> -> vector<16x384xf32>
    %188 = arith.addf %185, %187 : vector<16x384xf32>
    %189 = vector.extract_strided_slice %180 {offsets = [0, 24], sizes = [24, 384], strides = [1, 1]} : vector<24x456xf32> to vector<24x384xf32>
    %cst_82 = arith.constant dense<0.000000e+00> : vector<16x384xf32>
    %190 = tpu.matmul %7, %189, %cst_82 {dimension_numbers = #tpu.dot_dimension_numbers<[1], [0], [0], [1], [0, 0, 1, 1], [], []>} : vector<16x24xf32>, vector<24x384xf32>, vector<16x384xf32> -> vector<16x384xf32>
    %191 = arith.addf %188, %190 : vector<16x384xf32>
    %192 = vector.extract_strided_slice %180 {offsets = [0, 25], sizes = [24, 384], strides = [1, 1]} : vector<24x456xf32> to vector<24x384xf32>
    %cst_83 = arith.constant dense<0.000000e+00> : vector<16x384xf32>
    %193 = tpu.matmul %9, %192, %cst_83 {dimension_numbers = #tpu.dot_dimension_numbers<[1], [0], [0], [1], [0, 0, 1, 1], [], []>} : vector<16x24xf32>, vector<24x384xf32>, vector<16x384xf32> -> vector<16x384xf32>
    %194 = arith.addf %191, %193 : vector<16x384xf32>
    %195 = vector.extract_strided_slice %180 {offsets = [0, 26], sizes = [24, 384], strides = [1, 1]} : vector<24x456xf32> to vector<24x384xf32>
    %cst_84 = arith.constant dense<0.000000e+00> : vector<16x384xf32>
    %196 = tpu.matmul %11, %195, %cst_84 {dimension_numbers = #tpu.dot_dimension_numbers<[1], [0], [0], [1], [0, 0, 1, 1], [], []>} : vector<16x24xf32>, vector<24x384xf32>, vector<16x384xf32> -> vector<16x384xf32>
    %197 = arith.addf %194, %196 : vector<16x384xf32>
    %198 = vector.extract_strided_slice %180 {offsets = [0, 48], sizes = [24, 384], strides = [1, 1]} : vector<24x456xf32> to vector<24x384xf32>
    %cst_85 = arith.constant dense<0.000000e+00> : vector<16x384xf32>
    %199 = tpu.matmul %13, %198, %cst_85 {dimension_numbers = #tpu.dot_dimension_numbers<[1], [0], [0], [1], [0, 0, 1, 1], [], []>} : vector<16x24xf32>, vector<24x384xf32>, vector<16x384xf32> -> vector<16x384xf32>
    %200 = arith.addf %197, %199 : vector<16x384xf32>
    %201 = vector.extract_strided_slice %180 {offsets = [0, 49], sizes = [24, 384], strides = [1, 1]} : vector<24x456xf32> to vector<24x384xf32>
    %cst_86 = arith.constant dense<0.000000e+00> : vector<16x384xf32>
    %202 = tpu.matmul %15, %201, %cst_86 {dimension_numbers = #tpu.dot_dimension_numbers<[1], [0], [0], [1], [0, 0, 1, 1], [], []>} : vector<16x24xf32>, vector<24x384xf32>, vector<16x384xf32> -> vector<16x384xf32>
    %203 = arith.addf %200, %202 : vector<16x384xf32>
    %204 = vector.extract_strided_slice %180 {offsets = [0, 50], sizes = [24, 384], strides = [1, 1]} : vector<24x456xf32> to vector<24x384xf32>
    %cst_87 = arith.constant dense<0.000000e+00> : vector<16x384xf32>
    %205 = tpu.matmul %17, %204, %cst_87 {dimension_numbers = #tpu.dot_dimension_numbers<[1], [0], [0], [1], [0, 0, 1, 1], [], []>} : vector<16x24xf32>, vector<24x384xf32>, vector<16x384xf32> -> vector<16x384xf32>
    %206 = arith.addf %203, %205 : vector<16x384xf32>
    %207 = vector.broadcast %18 : vector<16x1xf32> to vector<16x384xf32>
    %208 = arith.addf %206, %207 : vector<16x384xf32>
    %209 = vector.extract_strided_slice %208 {offsets = [0, 0], sizes = [8, 384], strides = [1, 1]} : vector<16x384xf32> to vector<8x384xf32>
    %210 = math.tanh %209 : vector<8x384xf32>
    %211 = vector.extract_strided_slice %208 {offsets = [8, 0], sizes = [8, 384], strides = [1, 1]} : vector<16x384xf32> to vector<8x384xf32>
    %cst_88 = arith.constant 5.000000e-01 : f32
    %212 = vector.broadcast %cst_88 : f32 to vector<8x384xf32>
    %213 = arith.mulf %212, %211 : vector<8x384xf32>
    %214 = math.tanh %213 : vector<8x384xf32>
    %cst_89 = arith.constant 1.000000e+00 : f32
    %215 = vector.broadcast %cst_89 : f32 to vector<8x384xf32>
    %216 = arith.addf %215, %214 : vector<8x384xf32>
    %cst_90 = arith.constant 5.000000e-01 : f32
    %217 = vector.broadcast %cst_90 : f32 to vector<8x384xf32>
    %218 = arith.mulf %217, %216 : vector<8x384xf32>
    %219 = arith.mulf %218, %171 : vector<8x384xf32>
    %cst_91 = arith.constant 1.000000e+00 : f32
    %220 = vector.broadcast %cst_91 : f32 to vector<8x384xf32>
    %221 = arith.subf %220, %218 : vector<8x384xf32>
    %222 = arith.mulf %221, %210 : vector<8x384xf32>
    %223 = arith.addf %219, %222 : vector<8x384xf32>
    %c0_92 = arith.constant 0 : index
    %224 = arith.index_cast %c3_i32 : i32 to index
    %c0_93 = arith.constant 0 : index
    %c0_94 = arith.constant 0 : index
    %225 = vector.load %arg4[%c0_92, %224, %c0_93, %c0_94] : memref<1x8x8x384xf32, #tpu.memory_space<vmem>>, vector<1x1x8x384xf32>
    %226 = vector.shape_cast %225 : vector<1x1x8x384xf32> to vector<8x384xf32>
    %227 = vector.shape_cast %223 : vector<8x384xf32> to vector<1x1x8x384xf32>
    tpu.vector_store %arg4[%c0_92, %224, %c0_93, %c0_94], %227 {strides = array<i32>} : memref<1x8x8x384xf32, #tpu.memory_space<vmem>>, vector<1x1x8x384xf32>,
    %c4_i32 = arith.constant 4 : i32
    %c8_i32_95 = arith.constant 8 : i32
    %228 = arith.muli %c4_i32, %c8_i32_95 : i32
    %229 = tpu.assume_multiple %228, 8 : i32
    %c0_96 = arith.constant 0 : index
    %230 = arith.index_cast %229 : i32 to index
    %c0_97 = arith.constant 0 : index
    %231 = vector.load %arg1[%c0_96, %230, %c0_97] : memref<1x80x456xf32, #tpu.memory_space<vmem>>, vector<1x24x456xf32>
    %232 = vector.shape_cast %231 : vector<1x24x456xf32> to vector<24x456xf32>
    %233 = vector.extract_strided_slice %232 {offsets = [0, 0], sizes = [24, 384], strides = [1, 1]} : vector<24x456xf32> to vector<24x384xf32>
    %cst_98 = arith.constant dense<0.000000e+00> : vector<16x384xf32>
    %234 = tpu.matmul %1, %233, %cst_98 {dimension_numbers = #tpu.dot_dimension_numbers<[1], [0], [0], [1], [0, 0, 1, 1], [], []>} : vector<16x24xf32>, vector<24x384xf32>, vector<16x384xf32> -> vector<16x384xf32>
    %235 = vector.extract_strided_slice %232 {offsets = [0, 1], sizes = [24, 384], strides = [1, 1]} : vector<24x456xf32> to vector<24x384xf32>
    %cst_99 = arith.constant dense<0.000000e+00> : vector<16x384xf32>
    %236 = tpu.matmul %3, %235, %cst_99 {dimension_numbers = #tpu.dot_dimension_numbers<[1], [0], [0], [1], [0, 0, 1, 1], [], []>} : vector<16x24xf32>, vector<24x384xf32>, vector<16x384xf32> -> vector<16x384xf32>
    %237 = arith.addf %234, %236 : vector<16x384xf32>
    %238 = vector.extract_strided_slice %232 {offsets = [0, 2], sizes = [24, 384], strides = [1, 1]} : vector<24x456xf32> to vector<24x384xf32>
    %cst_100 = arith.constant dense<0.000000e+00> : vector<16x384xf32>
    %239 = tpu.matmul %5, %238, %cst_100 {dimension_numbers = #tpu.dot_dimension_numbers<[1], [0], [0], [1], [0, 0, 1, 1], [], []>} : vector<16x24xf32>, vector<24x384xf32>, vector<16x384xf32> -> vector<16x384xf32>
    %240 = arith.addf %237, %239 : vector<16x384xf32>
    %241 = vector.extract_strided_slice %232 {offsets = [0, 24], sizes = [24, 384], strides = [1, 1]} : vector<24x456xf32> to vector<24x384xf32>
    %cst_101 = arith.constant dense<0.000000e+00> : vector<16x384xf32>
    %242 = tpu.matmul %7, %241, %cst_101 {dimension_numbers = #tpu.dot_dimension_numbers<[1], [0], [0], [1], [0, 0, 1, 1], [], []>} : vector<16x24xf32>, vector<24x384xf32>, vector<16x384xf32> -> vector<16x384xf32>
    %243 = arith.addf %240, %242 : vector<16x384xf32>
    %244 = vector.extract_strided_slice %232 {offsets = [0, 25], sizes = [24, 384], strides = [1, 1]} : vector<24x456xf32> to vector<24x384xf32>
    %cst_102 = arith.constant dense<0.000000e+00> : vector<16x384xf32>
    %245 = tpu.matmul %9, %244, %cst_102 {dimension_numbers = #tpu.dot_dimension_numbers<[1], [0], [0], [1], [0, 0, 1, 1], [], []>} : vector<16x24xf32>, vector<24x384xf32>, vector<16x384xf32> -> vector<16x384xf32>
    %246 = arith.addf %243, %245 : vector<16x384xf32>
    %247 = vector.extract_strided_slice %232 {offsets = [0, 26], sizes = [24, 384], strides = [1, 1]} : vector<24x456xf32> to vector<24x384xf32>
    %cst_103 = arith.constant dense<0.000000e+00> : vector<16x384xf32>
    %248 = tpu.matmul %11, %247, %cst_103 {dimension_numbers = #tpu.dot_dimension_numbers<[1], [0], [0], [1], [0, 0, 1, 1], [], []>} : vector<16x24xf32>, vector<24x384xf32>, vector<16x384xf32> -> vector<16x384xf32>
    %249 = arith.addf %246, %248 : vector<16x384xf32>
    %250 = vector.extract_strided_slice %232 {offsets = [0, 48], sizes = [24, 384], strides = [1, 1]} : vector<24x456xf32> to vector<24x384xf32>
    %cst_104 = arith.constant dense<0.000000e+00> : vector<16x384xf32>
    %251 = tpu.matmul %13, %250, %cst_104 {dimension_numbers = #tpu.dot_dimension_numbers<[1], [0], [0], [1], [0, 0, 1, 1], [], []>} : vector<16x24xf32>, vector<24x384xf32>, vector<16x384xf32> -> vector<16x384xf32>
    %252 = arith.addf %249, %251 : vector<16x384xf32>
    %253 = vector.extract_strided_slice %232 {offsets = [0, 49], sizes = [24, 384], strides = [1, 1]} : vector<24x456xf32> to vector<24x384xf32>
    %cst_105 = arith.constant dense<0.000000e+00> : vector<16x384xf32>
    %254 = tpu.matmul %15, %253, %cst_105 {dimension_numbers = #tpu.dot_dimension_numbers<[1], [0], [0], [1], [0, 0, 1, 1], [], []>} : vector<16x24xf32>, vector<24x384xf32>, vector<16x384xf32> -> vector<16x384xf32>
    %255 = arith.addf %252, %254 : vector<16x384xf32>
    %256 = vector.extract_strided_slice %232 {offsets = [0, 50], sizes = [24, 384], strides = [1, 1]} : vector<24x456xf32> to vector<24x384xf32>
    %cst_106 = arith.constant dense<0.000000e+00> : vector<16x384xf32>
    %257 = tpu.matmul %17, %256, %cst_106 {dimension_numbers = #tpu.dot_dimension_numbers<[1], [0], [0], [1], [0, 0, 1, 1], [], []>} : vector<16x24xf32>, vector<24x384xf32>, vector<16x384xf32> -> vector<16x384xf32>
    %258 = arith.addf %255, %257 : vector<16x384xf32>
    %259 = vector.broadcast %18 : vector<16x1xf32> to vector<16x384xf32>
    %260 = arith.addf %258, %259 : vector<16x384xf32>
    %261 = vector.extract_strided_slice %260 {offsets = [0, 0], sizes = [8, 384], strides = [1, 1]} : vector<16x384xf32> to vector<8x384xf32>
    %262 = math.tanh %261 : vector<8x384xf32>
    %263 = vector.extract_strided_slice %260 {offsets = [8, 0], sizes = [8, 384], strides = [1, 1]} : vector<16x384xf32> to vector<8x384xf32>
    %cst_107 = arith.constant 5.000000e-01 : f32
    %264 = vector.broadcast %cst_107 : f32 to vector<8x384xf32>
    %265 = arith.mulf %264, %263 : vector<8x384xf32>
    %266 = math.tanh %265 : vector<8x384xf32>
    %cst_108 = arith.constant 1.000000e+00 : f32
    %267 = vector.broadcast %cst_108 : f32 to vector<8x384xf32>
    %268 = arith.addf %267, %266 : vector<8x384xf32>
    %cst_109 = arith.constant 5.000000e-01 : f32
    %269 = vector.broadcast %cst_109 : f32 to vector<8x384xf32>
    %270 = arith.mulf %269, %268 : vector<8x384xf32>
    %271 = arith.mulf %270, %223 : vector<8x384xf32>
    %cst_110 = arith.constant 1.000000e+00 : f32
    %272 = vector.broadcast %cst_110 : f32 to vector<8x384xf32>
    %273 = arith.subf %272, %270 : vector<8x384xf32>
    %274 = arith.mulf %273, %262 : vector<8x384xf32>
    %275 = arith.addf %271, %274 : vector<8x384xf32>
    %c0_111 = arith.constant 0 : index
    %276 = arith.index_cast %c4_i32 : i32 to index
    %c0_112 = arith.constant 0 : index
    %c0_113 = arith.constant 0 : index
    %277 = vector.load %arg4[%c0_111, %276, %c0_112, %c0_113] : memref<1x8x8x384xf32, #tpu.memory_space<vmem>>, vector<1x1x8x384xf32>
    %278 = vector.shape_cast %277 : vector<1x1x8x384xf32> to vector<8x384xf32>
    %279 = vector.shape_cast %275 : vector<8x384xf32> to vector<1x1x8x384xf32>
    tpu.vector_store %arg4[%c0_111, %276, %c0_112, %c0_113], %279 {strides = array<i32>} : memref<1x8x8x384xf32, #tpu.memory_space<vmem>>, vector<1x1x8x384xf32>,
    %c5_i32 = arith.constant 5 : i32
    %c8_i32_114 = arith.constant 8 : i32
    %280 = arith.muli %c5_i32, %c8_i32_114 : i32
    %281 = tpu.assume_multiple %280, 8 : i32
    %c0_115 = arith.constant 0 : index
    %282 = arith.index_cast %281 : i32 to index
    %c0_116 = arith.constant 0 : index
    %283 = vector.load %arg1[%c0_115, %282, %c0_116] : memref<1x80x456xf32, #tpu.memory_space<vmem>>, vector<1x24x456xf32>
    %284 = vector.shape_cast %283 : vector<1x24x456xf32> to vector<24x456xf32>
    %285 = vector.extract_strided_slice %284 {offsets = [0, 0], sizes = [24, 384], strides = [1, 1]} : vector<24x456xf32> to vector<24x384xf32>
    %cst_117 = arith.constant dense<0.000000e+00> : vector<16x384xf32>
    %286 = tpu.matmul %1, %285, %cst_117 {dimension_numbers = #tpu.dot_dimension_numbers<[1], [0], [0], [1], [0, 0, 1, 1], [], []>} : vector<16x24xf32>, vector<24x384xf32>, vector<16x384xf32> -> vector<16x384xf32>
    %287 = vector.extract_strided_slice %284 {offsets = [0, 1], sizes = [24, 384], strides = [1, 1]} : vector<24x456xf32> to vector<24x384xf32>
    %cst_118 = arith.constant dense<0.000000e+00> : vector<16x384xf32>
    %288 = tpu.matmul %3, %287, %cst_118 {dimension_numbers = #tpu.dot_dimension_numbers<[1], [0], [0], [1], [0, 0, 1, 1], [], []>} : vector<16x24xf32>, vector<24x384xf32>, vector<16x384xf32> -> vector<16x384xf32>
    %289 = arith.addf %286, %288 : vector<16x384xf32>
    %290 = vector.extract_strided_slice %284 {offsets = [0, 2], sizes = [24, 384], strides = [1, 1]} : vector<24x456xf32> to vector<24x384xf32>
    %cst_119 = arith.constant dense<0.000000e+00> : vector<16x384xf32>
    %291 = tpu.matmul %5, %290, %cst_119 {dimension_numbers = #tpu.dot_dimension_numbers<[1], [0], [0], [1], [0, 0, 1, 1], [], []>} : vector<16x24xf32>, vector<24x384xf32>, vector<16x384xf32> -> vector<16x384xf32>
    %292 = arith.addf %289, %291 : vector<16x384xf32>
    %293 = vector.extract_strided_slice %284 {offsets = [0, 24], sizes = [24, 384], strides = [1, 1]} : vector<24x456xf32> to vector<24x384xf32>
    %cst_120 = arith.constant dense<0.000000e+00> : vector<16x384xf32>
    %294 = tpu.matmul %7, %293, %cst_120 {dimension_numbers = #tpu.dot_dimension_numbers<[1], [0], [0], [1], [0, 0, 1, 1], [], []>} : vector<16x24xf32>, vector<24x384xf32>, vector<16x384xf32> -> vector<16x384xf32>
    %295 = arith.addf %292, %294 : vector<16x384xf32>
    %296 = vector.extract_strided_slice %284 {offsets = [0, 25], sizes = [24, 384], strides = [1, 1]} : vector<24x456xf32> to vector<24x384xf32>
    %cst_121 = arith.constant dense<0.000000e+00> : vector<16x384xf32>
    %297 = tpu.matmul %9, %296, %cst_121 {dimension_numbers = #tpu.dot_dimension_numbers<[1], [0], [0], [1], [0, 0, 1, 1], [], []>} : vector<16x24xf32>, vector<24x384xf32>, vector<16x384xf32> -> vector<16x384xf32>
    %298 = arith.addf %295, %297 : vector<16x384xf32>
    %299 = vector.extract_strided_slice %284 {offsets = [0, 26], sizes = [24, 384], strides = [1, 1]} : vector<24x456xf32> to vector<24x384xf32>
    %cst_122 = arith.constant dense<0.000000e+00> : vector<16x384xf32>
    %300 = tpu.matmul %11, %299, %cst_122 {dimension_numbers = #tpu.dot_dimension_numbers<[1], [0], [0], [1], [0, 0, 1, 1], [], []>} : vector<16x24xf32>, vector<24x384xf32>, vector<16x384xf32> -> vector<16x384xf32>
    %301 = arith.addf %298, %300 : vector<16x384xf32>
    %302 = vector.extract_strided_slice %284 {offsets = [0, 48], sizes = [24, 384], strides = [1, 1]} : vector<24x456xf32> to vector<24x384xf32>
    %cst_123 = arith.constant dense<0.000000e+00> : vector<16x384xf32>
    %303 = tpu.matmul %13, %302, %cst_123 {dimension_numbers = #tpu.dot_dimension_numbers<[1], [0], [0], [1], [0, 0, 1, 1], [], []>} : vector<16x24xf32>, vector<24x384xf32>, vector<16x384xf32> -> vector<16x384xf32>
    %304 = arith.addf %301, %303 : vector<16x384xf32>
    %305 = vector.extract_strided_slice %284 {offsets = [0, 49], sizes = [24, 384], strides = [1, 1]} : vector<24x456xf32> to vector<24x384xf32>
    %cst_124 = arith.constant dense<0.000000e+00> : vector<16x384xf32>
    %306 = tpu.matmul %15, %305, %cst_124 {dimension_numbers = #tpu.dot_dimension_numbers<[1], [0], [0], [1], [0, 0, 1, 1], [], []>} : vector<16x24xf32>, vector<24x384xf32>, vector<16x384xf32> -> vector<16x384xf32>
    %307 = arith.addf %304, %306 : vector<16x384xf32>
    %308 = vector.extract_strided_slice %284 {offsets = [0, 50], sizes = [24, 384], strides = [1, 1]} : vector<24x456xf32> to vector<24x384xf32>
    %cst_125 = arith.constant dense<0.000000e+00> : vector<16x384xf32>
    %309 = tpu.matmul %17, %308, %cst_125 {dimension_numbers = #tpu.dot_dimension_numbers<[1], [0], [0], [1], [0, 0, 1, 1], [], []>} : vector<16x24xf32>, vector<24x384xf32>, vector<16x384xf32> -> vector<16x384xf32>
    %310 = arith.addf %307, %309 : vector<16x384xf32>
    %311 = vector.broadcast %18 : vector<16x1xf32> to vector<16x384xf32>
    %312 = arith.addf %310, %311 : vector<16x384xf32>
    %313 = vector.extract_strided_slice %312 {offsets = [0, 0], sizes = [8, 384], strides = [1, 1]} : vector<16x384xf32> to vector<8x384xf32>
    %314 = math.tanh %313 : vector<8x384xf32>
    %315 = vector.extract_strided_slice %312 {offsets = [8, 0], sizes = [8, 384], strides = [1, 1]} : vector<16x384xf32> to vector<8x384xf32>
    %cst_126 = arith.constant 5.000000e-01 : f32
    %316 = vector.broadcast %cst_126 : f32 to vector<8x384xf32>
    %317 = arith.mulf %316, %315 : vector<8x384xf32>
    %318 = math.tanh %317 : vector<8x384xf32>
    %cst_127 = arith.constant 1.000000e+00 : f32
    %319 = vector.broadcast %cst_127 : f32 to vector<8x384xf32>
    %320 = arith.addf %319, %318 : vector<8x384xf32>
    %cst_128 = arith.constant 5.000000e-01 : f32
    %321 = vector.broadcast %cst_128 : f32 to vector<8x384xf32>
    %322 = arith.mulf %321, %320 : vector<8x384xf32>
    %323 = arith.mulf %322, %275 : vector<8x384xf32>
    %cst_129 = arith.constant 1.000000e+00 : f32
    %324 = vector.broadcast %cst_129 : f32 to vector<8x384xf32>
    %325 = arith.subf %324, %322 : vector<8x384xf32>
    %326 = arith.mulf %325, %314 : vector<8x384xf32>
    %327 = arith.addf %323, %326 : vector<8x384xf32>
    %c0_130 = arith.constant 0 : index
    %328 = arith.index_cast %c5_i32 : i32 to index
    %c0_131 = arith.constant 0 : index
    %c0_132 = arith.constant 0 : index
    %329 = vector.load %arg4[%c0_130, %328, %c0_131, %c0_132] : memref<1x8x8x384xf32, #tpu.memory_space<vmem>>, vector<1x1x8x384xf32>
    %330 = vector.shape_cast %329 : vector<1x1x8x384xf32> to vector<8x384xf32>
    %331 = vector.shape_cast %327 : vector<8x384xf32> to vector<1x1x8x384xf32>
    tpu.vector_store %arg4[%c0_130, %328, %c0_131, %c0_132], %331 {strides = array<i32>} : memref<1x8x8x384xf32, #tpu.memory_space<vmem>>, vector<1x1x8x384xf32>,
    %c6_i32 = arith.constant 6 : i32
    %c8_i32_133 = arith.constant 8 : i32
    %332 = arith.muli %c6_i32, %c8_i32_133 : i32
    %333 = tpu.assume_multiple %332, 8 : i32
    %c0_134 = arith.constant 0 : index
    %334 = arith.index_cast %333 : i32 to index
    %c0_135 = arith.constant 0 : index
    %335 = vector.load %arg1[%c0_134, %334, %c0_135] : memref<1x80x456xf32, #tpu.memory_space<vmem>>, vector<1x24x456xf32>
    %336 = vector.shape_cast %335 : vector<1x24x456xf32> to vector<24x456xf32>
    %337 = vector.extract_strided_slice %336 {offsets = [0, 0], sizes = [24, 384], strides = [1, 1]} : vector<24x456xf32> to vector<24x384xf32>
    %cst_136 = arith.constant dense<0.000000e+00> : vector<16x384xf32>
    %338 = tpu.matmul %1, %337, %cst_136 {dimension_numbers = #tpu.dot_dimension_numbers<[1], [0], [0], [1], [0, 0, 1, 1], [], []>} : vector<16x24xf32>, vector<24x384xf32>, vector<16x384xf32> -> vector<16x384xf32>
    %339 = vector.extract_strided_slice %336 {offsets = [0, 1], sizes = [24, 384], strides = [1, 1]} : vector<24x456xf32> to vector<24x384xf32>
    %cst_137 = arith.constant dense<0.000000e+00> : vector<16x384xf32>
    %340 = tpu.matmul %3, %339, %cst_137 {dimension_numbers = #tpu.dot_dimension_numbers<[1], [0], [0], [1], [0, 0, 1, 1], [], []>} : vector<16x24xf32>, vector<24x384xf32>, vector<16x384xf32> -> vector<16x384xf32>
    %341 = arith.addf %338, %340 : vector<16x384xf32>
    %342 = vector.extract_strided_slice %336 {offsets = [0, 2], sizes = [24, 384], strides = [1, 1]} : vector<24x456xf32> to vector<24x384xf32>
    %cst_138 = arith.constant dense<0.000000e+00> : vector<16x384xf32>
    %343 = tpu.matmul %5, %342, %cst_138 {dimension_numbers = #tpu.dot_dimension_numbers<[1], [0], [0], [1], [0, 0, 1, 1], [], []>} : vector<16x24xf32>, vector<24x384xf32>, vector<16x384xf32> -> vector<16x384xf32>
    %344 = arith.addf %341, %343 : vector<16x384xf32>
    %345 = vector.extract_strided_slice %336 {offsets = [0, 24], sizes = [24, 384], strides = [1, 1]} : vector<24x456xf32> to vector<24x384xf32>
    %cst_139 = arith.constant dense<0.000000e+00> : vector<16x384xf32>
    %346 = tpu.matmul %7, %345, %cst_139 {dimension_numbers = #tpu.dot_dimension_numbers<[1], [0], [0], [1], [0, 0, 1, 1], [], []>} : vector<16x24xf32>, vector<24x384xf32>, vector<16x384xf32> -> vector<16x384xf32>
    %347 = arith.addf %344, %346 : vector<16x384xf32>
    %348 = vector.extract_strided_slice %336 {offsets = [0, 25], sizes = [24, 384], strides = [1, 1]} : vector<24x456xf32> to vector<24x384xf32>
    %cst_140 = arith.constant dense<0.000000e+00> : vector<16x384xf32>
    %349 = tpu.matmul %9, %348, %cst_140 {dimension_numbers = #tpu.dot_dimension_numbers<[1], [0], [0], [1], [0, 0, 1, 1], [], []>} : vector<16x24xf32>, vector<24x384xf32>, vector<16x384xf32> -> vector<16x384xf32>
    %350 = arith.addf %347, %349 : vector<16x384xf32>
    %351 = vector.extract_strided_slice %336 {offsets = [0, 26], sizes = [24, 384], strides = [1, 1]} : vector<24x456xf32> to vector<24x384xf32>
    %cst_141 = arith.constant dense<0.000000e+00> : vector<16x384xf32>
    %352 = tpu.matmul %11, %351, %cst_141 {dimension_numbers = #tpu.dot_dimension_numbers<[1], [0], [0], [1], [0, 0, 1, 1], [], []>} : vector<16x24xf32>, vector<24x384xf32>, vector<16x384xf32> -> vector<16x384xf32>
    %353 = arith.addf %350, %352 : vector<16x384xf32>
    %354 = vector.extract_strided_slice %336 {offsets = [0, 48], sizes = [24, 384], strides = [1, 1]} : vector<24x456xf32> to vector<24x384xf32>
    %cst_142 = arith.constant dense<0.000000e+00> : vector<16x384xf32>
    %355 = tpu.matmul %13, %354, %cst_142 {dimension_numbers = #tpu.dot_dimension_numbers<[1], [0], [0], [1], [0, 0, 1, 1], [], []>} : vector<16x24xf32>, vector<24x384xf32>, vector<16x384xf32> -> vector<16x384xf32>
    %356 = arith.addf %353, %355 : vector<16x384xf32>
    %357 = vector.extract_strided_slice %336 {offsets = [0, 49], sizes = [24, 384], strides = [1, 1]} : vector<24x456xf32> to vector<24x384xf32>
    %cst_143 = arith.constant dense<0.000000e+00> : vector<16x384xf32>
    %358 = tpu.matmul %15, %357, %cst_143 {dimension_numbers = #tpu.dot_dimension_numbers<[1], [0], [0], [1], [0, 0, 1, 1], [], []>} : vector<16x24xf32>, vector<24x384xf32>, vector<16x384xf32> -> vector<16x384xf32>
    %359 = arith.addf %356, %358 : vector<16x384xf32>
    %360 = vector.extract_strided_slice %336 {offsets = [0, 50], sizes = [24, 384], strides = [1, 1]} : vector<24x456xf32> to vector<24x384xf32>
    %cst_144 = arith.constant dense<0.000000e+00> : vector<16x384xf32>
    %361 = tpu.matmul %17, %360, %cst_144 {dimension_numbers = #tpu.dot_dimension_numbers<[1], [0], [0], [1], [0, 0, 1, 1], [], []>} : vector<16x24xf32>, vector<24x384xf32>, vector<16x384xf32> -> vector<16x384xf32>
    %362 = arith.addf %359, %361 : vector<16x384xf32>
    %363 = vector.broadcast %18 : vector<16x1xf32> to vector<16x384xf32>
    %364 = arith.addf %362, %363 : vector<16x384xf32>
    %365 = vector.extract_strided_slice %364 {offsets = [0, 0], sizes = [8, 384], strides = [1, 1]} : vector<16x384xf32> to vector<8x384xf32>
    %366 = math.tanh %365 : vector<8x384xf32>
    %367 = vector.extract_strided_slice %364 {offsets = [8, 0], sizes = [8, 384], strides = [1, 1]} : vector<16x384xf32> to vector<8x384xf32>
    %cst_145 = arith.constant 5.000000e-01 : f32
    %368 = vector.broadcast %cst_145 : f32 to vector<8x384xf32>
    %369 = arith.mulf %368, %367 : vector<8x384xf32>
    %370 = math.tanh %369 : vector<8x384xf32>
    %cst_146 = arith.constant 1.000000e+00 : f32
    %371 = vector.broadcast %cst_146 : f32 to vector<8x384xf32>
    %372 = arith.addf %371, %370 : vector<8x384xf32>
    %cst_147 = arith.constant 5.000000e-01 : f32
    %373 = vector.broadcast %cst_147 : f32 to vector<8x384xf32>
    %374 = arith.mulf %373, %372 : vector<8x384xf32>
    %375 = arith.mulf %374, %327 : vector<8x384xf32>
    %cst_148 = arith.constant 1.000000e+00 : f32
    %376 = vector.broadcast %cst_148 : f32 to vector<8x384xf32>
    %377 = arith.subf %376, %374 : vector<8x384xf32>
    %378 = arith.mulf %377, %366 : vector<8x384xf32>
    %379 = arith.addf %375, %378 : vector<8x384xf32>
    %c0_149 = arith.constant 0 : index
    %380 = arith.index_cast %c6_i32 : i32 to index
    %c0_150 = arith.constant 0 : index
    %c0_151 = arith.constant 0 : index
    %381 = vector.load %arg4[%c0_149, %380, %c0_150, %c0_151] : memref<1x8x8x384xf32, #tpu.memory_space<vmem>>, vector<1x1x8x384xf32>
    %382 = vector.shape_cast %381 : vector<1x1x8x384xf32> to vector<8x384xf32>
    %383 = vector.shape_cast %379 : vector<8x384xf32> to vector<1x1x8x384xf32>
    tpu.vector_store %arg4[%c0_149, %380, %c0_150, %c0_151], %383 {strides = array<i32>} : memref<1x8x8x384xf32, #tpu.memory_space<vmem>>, vector<1x1x8x384xf32>,
    %c7_i32 = arith.constant 7 : i32
    %c8_i32_152 = arith.constant 8 : i32
    %384 = arith.muli %c7_i32, %c8_i32_152 : i32
    %385 = tpu.assume_multiple %384, 8 : i32
    %c0_153 = arith.constant 0 : index
    %386 = arith.index_cast %385 : i32 to index
    %c0_154 = arith.constant 0 : index
    %387 = vector.load %arg1[%c0_153, %386, %c0_154] : memref<1x80x456xf32, #tpu.memory_space<vmem>>, vector<1x24x456xf32>
    %388 = vector.shape_cast %387 : vector<1x24x456xf32> to vector<24x456xf32>
    %389 = vector.extract_strided_slice %388 {offsets = [0, 0], sizes = [24, 384], strides = [1, 1]} : vector<24x456xf32> to vector<24x384xf32>
    %cst_155 = arith.constant dense<0.000000e+00> : vector<16x384xf32>
    %390 = tpu.matmul %1, %389, %cst_155 {dimension_numbers = #tpu.dot_dimension_numbers<[1], [0], [0], [1], [0, 0, 1, 1], [], []>} : vector<16x24xf32>, vector<24x384xf32>, vector<16x384xf32> -> vector<16x384xf32>
    %391 = vector.extract_strided_slice %388 {offsets = [0, 1], sizes = [24, 384], strides = [1, 1]} : vector<24x456xf32> to vector<24x384xf32>
    %cst_156 = arith.constant dense<0.000000e+00> : vector<16x384xf32>
    %392 = tpu.matmul %3, %391, %cst_156 {dimension_numbers = #tpu.dot_dimension_numbers<[1], [0], [0], [1], [0, 0, 1, 1], [], []>} : vector<16x24xf32>, vector<24x384xf32>, vector<16x384xf32> -> vector<16x384xf32>
    %393 = arith.addf %390, %392 : vector<16x384xf32>
    %394 = vector.extract_strided_slice %388 {offsets = [0, 2], sizes = [24, 384], strides = [1, 1]} : vector<24x456xf32> to vector<24x384xf32>
    %cst_157 = arith.constant dense<0.000000e+00> : vector<16x384xf32>
    %395 = tpu.matmul %5, %394, %cst_157 {dimension_numbers = #tpu.dot_dimension_numbers<[1], [0], [0], [1], [0, 0, 1, 1], [], []>} : vector<16x24xf32>, vector<24x384xf32>, vector<16x384xf32> -> vector<16x384xf32>
    %396 = arith.addf %393, %395 : vector<16x384xf32>
    %397 = vector.extract_strided_slice %388 {offsets = [0, 24], sizes = [24, 384], strides = [1, 1]} : vector<24x456xf32> to vector<24x384xf32>
    %cst_158 = arith.constant dense<0.000000e+00> : vector<16x384xf32>
    %398 = tpu.matmul %7, %397, %cst_158 {dimension_numbers = #tpu.dot_dimension_numbers<[1], [0], [0], [1], [0, 0, 1, 1], [], []>} : vector<16x24xf32>, vector<24x384xf32>, vector<16x384xf32> -> vector<16x384xf32>
    %399 = arith.addf %396, %398 : vector<16x384xf32>
    %400 = vector.extract_strided_slice %388 {offsets = [0, 25], sizes = [24, 384], strides = [1, 1]} : vector<24x456xf32> to vector<24x384xf32>
    %cst_159 = arith.constant dense<0.000000e+00> : vector<16x384xf32>
    %401 = tpu.matmul %9, %400, %cst_159 {dimension_numbers = #tpu.dot_dimension_numbers<[1], [0], [0], [1], [0, 0, 1, 1], [], []>} : vector<16x24xf32>, vector<24x384xf32>, vector<16x384xf32> -> vector<16x384xf32>
    %402 = arith.addf %399, %401 : vector<16x384xf32>
    %403 = vector.extract_strided_slice %388 {offsets = [0, 26], sizes = [24, 384], strides = [1, 1]} : vector<24x456xf32> to vector<24x384xf32>
    %cst_160 = arith.constant dense<0.000000e+00> : vector<16x384xf32>
    %404 = tpu.matmul %11, %403, %cst_160 {dimension_numbers = #tpu.dot_dimension_numbers<[1], [0], [0], [1], [0, 0, 1, 1], [], []>} : vector<16x24xf32>, vector<24x384xf32>, vector<16x384xf32> -> vector<16x384xf32>
    %405 = arith.addf %402, %404 : vector<16x384xf32>
    %406 = vector.extract_strided_slice %388 {offsets = [0, 48], sizes = [24, 384], strides = [1, 1]} : vector<24x456xf32> to vector<24x384xf32>
    %cst_161 = arith.constant dense<0.000000e+00> : vector<16x384xf32>
    %407 = tpu.matmul %13, %406, %cst_161 {dimension_numbers = #tpu.dot_dimension_numbers<[1], [0], [0], [1], [0, 0, 1, 1], [], []>} : vector<16x24xf32>, vector<24x384xf32>, vector<16x384xf32> -> vector<16x384xf32>
    %408 = arith.addf %405, %407 : vector<16x384xf32>
    %409 = vector.extract_strided_slice %388 {offsets = [0, 49], sizes = [24, 384], strides = [1, 1]} : vector<24x456xf32> to vector<24x384xf32>
    %cst_162 = arith.constant dense<0.000000e+00> : vector<16x384xf32>
    %410 = tpu.matmul %15, %409, %cst_162 {dimension_numbers = #tpu.dot_dimension_numbers<[1], [0], [0], [1], [0, 0, 1, 1], [], []>} : vector<16x24xf32>, vector<24x384xf32>, vector<16x384xf32> -> vector<16x384xf32>
    %411 = arith.addf %408, %410 : vector<16x384xf32>
    %412 = vector.extract_strided_slice %388 {offsets = [0, 50], sizes = [24, 384], strides = [1, 1]} : vector<24x456xf32> to vector<24x384xf32>
    %cst_163 = arith.constant dense<0.000000e+00> : vector<16x384xf32>
    %413 = tpu.matmul %17, %412, %cst_163 {dimension_numbers = #tpu.dot_dimension_numbers<[1], [0], [0], [1], [0, 0, 1, 1], [], []>} : vector<16x24xf32>, vector<24x384xf32>, vector<16x384xf32> -> vector<16x384xf32>
    %414 = arith.addf %411, %413 : vector<16x384xf32>
    %415 = vector.broadcast %18 : vector<16x1xf32> to vector<16x384xf32>
    %416 = arith.addf %414, %415 : vector<16x384xf32>
    %417 = vector.extract_strided_slice %416 {offsets = [0, 0], sizes = [8, 384], strides = [1, 1]} : vector<16x384xf32> to vector<8x384xf32>
    %418 = math.tanh %417 : vector<8x384xf32>
    %419 = vector.extract_strided_slice %416 {offsets = [8, 0], sizes = [8, 384], strides = [1, 1]} : vector<16x384xf32> to vector<8x384xf32>
    %cst_164 = arith.constant 5.000000e-01 : f32
    %420 = vector.broadcast %cst_164 : f32 to vector<8x384xf32>
    %421 = arith.mulf %420, %419 : vector<8x384xf32>
    %422 = math.tanh %421 : vector<8x384xf32>
    %cst_165 = arith.constant 1.000000e+00 : f32
    %423 = vector.broadcast %cst_165 : f32 to vector<8x384xf32>
    %424 = arith.addf %423, %422 : vector<8x384xf32>
    %cst_166 = arith.constant 5.000000e-01 : f32
    %425 = vector.broadcast %cst_166 : f32 to vector<8x384xf32>
    %426 = arith.mulf %425, %424 : vector<8x384xf32>
    %427 = arith.mulf %426, %379 : vector<8x384xf32>
    %cst_167 = arith.constant 1.000000e+00 : f32
    %428 = vector.broadcast %cst_167 : f32 to vector<8x384xf32>
    %429 = arith.subf %428, %426 : vector<8x384xf32>
    %430 = arith.mulf %429, %418 : vector<8x384xf32>
    %431 = arith.addf %427, %430 : vector<8x384xf32>
    %c0_168 = arith.constant 0 : index
    %432 = arith.index_cast %c7_i32 : i32 to index
    %c0_169 = arith.constant 0 : index
    %c0_170 = arith.constant 0 : index
    %433 = vector.load %arg4[%c0_168, %432, %c0_169, %c0_170] : memref<1x8x8x384xf32, #tpu.memory_space<vmem>>, vector<1x1x8x384xf32>
    %434 = vector.shape_cast %433 : vector<1x1x8x384xf32> to vector<8x384xf32>
    %435 = vector.shape_cast %431 : vector<8x384xf32> to vector<1x1x8x384xf32>
    tpu.vector_store %arg4[%c0_168, %432, %c0_169, %c0_170], %435 {strides = array<i32>} : memref<1x8x8x384xf32, #tpu.memory_space<vmem>>, vector<1x1x8x384xf32>,
    %c8_i32_171 = arith.constant 8 : i32
    return
  }
  func.func @transform_0(%arg0: i32) -> (i32, i32, i32) {
    %c0_i32 = arith.constant 0 : i32
    %c0_i32_0 = arith.constant 0 : i32
    %c0_i32_1 = arith.constant 0 : i32
    return %arg0, %c0_i32, %c0_i32_0 : i32, i32, i32
  }
  func.func @transform_1(%arg0: i32) -> (i32, i32, i32) {
    %c0_i32 = arith.constant 0 : i32
    %c0_i32_0 = arith.constant 0 : i32
    %c0_i32_1 = arith.constant 0 : i32
    %c0_i32_2 = arith.constant 0 : i32
    return %c0_i32, %c0_i32_0, %c0_i32_1 : i32, i32, i32
  }
  func.func @transform_2(%arg0: i32) -> (i32, i32) {
    %c0_i32 = arith.constant 0 : i32
    %c0_i32_0 = arith.constant 0 : i32
    %c0_i32_1 = arith.constant 0 : i32
    return %c0_i32, %c0_i32_0 : i32, i32
  }
  func.func @transform_3(%arg0: i32) -> (i32, i32, i32, i32) {
    %c0_i32 = arith.constant 0 : i32
    %c0_i32_0 = arith.constant 0 : i32
    %c0_i32_1 = arith.constant 0 : i32
    %c0_i32_2 = arith.constant 0 : i32
    return %arg0, %c0_i32, %c0_i32_0, %c0_i32_1 : i32, i32, i32, i32
  }
}

</mosaic_0001>

<bundles_post_ra>
// kernel: tpu_custom_call.1
= control target key start
LH: loop header
LB: loop body
LE: loop exit
PB: predicated region body
PF: predicated region fallthrough
CT: control target
= control target key end

     0   :  { %8 = vsyncpa [#allocation3], 0  ;;  %s22573_s0 = inlined_call_operand.hbm [shape: f32[2,80,456], index: 0, kind: input, shape index: {}]   ;;  %s22574_s1 = inlined_call_operand.hbm [shape: f32[9,16,24], index: 1, kind: input, shape index: {}]   ;;  %s22575_s2 = inlined_call_operand.vmem [shape: f32[16,1], index: 2, kind: input, shape index: {}]   ;;  %s22576_s3 = inlined_call_operand.hbm [shape: f32[2,8,8,384], index: 3, kind: output, shape index: {}]  }
   0x1   :  { %10 = vsyncpa [#allocation3 + $0x1], 0 }
   0x2   :  { %11 = vsyncpa [#allocation6], 0 }
   0x3   :  { %12 = vsyncpa [#allocation4], 0 }
   0x4   :  { %14 = vsyncpa [#allocation4 + $0x1], 0  ;;  %s18999_s12 = smov 0   ;;  %s19001_s13 = smov 0  }
   0x5   :  { %s19003_s14 = smov 0   ;;  %s19005_s15 = smov 0  }
   0x6 LB: > { %s19020_s16 = sadd.s32 4294967295, %s18958_s15   ;;  %s14888_s17 = sadd.s32 4294967294, %s18958_s15   ;;  %s18958_s15 = sphi %s19005_s15, %s22596_s15   ;;  %s18954_s14 = sphi %s19003_s14, %s22595_s14   ;;  %s18950_s13 = sphi %s19001_s13, %s22594_s13   ;;  %s18946_s12 = sphi %s18999_s12, %s22593_s12  }
   0x7   : > { %p40_p0 = scmp.ne.s32.totalorder %s18950_s13, %s18946_s12  ;;  %p22577_p1 = scmp.eq.s32.totalorder %s19020_s16, 0 }
   0x8   : > { %p112_p3 = scmp.eq.s32.totalorder %s14888_s17, 1  ;;  %p14889_p5 = scmp.ge.s32.totalorder %s18958_s15, 1 }
   0x9   : > { %p19029_p4 = por %p22577_p1, %p40_p0  ;;  %p119_p7 = scmp.lt.s32.totalorder %s18958_s15, 3 }
   0xa   : > { %p19034_p6 = por %p112_p3, %p40_p0  ;;  %s18960_s21 = smov [#allocation5]  }
   0xb   : > { %s22580_s18 = scalar_select %p19029_p4, 1, 0 }
   0xc   : > { %s22581_s19 = scalar_select %p19034_p6, 1, 0 }
   0xd   : > { %p19039_p8 = pnand %p14889_p5, %p119_p7  ;;  %s131_s22 = sshll.u32 %s18960_s21, 4  ;;  %s19043_s22 = int_to_ptr.vmem [resolvable:$true] %s131_s22 }
   0xe   : > { %s19055_s24 = sadd.s32 1, %s18958_s15   ;;  %s27_s25 = sadd.s32 1, %s18954_s14 }
   0xf   : > { %s22582_s20 = scalar_select %p19039_p8, 1, 0 }
  0x10   : > { %p17272_p9 = pneg %p19039_p8  ;;  %s24_s26 = ssub.s32 %s18958_s15, %s19055_s24 }
  0x11   : > { %s18830_s29 = scalar_lea.hbm %s22574_s1, 2304 }
  0x12   : > { %p19050_p11 = pnand %p17272_p9, %p22577_p1  ;;  %p18831_p12 = scmp.ne.s32.totalorder %s22574_s1, %s18830_s29 }
  0x13   : > { %p18837_p5 = scmp.lt.u32.totalorder %s18830_s29, %s22574_s1 }
  0x14   : > { %p18832_p13 = pneg %p19050_p11 }
  0x16   : > { %p18833_p0 = pnand %p18832_p13, %p18831_p12 }
  0x18   : > { %p18834_p3 = pneg %p18833_p0 }
  0x1a   : > { %p18839_p7 = pnand %p18837_p5, %p18834_p3 }
  0x1c   : > { %18842 = shalt.err (!%p18839_p7)
}
  0x1d   : > { %s18843_s7 = scalar_lea.vmem %s19043_s22, 2304  ;;  %p18851_p2 = scmp.lt.s32.totalorder %s19043_s22, %s19043_s22 }
  0x1e   : > { %p18844_p9 = scmp.ne.s32.totalorder %s19043_s22, %s18843_s7  ;;  %p18852_p6 = scmp.lt.s32.totalorder %s18843_s7, %s18843_s7 }
  0x20   : > { %p18846_p10 = pnand %p18844_p9, %p18832_p13  ;;  %p18853_p4 = por %p18852_p6, %p18851_p2 }
  0x22   : > { %p18847_p1 = pneg %p18846_p10 }
  0x24   : > { %p18854_p8 = pnand %p18853_p4, %p18847_p1 }
  0x26   : > { %18857 = shalt.err (!%p18854_p8)
}
  0x27   : > { %s18961_s8 = smov 128   ;;  %s18962_s9 = smov 8  }
  0x28   : > { %17275 = dma.hbm_to_vmem [thread:$0]  (!%p19050_p11), %s22574_s1, 2304, %s19043_s22, [#allocation6], %s18961_s8, %s18961_s8, %s18962_s9  }
  0x29   : > { %p25_p2 = scmp.eq.s32.totalorder %s24_s26, 0  ;;  %p34_p1 = scmp.ne.s32.totalorder %s18954_s14, %s18950_s13 }
  0x2a   : > { %p35_p4 = scmp.eq.s32.totalorder %s18958_s15, 0  ;;  %p17285_p6 = scmp.lt.s32.totalorder %s18958_s15, 2 }
  0x2b   : > { %s19086_s17 = scalar_select %p25_p2, %s18954_s14, %s27_s25  }
  0x2c   : > { %p36_p8 = por %p35_p4, %p34_p1  ;;  %p22584_p10 = scmp.eq.s32.totalorder %s19020_s16, 1 }
  0x2d   : > { %s148_s27 = sand.u32 1, %s18954_s14   ;;  %s17260_s28 = smul.u32 5120, %s18958_s15 }
  0x2e   : > { %p19090_p12 = por %p22584_p10, %p34_p1  ;;  %s17259_s29 = smul.u32 320, %s148_s27 }
  0x2f   : > { %s19099_s4 = scalar_lea.hbm %s22573_s0, %s17260_s28  ;;  %p19101_p11 = pnand %p17285_p6, %p36_p8 }
  0x30   : > { %s152_s25 = scalar_lea.vmem [#allocation2], %s17259_s29  ;;  %s19107_s5 = scalar_lea.sflag [#allocation3], %s148_s27 }
  0x31   : > { %s159_s26 = sshll.u32 %s152_s25, 4  ;;  %s18858_s6 = scalar_lea.hbm %s19099_s4, 5120  ;;  %s19105_s26 = int_to_ptr.vmem [resolvable:$true] %s159_s26 }
  0x32   : > { %p18859_p13 = scmp.ne.s32.totalorder %s19099_s4, %s18858_s6  ;;  %p18860_p0 = pneg %p19101_p11 }
  0x33   : > { %s18863_s9 = scalar_lea.hbm %s22573_s0, 10240  ;;  %p18864_p7 = scmp.lt.u32.totalorder %s19099_s4, %s22573_s0 }
  0x34   : > { %p18861_p3 = pnand %p18860_p0, %p18859_p13  ;;  %p18865_p9 = scmp.lt.u32.totalorder %s18863_s9, %s18858_s6 }
  0x35   : > { %p18867_p1 = scmp.lt.u32.totalorder %s18858_s6, %s19099_s4 }
  0x36   : > { %p18862_p5 = pneg %p18861_p3  ;;  %p18866_p2 = por %p18865_p9, %p18864_p7 }
  0x38   : > { %p18868_p4 = por %p18867_p1, %p18866_p2 }
  0x3a   : > { %p18869_p6 = pnand %p18868_p4, %p18862_p5 }
  0x3c   : > { %18872 = shalt.err (!%p18869_p6)
}
  0x3d   : > { %s18873_s27 = scalar_lea.vmem %s19105_s26, 5120  ;;  %s18963_s28 = smov [#allocation2]  }
  0x3e   : > { %p18874_p8 = scmp.ne.s32.totalorder %s19105_s26, %s18873_s27  ;;  %s18878_s29 = sshll.u32 %s18963_s28, 4  ;;  %s18879_s29 = int_to_ptr.vmem [resolvable:$false] %s18878_s29 }
  0x3f   : > { %s18880_s23 = scalar_lea.vmem %s18879_s29, 10240  ;;  %p18881_p3 = scmp.lt.s32.totalorder %s19105_s26, %s18879_s29 }
  0x40   : > { %p18876_p10 = pnand %p18874_p8, %p18860_p0  ;;  %p18882_p7 = scmp.lt.s32.totalorder %s18880_s23, %s18873_s27 }
  0x42   : > { %p18877_p13 = pneg %p18876_p10  ;;  %p18883_p9 = por %p18882_p7, %p18881_p3 }
  0x44   : > { %p18884_p2 = pnand %p18883_p9, %p18877_p13 }
  0x46   : > { %18887 = shalt.err (!%p18884_p2)
}
  0x47   : > { %s18964_s30 = smov 512   ;;  %s18965_s25 = smov 32  }
  0x48   : > { %17279 = dma.hbm_to_vmem [thread:$0]  (!%p19101_p11), %s19099_s4, 5120, %s19105_s26, %s19107_s5, %s18964_s30, %s18964_s30, %s18965_s25  }
  0x49   : > { %p22587_p0 = scmp.ne.s32.totalorder %s22582_s20, 0 }
  0x4a   : > { %s19138_s6 = sand.u32 (!%p22587_p0), 1, %s18950_s13   ;;  %p22588_p5 = scmp.ne.s32.totalorder (!%p22587_p0), %s22580_s18, 0 }
  0x4b   : > { %171 = sbr.rel (%p22587_p0) target bundleno = 1513 (0x5e9), region = 32  ;;  %s174_s8 = scalar_lea.sflag (!%p22587_p0), [#allocation3], %s19138_s6 }
  0x4c   : > { %s17261_s7 = smul.u32 (!%p22587_p0), 320, %s19138_s6 }
  0x4e   : > { %s19142_s9 = scalar_lea.vmem (!%p22587_p0), [#allocation2], %s17261_s7 }
  0x52   : > { %18933 = dma.done.wait (%p22588_p5), %s174_s8, 5120  }
  0x53   : > { %18935 = vsyncadd (%p22588_p5), %s174_s8, 4294962176  ;;  %p22589_p11 = scmp.eq.s32.totalorder %s19020_s16, 0 }
  0x55   : > { %18937 = dma.done.wait (%p22589_p11), [#allocation6], 2304   ;;  %p22590_p1 = pmov %p22589_p11 }
  0x56   : > { %v19153_v0 = vld [vmem:[%s19142_s9 + $0x20] sm:$0xff]  ;;  %v19156_v1 = vld [vmem:[%s19142_s9 + $0x28] sm:$0xff]  ;;  %v241_v5 = vld [vmem:[%s19142_s9 + $0x30] sm:$0xff]  ;;  %s18966_s18 = smov 127   ;;  %v18967_v12 = vmov 0   ;;  %v18968_v16 = vmov 0.0  }
  0x57   : > { %18939 = vsyncadd (%p22590_p1), [#allocation6], 4294964992  ;;  %v19159_v2 = vld [vmem:[%s19142_s9] sm:$0xff]  ;;  %v19163_v3 = vpack.i.bf16 %v19156_v1, %v19153_v0  ;;  %v19166_v4 = vld [vmem:[%s19142_s9 + $0x8] sm:$0xff]  ;;  %17497 = vset.pattern.permute.xlu0 %v18967_v12  ;;  %17498 = vset.pattern.permute.xlu1 %v18967_v12  ;;  %vm302_vm0 = vcmask 195584   ;;  %s18969_s20 = smov 126  }
  0x58   : > { %v242_v6 = vld [vmem:[%s19142_s9 + $0x38] sm:$0xff]  ;;  %v19172_v7 = vpack.i.bf16 %v19166_v4, %v19159_v2  ;;  %v237_v8 = vld [vmem:[%s19142_s9 + $0x10] sm:$0xff]  ;;  %v19189_v13 = vld [vmem:[%s19142_s9 + $0x48] sm:$0xff]  ;;  %373 = vmatprep.mubr.f32.mxu0 %v18968_v16  ;;  %s18970_s4 = smov 104   ;;  %s18971_s22 = smov 103   ;;  %vm283_vm1 = vcmask 1039360   ;;  %v16307_v58 = vpack.c.bf16 %v19156_v1, %v19166_v4  ;;  %v16309_v4 = vpack.c.bf16 %v19153_v0, %v19159_v2 }
  0x59   : > { %v238_v9 = vld [vmem:[%s19142_s9 + $0x18] sm:$0xff]  ;;  %17348 = vrot.lane.b32.xlu1 %v19163_v3, %s18966_s18  ;;  %v19178_v10 = vpack.i.bf16 %v242_v6, %v241_v5  ;;  %v16311_v14 = vpack.c.bf16 %v241_v5, %v237_v8  ;;  %v19192_v15 = vld [vmem:[%s19142_s9 + $0x40] sm:$0xff]  ;;  %v19198_v17 = vld [vmem:[%s19142_s9 + $0x50] sm:$0xff]  ;;  %s18972_s26 = smov 102   ;;  %s18973_s5 = smov 80   ;;  %vm643_vm2 = vcmask 1031168  }
  0x5a   : > { %17338 = vrot.lane.b32.xlu0 %v19172_v7, %s18966_s18  ;;  %v19182_v11 = vpack.i.bf16 %v238_v9, %v237_v8  ;;  %v19203_v18 = vld [vmem:[%s19142_s9 + $0x58] sm:$0xff]  ;;  %v19209_v19 = vld [vmem:[#allocation5] sm:$0xff]  ;;  %v19215_v20 = vld [vmem:[#allocation5 + $0x8] sm:$0xff]  ;;  %s18974_s10 = smov 79   ;;  %s18975_s11 = smov 78   ;;  %v19363_v59 = vpack.i.bf16 %v19189_v13, %v19192_v15  ;;  %vm850_vm3 = vcmask 850944  }
  0x5b   : > { %16312 = vmatprep.subr.bf16.mxu1 %v16311_v14  ;;  %15666 = vmatprep.mubr.msk.f32.mxu1 %vm302_vm0, %v19209_v19  ;;  %v19233_v21 = vld [vmem:[#allocation5 + $0x20] sm:$0xff]  ;;  %v231_v42 = vld [vmem:[%s22575_s2 + $0x8] sm:$0xff]  ;;  %v19348_v49 = vld [vmem:[#allocation5 + $0x10] sm:$0xff]  ;;  %v19369_v61 = vpack.i.bf16 %v19203_v18, %v19198_v17  ;;  %vm1057_vm4 = vcmask 842752   ;;  %vm1264_vm5 = vcmask 834560   ;;  %vm1471_vm6 = vcmask 654336  }
  0x5c   : > { %16314 = vmatpush3.bf16.msra.mxu1 %v16311_v14  ;;  %v230_v44 = vld [vmem:[%s22575_s2] sm:$0xff]  ;;  %v19355_v55 = vld [vmem:[#allocation5 + $0x18] sm:$0xff]  ;;  %vm1678_vm7 = vcmask 646144   ;;  %vm1885_vm8 = vcmask 637952   ;;  %s17262_s30 = smul.u32 192, %s19138_s6 }
  0x5d   : > { %17353 = vrot.lane.b32.xlu1 %v19178_v10, %s18966_s18  ;;  %15664 = vmatprep.subr.mxu1 %v19198_v17  ;;  %v19386_v0 = vld [vmem:[%s19142_s9 + $0x60] sm:$0xff]  ;;  %s17263_s7 = smul.u32 3072, %s19020_s16  ;;  %s14785_s16 = scalar_lea.sflag [#allocation4], %s19138_s6 }
  0x5e   : > { %17343 = vrot.lane.b32.xlu0 %v19182_v11, %s18966_s18  ;;  %s20346_s25 = scalar_lea.vmem [#allocation7], %s17262_s30 }
  0x5f   : > { %s14798_s8 = sshll.u32 %s20346_s25, 4  ;;  %s22528_s8 = int_to_ptr.vmem [resolvable:$true] %s14798_s8 }
  0x60   : > { %15665 = vmatpush3.msra.mxu1 %v19198_v17 }
  0x61   : > { %277 = vrot.lane.b32.xlu1 %v19189_v13, %s18966_s18  ;;  %15667 = vmatmul.mubr.msk.f32.vlgmr.msra.gmra.mrb[0].mxu1 %vm302_vm0, %v19215_v20 }
  0x62   : > { %275 = vrot.lane.b32.xlu0 %v19192_v15, %s18966_s18  ;;  %15675 = vmatprep.mubr.msk.f32.mxu1 %vm302_vm0, %v19233_v21 }
  0x65   : > { %281 = vrot.lane.b32.xlu1 %v19203_v18, %s18966_s18 }
  0x66   : > { %279 = vrot.lane.b32.xlu0 %v19198_v17, %s18966_s18 }
  0x69   : > { %17363 = vrot.lane.b32.xlu1 %v19182_v11, %s18969_s20 }
  0x6a   : > { %17358 = vrot.lane.b32.xlu0 %v19172_v7, %s18969_s20 }
  0x6d   : > { %17373 = vrot.lane.b32.xlu1 %v19178_v10, %s18969_s20 }
  0x6e   : > { %17368 = vrot.lane.b32.xlu0 %v19163_v3, %s18969_s20 }
  0x71   : > { %637 = vrot.lane.b32.xlu1 %v19189_v13, %s18969_s20 }
  0x72   : > { %635 = vrot.lane.b32.xlu0 %v19192_v15, %s18969_s20 }
  0x75   : > { %641 = vrot.lane.b32.xlu1 %v19203_v18, %s18969_s20 }
  0x76   : > { %639 = vrot.lane.b32.xlu0 %v19198_v17, %s18969_s20 }
  0x79   : > { %17383 = vrot.lane.b32.xlu1 %v19182_v11, %s18970_s4 }
  0x7a   : > { %17378 = vrot.lane.b32.xlu0 %v19172_v7, %s18970_s4 }
  0x7d   : > { %17393 = vrot.lane.b32.xlu1 %v19178_v10, %s18970_s4 }
  0x7e   : > { %17388 = vrot.lane.b32.xlu0 %v19163_v3, %s18970_s4 }
  0x81   : > { %844 = vrot.lane.b32.xlu1 %v19189_v13, %s18970_s4 }
  0x82   : > { %842 = vrot.lane.b32.xlu0 %v19192_v15, %s18970_s4 }
  0x85   : > { %848 = vrot.lane.b32.xlu1 %v19203_v18, %s18970_s4 }
  0x86   : > { %846 = vrot.lane.b32.xlu0 %v19198_v17, %s18970_s4 }
  0x89   : > { %17403 = vrot.lane.b32.xlu1 %v19182_v11, %s18971_s22 }
  0x8a   : > { %17398 = vrot.lane.b32.xlu0 %v19172_v7, %s18971_s22 }
  0x8d   : > { %17413 = vrot.lane.b32.xlu1 %v19178_v10, %s18971_s22 }
  0x8e   : > { %17408 = vrot.lane.b32.xlu0 %v19163_v3, %s18971_s22 }
  0x91   : > { %1051 = vrot.lane.b32.xlu1 %v19189_v13, %s18971_s22 }
  0x92   : > { %1049 = vrot.lane.b32.xlu0 %v19192_v15, %s18971_s22 }
  0x95   : > { %1055 = vrot.lane.b32.xlu1 %v19203_v18, %s18971_s22 }
  0x96   : > { %1053 = vrot.lane.b32.xlu0 %v19198_v17, %s18971_s22 }
  0x99   : > { %17423 = vrot.lane.b32.xlu1 %v19182_v11, %s18972_s26 }
  0x9a   : > { %17418 = vrot.lane.b32.xlu0 %v19172_v7, %s18972_s26 }
  0x9d   : > { %17433 = vrot.lane.b32.xlu1 %v19178_v10, %s18972_s26 }
  0x9e   : > { %17428 = vrot.lane.b32.xlu0 %v19163_v3, %s18972_s26 }
  0xa1   : > { %1258 = vrot.lane.b32.xlu1 %v19189_v13, %s18972_s26 }
  0xa2   : > { %1256 = vrot.lane.b32.xlu0 %v19192_v15, %s18972_s26 }
  0xa5   : > { %1262 = vrot.lane.b32.xlu1 %v19203_v18, %s18972_s26 }
  0xa6   : > { %1260 = vrot.lane.b32.xlu0 %v19198_v17, %s18972_s26 }
  0xa9   : > { %17443 = vrot.lane.b32.xlu1 %v19182_v11, %s18973_s5 }
  0xaa   : > { %17438 = vrot.lane.b32.xlu0 %v19172_v7, %s18973_s5 }
  0xad   : > { %17453 = vrot.lane.b32.xlu1 %v19178_v10, %s18973_s5 }
  0xae   : > { %17448 = vrot.lane.b32.xlu0 %v19163_v3, %s18973_s5 }
  0xb1   : > { %1465 = vrot.lane.b32.xlu1 %v19189_v13, %s18973_s5 }
  0xb2   : > { %1463 = vrot.lane.b32.xlu0 %v19192_v15, %s18973_s5 }
  0xb5   : > { %1469 = vrot.lane.b32.xlu1 %v19203_v18, %s18973_s5 }
  0xb6   : > { %1467 = vrot.lane.b32.xlu0 %v19198_v17, %s18973_s5 }
  0xb9   : > { %17463 = vrot.lane.b32.xlu1 %v19182_v11, %s18974_s10 }
  0xba   : > { %17458 = vrot.lane.b32.xlu0 %v19172_v7, %s18974_s10 }
  0xbd   : > { %17473 = vrot.lane.b32.xlu1 %v19178_v10, %s18974_s10 }
  0xbe   : > { %17468 = vrot.lane.b32.xlu0 %v19163_v3, %s18974_s10 }
  0xc1   : > { %1672 = vrot.lane.b32.xlu1 %v19189_v13, %s18974_s10 }
  0xc2   : > { %1670 = vrot.lane.b32.xlu0 %v19192_v15, %s18974_s10 }
  0xc5   : > { %1676 = vrot.lane.b32.xlu1 %v19203_v18, %s18974_s10 }
  0xc6   : > { %1674 = vrot.lane.b32.xlu0 %v19198_v17, %s18974_s10 }
  0xc9   : > { %17483 = vrot.lane.b32.xlu1 %v19182_v11, %s18975_s11 }
  0xca   : > { %17478 = vrot.lane.b32.xlu0 %v19172_v7, %s18975_s11 }
  0xcb   : > { %v17349_v22 = vpop.permute.xlu1 %17348 }
  0xcc   : > { %v17339_v23 = vpop.permute.xlu0 %17338  ;;  %v17351_v24 = vunpack.i.h.bf16 %v17349_v22  ;;  %v17350_v25 = vunpack.i.l.bf16 %v17349_v22 }
  0xcd   : > { %17493 = vrot.lane.b32.xlu1 %v19178_v10, %s18975_s11  ;;  %v17341_v26 = vunpack.i.h.bf16 %v17339_v23  ;;  %v17340_v27 = vunpack.i.l.bf16 %v17339_v23 }
  0xce   : > { %17488 = vrot.lane.b32.xlu0 %v19163_v3, %s18975_s11  ;;  %v287_v34 = vsel %vm283_vm1, %v17350_v25, %v17351_v24 }
  0xcf   : > { %v17354_v28 = vpop.permute.xlu1 %17353  ;;  %v284_v33 = vsel %vm283_vm1, %v17340_v27, %v17341_v26 }
  0xd0   : > { %v17355_v29 = vunpack.i.l.bf16 %v17354_v28  ;;  %v17344_v30 = vpop.permute.xlu0 %17343  ;;  %v17356_v35 = vunpack.i.h.bf16 %v17354_v28  ;;  %v16301_v41 = vpack.c.bf16 %v287_v34, %v284_v33  ;;  %v19416_v34 = vld [vmem:[#allocation5 + $0x28] sm:$0xff] }
  0xd1   : > { %v17345_v31 = vunpack.i.l.bf16 %v17344_v30  ;;  %1879 = vrot.lane.b32.xlu1 %v19189_v13, %s18975_s11  ;;  %v17346_v36 = vunpack.i.h.bf16 %v17344_v30  ;;  %v19407_v30 = vld [vmem:[%s19142_s9 + $0x70] sm:$0xff] }
  0xd2   : > { %1877 = vrot.lane.b32.xlu0 %v19192_v15, %s18975_s11  ;;  %v288_v32 = vsel %vm283_vm1, %v17351_v24, %v17355_v29  ;;  %v289_v46 = vsel %vm283_vm1, %v17355_v29, %v17356_v35 }
  0xd3   : > { %v278_v37 = vpop.permute.xlu1 %277  ;;  %v285_v38 = vsel %vm283_vm1, %v17341_v26, %v17345_v31  ;;  %v286_v45 = vsel %vm283_vm1, %v17345_v31, %v17346_v36 }
  0xd4   : > { %v276_v39 = vpop.permute.xlu0 %275  ;;  %v16299_v40 = vpack.c.bf16 %v288_v32, %v285_v38  ;;  %v16303_v51 = vpack.c.bf16 %v289_v46, %v286_v45  ;;  %v19410_v32 = vld [vmem:[%s19142_s9 + $0x78] sm:$0xff]  ;;  %v19422_v38 = vld [vmem:[#allocation5 + $0x30] sm:$0xff] }
  0xd5   : > { %1883 = vrot.lane.b32.xlu1 %v19203_v18, %s18975_s11  ;;  %v290_v50 = vsel %vm283_vm1, %v276_v39, %v278_v37  ;;  %v19390_v18 = vld [vmem:[%s19142_s9 + $0x68] sm:$0xff] }
  0xd6   : > { %1881 = vrot.lane.b32.xlu0 %v19198_v17, %s18975_s11  ;;  %16300 = vmatprep.subr.bf16.mxu0 %v16299_v40 }
  0xd7   : > { %16302 = vmatpush1.bf16.msra.mxu0 %v16301_v41  ;;  %v282_v43 = vpop.permute.xlu1 %281 }
  0xd8   : > { %v280_v47 = vpop.permute.xlu0 %279 }
  0xd9   : > { %v291_v48 = vsel %vm283_vm1, %v278_v37, %v280_v47  ;;  %2075 = vperm.xlu1 %17498, %v231_v42   ;;  %v292_v54 = vsel %vm283_vm1, %v280_v47, %v282_v43 }
  0xda   : > { %313 = vmatprep.subr.mxu0 %v291_v48  ;;  %2070 = vperm.xlu0 %17497, %v230_v44  }
  0xdb   : > { %314 = vmatpush1.msra.mxu0 %v290_v50  ;;  %v17364_v52 = vpop.permute.xlu1 %17363 }
  0xdc   : > { %v17359_v53 = vpop.permute.xlu0 %17358  ;;  %14895 = vmatmul.mubr.msk.f32.vlgmr.msra.gmra.mrb[0].mxu0 %vm302_vm0, %v19348_v49  ;;  %16304 = vmatprep.subr.bf16.mxu0 %v16303_v51  ;;  %v17366_v56 = vunpack.i.h.bf16 %v17364_v52  ;;  %v17365_v57 = vunpack.i.l.bf16 %v17364_v52 }
  0xdd   : > { %16306 = vmatpush3.bf16.msra.mxu0 %v16303_v51  ;;  %379 = vmatprep.mubr.f32.mxu0 %v18968_v16  ;;  %v17361_v9 = vunpack.i.h.bf16 %v17359_v53  ;;  %v17360_v14 = vunpack.i.l.bf16 %v17359_v53 }
  0xde   : > { %15655 = vmatprep.subr.mxu0 %v292_v54  ;;  %17500 = vrot.lane.b32.xlu1 %v19163_v3, %s18966_s18  ;;  %v646_v7 = vsel %vm643_vm2, %v17365_v57, %v17366_v56 }
  0xdf   : > { %v17374_v60 = vpop.permute.xlu1 %17373  ;;  %17505 = vrot.lane.b32.xlu0 %v19178_v10, %s18966_s18  ;;  %v645_v24 = vsel %vm643_vm2, %v17361_v9, %v17365_v57  ;;  %v644_v25 = vsel %vm643_vm2, %v17360_v14, %v17361_v9 }
  0xe0   : > { %v17376_v62 = vunpack.i.h.bf16 %v17374_v60  ;;  %v17375_v63 = vunpack.i.l.bf16 %v17374_v60  ;;  %v17369_v5 = vpop.permute.xlu0 %17368  ;;  %14896 = vmatmul.mubr.msk.f32.gmra.mrb[2].mxu0 %vm302_vm0, %v19355_v55 }
  0xe1   : > { %v17371_v1 = vunpack.i.h.bf16 %v17369_v5  ;;  %15656 = vmatpush3.msra.mxu0 %v292_v54  ;;  %15657 = vmatprep.mubr.msk.f32.mxu0 %vm302_vm0, %v19348_v49  ;;  %v17370_v6 = vunpack.i.l.bf16 %v17369_v5 }
  0xe2   : > { %16308 = vmatprep.subr.bf16.mxu0 %v16307_v58  ;;  %v649_v8 = vsel %vm643_vm2, %v17375_v63, %v17376_v62  ;;  %17510 = vrot.lane.b32.xlu1 %v19363_v59, %s18966_s18 }
  0xe3   : > { %v638_v11 = vpop.permute.xlu1 %637  ;;  %v16319_v12 = vpack.c.bf16 %v649_v8, %v646_v7  ;;  %17515 = vrot.lane.b32.xlu0 %v19369_v61, %s18966_s18  ;;  %v648_v2 = vsel %vm643_vm2, %v17371_v1, %v17375_v63  ;;  %v647_v22 = vsel %vm643_vm2, %v17370_v6, %v17371_v1  ;;  %v19454_v63 = vld [vmem:[#allocation5 + $0x38] sm:$0xff]  ;;  %v19456_v1 = vld [vmem:[#allocation5 + $0x40] sm:$0xff] }
  0xe4   : > { %v636_v17 = vpop.permute.xlu0 %635  ;;  %15658 = vmatmul.mubr.msk.f32.vlgmr.msra.gmra.mrb[4].mxu0 %vm302_vm0, %v19355_v55  ;;  %v16315_v27 = vpack.c.bf16 %v648_v2, %v645_v24 }
  0xe5   : > { %16310 = vmatpush1.bf16.msra.mxu0 %v16309_v4  ;;  %16320 = vmatprep.subr.bf16.mxu1 %v16319_v12 }
  0xe6   : > { %471 = vmatprep.subr.mxu0 %v19189_v13  ;;  %16322 = vmatpush3.bf16.msra.mxu1 %v16319_v12  ;;  %v16317_v13 = vpack.c.bf16 %v647_v22, %v644_v25 }
  0xe7   : > { %v642_v23 = vpop.permute.xlu1 %641  ;;  %531 = vmatprep.mubr.f32.mxu0 %v18968_v16  ;;  %2157 = vrot.lane.b32.xlu1 %v19386_v0, %s18966_s18 }
  0xe8   : > { %v640_v26 = vpop.permute.xlu0 %639  ;;  %2159 = vrot.lane.b32.xlu0 %v19390_v18, %s18966_s18 }
  0xe9   : > { %472 = vmatpush1.msra.mxu0 %v19192_v15  ;;  %v652_v28 = vsel %vm643_vm2, %v640_v26, %v642_v23  ;;  %v651_v29 = vsel %vm643_vm2, %v638_v11, %v640_v26  ;;  %v650_v15 = vsel %vm643_vm2, %v636_v17, %v638_v11 }
  0xea   : > { %16316 = vmatprep.subr.bf16.mxu0 %v16315_v27  ;;  %14899 = vmatmul.mubr.msk.f32.vlgmr.msra.gmra.mrb[0].mxu0 %vm302_vm0, %v19209_v19 }
  0xeb   : > { %16318 = vmatpush1.bf16.msra.mxu0 %v16317_v13  ;;  %15673 = vmatprep.subr.mxu1 %v652_v28  ;;  %v17384_v31 = vpop.permute.xlu1 %17383 }
  0xec   : > { %672 = vmatprep.subr.mxu0 %v651_v29  ;;  %15674 = vmatpush3.msra.mxu1 %v652_v28  ;;  %v17379_v33 = vpop.permute.xlu0 %17378  ;;  %v17386_v19 = vunpack.i.h.bf16 %v17384_v31  ;;  %v17385_v35 = vunpack.i.l.bf16 %v17384_v31 }
  0xed   : > { %537 = vmatprep.mubr.f32.mxu0 %v18968_v16  ;;  %2161 = vrot.lane.b32.xlu1 %v19407_v30, %s18966_s18  ;;  %v17381_v36 = vunpack.i.h.bf16 %v17379_v33  ;;  %v17380_v37 = vunpack.i.l.bf16 %v17379_v33 }
  0xee   : > { %14900 = vmatmul.mubr.msk.f32.gmra.mrb[2].mxu0 %vm302_vm0, %v19215_v20  ;;  %2163 = vrot.lane.b32.xlu0 %v19410_v32, %s18966_s18  ;;  %v853_v45 = vsel %vm850_vm3, %v17385_v35, %v17386_v19 }
  0xef   : > { %673 = vmatpush1.msra.mxu0 %v650_v15  ;;  %v17394_v39 = vpop.permute.xlu1 %17393  ;;  %732 = vmatprep.mubr.f32.mxu0 %v18968_v16  ;;  %v851_v20 = vsel %vm850_vm3, %v17380_v37, %v17381_v36  ;;  %v852_v50 = vsel %vm850_vm3, %v17381_v36, %v17385_v35 }
  0xf0   : > { %v17396_v40 = vunpack.i.h.bf16 %v17394_v39  ;;  %v17395_v41 = vunpack.i.l.bf16 %v17394_v39  ;;  %v17389_v42 = vpop.permute.xlu0 %17388  ;;  %15676 = vmatmul.mubr.msk.f32.vlgmr.msra.gmra.mrb[0].mxu1 %vm302_vm0, %v19416_v34 }
  0xf1   : > { %v17391_v43 = vunpack.i.h.bf16 %v17389_v42  ;;  %v17390_v44 = vunpack.i.l.bf16 %v17389_v42  ;;  %17520 = vrot.lane.b32.xlu1 %v19163_v3, %s18969_s20  ;;  %15684 = vmatprep.mubr.msk.f32.mxu1 %vm302_vm0, %v19422_v38  ;;  %v19495_v42 = vld [vmem:[#allocation5 + $0x50] sm:$0xff] }
  0xf2   : > { %v856_v46 = vsel %vm850_vm3, %v17395_v41, %v17396_v40  ;;  %14903 = vmatmul.mubr.msk.f32.vlgmr.msra.gmra.mrb[0].mxu0 %vm302_vm0, %v19233_v21  ;;  %17525 = vrot.lane.b32.xlu0 %v19178_v10, %s18969_s20  ;;  %v19493_v40 = vld [vmem:[#allocation5 + $0x48] sm:$0xff] }
  0xf3   : > { %v854_v47 = vsel %vm850_vm3, %v17390_v44, %v17391_v43  ;;  %v845_v48 = vpop.permute.xlu1 %844  ;;  %v855_v51 = vsel %vm850_vm3, %v17391_v43, %v17395_v41  ;;  %v16327_v52 = vpack.c.bf16 %v856_v46, %v853_v45  ;;  %738 = vmatprep.mubr.f32.mxu0 %v18968_v16 }
  0xf4   : > { %v843_v53 = vpop.permute.xlu0 %842  ;;  %v16323_v54 = vpack.c.bf16 %v855_v51, %v852_v50  ;;  %v16325_v56 = vpack.c.bf16 %v854_v47, %v851_v20 }
  0xf5   : > { %16328 = vmatprep.subr.bf16.mxu1 %v16327_v52  ;;  %17530 = vrot.lane.b32.xlu1 %v19363_v59, %s18969_s20  ;;  %v857_v62 = vsel %vm850_vm3, %v843_v53, %v845_v48 }
  0xf6   : > { %16324 = vmatprep.subr.bf16.mxu0 %v16323_v54  ;;  %16330 = vmatpush3.bf16.msra.mxu1 %v16327_v52 }
  0xf7   : > { %16326 = vmatpush1.bf16.msra.mxu0 %v16325_v56  ;;  %v849_v21 = vpop.permute.xlu1 %848  ;;  %17535 = vrot.lane.b32.xlu0 %v19369_v61, %s18969_s20 }
  0xf8   : > { %v847_v57 = vpop.permute.xlu0 %846  ;;  %14904 = vmatmul.mubr.msk.f32.gmra.mrb[2].mxu0 %vm302_vm0, %v19416_v34 }
  0xf9   : > { %v858_v58 = vsel %vm850_vm3, %v845_v48, %v847_v57  ;;  %v859_v60 = vsel %vm850_vm3, %v847_v57, %v849_v21  ;;  %2503 = vrot.lane.b32.xlu1 %v19386_v0, %s18969_s20  ;;  %939 = vmatprep.mubr.f32.mxu0 %v18968_v16 }
  0xfa   : > { %879 = vmatprep.subr.mxu0 %v858_v58  ;;  %15682 = vmatprep.subr.mxu1 %v859_v60 }
  0xfb   : > { %880 = vmatpush1.msra.mxu0 %v857_v62  ;;  %15683 = vmatpush3.msra.mxu1 %v859_v60  ;;  %v17404_v5 = vpop.permute.xlu1 %17403 }
  0xfc   : > { %v17399_v4 = vpop.permute.xlu0 %17398  ;;  %2505 = vrot.lane.b32.xlu0 %v19390_v18, %s18969_s20  ;;  %14907 = vmatmul.mubr.msk.f32.vlgmr.msra.gmra.mrb[0].mxu0 %vm302_vm0, %v19422_v38  ;;  %v17406_v6 = vunpack.i.h.bf16 %v17404_v5  ;;  %v17405_v7 = vunpack.i.l.bf16 %v17404_v5 }
  0xfd   : > { %2507 = vrot.lane.b32.xlu1 %v19407_v30, %s18969_s20  ;;  %15685 = vmatmul.mubr.msk.f32.vlgmr.msra.gmra.mrb[0].mxu1 %vm302_vm0, %v19454_v63  ;;  %v17401_v8 = vunpack.i.h.bf16 %v17399_v4  ;;  %v17400_v9 = vunpack.i.l.bf16 %v17399_v4 }
  0xfe   : > { %945 = vmatprep.mubr.f32.mxu0 %v18968_v16  ;;  %15693 = vmatprep.mubr.msk.f32.mxu1 %vm302_vm0, %v19456_v1  ;;  %v1060_v24 = vsel %vm1057_vm4, %v17405_v7, %v17406_v6 }
  0xff   : > { %v17414_v11 = vpop.permute.xlu1 %17413  ;;  %v1058_v23 = vsel %vm1057_vm4, %v17400_v9, %v17401_v8  ;;  %v1059_v13 = vsel %vm1057_vm4, %v17401_v8, %v17405_v7 }
 0x100   : > { %v17416_v12 = vunpack.i.h.bf16 %v17414_v11  ;;  %v17415_v14 = vunpack.i.l.bf16 %v17414_v11  ;;  %v17409_v17 = vpop.permute.xlu0 %17408  ;;  %2509 = vrot.lane.b32.xlu0 %v19410_v32, %s18969_s20  ;;  %14908 = vmatmul.mubr.msk.f32.gmra.mrb[2].mxu0 %vm302_vm0, %v19454_v63 }
 0x101   : > { %v17411_v2 = vunpack.i.h.bf16 %v17409_v17  ;;  %v17410_v22 = vunpack.i.l.bf16 %v17409_v17  ;;  %17540 = vrot.lane.b32.xlu1 %v19163_v3, %s18970_s4  ;;  %1146 = vmatprep.mubr.f32.mxu0 %v18968_v16  ;;  %v19532_v17 = vld [vmem:[#allocation5 + $0x58] sm:$0xff] }
 0x102   : > { %v1063_v25 = vsel %vm1057_vm4, %v17415_v14, %v17416_v12 }
 0x103   : > { %v1061_v26 = vsel %vm1057_vm4, %v17410_v22, %v17411_v2  ;;  %v1052_v27 = vpop.permute.xlu1 %1051  ;;  %v1062_v28 = vsel %vm1057_vm4, %v17411_v2, %v17415_v14  ;;  %v16335_v29 = vpack.c.bf16 %v1063_v25, %v1060_v24  ;;  %v19534_v22 = vld [vmem:[#allocation5 + $0x60] sm:$0xff] }
 0x104   : > { %v1050_v31 = vpop.permute.xlu0 %1049  ;;  %v16331_v33 = vpack.c.bf16 %v1062_v28, %v1059_v13  ;;  %v16333_v15 = vpack.c.bf16 %v1061_v26, %v1058_v23  ;;  %17545 = vrot.lane.b32.xlu0 %v19178_v10, %s18970_s4 }
 0x105   : > { %16336 = vmatprep.subr.bf16.mxu1 %v16335_v29  ;;  %17550 = vrot.lane.b32.xlu1 %v19363_v59, %s18970_s4  ;;  %v1064_v39 = vsel %vm1057_vm4, %v1050_v31, %v1052_v27 }
 0x106   : > { %16332 = vmatprep.subr.bf16.mxu0 %v16331_v33  ;;  %16338 = vmatpush3.bf16.msra.mxu1 %v16335_v29 }
 0x107   : > { %16334 = vmatpush1.bf16.msra.mxu0 %v16333_v15  ;;  %v1056_v19 = vpop.permute.xlu1 %1055 }
 0x108   : > { %v1054_v35 = vpop.permute.xlu0 %1053  ;;  %17555 = vrot.lane.b32.xlu0 %v19369_v61, %s18970_s4 }
 0x109   : > { %v1065_v36 = vsel %vm1057_vm4, %v1052_v27, %v1054_v35  ;;  %v1066_v37 = vsel %vm1057_vm4, %v1054_v35, %v1056_v19  ;;  %2703 = vrot.lane.b32.xlu1 %v19386_v0, %s18970_s4 }
 0x10a   : > { %1086 = vmatprep.subr.mxu0 %v1065_v36  ;;  %15691 = vmatprep.subr.mxu1 %v1066_v37 }
 0x10b   : > { %1087 = vmatpush1.msra.mxu0 %v1064_v39  ;;  %15692 = vmatpush3.msra.mxu1 %v1066_v37  ;;  %v17424_v41 = vpop.permute.xlu1 %17423 }
 0x10c   : > { %v17419_v43 = vpop.permute.xlu0 %17418  ;;  %2705 = vrot.lane.b32.xlu0 %v19390_v18, %s18970_s4  ;;  %14911 = vmatmul.mubr.msk.f32.vlgmr.msra.gmra.mrb[0].mxu0 %vm302_vm0, %v19456_v1  ;;  %v17426_v44 = vunpack.i.h.bf16 %v17424_v41  ;;  %v17425_v20 = vunpack.i.l.bf16 %v17424_v41 }
 0x10d   : > { %2707 = vrot.lane.b32.xlu1 %v19407_v30, %s18970_s4  ;;  %15694 = vmatmul.mubr.msk.f32.vlgmr.msra.gmra.mrb[0].mxu1 %vm302_vm0, %v19493_v40  ;;  %v17421_v45 = vunpack.i.h.bf16 %v17419_v43  ;;  %v17420_v46 = vunpack.i.l.bf16 %v17419_v43 }
 0x10e   : > { %1152 = vmatprep.mubr.f32.mxu0 %v18968_v16  ;;  %15702 = vmatprep.mubr.msk.f32.mxu1 %vm302_vm0, %v19495_v42  ;;  %v1267_v56 = vsel %vm1264_vm5, %v17425_v20, %v17426_v44 }
 0x10f   : > { %v17434_v47 = vpop.permute.xlu1 %17433  ;;  %v1265_v54 = vsel %vm1264_vm5, %v17420_v46, %v17421_v45  ;;  %v1266_v60 = vsel %vm1264_vm5, %v17421_v45, %v17425_v20 }
 0x110   : > { %v17436_v48 = vunpack.i.h.bf16 %v17434_v47  ;;  %v17435_v50 = vunpack.i.l.bf16 %v17434_v47  ;;  %v17429_v51 = vpop.permute.xlu0 %17428  ;;  %2709 = vrot.lane.b32.xlu0 %v19410_v32, %s18970_s4  ;;  %14912 = vmatmul.mubr.msk.f32.gmra.mrb[2].mxu0 %vm302_vm0, %v19493_v40 }
 0x111   : > { %v17431_v52 = vunpack.i.h.bf16 %v17429_v51  ;;  %v17430_v53 = vunpack.i.l.bf16 %v17429_v51  ;;  %17560 = vrot.lane.b32.xlu1 %v19163_v3, %s18971_s22  ;;  %1353 = vmatprep.mubr.f32.mxu0 %v18968_v16 }
 0x112   : > { %v1270_v21 = vsel %vm1264_vm5, %v17435_v50, %v17436_v48 }
 0x113   : > { %v1268_v57 = vsel %vm1264_vm5, %v17430_v53, %v17431_v52  ;;  %v1259_v58 = vpop.permute.xlu1 %1258  ;;  %v1269_v62 = vsel %vm1264_vm5, %v17431_v52, %v17435_v50  ;;  %v16343_v5 = vpack.c.bf16 %v1270_v21, %v1267_v56  ;;  %v19571_v53 = vld [vmem:[#allocation5 + $0x68] sm:$0xff]  ;;  %v19573_v56 = vld [vmem:[#allocation5 + $0x70] sm:$0xff] }
 0x114   : > { %v1257_v4 = vpop.permute.xlu0 %1256  ;;  %v16339_v6 = vpack.c.bf16 %v1269_v62, %v1266_v60  ;;  %v16341_v7 = vpack.c.bf16 %v1268_v57, %v1265_v54  ;;  %17565 = vrot.lane.b32.xlu0 %v19178_v10, %s18971_s22 }
 0x115   : > { %16344 = vmatprep.subr.bf16.mxu1 %v16343_v5  ;;  %17570 = vrot.lane.b32.xlu1 %v19363_v59, %s18971_s22  ;;  %v1271_v14 = vsel %vm1264_vm5, %v1257_v4, %v1259_v58 }
 0x116   : > { %16340 = vmatprep.subr.bf16.mxu0 %v16339_v6  ;;  %16346 = vmatpush3.bf16.msra.mxu1 %v16343_v5 }
 0x117   : > { %16342 = vmatpush1.bf16.msra.mxu0 %v16341_v7  ;;  %v1263_v8 = vpop.permute.xlu1 %1262 }
 0x118   : > { %v1261_v9 = vpop.permute.xlu0 %1260  ;;  %17575 = vrot.lane.b32.xlu0 %v19369_v61, %s18971_s22 }
 0x119   : > { %v1272_v11 = vsel %vm1264_vm5, %v1259_v58, %v1261_v9  ;;  %v1273_v12 = vsel %vm1264_vm5, %v1261_v9, %v1263_v8  ;;  %2903 = vrot.lane.b32.xlu1 %v19386_v0, %s18971_s22 }
 0x11a   : > { %1293 = vmatprep.subr.mxu0 %v1272_v11  ;;  %15700 = vmatprep.subr.mxu1 %v1273_v12 }
 0x11b   : > { %1294 = vmatpush1.msra.mxu0 %v1271_v14  ;;  %15701 = vmatpush3.msra.mxu1 %v1273_v12  ;;  %v17444_v2 = vpop.permute.xlu1 %17443 }
 0x11c   : > { %v17439_v23 = vpop.permute.xlu0 %17438  ;;  %2905 = vrot.lane.b32.xlu0 %v19390_v18, %s18971_s22  ;;  %14915 = vmatmul.mubr.msk.f32.vlgmr.msra.gmra.mrb[0].mxu0 %vm302_vm0, %v19495_v42  ;;  %v17446_v24 = vunpack.i.h.bf16 %v17444_v2  ;;  %v17445_v25 = vunpack.i.l.bf16 %v17444_v2 }
 0x11d   : > { %2907 = vrot.lane.b32.xlu1 %v19407_v30, %s18971_s22  ;;  %15703 = vmatmul.mubr.msk.f32.vlgmr.msra.gmra.mrb[0].mxu1 %vm302_vm0, %v19532_v17  ;;  %v17441_v26 = vunpack.i.h.bf16 %v17439_v23  ;;  %v17440_v27 = vunpack.i.l.bf16 %v17439_v23 }
 0x11e   : > { %1359 = vmatprep.mubr.f32.mxu0 %v18968_v16  ;;  %15711 = vmatprep.mubr.msk.f32.mxu1 %vm302_vm0, %v19534_v22  ;;  %v1474_v35 = vsel %vm1471_vm6, %v17445_v25, %v17446_v24 }
 0x11f   : > { %v17454_v13 = vpop.permute.xlu1 %17453  ;;  %v1472_v19 = vsel %vm1471_vm6, %v17440_v27, %v17441_v26  ;;  %v1473_v41 = vsel %vm1471_vm6, %v17441_v26, %v17445_v25 }
 0x120   : > { %v17456_v28 = vunpack.i.h.bf16 %v17454_v13  ;;  %v17455_v29 = vunpack.i.l.bf16 %v17454_v13  ;;  %v17449_v31 = vpop.permute.xlu0 %17448  ;;  %2909 = vrot.lane.b32.xlu0 %v19410_v32, %s18971_s22  ;;  %14916 = vmatmul.mubr.msk.f32.gmra.mrb[2].mxu0 %vm302_vm0, %v19532_v17 }
 0x121   : > { %v17451_v33 = vunpack.i.h.bf16 %v17449_v31  ;;  %v17450_v15 = vunpack.i.l.bf16 %v17449_v31  ;;  %17580 = vrot.lane.b32.xlu1 %v19163_v3, %s18972_s26  ;;  %1560 = vmatprep.mubr.f32.mxu0 %v18968_v16 }
 0x122   : > { %v1477_v36 = vsel %vm1471_vm6, %v17455_v29, %v17456_v28 }
 0x123   : > { %v1475_v37 = vsel %vm1471_vm6, %v17450_v15, %v17451_v33  ;;  %v1466_v39 = vpop.permute.xlu1 %1465  ;;  %v1476_v43 = vsel %vm1471_vm6, %v17451_v33, %v17455_v29  ;;  %v16351_v44 = vpack.c.bf16 %v1477_v36, %v1474_v35  ;;  %v19610_v35 = vld [vmem:[#allocation5 + $0x78] sm:$0xff] }
 0x124   : > { %v1464_v20 = vpop.permute.xlu0 %1463  ;;  %v16347_v45 = vpack.c.bf16 %v1476_v43, %v1473_v41  ;;  %v16349_v46 = vpack.c.bf16 %v1475_v37, %v1472_v19  ;;  %17585 = vrot.lane.b32.xlu0 %v19178_v10, %s18972_s26  ;;  %v19612_v37 = vld [vmem:[#allocation5 + $0x80] sm:$0xff] }
 0x125   : > { %16352 = vmatprep.subr.bf16.mxu1 %v16351_v44  ;;  %17590 = vrot.lane.b32.xlu1 %v19363_v59, %s18972_s26  ;;  %v1478_v52 = vsel %vm1471_vm6, %v1464_v20, %v1466_v39 }
 0x126   : > { %16348 = vmatprep.subr.bf16.mxu0 %v16347_v45  ;;  %16354 = vmatpush3.bf16.msra.mxu1 %v16351_v44 }
 0x127   : > { %16350 = vmatpush1.bf16.msra.mxu0 %v16349_v46  ;;  %v1470_v47 = vpop.permute.xlu1 %1469 }
 0x128   : > { %v1468_v48 = vpop.permute.xlu0 %1467  ;;  %17595 = vrot.lane.b32.xlu0 %v19369_v61, %s18972_s26 }
 0x129   : > { %v1479_v50 = vsel %vm1471_vm6, %v1466_v39, %v1468_v48  ;;  %v1480_v51 = vsel %vm1471_vm6, %v1468_v48, %v1470_v47  ;;  %3103 = vrot.lane.b32.xlu1 %v19386_v0, %s18972_s26 }
 0x12a   : > { %1500 = vmatprep.subr.mxu0 %v1479_v50  ;;  %15709 = vmatprep.subr.mxu1 %v1480_v51 }
 0x12b   : > { %1501 = vmatpush1.msra.mxu0 %v1478_v52  ;;  %15710 = vmatpush3.msra.mxu1 %v1480_v51  ;;  %v17464_v54 = vpop.permute.xlu1 %17463 }
 0x12c   : > { %v17459_v21 = vpop.permute.xlu0 %17458  ;;  %3105 = vrot.lane.b32.xlu0 %v19390_v18, %s18972_s26  ;;  %14919 = vmatmul.mubr.msk.f32.vlgmr.msra.gmra.mrb[0].mxu0 %vm302_vm0, %v19534_v22  ;;  %v17466_v57 = vunpack.i.h.bf16 %v17464_v54  ;;  %v17465_v58 = vunpack.i.l.bf16 %v17464_v54 }
 0x12d   : > { %3107 = vrot.lane.b32.xlu1 %v19407_v30, %s18972_s26  ;;  %15712 = vmatmul.mubr.msk.f32.vlgmr.msra.gmra.mrb[0].mxu1 %vm302_vm0, %v19571_v53  ;;  %v17461_v60 = vunpack.i.h.bf16 %v17459_v21  ;;  %v17460_v62 = vunpack.i.l.bf16 %v17459_v21 }
 0x12e   : > { %1566 = vmatprep.mubr.f32.mxu0 %v18968_v16  ;;  %15720 = vmatprep.mubr.msk.f32.mxu1 %vm302_vm0, %v19573_v56  ;;  %v1681_v12 = vsel %vm1678_vm7, %v17465_v58, %v17466_v57 }
 0x12f   : > { %v17474_v5 = vpop.permute.xlu1 %17473  ;;  %v1679_v11 = vsel %vm1678_vm7, %v17460_v62, %v17461_v60  ;;  %v1680_v24 = vsel %vm1678_vm7, %v17461_v60, %v17465_v58 }
 0x130   : > { %v17476_v4 = vunpack.i.h.bf16 %v17474_v5  ;;  %v17475_v6 = vunpack.i.l.bf16 %v17474_v5  ;;  %v17469_v7 = vpop.permute.xlu0 %17468  ;;  %3109 = vrot.lane.b32.xlu0 %v19410_v32, %s18972_s26  ;;  %14920 = vmatmul.mubr.msk.f32.gmra.mrb[2].mxu0 %vm302_vm0, %v19571_v53 }
 0x131   : > { %v17471_v8 = vunpack.i.h.bf16 %v17469_v7  ;;  %v17470_v9 = vunpack.i.l.bf16 %v17469_v7  ;;  %17600 = vrot.lane.b32.xlu1 %v19163_v3, %s18973_s5  ;;  %1767 = vmatprep.mubr.f32.mxu0 %v18968_v16 }
 0x132   : > { %v1684_v14 = vsel %vm1678_vm7, %v17475_v6, %v17476_v4 }
 0x133   : > { %v1682_v2 = vsel %vm1678_vm7, %v17470_v9, %v17471_v8  ;;  %v1673_v23 = vpop.permute.xlu1 %1672  ;;  %v1683_v25 = vsel %vm1678_vm7, %v17471_v8, %v17475_v6  ;;  %v16359_v26 = vpack.c.bf16 %v1684_v14, %v1681_v12  ;;  %v19646_v14 = vld [vmem:[#allocation5 + $0x88] sm:$0xff] }
 0x134   : > { %v1671_v27 = vpop.permute.xlu0 %1670  ;;  %v16355_v13 = vpack.c.bf16 %v1683_v25, %v1680_v24  ;;  %v16357_v28 = vpack.c.bf16 %v1682_v2, %v1679_v11  ;;  %17605 = vrot.lane.b32.xlu0 %v19178_v10, %s18973_s5  ;;  %v19682_v25 = vld [vmem:[%s19142_s9 + $0x40] sm:$0xff] }
 0x135   : > { %16360 = vmatprep.subr.bf16.mxu1 %v16359_v26  ;;  %17610 = vrot.lane.b32.xlu1 %v19363_v59, %s18973_s5  ;;  %v1685_v19 = vsel %vm1678_vm7, %v1671_v27, %v1673_v23 }
 0x136   : > { %16356 = vmatprep.subr.bf16.mxu0 %v16355_v13  ;;  %16362 = vmatpush3.bf16.msra.mxu1 %v16359_v26  ;;  %v19685_v26 = vld [vmem:[%s19142_s9 + $0x48] sm:$0xff] }
 0x137   : > { %16358 = vmatpush1.bf16.msra.mxu0 %v16357_v28  ;;  %v1677_v29 = vpop.permute.xlu1 %1676 }
 0x138   : > { %v1675_v31 = vpop.permute.xlu0 %1674  ;;  %17615 = vrot.lane.b32.xlu0 %v19369_v61, %s18973_s5 }
 0x139   : > { %v1686_v33 = vsel %vm1678_vm7, %v1673_v23, %v1675_v31  ;;  %v1687_v15 = vsel %vm1678_vm7, %v1675_v31, %v1677_v29  ;;  %3303 = vrot.lane.b32.xlu1 %v19386_v0, %s18973_s5 }
 0x13a   : > { %1707 = vmatprep.subr.mxu0 %v1686_v33  ;;  %15718 = vmatprep.subr.mxu1 %v1687_v15 }
 0x13b   : > { %1708 = vmatpush1.msra.mxu0 %v1685_v19  ;;  %15719 = vmatpush3.msra.mxu1 %v1687_v15  ;;  %v17484_v36 = vpop.permute.xlu1 %17483 }
 0x13c   : > { %v17479_v39 = vpop.permute.xlu0 %17478  ;;  %3305 = vrot.lane.b32.xlu0 %v19390_v18, %s18973_s5  ;;  %14923 = vmatmul.mubr.msk.f32.vlgmr.msra.gmra.mrb[0].mxu0 %vm302_vm0, %v19573_v56  ;;  %v17486_v41 = vunpack.i.h.bf16 %v17484_v36  ;;  %v17485_v43 = vunpack.i.l.bf16 %v17484_v36 }
 0x13d   : > { %15721 = vmatmul.mubr.msk.f32.vlgmr.msra.gmra.mrb[0].mxu1 %vm302_vm0, %v19610_v35  ;;  %3307 = vrot.lane.b32.xlu1 %v19407_v30, %s18973_s5  ;;  %v17481_v44 = vunpack.i.h.bf16 %v17479_v39  ;;  %v17480_v20 = vunpack.i.l.bf16 %v17479_v39 }
 0x13e   : > { %1773 = vmatprep.mubr.f32.mxu0 %v18968_v16  ;;  %15729 = vmatprep.mubr.msk.f32.mxu1 %vm302_vm0, %v19612_v37  ;;  %v1888_v54 = vsel %vm1885_vm8, %v17485_v43, %v17486_v41 }
 0x13f   : > { %v17494_v45 = vpop.permute.xlu1 %17493  ;;  %v1886_v52 = vsel %vm1885_vm8, %v17480_v20, %v17481_v44  ;;  %v1887_v60 = vsel %vm1885_vm8, %v17481_v44, %v17485_v43  ;;  %v19705_v44 = vpack.i.bf16 %v19390_v18, %v19386_v0 }
 0x140   : > { %v17496_v46 = vunpack.i.h.bf16 %v17494_v45  ;;  %v17495_v47 = vunpack.i.l.bf16 %v17494_v45  ;;  %v17489_v48 = vpop.permute.xlu0 %17488  ;;  %3309 = vrot.lane.b32.xlu0 %v19410_v32, %s18973_s5  ;;  %14924 = vmatmul.mubr.msk.f32.gmra.mrb[2].mxu0 %vm302_vm0, %v19610_v35 }
 0x141   : > { %v17491_v50 = vunpack.i.h.bf16 %v17489_v48  ;;  %v17490_v51 = vunpack.i.l.bf16 %v17489_v48  ;;  %17620 = vrot.lane.b32.xlu1 %v19163_v3, %s18974_s10  ;;  %1974 = vmatprep.mubr.f32.mxu0 %v18968_v16 }
 0x142   : > { %v1891_v21 = vsel %vm1885_vm8, %v17495_v47, %v17496_v46 }
 0x143   : > { %v1889_v57 = vsel %vm1885_vm8, %v17490_v51, %v17491_v50  ;;  %v1880_v58 = vpop.permute.xlu1 %1879  ;;  %v1890_v62 = vsel %vm1885_vm8, %v17491_v50, %v17495_v47  ;;  %v16367_v5 = vpack.c.bf16 %v1891_v21, %v1888_v54 }
 0x144   : > { %v1878_v4 = vpop.permute.xlu0 %1877  ;;  %v16363_v6 = vpack.c.bf16 %v1890_v62, %v1887_v60  ;;  %v16365_v7 = vpack.c.bf16 %v1889_v57, %v1886_v52  ;;  %17625 = vrot.lane.b32.xlu0 %v19178_v10, %s18974_s10  ;;  %v19722_v60 = vld [vmem:[%s19142_s9 + $0x80] sm:$0xff] }
 0x145   : > { %16368 = vmatprep.subr.bf16.mxu1 %v16367_v5  ;;  %17630 = vrot.lane.b32.xlu1 %v19363_v59, %s18974_s10  ;;  %v1892_v2 = vsel %vm1885_vm8, %v1878_v4, %v1880_v58 }
 0x146   : > { %16364 = vmatprep.subr.bf16.mxu0 %v16363_v6  ;;  %16370 = vmatpush3.bf16.msra.mxu1 %v16367_v5  ;;  %v18715_v6 = vld [vmem:[%s19142_s9 + $0x28] sm:$0xff] }
 0x147   : > { %16366 = vmatpush1.bf16.msra.mxu0 %v16365_v7  ;;  %v1884_v8 = vpop.permute.xlu1 %1883  ;;  %v18716_v7 = vld [vmem:[%s19142_s9 + $0x48] sm:$0xff] }
 0x148   : > { %v1882_v9 = vpop.permute.xlu0 %1881  ;;  %17635 = vrot.lane.b32.xlu0 %v19369_v61, %s18974_s10 }
 0x149   : > { %v1893_v11 = vsel %vm1885_vm8, %v1880_v58, %v1882_v9  ;;  %v1894_v12 = vsel %vm1885_vm8, %v1882_v9, %v1884_v8  ;;  %3503 = vrot.lane.b32.xlu1 %v19386_v0, %s18974_s10  ;;  %v19717_v58 = vpack.i.bf16 %v19410_v32, %v19407_v30  ;;  %v16379_v8 = vpack.c.bf16 %v18716_v7, %v18715_v6  ;;  %v18717_v9 = vld [vmem:[%s19142_s9 + $0x30] sm:$0xff] }
 0x14a   : > { %1914 = vmatprep.subr.mxu0 %v1893_v11  ;;  %15727 = vmatprep.subr.mxu1 %v1894_v12  ;;  %v18718_v11 = vld [vmem:[%s19142_s9 + $0x50] sm:$0xff] }
 0x14b   : > { %1915 = vmatpush1.msra.mxu0 %v1892_v2  ;;  %15728 = vmatpush3.msra.mxu1 %v1894_v12  ;;  %v16383_v12 = vpack.c.bf16 %v18718_v11, %v18717_v9  ;;  %v19797_v11 = vld [vmem:[#allocation5 + $0x20] sm:$0xff] }
 0x14c   : > { %14927 = vmatmul.mubr.msk.f32.vlgmr.msra.gmra.mrb[0].mxu0 %vm302_vm0, %v19612_v37  ;;  %15730 = vmatmul.mubr.msk.f32.vlgmr.msra.gmra.mrb[0].mxu1 %vm302_vm0, %v19646_v14 }
 0x14d   : > { %1980 = vmatprep.mubr.f32.mxu0 %v18968_v16  ;;  %3505 = vrot.lane.b32.xlu0 %v19390_v18, %s18974_s10 }
 0x14e   : > { %3507 = vrot.lane.b32.xlu1 %v19407_v30, %s18974_s10  ;;  %15738 = vmatprep.mubr.msk.f32.mxu1 %vm302_vm0, %v19348_v49 }
 0x150   : > { %14928 = vmatmul.mubr.msk.f32.gmra.mrb[2].mxu0 %vm302_vm0, %v19646_v14 }
 0x151   : > { %3509 = vrot.lane.b32.xlu0 %v19410_v32, %s18974_s10  ;;  %2247 = vmatprep.mubr.f32.mxu0 %v18968_v16 }
 0x152   : > { %17640 = vrot.lane.b32.xlu1 %v19163_v3, %s18975_s11 }
 0x155   : > { %17645 = vrot.lane.b32.xlu0 %v19178_v10, %s18975_s11  ;;  %v19693_v10 = vpack.i.bf16 %v19685_v26, %v19682_v25 }
 0x156   : > { %17650 = vrot.lane.b32.xlu1 %v19363_v59, %s18975_s11  ;;  %v14984_v59 = vld [vmem:[%s19142_s9 + $0x50] sm:$0xff] }
 0x158   : > { %v19673_v23 = vpop.permute.xlu1 %2075 }
 0x159   : > { %v19675_v24 = vpop.permute.xlu0 %2070  ;;  %17655 = vrot.lane.b32.xlu0 %v19369_v61, %s18975_s11  ;;  %v14985_v61 = vld [vmem:[%s19142_s9 + $0x58] sm:$0xff] }
 0x15a   : > { %3703 = vrot.lane.b32.xlu1 %v19386_v0, %s18975_s11  ;;  %v19699_v39 = vpack.i.bf16 %v14985_v61, %v14984_v59 }
 0x15c   : > { %v17501_v3 = vpop.permute.xlu1 %17500 }
 0x15d   : > { %v17506_v27 = vpop.permute.xlu0 %17505  ;;  %3705 = vrot.lane.b32.xlu0 %v19390_v18, %s18975_s11  ;;  %v17503_v13 = vunpack.i.h.bf16 %v17501_v3  ;;  %v17502_v28 = vunpack.i.l.bf16 %v17501_v3  ;;  %v18719_v3 = vld [vmem:[%s19142_s9 + $0x20] sm:$0xff] }
 0x15e   : > { %3707 = vrot.lane.b32.xlu1 %v19407_v30, %s18975_s11  ;;  %v17507_v29 = vunpack.i.l.bf16 %v17506_v27  ;;  %v17508_v31 = vunpack.i.h.bf16 %v17506_v27  ;;  %v18720_v27 = vld [vmem:[%s19142_s9 + $0x40] sm:$0xff] }
 0x15f   : > { %v2165_v20 = vsel %vm283_vm1, %v17502_v28, %v17503_v13  ;;  %v16381_v59 = vpack.c.bf16 %v18720_v27, %v18719_v3  ;;  %v19742_v28 = vld [vmem:[%s19142_s9 + $0x88] sm:$0xff] }
 0x160   : > { %v17511_v33 = vpop.permute.xlu1 %17510  ;;  %v2166_v46 = vsel %vm283_vm1, %v17503_v13, %v17507_v29  ;;  %v2167_v50 = vsel %vm283_vm1, %v17507_v29, %v17508_v31 }
 0x161   : > { %v17513_v15 = vunpack.i.h.bf16 %v17511_v33  ;;  %v17512_v19 = vunpack.i.l.bf16 %v17511_v33  ;;  %v17516_v36 = vpop.permute.xlu0 %17515  ;;  %3709 = vrot.lane.b32.xlu0 %v19410_v32, %s18975_s11 }
 0x162   : > { %v17518_v41 = vunpack.i.h.bf16 %v17516_v36  ;;  %v17517_v43 = vunpack.i.l.bf16 %v17516_v36  ;;  %17660 = vrot.lane.b32.xlu1 %v19693_v10, %s18966_s18 }
 0x163   : > { %v2168_v45 = vsel %vm283_vm1, %v17512_v19, %v17513_v15  ;;  %v19745_v19 = vld [vmem:[%s19142_s9 + $0x90] sm:$0xff] }
 0x164   : > { %v2158_v47 = vpop.permute.xlu1 %2157  ;;  %v2169_v48 = vsel %vm283_vm1, %v17513_v15, %v17517_v43  ;;  %v2170_v51 = vsel %vm283_vm1, %v17517_v43, %v17518_v41  ;;  %v16373_v52 = vpack.c.bf16 %v2168_v45, %v2165_v20  ;;  %v19754_v20 = vld [vmem:[%s19142_s9 + $0x98] sm:$0xff] }
 0x165   : > { %v2160_v54 = vpop.permute.xlu0 %2159  ;;  %v16371_v21 = vpack.c.bf16 %v2169_v48, %v2166_v46  ;;  %v16375_v57 = vpack.c.bf16 %v2170_v51, %v2167_v50  ;;  %17665 = vrot.lane.b32.xlu0 %v19699_v39, %s18966_s18 }
 0x166   : > { %17670 = vrot.lane.b32.xlu1 %v19705_v44, %s18966_s18  ;;  %v2171_v2 = vsel %vm283_vm1, %v2158_v47, %v2160_v54 }
 0x167   : > { %16372 = vmatprep.subr.bf16.mxu0 %v16371_v21  ;;  %16376 = vmatprep.subr.bf16.mxu1 %v16375_v57 }
 0x168   : > { %16374 = vmatpush1.bf16.msra.mxu0 %v16373_v52  ;;  %16378 = vmatpush3.bf16.msra.mxu1 %v16375_v57  ;;  %v2162_v62 = vpop.permute.xlu1 %2161  ;;  %v19770_v57 = vld [vmem:[#allocation5] sm:$0xff] }
 0x169   : > { %v2164_v5 = vpop.permute.xlu0 %2163  ;;  %v2172_v4 = vsel %vm283_vm1, %v2160_v54, %v2162_v62  ;;  %17675 = vrot.lane.b32.xlu0 %v19717_v58, %s18966_s18 }
 0x16a   : > { %2187 = vmatprep.subr.mxu0 %v2172_v4  ;;  %v2173_v32 = vsel %vm283_vm1, %v2162_v62, %v2164_v5  ;;  %3967 = vrot.lane.b32.xlu1 %v19722_v60, %s18966_s18  ;;  %v19776_v62 = vld [vmem:[#allocation5 + $0x8] sm:$0xff] }
 0x16b   : > { %15736 = vmatprep.subr.mxu1 %v2173_v32 }
 0x16c   : > { %2188 = vmatpush1.msra.mxu0 %v2171_v2  ;;  %15737 = vmatpush3.msra.mxu1 %v2173_v32  ;;  %v17521_v61 = vpop.permute.xlu1 %17520 }
 0x16d   : > { %v17526_v13 = vpop.permute.xlu0 %17525  ;;  %14943 = vmatmul.mubr.msk.f32.vlgmr.msra.gmra.mrb[6].mxu0 %vm302_vm0, %v19348_v49  ;;  %15739 = vmatmul.mubr.msk.f32.vlgmr.msra.gmra.mrb[2].mxu1 %vm302_vm0, %v19355_v55  ;;  %v17523_v29 = vunpack.i.h.bf16 %v17521_v61  ;;  %v17522_v31 = vunpack.i.l.bf16 %v17521_v61 }
 0x16e   : > { %16380 = vmatprep.subr.bf16.mxu0 %v16379_v8  ;;  %16384 = vmatprep.subr.bf16.mxu1 %v16383_v12  ;;  %v17528_v33 = vunpack.i.h.bf16 %v17526_v13  ;;  %v17527_v15 = vunpack.i.l.bf16 %v17526_v13 }
 0x16f   : > { %16382 = vmatpush1.bf16.msra.mxu0 %v16381_v59  ;;  %16386 = vmatpush3.bf16.msra.mxu1 %v16383_v12  ;;  %v2511_v45 = vsel %vm643_vm2, %v17522_v31, %v17523_v29 }
 0x170   : > { %v17531_v36 = vpop.permute.xlu1 %17530  ;;  %3969 = vrot.lane.b32.xlu0 %v19742_v28, %s18966_s18  ;;  %2253 = vmatprep.mubr.f32.mxu0 %v18968_v16 }
 0x171   : > { %v17533_v49 = vunpack.i.h.bf16 %v17531_v36  ;;  %v17532_v41 = vunpack.i.l.bf16 %v17531_v36  ;;  %v17536_v43 = vpop.permute.xlu0 %17535  ;;  %14944 = vmatmul.mubr.msk.f32.gmra.mrb[8].mxu0 %vm302_vm0, %v19355_v55  ;;  %2339 = vmatprep.subr.mxu0 %v19390_v18  ;;  %v2512_v55 = vsel %vm643_vm2, %v17523_v29, %v17527_v15  ;;  %v2513_v18 = vsel %vm643_vm2, %v17527_v15, %v17528_v33 }
 0x172   : > { %v17538_v46 = vunpack.i.h.bf16 %v17536_v43  ;;  %v17537_v47 = vunpack.i.l.bf16 %v17536_v43  ;;  %15745 = vmatprep.subr.mxu1 %v19407_v30  ;;  %3971 = vrot.lane.b32.xlu1 %v19745_v19, %s18966_s18 }
 0x173   : > { %v2514_v48 = vsel %vm643_vm2, %v17532_v41, %v17533_v49  ;;  %2340 = vmatpush1.msra.mxu0 %v19386_v0  ;;  %15746 = vmatpush3.msra.mxu1 %v19407_v30 }
 0x174   : > { %v2504_v50 = vpop.permute.xlu1 %2503  ;;  %3973 = vrot.lane.b32.xlu0 %v19754_v20, %s18966_s18  ;;  %2399 = vmatprep.mubr.f32.mxu0 %v18968_v16  ;;  %v2515_v51 = vsel %vm643_vm2, %v17533_v49, %v17537_v47  ;;  %v2516_v52 = vsel %vm643_vm2, %v17537_v47, %v17538_v46  ;;  %v16389_v54 = vpack.c.bf16 %v2514_v48, %v2511_v45 }
 0x175   : > { %v2506_v21 = vpop.permute.xlu0 %2505  ;;  %15747 = vmatprep.mubr.msk.f32.mxu1 %vm302_vm0, %v19770_v57  ;;  %v16387_v0 = vpack.c.bf16 %v2515_v51, %v2512_v55  ;;  %v16391_v30 = vpack.c.bf16 %v2516_v52, %v2513_v18  ;;  %14947 = vmatmul.mubr.msk.f32.vlgmr.msra.gmra.mrb[6].mxu0 %vm302_vm0, %v19770_v57 }
 0x176   : > { %15748 = vmatmul.mubr.msk.f32.vlgmr.msra.gmra.mrb[2].mxu1 %vm302_vm0, %v19776_v62  ;;  %17680 = vrot.lane.b32.xlu1 %v19693_v10, %s18969_s20  ;;  %v2517_v7 = vsel %vm643_vm2, %v2504_v50, %v2506_v21 }
 0x177   : > { %16388 = vmatprep.subr.bf16.mxu0 %v16387_v0  ;;  %16392 = vmatprep.subr.bf16.mxu1 %v16391_v30 }
 0x178   : > { %16390 = vmatpush1.bf16.msra.mxu0 %v16389_v54  ;;  %16394 = vmatpush3.bf16.msra.mxu1 %v16391_v30  ;;  %v2508_v5 = vpop.permute.xlu1 %2507 }
 0x179   : > { %v2510_v4 = vpop.permute.xlu0 %2509  ;;  %17685 = vrot.lane.b32.xlu0 %v19699_v39, %s18969_s20  ;;  %v2518_v32 = vsel %vm643_vm2, %v2506_v21, %v2508_v5  ;;  %2405 = vmatprep.mubr.f32.mxu0 %v18968_v16 }
 0x17a   : > { %2533 = vmatprep.subr.mxu0 %v2518_v32  ;;  %v2519_v6 = vsel %vm643_vm2, %v2508_v5, %v2510_v4  ;;  %17690 = vrot.lane.b32.xlu1 %v19705_v44, %s18969_s20 }
 0x17b   : > { %15754 = vmatprep.subr.mxu1 %v2519_v6  ;;  %14948 = vmatmul.mubr.msk.f32.gmra.mrb[8].mxu0 %vm302_vm0, %v19776_v62 }
 0x17c   : > { %2534 = vmatpush1.msra.mxu0 %v2517_v7  ;;  %15755 = vmatpush3.msra.mxu1 %v2519_v6  ;;  %v17541_v8 = vpop.permute.xlu1 %17540 }
 0x17d   : > { %v17546_v9 = vpop.permute.xlu0 %17545  ;;  %17695 = vrot.lane.b32.xlu0 %v19717_v58, %s18969_s20  ;;  %2593 = vmatprep.mubr.f32.mxu0 %v18968_v16  ;;  %v17543_v12 = vunpack.i.h.bf16 %v17541_v8  ;;  %v17542_v2 = vunpack.i.l.bf16 %v17541_v8 }
 0x17e   : > { %4313 = vrot.lane.b32.xlu1 %v19722_v60, %s18969_s20  ;;  %15756 = vmatprep.mubr.msk.f32.mxu1 %vm302_vm0, %v19797_v11  ;;  %v17547_v3 = vunpack.i.l.bf16 %v17546_v9  ;;  %v17548_v27 = vunpack.i.h.bf16 %v17546_v9 }
 0x17f   : > { %14951 = vmatmul.mubr.msk.f32.vlgmr.msra.gmra.mrb[6].mxu0 %vm302_vm0, %v19797_v11  ;;  %15757 = vmatmul.mubr.msk.f32.vlgmr.msra.gmra.mrb[2].mxu1 %vm302_vm0, %v19416_v34  ;;  %v2711_v15 = vsel %vm850_vm3, %v17542_v2, %v17543_v12 }
 0x180   : > { %v17551_v59 = vpop.permute.xlu1 %17550  ;;  %2599 = vmatprep.mubr.f32.mxu0 %v18968_v16  ;;  %15765 = vmatprep.mubr.msk.f32.mxu1 %vm302_vm0, %v19422_v38  ;;  %v2712_v49 = vsel %vm850_vm3, %v17543_v12, %v17547_v3  ;;  %v2713_v45 = vsel %vm850_vm3, %v17547_v3, %v17548_v27 }
 0x181   : > { %v17553_v61 = vunpack.i.h.bf16 %v17551_v59  ;;  %v17552_v13 = vunpack.i.l.bf16 %v17551_v59  ;;  %v17556_v29 = vpop.permute.xlu0 %17555  ;;  %4315 = vrot.lane.b32.xlu0 %v19742_v28, %s18969_s20 }
 0x182   : > { %v17558_v31 = vunpack.i.h.bf16 %v17556_v29  ;;  %v17557_v33 = vunpack.i.l.bf16 %v17556_v29  ;;  %4317 = vrot.lane.b32.xlu1 %v19745_v19, %s18969_s20 }
 0x183   : > { %v2714_v36 = vsel %vm850_vm3, %v17552_v13, %v17553_v61  ;;  %14952 = vmatmul.mubr.msk.f32.gmra.mrb[8].mxu0 %vm302_vm0, %v19416_v34 }
 0x184   : > { %v2704_v41 = vpop.permute.xlu1 %2703  ;;  %v2715_v43 = vsel %vm850_vm3, %v17553_v61, %v17557_v33  ;;  %v2716_v46 = vsel %vm850_vm3, %v17557_v33, %v17558_v31  ;;  %v16397_v47 = vpack.c.bf16 %v2714_v36, %v2711_v15  ;;  %2793 = vmatprep.mubr.f32.mxu0 %v18968_v16 }
 0x185   : > { %v2706_v48 = vpop.permute.xlu0 %2705  ;;  %4319 = vrot.lane.b32.xlu0 %v19754_v20, %s18969_s20  ;;  %v16395_v55 = vpack.c.bf16 %v2715_v43, %v2712_v49  ;;  %v16399_v18 = vpack.c.bf16 %v2716_v46, %v2713_v45 }
 0x186   : > { %17700 = vrot.lane.b32.xlu1 %v19693_v10, %s18970_s4  ;;  %v2717_v54 = vsel %vm850_vm3, %v2704_v41, %v2706_v48 }
 0x187   : > { %16396 = vmatprep.subr.bf16.mxu0 %v16395_v55  ;;  %16400 = vmatprep.subr.bf16.mxu1 %v16399_v18 }
 0x188   : > { %16398 = vmatpush1.bf16.msra.mxu0 %v16397_v47  ;;  %16402 = vmatpush3.bf16.msra.mxu1 %v16399_v18  ;;  %v2708_v34 = vpop.permute.xlu1 %2707  ;;  %v19869_v47 = vld [vmem:[#allocation5 + $0x40] sm:$0xff] }
 0x189   : > { %v2710_v50 = vpop.permute.xlu0 %2709  ;;  %17705 = vrot.lane.b32.xlu0 %v19699_v39, %s18970_s4  ;;  %v2718_v51 = vsel %vm850_vm3, %v2706_v48, %v2708_v34 }
 0x18a   : > { %2733 = vmatprep.subr.mxu0 %v2718_v51  ;;  %v2719_v52 = vsel %vm850_vm3, %v2708_v34, %v2710_v50  ;;  %17710 = vrot.lane.b32.xlu1 %v19705_v44, %s18970_s4 }
 0x18b   : > { %15763 = vmatprep.subr.mxu1 %v2719_v52 }
 0x18c   : > { %2734 = vmatpush1.msra.mxu0 %v2717_v54  ;;  %15764 = vmatpush3.msra.mxu1 %v2719_v52  ;;  %v17561_v21 = vpop.permute.xlu1 %17560 }
 0x18d   : > { %v17566_v0 = vpop.permute.xlu0 %17565  ;;  %17715 = vrot.lane.b32.xlu0 %v19717_v58, %s18970_s4  ;;  %14955 = vmatmul.mubr.msk.f32.vlgmr.msra.gmra.mrb[6].mxu0 %vm302_vm0, %v19422_v38  ;;  %v17563_v30 = vunpack.i.h.bf16 %v17561_v21  ;;  %v17562_v5 = vunpack.i.l.bf16 %v17561_v21 }
 0x18e   : > { %4513 = vrot.lane.b32.xlu1 %v19722_v60, %s18970_s4  ;;  %15766 = vmatmul.mubr.msk.f32.vlgmr.msra.gmra.mrb[2].mxu1 %vm302_vm0, %v19454_v63  ;;  %v17567_v4 = vunpack.i.l.bf16 %v17566_v0  ;;  %v17568_v32 = vunpack.i.h.bf16 %v17566_v0 }
 0x18f   : > { %2799 = vmatprep.mubr.f32.mxu0 %v18968_v16  ;;  %15774 = vmatprep.mubr.msk.f32.mxu1 %vm302_vm0, %v19456_v1  ;;  %v2911_v1 = vsel %vm1057_vm4, %v17562_v5, %v17563_v30 }
 0x190   : > { %v17571_v6 = vpop.permute.xlu1 %17570  ;;  %v2912_v3 = vsel %vm1057_vm4, %v17563_v30, %v17567_v4  ;;  %v2913_v61 = vsel %vm1057_vm4, %v17567_v4, %v17568_v32 }
 0x191   : > { %v17573_v7 = vunpack.i.h.bf16 %v17571_v6  ;;  %v17572_v8 = vunpack.i.l.bf16 %v17571_v6  ;;  %v17576_v9 = vpop.permute.xlu0 %17575  ;;  %4515 = vrot.lane.b32.xlu0 %v19742_v28, %s18970_s4  ;;  %14956 = vmatmul.mubr.msk.f32.gmra.mrb[8].mxu0 %vm302_vm0, %v19454_v63 }
 0x192   : > { %v17578_v38 = vunpack.i.h.bf16 %v17576_v9  ;;  %v17577_v12 = vunpack.i.l.bf16 %v17576_v9  ;;  %4517 = vrot.lane.b32.xlu1 %v19745_v19, %s18970_s4  ;;  %2993 = vmatprep.mubr.f32.mxu0 %v18968_v16 }
 0x193   : > { %v2914_v2 = vsel %vm1057_vm4, %v17572_v8, %v17573_v7 }
 0x194   : > { %v2904_v27 = vpop.permute.xlu1 %2903  ;;  %v2915_v59 = vsel %vm1057_vm4, %v17573_v7, %v17577_v12  ;;  %v2916_v63 = vsel %vm1057_vm4, %v17577_v12, %v17578_v38  ;;  %v16405_v13 = vpack.c.bf16 %v2914_v2, %v2911_v1 }
 0x195   : > { %v2906_v29 = vpop.permute.xlu0 %2905  ;;  %4519 = vrot.lane.b32.xlu0 %v19754_v20, %s18970_s4  ;;  %v16403_v31 = vpack.c.bf16 %v2915_v59, %v2912_v3  ;;  %v16407_v33 = vpack.c.bf16 %v2916_v63, %v2913_v61 }
 0x196   : > { %17720 = vrot.lane.b32.xlu1 %v19693_v10, %s18971_s22  ;;  %v2917_v43 = vsel %vm1057_vm4, %v2904_v27, %v2906_v29 }
 0x197   : > { %16404 = vmatprep.subr.bf16.mxu0 %v16403_v31  ;;  %16408 = vmatprep.subr.bf16.mxu1 %v16407_v33 }
 0x198   : > { %16406 = vmatpush1.bf16.msra.mxu0 %v16405_v13  ;;  %16410 = vmatpush3.bf16.msra.mxu1 %v16407_v33  ;;  %v2908_v15 = vpop.permute.xlu1 %2907 }
 0x199   : > { %v2910_v36 = vpop.permute.xlu0 %2909  ;;  %17725 = vrot.lane.b32.xlu0 %v19699_v39, %s18971_s22  ;;  %v2918_v49 = vsel %vm1057_vm4, %v2906_v29, %v2908_v15  ;;  %v19911_v29 = vld [vmem:[#allocation5 + $0x50] sm:$0xff] }
 0x19a   : > { %2933 = vmatprep.subr.mxu0 %v2918_v49  ;;  %v2919_v41 = vsel %vm1057_vm4, %v2908_v15, %v2910_v36  ;;  %17730 = vrot.lane.b32.xlu1 %v19705_v44, %s18971_s22 }
 0x19b   : > { %15772 = vmatprep.subr.mxu1 %v2919_v41 }
 0x19c   : > { %2934 = vmatpush1.msra.mxu0 %v2917_v43  ;;  %15773 = vmatpush3.msra.mxu1 %v2919_v41  ;;  %v17581_v45 = vpop.permute.xlu1 %17580 }
 0x19d   : > { %v17586_v46 = vpop.permute.xlu0 %17585  ;;  %17735 = vrot.lane.b32.xlu0 %v19717_v58, %s18971_s22  ;;  %14959 = vmatmul.mubr.msk.f32.vlgmr.msra.gmra.mrb[6].mxu0 %vm302_vm0, %v19869_v47  ;;  %v17583_v48 = vunpack.i.h.bf16 %v17581_v45  ;;  %v17582_v55 = vunpack.i.l.bf16 %v17581_v45 }
 0x19e   : > { %4713 = vrot.lane.b32.xlu1 %v19722_v60, %s18971_s22  ;;  %15775 = vmatmul.mubr.msk.f32.vlgmr.msra.gmra.mrb[2].mxu1 %vm302_vm0, %v19493_v40  ;;  %v17587_v18 = vunpack.i.l.bf16 %v17586_v46  ;;  %v17588_v34 = vunpack.i.h.bf16 %v17586_v46 }
 0x19f   : > { %15783 = vmatprep.mubr.msk.f32.mxu1 %vm302_vm0, %v19495_v42  ;;  %2999 = vmatprep.mubr.f32.mxu0 %v18968_v16  ;;  %v3111_v42 = vsel %vm1264_vm5, %v17582_v55, %v17583_v48 }
 0x1a0   : > { %v17591_v50 = vpop.permute.xlu1 %17590  ;;  %v3112_v5 = vsel %vm1264_vm5, %v17583_v48, %v17587_v18  ;;  %v3113_v6 = vsel %vm1264_vm5, %v17587_v18, %v17588_v34 }
 0x1a1   : > { %v17593_v51 = vunpack.i.h.bf16 %v17591_v50  ;;  %v17592_v52 = vunpack.i.l.bf16 %v17591_v50  ;;  %v17596_v54 = vpop.permute.xlu0 %17595  ;;  %4715 = vrot.lane.b32.xlu0 %v19742_v28, %s18971_s22  ;;  %14960 = vmatmul.mubr.msk.f32.gmra.mrb[8].mxu0 %vm302_vm0, %v19493_v40 }
 0x1a2   : > { %v17598_v21 = vunpack.i.h.bf16 %v17596_v54  ;;  %v17597_v0 = vunpack.i.l.bf16 %v17596_v54  ;;  %4717 = vrot.lane.b32.xlu1 %v19745_v19, %s18971_s22  ;;  %3193 = vmatprep.mubr.f32.mxu0 %v18968_v16 }
 0x1a3   : > { %v3114_v30 = vsel %vm1264_vm5, %v17592_v52, %v17593_v51 }
 0x1a4   : > { %v3104_v4 = vpop.permute.xlu1 %3103  ;;  %v3115_v32 = vsel %vm1264_vm5, %v17593_v51, %v17597_v0  ;;  %v3116_v40 = vsel %vm1264_vm5, %v17597_v0, %v17598_v21  ;;  %v16413_v7 = vpack.c.bf16 %v3114_v30, %v3111_v42 }
 0x1a5   : > { %v3106_v8 = vpop.permute.xlu0 %3105  ;;  %4719 = vrot.lane.b32.xlu0 %v19754_v20, %s18971_s22  ;;  %v16411_v9 = vpack.c.bf16 %v3115_v32, %v3112_v5  ;;  %v16415_v38 = vpack.c.bf16 %v3116_v40, %v3113_v6 }
 0x1a6   : > { %17740 = vrot.lane.b32.xlu1 %v19693_v10, %s18972_s26  ;;  %v3117_v27 = vsel %vm1264_vm5, %v3104_v4, %v3106_v8 }
 0x1a7   : > { %16412 = vmatprep.subr.bf16.mxu0 %v16411_v9  ;;  %16416 = vmatprep.subr.bf16.mxu1 %v16415_v38 }
 0x1a8   : > { %16414 = vmatpush1.bf16.msra.mxu0 %v16413_v7  ;;  %16418 = vmatpush3.bf16.msra.mxu1 %v16415_v38  ;;  %v3108_v12 = vpop.permute.xlu1 %3107 }
 0x1a9   : > { %v3110_v1 = vpop.permute.xlu0 %3109  ;;  %17745 = vrot.lane.b32.xlu0 %v19699_v39, %s18972_s26  ;;  %v3118_v2 = vsel %vm1264_vm5, %v3106_v8, %v3108_v12 }
 0x1aa   : > { %3133 = vmatprep.subr.mxu0 %v3118_v2  ;;  %v3119_v3 = vsel %vm1264_vm5, %v3108_v12, %v3110_v1  ;;  %17750 = vrot.lane.b32.xlu1 %v19705_v44, %s18972_s26 }
 0x1ab   : > { %15781 = vmatprep.subr.mxu1 %v3119_v3 }
 0x1ac   : > { %3134 = vmatpush1.msra.mxu0 %v3117_v27  ;;  %15782 = vmatpush3.msra.mxu1 %v3119_v3  ;;  %v17601_v59 = vpop.permute.xlu1 %17600 }
 0x1ad   : > { %v17606_v61 = vpop.permute.xlu0 %17605  ;;  %17755 = vrot.lane.b32.xlu0 %v19717_v58, %s18972_s26  ;;  %15784 = vmatmul.mubr.msk.f32.vlgmr.msra.gmra.mrb[2].mxu1 %vm302_vm0, %v19532_v17  ;;  %v17603_v63 = vunpack.i.h.bf16 %v17601_v59  ;;  %v17602_v13 = vunpack.i.l.bf16 %v17601_v59 }
 0x1ae   : > { %4913 = vrot.lane.b32.xlu1 %v19722_v60, %s18972_s26  ;;  %3393 = vmatprep.mubr.f32.mxu1 %v18968_v16  ;;  %v17607_v31 = vunpack.i.l.bf16 %v17606_v61  ;;  %v17608_v52 = vunpack.i.h.bf16 %v17606_v61  ;;  %v19959_v61 = vld [vmem:[#allocation5 + $0x60] sm:$0xff] }
 0x1af   : > { %14963 = vmatmul.mubr.msk.f32.vlgmr.msra.gmra.mrb[6].mxu0 %vm302_vm0, %v19911_v29  ;;  %v3311_v43 = vsel %vm1471_vm6, %v17602_v13, %v17603_v63 }
 0x1b0   : > { %v17611_v33 = vpop.permute.xlu1 %17610  ;;  %3199 = vmatprep.mubr.f32.mxu0 %v18968_v16  ;;  %v3312_v55 = vsel %vm1471_vm6, %v17603_v63, %v17607_v31  ;;  %v3313_v5 = vsel %vm1471_vm6, %v17607_v31, %v17608_v52 }
 0x1b1   : > { %v17613_v15 = vunpack.i.h.bf16 %v17611_v33  ;;  %v17612_v36 = vunpack.i.l.bf16 %v17611_v33  ;;  %v17616_v49 = vpop.permute.xlu0 %17615  ;;  %4915 = vrot.lane.b32.xlu0 %v19742_v28, %s18972_s26 }
 0x1b2   : > { %v17617_v41 = vunpack.i.l.bf16 %v17616_v49  ;;  %4917 = vrot.lane.b32.xlu1 %v19745_v19, %s18972_s26  ;;  %v17618_v46 = vunpack.i.h.bf16 %v17616_v49 }
 0x1b3   : > { %v3314_v45 = vsel %vm1471_vm6, %v17612_v36, %v17613_v15  ;;  %14964 = vmatmul.mubr.msk.f32.gmra.mrb[8].mxu0 %vm302_vm0, %v19532_v17 }
 0x1b4   : > { %v3304_v48 = vpop.permute.xlu1 %3303  ;;  %v3315_v18 = vsel %vm1471_vm6, %v17613_v15, %v17617_v41  ;;  %v16421_v34 = vpack.c.bf16 %v3314_v45, %v3311_v43  ;;  %4057 = vmatprep.mubr.f32.mxu0 %v18968_v16  ;;  %v3316_v21 = vsel %vm1471_vm6, %v17617_v41, %v17618_v46 }
 0x1b5   : > { %v3306_v50 = vpop.permute.xlu0 %3305  ;;  %4919 = vrot.lane.b32.xlu0 %v19754_v20, %s18972_s26  ;;  %v16419_v51 = vpack.c.bf16 %v3315_v18, %v3312_v55  ;;  %v16423_v32 = vpack.c.bf16 %v3316_v21, %v3313_v5 }
 0x1b6   : > { %17760 = vrot.lane.b32.xlu1 %v19693_v10, %s18973_s5  ;;  %v3317_v4 = vsel %vm1471_vm6, %v3304_v48, %v3306_v50 }
 0x1b7   : > { %16420 = vmatprep.subr.bf16.mxu1 %v16419_v51  ;;  %v19931_v17 = vpop.f32.mrb[4].mxu0 }
 0x1b8   : > { %16422 = vmatpush1.bf16.msra.mxu1 %v16421_v34  ;;  %v3308_v54 = vpop.permute.xlu1 %3307  ;;  %v19934_v0 = vpop.f32.mrb[5].mxu0 }
 0x1b9   : > { %v3310_v42 = vpop.permute.xlu0 %3309  ;;  %17765 = vrot.lane.b32.xlu0 %v19699_v39, %s18973_s5  ;;  %v3318_v30 = vsel %vm1471_vm6, %v3306_v50, %v3308_v54 }
 0x1ba   : > { %3333 = vmatprep.subr.mxu1 %v3318_v30  ;;  %17770 = vrot.lane.b32.xlu1 %v19705_v44, %s18973_s5  ;;  %v3319_v7 = vsel %vm1471_vm6, %v3308_v54, %v3310_v42 }
 0x1bc   : > { %3334 = vmatpush1.msra.mxu1 %v3317_v4  ;;  %v17621_v6 = vpop.permute.xlu1 %17620 }
 0x1bd   : > { %v17626_v40 = vpop.permute.xlu0 %17625  ;;  %16424 = vmatprep.subr.bf16.mxu1 %v16423_v32  ;;  %14967 = vmatmul.mubr.msk.f32.vlgmr.msra.gmra.mrb[4].mxu1 %vm302_vm0, %v19534_v22  ;;  %v17623_v8 = vunpack.i.h.bf16 %v17621_v6  ;;  %v17622_v9 = vunpack.i.l.bf16 %v17621_v6 }
 0x1be   : > { %16426 = vmatpush3.bf16.msra.mxu1 %v16423_v32  ;;  %17775 = vrot.lane.b32.xlu0 %v19717_v58, %s18973_s5  ;;  %v17627_v38 = vunpack.i.l.bf16 %v17626_v40  ;;  %v17628_v41 = vunpack.i.h.bf16 %v17626_v40  ;;  %v19996_v40 = vld [vmem:[#allocation5 + $0x70] sm:$0xff] }
 0x1bf   : > { %15790 = vmatprep.subr.mxu1 %v3319_v7  ;;  %5113 = vrot.lane.b32.xlu1 %v19722_v60, %s18973_s5  ;;  %v3511_v27 = vsel %vm1678_vm7, %v17622_v9, %v17623_v8 }
 0x1c0   : > { %v17631_v12 = vpop.permute.xlu1 %17630  ;;  %3399 = vmatprep.mubr.f32.mxu1 %v18968_v16  ;;  %v3512_v31 = vsel %vm1678_vm7, %v17623_v8, %v17627_v38 }
 0x1c1   : > { %v17633_v1 = vunpack.i.h.bf16 %v17631_v12  ;;  %v17632_v2 = vunpack.i.l.bf16 %v17631_v12  ;;  %v17636_v3 = vpop.permute.xlu0 %17635  ;;  %14968 = vmatmul.mubr.msk.f32.gmra.mrb[6].mxu1 %vm302_vm0, %v19571_v53 }
 0x1c2   : > { %v17637_v22 = vunpack.i.l.bf16 %v17636_v3  ;;  %15791 = vmatpush3.msra.mxu1 %v3319_v7  ;;  %5115 = vrot.lane.b32.xlu0 %v19742_v28, %s18973_s5  ;;  %v17638_v63 = vunpack.i.h.bf16 %v17636_v3 }
 0x1c3   : > { %v3514_v59 = vsel %vm1678_vm7, %v17632_v2, %v17633_v1  ;;  %5117 = vrot.lane.b32.xlu1 %v19745_v19, %s18973_s5  ;;  %15792 = vmatprep.mubr.msk.f32.mxu1 %vm302_vm0, %v19959_v61 }
 0x1c4   : > { %v3504_v13 = vpop.permute.xlu1 %3503  ;;  %v3515_v33 = vsel %vm1678_vm7, %v17633_v1, %v17637_v22  ;;  %v16429_v15 = vpack.c.bf16 %v3514_v59, %v3511_v27  ;;  %v3516_v45 = vsel %vm1678_vm7, %v17637_v22, %v17638_v63 }
 0x1c5   : > { %v3506_v36 = vpop.permute.xlu0 %3505  ;;  %v16427_v49 = vpack.c.bf16 %v3515_v33, %v3512_v31  ;;  %15793 = vmatmul.mubr.msk.f32.vlgmr.msra.gmra.mrb[2].mxu1 %vm302_vm0, %v19571_v53  ;;  %v3513_v53 = vsel %vm1678_vm7, %v17627_v38, %v17628_v41  ;;  %v15034_v41 = vld [vmem:[%s19142_s9 + $0x68] sm:$0xff] }
 0x1c6   : > { %5119 = vrot.lane.b32.xlu0 %v19754_v20, %s18973_s5  ;;  %3593 = vmatprep.mubr.f32.mxu1 %v18968_v16  ;;  %v3517_v55 = vsel %vm1678_vm7, %v3504_v13, %v3506_v36  ;;  %v16431_v18 = vpack.c.bf16 %v3516_v45, %v3513_v53 }
 0x1c7   : > { %16428 = vmatprep.subr.bf16.mxu1 %v16427_v49  ;;  %17780 = vrot.lane.b32.xlu1 %v19693_v10, %s18974_s10 }
 0x1c8   : > { %16430 = vmatpush1.bf16.msra.mxu1 %v16429_v15  ;;  %v3508_v43 = vpop.permute.xlu1 %3507 }
 0x1c9   : > { %v3510_v46 = vpop.permute.xlu0 %3509  ;;  %v3518_v48 = vsel %vm1678_vm7, %v3506_v36, %v3508_v43 }
 0x1ca   : > { %17785 = vrot.lane.b32.xlu0 %v19699_v39, %s18974_s10  ;;  %3533 = vmatprep.subr.mxu1 %v3518_v48  ;;  %v3519_v51 = vsel %vm1678_vm7, %v3508_v43, %v3510_v46 }
 0x1cb   : > { %17790 = vrot.lane.b32.xlu1 %v19705_v44, %s18974_s10 }
 0x1cc   : > { %3534 = vmatpush1.msra.mxu1 %v3517_v55  ;;  %v17641_v34 = vpop.permute.xlu1 %17640  ;;  %v20033_v55 = vld [vmem:[#allocation5 + $0x80] sm:$0xff] }
 0x1cd   : > { %v17646_v50 = vpop.permute.xlu0 %17645  ;;  %16432 = vmatprep.subr.bf16.mxu1 %v16431_v18  ;;  %14971 = vmatmul.mubr.msk.f32.vlgmr.msra.gmra.mrb[4].mxu1 %vm302_vm0, %v19573_v56  ;;  %v17643_v52 = vunpack.i.h.bf16 %v17641_v34  ;;  %v17642_v54 = vunpack.i.l.bf16 %v17641_v34  ;;  %v15035_v34 = vld [vmem:[%s19142_s9 + $0x70] sm:$0xff] }
 0x1ce   : > { %16434 = vmatpush3.bf16.msra.mxu1 %v16431_v18  ;;  %17795 = vrot.lane.b32.xlu0 %v19717_v58, %s18974_s10  ;;  %v17647_v21 = vunpack.i.l.bf16 %v17646_v50  ;;  %v17648_v3 = vunpack.i.h.bf16 %v17646_v50  ;;  %v15036_v50 = vld [vmem:[%s19142_s9 + $0x78] sm:$0xff] }
 0x1cf   : > { %15799 = vmatprep.subr.mxu1 %v3519_v51  ;;  %5313 = vrot.lane.b32.xlu1 %v19722_v60, %s18974_s10  ;;  %v3711_v32 = vsel %vm1885_vm8, %v17642_v54, %v17643_v52 }
 0x1d0   : > { %v17651_v42 = vpop.permute.xlu1 %17650  ;;  %3599 = vmatprep.mubr.f32.mxu1 %v18968_v16  ;;  %v3712_v9 = vsel %vm1885_vm8, %v17643_v52, %v17647_v21 }
 0x1d1   : > { %v17653_v30 = vunpack.i.h.bf16 %v17651_v42  ;;  %v17652_v5 = vunpack.i.l.bf16 %v17651_v42  ;;  %v17656_v4 = vpop.permute.xlu0 %17655  ;;  %14972 = vmatmul.mubr.msk.f32.gmra.mrb[6].mxu1 %vm302_vm0, %v19610_v35 }
 0x1d2   : > { %v17657_v56 = vunpack.i.l.bf16 %v17656_v4  ;;  %15800 = vmatpush3.msra.mxu1 %v3519_v51  ;;  %5315 = vrot.lane.b32.xlu0 %v19742_v28, %s18974_s10  ;;  %v17658_v7 = vunpack.i.h.bf16 %v17656_v4 }
 0x1d3   : > { %v3714_v6 = vsel %vm1885_vm8, %v17652_v5, %v17653_v30  ;;  %5317 = vrot.lane.b32.xlu1 %v19745_v19, %s18974_s10  ;;  %15801 = vmatprep.mubr.msk.f32.mxu1 %vm302_vm0, %v19996_v40 }
 0x1d4   : > { %v3704_v8 = vpop.permute.xlu1 %3703  ;;  %v3715_v38 = vsel %vm1885_vm8, %v17653_v30, %v17657_v56  ;;  %v16437_v12 = vpack.c.bf16 %v3714_v6, %v3711_v32  ;;  %v3716_v27 = vsel %vm1885_vm8, %v17657_v56, %v17658_v7  ;;  %v20049_v56 = vpack.i.bf16 %v15036_v50, %v15035_v34 }
 0x1d5   : > { %v3706_v1 = vpop.permute.xlu0 %3705  ;;  %v16435_v2 = vpack.c.bf16 %v3715_v38, %v3712_v9  ;;  %15802 = vmatmul.mubr.msk.f32.vlgmr.msra.gmra.mrb[2].mxu1 %vm302_vm0, %v19610_v35  ;;  %v3713_v35 = vsel %vm1885_vm8, %v17647_v21, %v17648_v3  ;;  %v20065_v38 = vpack.i.bf16 %v19754_v20, %v19745_v19 }
 0x1d6   : > { %5319 = vrot.lane.b32.xlu0 %v19754_v20, %s18974_s10  ;;  %3793 = vmatprep.mubr.f32.mxu1 %v18968_v16  ;;  %v3717_v13 = vsel %vm1885_vm8, %v3704_v8, %v3706_v1  ;;  %v16439_v31 = vpack.c.bf16 %v3716_v27, %v3713_v35 }
 0x1d7   : > { %16436 = vmatprep.subr.bf16.mxu1 %v16435_v2  ;;  %17800 = vrot.lane.b32.xlu1 %v19693_v10, %s18975_s11 }
 0x1d8   : > { %16438 = vmatpush1.bf16.msra.mxu1 %v16437_v12  ;;  %v3708_v22 = vpop.permute.xlu1 %3707 }
 0x1d9   : > { %v3710_v59 = vpop.permute.xlu0 %3709  ;;  %v3718_v63 = vsel %vm1885_vm8, %v3706_v1, %v3708_v22 }
 0x1da   : > { %17805 = vrot.lane.b32.xlu0 %v19699_v39, %s18975_s11  ;;  %3733 = vmatprep.subr.mxu1 %v3718_v63  ;;  %v3719_v39 = vsel %vm1885_vm8, %v3708_v22, %v3710_v59  ;;  %v20074_v22 = vld [vmem:[#allocation5 + $0x10] sm:$0xff]  ;;  %v20086_v59 = vld [vmem:[%s19142_s9 + $0xa8] sm:$0xff] }
 0x1db   : > { %17810 = vrot.lane.b32.xlu1 %v19705_v44, %s18975_s11  ;;  %v18730_v63 = vld [vmem:[%s19142_s9 + $0x68] sm:$0xff] }
 0x1dc   : > { %3734 = vmatpush1.msra.mxu1 %v3717_v13  ;;  %v17661_v10 = vpop.permute.xlu1 %17660  ;;  %v16451_v35 = vpack.c.bf16 %v18730_v63, %v19685_v26  ;;  %v18732_v26 = vld [vmem:[%s19142_s9 + $0x60] sm:$0xff] }
 0x1dd   : > { %v17666_v33 = vpop.permute.xlu0 %17665  ;;  %14975 = vmatmul.mubr.msk.f32.vlgmr.msra.gmra.mrb[4].mxu1 %vm302_vm0, %v19612_v37  ;;  %16440 = vmatprep.subr.bf16.mxu1 %v16439_v31  ;;  %v17663_v15 = vunpack.i.h.bf16 %v17661_v10  ;;  %v17662_v36 = vunpack.i.l.bf16 %v17661_v10  ;;  %v15033_v37 = vld [vmem:[%s19142_s9 + $0x60] sm:$0xff]  ;;  %v20094_v10 = vld [vmem:[#allocation5 + $0x18] sm:$0xff] }
 0x1de   : > { %16442 = vmatpush3.bf16.msra.mxu1 %v16439_v31  ;;  %17815 = vrot.lane.b32.xlu0 %v19717_v58, %s18975_s11  ;;  %v17667_v44 = vunpack.i.l.bf16 %v17666_v33  ;;  %v20037_v18 = vpack.i.bf16 %v15034_v41, %v15033_v37  ;;  %v17668_v4 = vunpack.i.h.bf16 %v17666_v33  ;;  %v20099_v33 = vld [vmem:[%s19142_s9 + $0xb0] sm:$0xff] }
 0x1df   : > { %15808 = vmatprep.subr.mxu1 %v3719_v39  ;;  %3799 = vmatprep.mubr.f32.mxu1 %v18968_v16  ;;  %v3975_v48 = vsel %vm283_vm1, %v17662_v36, %v17663_v15 }
 0x1e0   : > { %v17671_v49 = vpop.permute.xlu1 %17670  ;;  %5513 = vrot.lane.b32.xlu1 %v19722_v60, %s18975_s11  ;;  %v3976_v54 = vsel %vm283_vm1, %v17663_v15, %v17667_v44  ;;  %v3977_v9 = vsel %vm283_vm1, %v17667_v44, %v17668_v4  ;;  %v20108_v15 = vld [vmem:[%s19142_s9 + $0xb8] sm:$0xff] }
 0x1e1   : > { %v17673_v43 = vunpack.i.h.bf16 %v17671_v49  ;;  %v17672_v45 = vunpack.i.l.bf16 %v17671_v49  ;;  %v17676_v46 = vpop.permute.xlu0 %17675  ;;  %14976 = vmatmul.mubr.msk.f32.gmra.mrb[6].mxu1 %vm302_vm0, %v19646_v14  ;;  %v18734_v49 = vld [vmem:[%s19142_s9 + $0x50] sm:$0xff] }
 0x1e2   : > { %v17677_v58 = vunpack.i.l.bf16 %v17676_v46  ;;  %15809 = vmatpush3.msra.mxu1 %v3719_v39  ;;  %5515 = vrot.lane.b32.xlu0 %v19742_v28, %s18975_s11  ;;  %v17678_v51 = vunpack.i.h.bf16 %v17676_v46  ;;  %v16453_v39 = vpack.c.bf16 %v18732_v26, %v19682_v25  ;;  %v18733_v25 = vld [vmem:[%s19142_s9 + $0x70] sm:$0xff] }
 0x1e3   : > { %v3978_v53 = vsel %vm283_vm1, %v17672_v45, %v17673_v43  ;;  %15810 = vmatprep.mubr.msk.f32.mxu1 %vm302_vm0, %v20033_v55  ;;  %v16455_v37 = vpack.c.bf16 %v18733_v25, %v18734_v49  ;;  %v20181_v25 = vld [vmem:[#allocation5 + $0x28] sm:$0xff] }
 0x1e4   : > { %v3968_v52 = vpop.permute.xlu1 %3967  ;;  %5517 = vrot.lane.b32.xlu1 %v19745_v19, %s18975_s11  ;;  %v3979_v21 = vsel %vm283_vm1, %v17673_v43, %v17677_v58  ;;  %v16445_v42 = vpack.c.bf16 %v3978_v53, %v3975_v48  ;;  %v3980_v6 = vsel %vm283_vm1, %v17677_v58, %v17678_v51 }
 0x1e5   : > { %v3970_v30 = vpop.permute.xlu0 %3969  ;;  %15811 = vmatmul.mubr.msk.f32.vlgmr.msra.gmra.mrb[2].mxu1 %vm302_vm0, %v19646_v14  ;;  %v16443_v5 = vpack.c.bf16 %v3979_v21, %v3976_v54  ;;  %v20057_v14 = vpack.i.bf16 %v19742_v28, %v19722_v60  ;;  %v16447_v1 = vpack.c.bf16 %v3980_v6, %v3977_v9 }
 0x1e6   : > { %5519 = vrot.lane.b32.xlu0 %v19754_v20, %s18975_s11  ;;  %5867 = vmatprep.mubr.f32.mxu1 %v18968_v16  ;;  %v3981_v12 = vsel %vm283_vm1, %v3968_v52, %v3970_v30  ;;  %v20079_v20 = vld [vmem:[%s19142_s9 + $0xa0] sm:$0xff] }
 0x1e7   : > { %16444 = vmatprep.subr.bf16.mxu0 %v16443_v5 }
 0x1e8   : > { %16446 = vmatpush1.bf16.msra.mxu0 %v16445_v42  ;;  %v3972_v32 = vpop.permute.xlu1 %3971  ;;  %17820 = vrot.lane.b32.xlu1 %v20037_v18, %s18966_s18 }
 0x1e9   : > { %v3974_v7 = vpop.permute.xlu0 %3973  ;;  %v3982_v8 = vsel %vm283_vm1, %v3970_v30, %v3972_v32 }
 0x1ea   : > { %17825 = vrot.lane.b32.xlu0 %v20049_v56, %s18966_s18  ;;  %3997 = vmatprep.subr.mxu0 %v3982_v8  ;;  %v3983_v27 = vsel %vm283_vm1, %v3972_v32, %v3974_v7 }
 0x1ec   : > { %3998 = vmatpush1.msra.mxu0 %v3981_v12  ;;  %v20068_v2 = vpop.permute.xlu1 %17680  ;;  %17830 = vrot.lane.b32.xlu1 %v20057_v14, %s18966_s18 }
 0x1ed   : > { %v20072_v3 = vpop.permute.xlu0 %17685  ;;  %14994 = vmatmul.mubr.msk.f32.vlgmr.msra.gmra.mrb[10].mxu0 %vm302_vm0, %v20074_v22  ;;  %16448 = vmatprep.subr.bf16.mxu0 %v16447_v1  ;;  %v17683_v58 = vunpack.i.h.bf16 %v20068_v2  ;;  %v17682_v50 = vunpack.i.l.bf16 %v20068_v2 }
 0x1ee   : > { %16450 = vmatpush3.bf16.msra.mxu0 %v16447_v1  ;;  %17835 = vrot.lane.b32.xlu0 %v20065_v38, %s18966_s18  ;;  %v17687_v48 = vunpack.i.l.bf16 %v20072_v3  ;;  %v17688_v4 = vunpack.i.h.bf16 %v20072_v3 }
 0x1ef   : > { %15817 = vmatprep.subr.mxu0 %v3983_v27  ;;  %4063 = vmatprep.mubr.f32.mxu0 %v18968_v16  ;;  %v4321_v30 = vsel %vm643_vm2, %v17682_v50, %v17683_v58 }
 0x1f0   : > { %v17691_v13 = vpop.permute.xlu1 %17690  ;;  %5777 = vrot.lane.b32.xlu1 %v20079_v20, %s18966_s18 }
 0x1f1   : > { %v20092_v31 = vpop.permute.xlu0 %17695  ;;  %14995 = vmatmul.mubr.msk.f32.gmra.mrb[12].mxu0 %vm302_vm0, %v20094_v10  ;;  %v17693_v41 = vunpack.i.h.bf16 %v17691_v13 }
 0x1f2   : > { %15818 = vmatpush3.msra.mxu0 %v3983_v27  ;;  %5779 = vrot.lane.b32.xlu0 %v20086_v59, %s18966_s18  ;;  %v17697_v43 = vunpack.i.l.bf16 %v20092_v31  ;;  %v17698_v21 = vunpack.i.h.bf16 %v20092_v31 }
 0x1f3   : > { %15819 = vmatprep.mubr.msk.f32.mxu0 %vm302_vm0, %v20074_v22  ;;  %16452 = vmatprep.subr.bf16.mxu0 %v16451_v35 }
 0x1f4   : > { %v4314_v36 = vpop.permute.xlu1 %4313  ;;  %5781 = vrot.lane.b32.xlu1 %v20099_v33, %s18966_s18  ;;  %v4325_v34 = vsel %vm643_vm2, %v17693_v41, %v17697_v43  ;;  %v4326_v6 = vsel %vm643_vm2, %v17697_v43, %v17698_v21 }
 0x1f5   : > { %v4316_v44 = vpop.permute.xlu0 %4315  ;;  %15820 = vmatmul.mubr.msk.f32.vlgmr.msra.gmra.mrb[14].mxu0 %vm302_vm0, %v20094_v10 }
 0x1f6   : > { %16454 = vmatpush1.bf16.msra.mxu0 %v16453_v39  ;;  %5783 = vrot.lane.b32.xlu0 %v20108_v15, %s18966_s18  ;;  %v4327_v12 = vsel %vm643_vm2, %v4314_v36, %v4316_v44 }
 0x1f7   : > { %4149 = vmatprep.subr.mxu0 %v19742_v28  ;;  %4209 = vmatprep.mubr.f32.mxu0 %v18968_v16  ;;  %v17692_v28 = vunpack.i.l.bf16 %v17691_v13 }
 0x1f8   : > { %v4318_v45 = vpop.permute.xlu1 %4317  ;;  %17840 = vrot.lane.b32.xlu1 %v20037_v18, %s18969_s20 }
 0x1f9   : > { %v4320_v46 = vpop.permute.xlu0 %4319  ;;  %v4324_v52 = vsel %vm643_vm2, %v17692_v28, %v17693_v41 }
 0x1fa   : > { %4150 = vmatpush1.msra.mxu0 %v19722_v60  ;;  %17845 = vrot.lane.b32.xlu0 %v20049_v56, %s18969_s20  ;;  %v4322_v60 = vsel %vm643_vm2, %v17683_v58, %v17687_v48  ;;  %v16461_v32 = vpack.c.bf16 %v4324_v52, %v4321_v30  ;;  %v4329_v13 = vsel %vm643_vm2, %v4318_v45, %v4320_v46 }
 0x1fb   : > { %14998 = vmatmul.mubr.msk.f32.vlgmr.msra.gmra.mrb[10].mxu0 %vm302_vm0, %v19770_v57  ;;  %16456 = vmatprep.subr.bf16.mxu0 %v16455_v37  ;;  %v16459_v54 = vpack.c.bf16 %v4325_v34, %v4322_v60 }
 0x1fc   : > { %16458 = vmatpush3.bf16.msra.mxu0 %v16455_v37  ;;  %v20130_v53 = vpop.permute.xlu1 %17700  ;;  %4215 = vmatprep.mubr.f32.mxu0 %v18968_v16 }
 0x1fd   : > { %v20135_v51 = vpop.permute.xlu0 %17705  ;;  %15826 = vmatprep.subr.mxu0 %v19745_v19  ;;  %17850 = vrot.lane.b32.xlu1 %v20057_v14, %s18969_s20  ;;  %v17703_v2 = vunpack.i.h.bf16 %v20130_v53  ;;  %v17702_v26 = vunpack.i.l.bf16 %v20130_v53 }
 0x1fe   : > { %17855 = vrot.lane.b32.xlu0 %v20065_v38, %s18969_s20  ;;  %v17707_v3 = vunpack.i.l.bf16 %v20135_v51 }
 0x1ff   : > { %14999 = vmatmul.mubr.msk.f32.gmra.mrb[12].mxu0 %vm302_vm0, %v19776_v62  ;;  %v4521_v43 = vsel %vm850_vm3, %v17702_v26, %v17703_v2 }
 0x200   : > { %15827 = vmatpush3.msra.mxu0 %v19745_v19  ;;  %v17711_v42 = vpop.permute.xlu1 %17710  ;;  %15828 = vmatprep.mubr.msk.f32.mxu0 %vm302_vm0, %v19770_v57  ;;  %v4328_v19 = vsel %vm643_vm2, %v4316_v44, %v4318_v45  ;;  %v4522_v36 = vsel %vm850_vm3, %v17703_v2, %v17707_v3  ;;  %v17708_v45 = vunpack.i.h.bf16 %v20135_v51 }
 0x201   : > { %16460 = vmatprep.subr.bf16.mxu0 %v16459_v54  ;;  %v17716_v5 = vpop.permute.xlu0 %17715  ;;  %6123 = vrot.lane.b32.xlu1 %v20079_v20, %s18969_s20  ;;  %v17713_v8 = vunpack.i.h.bf16 %v17711_v42  ;;  %v17712_v63 = vunpack.i.l.bf16 %v17711_v42 }
 0x202   : > { %6125 = vrot.lane.b32.xlu0 %v20086_v59, %s18969_s20  ;;  %v17717_v9 = vunpack.i.l.bf16 %v17716_v5  ;;  %v17718_v41 = vunpack.i.h.bf16 %v17716_v5  ;;  %v4523_v50 = vsel %vm850_vm3, %v17707_v3, %v17708_v45  ;;  %v20207_v5 = vld [vmem:[#allocation5 + $0x30] sm:$0xff] }
 0x203   : > { %15829 = vmatmul.mubr.msk.f32.vlgmr.msra.gmra.mrb[14].mxu0 %vm302_vm0, %v19776_v62  ;;  %v4323_v62 = vsel %vm643_vm2, %v17687_v48, %v17688_v4  ;;  %v4524_v44 = vsel %vm850_vm3, %v17712_v63, %v17713_v8 }
 0x204   : > { %16462 = vmatpush1.bf16.msra.mxu0 %v16461_v32  ;;  %v4514_v57 = vpop.permute.xlu1 %4513  ;;  %4403 = vmatprep.mubr.f32.mxu0 %v18968_v16  ;;  %v16463_v1 = vpack.c.bf16 %v4326_v6, %v4323_v62  ;;  %v4525_v31 = vsel %vm850_vm3, %v17713_v8, %v17717_v9  ;;  %v16469_v46 = vpack.c.bf16 %v4524_v44, %v4521_v43 }
 0x205   : > { %4343 = vmatprep.subr.mxu0 %v4328_v19  ;;  %v4516_v7 = vpop.permute.xlu0 %4515  ;;  %6127 = vrot.lane.b32.xlu1 %v20099_v33, %s18969_s20  ;;  %v16467_v37 = vpack.c.bf16 %v4525_v31, %v4522_v36  ;;  %v4526_v28 = vsel %vm850_vm3, %v17717_v9, %v17718_v41  ;;  %v20222_v9 = vld [vmem:[#allocation5 + $0x38] sm:$0xff] }
 0x206   : > { %6129 = vrot.lane.b32.xlu0 %v20108_v15, %s18969_s20  ;;  %v4527_v60 = vsel %vm850_vm3, %v4514_v57, %v4516_v7  ;;  %v16471_v52 = vpack.c.bf16 %v4526_v28, %v4523_v50 }
 0x208   : > { %4344 = vmatpush1.msra.mxu0 %v4327_v12  ;;  %v4518_v27 = vpop.permute.xlu1 %4517 }
 0x209   : > { %15002 = vmatmul.mubr.msk.f32.vlgmr.msra.gmra.mrb[10].mxu0 %vm302_vm0, %v19797_v11  ;;  %16464 = vmatprep.subr.bf16.mxu0 %v16463_v1  ;;  %v4520_v35 = vpop.permute.xlu0 %4519 }
 0x20a   : > { %16466 = vmatpush3.bf16.msra.mxu0 %v16463_v1  ;;  %4409 = vmatprep.mubr.f32.mxu0 %v18968_v16  ;;  %v4529_v4 = vsel %vm850_vm3, %v4518_v27, %v4520_v35 }
 0x20b   : > { %15835 = vmatprep.subr.mxu0 %v4329_v13  ;;  %17860 = vrot.lane.b32.xlu1 %v20037_v18, %s18970_s4 }
 0x20c   : > { %17865 = vrot.lane.b32.xlu0 %v20049_v56, %s18970_s4  ;;  %v17721_v39 = vpop.permute.xlu1 %17720 }
 0x20d   : > { %15003 = vmatmul.mubr.msk.f32.gmra.mrb[12].mxu0 %vm302_vm0, %v20181_v25  ;;  %v20185_v49 = vpop.permute.xlu0 %17725  ;;  %v17723_v21 = vunpack.i.h.bf16 %v17721_v39  ;;  %v17722_v57 = vunpack.i.l.bf16 %v17721_v39 }
 0x20e   : > { %15836 = vmatpush3.msra.mxu0 %v4329_v13  ;;  %15837 = vmatprep.mubr.msk.f32.mxu0 %vm302_vm0, %v19797_v11  ;;  %v4528_v11 = vsel %vm850_vm3, %v4516_v7, %v4518_v27  ;;  %v17727_v42 = vunpack.i.l.bf16 %v20185_v49  ;;  %v17728_v3 = vunpack.i.h.bf16 %v20185_v49 }
 0x20f   : > { %16468 = vmatprep.subr.bf16.mxu0 %v16467_v37  ;;  %17870 = vrot.lane.b32.xlu1 %v20057_v14, %s18970_s4  ;;  %v4721_v2 = vsel %vm1057_vm4, %v17722_v57, %v17723_v21 }
 0x210   : > { %17875 = vrot.lane.b32.xlu0 %v20065_v38, %s18970_s4  ;;  %v17731_v58 = vpop.permute.xlu1 %17730  ;;  %v4722_v7 = vsel %vm1057_vm4, %v17723_v21, %v17727_v42  ;;  %v4723_v43 = vsel %vm1057_vm4, %v17727_v42, %v17728_v3 }
 0x211   : > { %15838 = vmatmul.mubr.msk.f32.vlgmr.msra.gmra.mrb[14].mxu0 %vm302_vm0, %v20181_v25  ;;  %v17736_v48 = vpop.permute.xlu0 %17735  ;;  %v17733_v53 = vunpack.i.h.bf16 %v17731_v58  ;;  %v17732_v30 = vunpack.i.l.bf16 %v17731_v58 }
 0x212   : > { %16470 = vmatpush1.bf16.msra.mxu0 %v16469_v46  ;;  %4603 = vmatprep.mubr.f32.mxu0 %v18968_v16  ;;  %v17737_v34 = vunpack.i.l.bf16 %v17736_v48  ;;  %v17738_v12 = vunpack.i.h.bf16 %v17736_v48 }
 0x213   : > { %4543 = vmatprep.subr.mxu0 %v4528_v11  ;;  %6323 = vrot.lane.b32.xlu1 %v20079_v20, %s18970_s4  ;;  %v4724_v8 = vsel %vm1057_vm4, %v17732_v30, %v17733_v53 }
 0x214   : > { %6325 = vrot.lane.b32.xlu0 %v20086_v59, %s18970_s4  ;;  %v4714_v51 = vpop.permute.xlu1 %4713  ;;  %v4725_v19 = vsel %vm1057_vm4, %v17733_v53, %v17737_v34  ;;  %v16477_v63 = vpack.c.bf16 %v4724_v8, %v4721_v2  ;;  %v4726_v44 = vsel %vm1057_vm4, %v17737_v34, %v17738_v12 }
 0x215   : > { %v4716_v54 = vpop.permute.xlu0 %4715  ;;  %v16475_v62 = vpack.c.bf16 %v4725_v19, %v4722_v7  ;;  %v16479_v28 = vpack.c.bf16 %v4726_v44, %v4723_v43 }
 0x216   : > { %4544 = vmatpush1.msra.mxu0 %v4527_v60  ;;  %v4727_v48 = vsel %vm1057_vm4, %v4714_v51, %v4716_v54 }
 0x217   : > { %15006 = vmatmul.mubr.msk.f32.vlgmr.msra.gmra.mrb[10].mxu0 %vm302_vm0, %v20207_v5  ;;  %16472 = vmatprep.subr.bf16.mxu0 %v16471_v52 }
 0x218   : > { %16474 = vmatpush3.bf16.msra.mxu0 %v16471_v52  ;;  %6327 = vrot.lane.b32.xlu1 %v20099_v33, %s18970_s4  ;;  %v20214_v32 = vpop.permute.xlu1 %4717 }
 0x219   : > { %15844 = vmatprep.subr.mxu0 %v4529_v4  ;;  %6329 = vrot.lane.b32.xlu0 %v20108_v15, %s18970_s4  ;;  %v4720_v6 = vpop.permute.xlu0 %4719  ;;  %v4728_v31 = vsel %vm1057_vm4, %v4716_v54, %v20214_v32 }
 0x21a   : > { %4609 = vmatprep.mubr.f32.mxu0 %v18968_v16  ;;  %v4729_v30 = vsel %vm1057_vm4, %v20214_v32, %v4720_v6  ;;  %v20278_v32 = vld [vmem:[#allocation5 + $0x48] sm:$0xff] }
 0x21b   : > { %15007 = vmatmul.mubr.msk.f32.gmra.mrb[12].mxu0 %vm302_vm0, %v20222_v9 }
 0x21c   : > { %15845 = vmatpush3.msra.mxu0 %v4529_v4  ;;  %17880 = vrot.lane.b32.xlu1 %v20037_v18, %s18971_s22  ;;  %v20228_v1 = vpop.permute.xlu1 %17740 }
 0x21d   : > { %16476 = vmatprep.subr.bf16.mxu0 %v16475_v62  ;;  %17885 = vrot.lane.b32.xlu0 %v20049_v56, %s18971_s22  ;;  %v20234_v27 = vpop.permute.xlu0 %17745  ;;  %v17743_v45 = vunpack.i.h.bf16 %v20228_v1  ;;  %v17742_v19 = vunpack.i.l.bf16 %v20228_v1 }
 0x21e   : > { %15846 = vmatprep.mubr.msk.f32.mxu0 %vm302_vm0, %v20207_v5  ;;  %v17747_v46 = vunpack.i.l.bf16 %v20234_v27 }
 0x21f   : > { %15847 = vmatmul.mubr.msk.f32.vlgmr.msra.gmra.mrb[14].mxu0 %vm302_vm0, %v20222_v9  ;;  %v1976_v35 = vpop.f32.mrb[0].mxu0  ;;  %v15731_v13 = vpop.f32.mrb[0].mxu1  ;;  %v4921_v3 = vsel %vm1264_vm5, %v17742_v19, %v17743_v45 }
 0x220   : > { %16478 = vmatpush1.bf16.msra.mxu0 %v16477_v63  ;;  %17890 = vrot.lane.b32.xlu1 %v20057_v14, %s18971_s22  ;;  %v16875_v26 = vadd.f32 %v15731_v13, %v19931_v17  ;;  %v1978_v39 = vpop.f32.mrb[1].mxu0  ;;  %v2053_v36 = vpop.f32.mrb[1].mxu1  ;;  %v4922_v4 = vsel %vm1264_vm5, %v17743_v45, %v17747_v46  ;;  %v2078_v1 = vadd.f32 %v19675_v24, %v1976_v35  ;;  %v17748_v13 = vunpack.i.h.bf16 %v20234_v27 }
 0x221   : > { %4743 = vmatprep.subr.mxu0 %v4728_v31  ;;  %17895 = vrot.lane.b32.xlu0 %v20065_v38, %s18971_s22  ;;  %v16876_v49 = vadd.f32 %v2053_v36, %v19934_v0  ;;  %v17751_v37 = vpop.permute.xlu1 %17750  ;;  %v20249_v41 = vpop.permute.xlu0 %17755  ;;  %v2079_v63 = vadd.f32 %v19675_v24, %v1978_v39 }
 0x222   : > { %v2083_v17 = vadd.f32 %v16875_v26, %v19673_v23  ;;  %4803 = vmatprep.mubr.f32.mxu0 %v18968_v16  ;;  %v17753_v58 = vunpack.i.h.bf16 %v17751_v37  ;;  %v17757_v11 = vunpack.i.l.bf16 %v20249_v41  ;;  %v17752_v60 = vunpack.i.l.bf16 %v17751_v37 }
 0x223   : > { %v1982_v0 = vpop.f32.mrb[2].mxu0  ;;  %v2080_v8 = vadd.f32 %v16876_v49, %v19675_v24  ;;  %v17758_v2 = vunpack.i.h.bf16 %v20249_v41  ;;  %v4923_v37 = vsel %vm1264_vm5, %v17747_v46, %v17748_v13 }
 0x224   : > { %v2089_v53 = vmul.f32 0.5, %v2083_v17  ;;  %4744 = vmatpush1.msra.mxu0 %v4727_v48  ;;  %6523 = vrot.lane.b32.xlu1 %v20079_v20, %s18971_s22  ;;  %v2081_v34 = vadd.f32 %v19673_v23, %v1982_v0  ;;  %v1984_v50 = vpop.f32.mrb[3].mxu0  ;;  %v4925_v21 = vsel %vm1264_vm5, %v17753_v58, %v17757_v11  ;;  %v4924_v62 = vsel %vm1264_vm5, %v17752_v60, %v17753_v58 }
 0x225   : > { %15010 = vmatmul.mubr.msk.f32.vlgmr.msra.gmra.mrb[10].mxu0 %vm302_vm0, %v19869_v47  ;;  %16480 = vmatprep.subr.bf16.mxu0 %v16479_v28  ;;  %v2082_v52 = vadd.f32 %v19673_v23, %v1984_v50  ;;  %v4914_v51 = vpop.permute.xlu1 %4913  ;;  %v4916_v54 = vpop.permute.xlu0 %4915  ;;  %v16483_v7 = vpack.c.bf16 %v4925_v21, %v4922_v4  ;;  %v16485_v31 = vpack.c.bf16 %v4924_v62, %v4921_v3 }
 0x226   : > { %18619 = vtanh.f32 %v2089_v53  ;;  %16482 = vmatpush3.bf16.msra.mxu0 %v16479_v28  ;;  %6525 = vrot.lane.b32.xlu0 %v20086_v59, %s18971_s22  ;;  %v2087_v42 = vmul.f32 0.5, %v2081_v34  ;;  %v4927_v43 = vsel %vm1264_vm5, %v4914_v51, %v4916_v54 }
 0x227   : > { %15853 = vmatprep.subr.mxu0 %v4729_v30  ;;  %v2088_v57 = vmul.f32 0.5, %v2082_v52  ;;  %4809 = vmatprep.mubr.f32.mxu0 %v18968_v16 }
 0x228   : > { %18621 = vtanh.f32 %v2087_v42  ;;  %6527 = vrot.lane.b32.xlu1 %v20099_v33, %s18971_s22 }
 0x229   : > { %18623 = vtanh.f32 %v2088_v57  ;;  %15011 = vmatmul.mubr.msk.f32.gmra.mrb[12].mxu0 %vm302_vm0, %v20278_v32  ;;  %v4918_v6 = vpop.permute.xlu1 %4917  ;;  %v4920_v12 = vpop.permute.xlu0 %4919 }
 0x22a   : > { %15854 = vmatpush3.msra.mxu0 %v4729_v30  ;;  %6529 = vrot.lane.b32.xlu0 %v20108_v15, %s18971_s22  ;;  %18625 = vtanh.f32 %v2080_v8  ;;  %v4928_v35 = vsel %vm1264_vm5, %v4916_v54, %v4918_v6  ;;  %v4929_v60 = vsel %vm1264_vm5, %v4918_v6, %v4920_v12  ;;  %v20329_v12 = vld [vmem:[#allocation5 + $0x58] sm:$0xff] }
 0x22b   : > { %16484 = vmatprep.subr.bf16.mxu0 %v16483_v7  ;;  %15855 = vmatprep.mubr.msk.f32.mxu0 %vm302_vm0, %v19869_v47  ;;  %18627 = vtanh.f32 %v2078_v1  ;;  %v4926_v47 = vsel %vm1264_vm5, %v17757_v11, %v17758_v2 }
 0x22c   : > { %17900 = vrot.lane.b32.xlu1 %v20037_v18, %s18972_s26  ;;  %18629 = vtanh.f32 %v2079_v63  ;;  %v16487_v45 = vpack.c.bf16 %v4926_v47, %v4923_v37 }
 0x22d   : > { %15856 = vmatmul.mubr.msk.f32.vlgmr.msra.gmra.mrb[14].mxu0 %vm302_vm0, %v20278_v32  ;;  %v17761_v26 = vpop.permute.xlu1 %17760  ;;  %v20296_v36 = vpop.permute.xlu0 %17765 }
 0x22e   : > { %16486 = vmatpush1.bf16.msra.mxu0 %v16485_v31  ;;  %17905 = vrot.lane.b32.xlu0 %v20049_v56, %s18972_s26  ;;  %v17763_v44 = vunpack.i.h.bf16 %v17761_v26  ;;  %v17767_v49 = vunpack.i.l.bf16 %v20296_v36  ;;  %v17762_v34 = vunpack.i.l.bf16 %v17761_v26 }
 0x22f   : > { %4943 = vmatprep.subr.mxu0 %v4928_v35  ;;  %5003 = vmatprep.mubr.f32.mxu0 %v18968_v16 }
 0x230   : > { %v18620_v39 = vpop.eup %18619  ;;  %17910 = vrot.lane.b32.xlu1 %v20057_v14, %s18972_s26  ;;  %v5122_v52 = vsel %vm1471_vm6, %v17763_v44, %v17767_v49  ;;  %v5121_v6 = vsel %vm1471_vm6, %v17762_v34, %v17763_v44 }
 0x231   : > { %v2095_v41 = vadd.f32 1.0, %v18620_v39  ;;  %v17771_v17 = vpop.permute.xlu1 %17770  ;;  %v20309_v58 = vpop.permute.xlu0 %17775 }
 0x232   : > { %v18622_v48 = vpop.eup %18621  ;;  %4944 = vmatpush1.msra.mxu0 %v4927_v43  ;;  %17915 = vrot.lane.b32.xlu0 %v20065_v38, %s18972_s26  ;;  %v17773_v11 = vunpack.i.h.bf16 %v17771_v17  ;;  %v17772_v27 = vunpack.i.l.bf16 %v17771_v17  ;;  %v17777_v46 = vunpack.i.l.bf16 %v20309_v58  ;;  %v17778_v63 = vunpack.i.h.bf16 %v20309_v58 }
 0x233   : > { %v18624_v28 = vpop.eup %18623  ;;  %v2098_v0 = vmul.f32 0.5, %v2095_v41  ;;  %v2093_v53 = vadd.f32 1.0, %v18622_v48  ;;  %16488 = vmatprep.subr.bf16.mxu0 %v16487_v45  ;;  %15014 = vmatmul.mubr.msk.f32.vlgmr.msra.gmra.mrb[10].mxu0 %vm302_vm0, %v19911_v29  ;;  %v17768_v43 = vunpack.i.h.bf16 %v20296_v36 }
 0x234   : > { %v2094_v50 = vadd.f32 1.0, %v18624_v28  ;;  %16490 = vmatpush3.bf16.msra.mxu0 %v16487_v45  ;;  %6723 = vrot.lane.b32.xlu1 %v20079_v20, %s18972_s26  ;;  %v5125_v51 = vsel %vm1471_vm6, %v17773_v11, %v17777_v46  ;;  %v5124_v42 = vsel %vm1471_vm6, %v17772_v27, %v17773_v11  ;;  %v18626_v57 = vpop.eup %18625  ;;  %v5126_v58 = vsel %vm1471_vm6, %v17777_v46, %v17778_v63 }
 0x235   : > { %v2104_v54 = vsub.f32 1.0, %v2098_v0  ;;  %v2096_v21 = vmul.f32 0.5, %v2093_v53  ;;  %15862 = vmatprep.subr.mxu0 %v4929_v60  ;;  %5009 = vmatprep.mubr.f32.mxu0 %v18968_v16  ;;  %v5114_v30 = vpop.permute.xlu1 %5113  ;;  %v5116_v4 = vpop.permute.xlu0 %5115  ;;  %v16491_v19 = vpack.c.bf16 %v5125_v51, %v5122_v52  ;;  %v2101_v8 = vmul.f32 0.0, %v2098_v0 }
 0x236   : > { %v2097_v7 = vmul.f32 0.5, %v2094_v50  ;;  %6725 = vrot.lane.b32.xlu0 %v20086_v59, %s18972_s26  ;;  %v18628_v2 = vpop.eup %18627  ;;  %v16493_v13 = vpack.c.bf16 %v5124_v42, %v5121_v6  ;;  %v5123_v27 = vsel %vm1471_vm6, %v17767_v49, %v17768_v43  ;;  %v5127_v28 = vsel %vm1471_vm6, %v5114_v30, %v5116_v4 }
 0x237   : > { %v2102_v62 = vsub.f32 1.0, %v2096_v21  ;;  %15015 = vmatmul.mubr.msk.f32.gmra.mrb[12].mxu0 %vm302_vm0, %v20329_v12  ;;  %v2107_v1 = vmul.f32 %v18626_v57, %v2104_v54  ;;  %v18630_v31 = vpop.eup %18629  ;;  %v2099_v35 = vmul.f32 0.0, %v2096_v21  ;;  %v16495_v0 = vpack.c.bf16 %v5126_v58, %v5123_v27 }
 0x238   : > { %v2103_v3 = vsub.f32 1.0, %v2097_v7  ;;  %15863 = vmatpush3.msra.mxu0 %v4929_v60  ;;  %6727 = vrot.lane.b32.xlu1 %v20099_v33, %s18972_s26  ;;  %v2100_v37 = vmul.f32 0.0, %v2097_v7 }
 0x239   : > { %v2105_v26 = vmul.f32 %v18628_v2, %v2102_v62  ;;  %15864 = vmatprep.mubr.msk.f32.mxu0 %vm302_vm0, %v19911_v29  ;;  %16492 = vmatprep.subr.bf16.mxu0 %v16491_v19  ;;  %v5118_v47 = vpop.permute.xlu1 %5117  ;;  %v5120_v39 = vpop.permute.xlu0 %5119  ;;  %v2110_v44 = vadd.f32 %v2107_v1, %v2101_v8 }
 0x23a   : > { %v2106_v41 = vmul.f32 %v18630_v31, %v2103_v3  ;;  %6729 = vrot.lane.b32.xlu0 %v20108_v15, %s18972_s26  ;;  %v5128_v45 = vsel %vm1471_vm6, %v5116_v4, %v5118_v47  ;;  %v5129_v36 = vsel %vm1471_vm6, %v5118_v47, %v5120_v39  ;;  %v20375_v4 = vld [vmem:[#allocation5 + $0x68] sm:$0xff] }
 0x23b   : > { %v2108_v17 = vadd.f32 %v2105_v26, %v2099_v35  ;;  %15865 = vmatmul.mubr.msk.f32.vlgmr.msra.gmra.mrb[14].mxu0 %vm302_vm0, %v20329_v12  ;;  %2113 = vst [vmem:[%s20346_s25 + $0x10] sm:$0xff] %v2110_v44 }
 0x23c   : > { %v2109_v29 = vadd.f32 %v2106_v41, %v2100_v37  ;;  %16494 = vmatpush1.bf16.msra.mxu0 %v16493_v13  ;;  %17920 = vrot.lane.b32.xlu1 %v20037_v18, %s18973_s5 }
 0x23d   : > { %2111 = vst [vmem:[%s20346_s25] sm:$0xff] %v2108_v17  ;;  %5143 = vmatprep.subr.mxu0 %v5128_v45  ;;  %v17781_v48 = vpop.permute.xlu1 %17780  ;;  %v17786_v11 = vpop.permute.xlu0 %17785  ;;  %5203 = vmatprep.mubr.f32.mxu0 %v18968_v16 }
 0x23e   : > { %2112 = vst [vmem:[%s20346_s25 + $0x8] sm:$0xff] %v2109_v29  ;;  %17925 = vrot.lane.b32.xlu0 %v20049_v56, %s18973_s5  ;;  %v17783_v53 = vunpack.i.h.bf16 %v17781_v48  ;;  %v17787_v46 = vunpack.i.l.bf16 %v17786_v11  ;;  %v17782_v34 = vunpack.i.l.bf16 %v17781_v48  ;;  %v17788_v6 = vunpack.i.h.bf16 %v17786_v11  ;;  %v20407_v48 = vld [vmem:[#allocation5 + $0x78] sm:$0xff] }
 0x240   : > { %5144 = vmatpush1.msra.mxu0 %v5127_v28  ;;  %17930 = vrot.lane.b32.xlu1 %v20057_v14, %s18973_s5  ;;  %v5322_v21 = vsel %vm1678_vm7, %v17783_v53, %v17787_v46  ;;  %v5321_v30 = vsel %vm1678_vm7, %v17782_v34, %v17783_v53 }
 0x241   : > { %16496 = vmatprep.subr.bf16.mxu0 %v16495_v0  ;;  %15018 = vmatmul.mubr.msk.f32.vlgmr.msra.gmra.mrb[10].mxu0 %vm302_vm0, %v19959_v61  ;;  %v17791_v50 = vpop.permute.xlu1 %17790  ;;  %v17796_v60 = vpop.permute.xlu0 %17795 }
 0x242   : > { %16498 = vmatpush3.bf16.msra.mxu0 %v16495_v0  ;;  %17935 = vrot.lane.b32.xlu0 %v20065_v38, %s18973_s5  ;;  %v17793_v49 = vunpack.i.h.bf16 %v17791_v50  ;;  %v17792_v52 = vunpack.i.l.bf16 %v17791_v50  ;;  %v17797_v51 = vunpack.i.l.bf16 %v17796_v60  ;;  %v17798_v8 = vunpack.i.h.bf16 %v17796_v60 }
 0x243   : > { %15871 = vmatprep.subr.mxu0 %v5129_v36  ;;  %5209 = vmatprep.mubr.f32.mxu0 %v18968_v16 }
 0x244   : > { %v5324_v54 = vsel %vm1678_vm7, %v17792_v52, %v17793_v49  ;;  %6923 = vrot.lane.b32.xlu1 %v20079_v20, %s18973_s5  ;;  %v5325_v42 = vsel %vm1678_vm7, %v17793_v49, %v17797_v51  ;;  %v5326_v63 = vsel %vm1678_vm7, %v17797_v51, %v17798_v8 }
 0x245   : > { %15019 = vmatmul.mubr.msk.f32.gmra.mrb[12].mxu0 %vm302_vm0, %v20375_v4  ;;  %v5314_v19 = vpop.permute.xlu1 %5313  ;;  %v5316_v57 = vpop.permute.xlu0 %5315  ;;  %v16499_v7 = vpack.c.bf16 %v5325_v42, %v5322_v21  ;;  %v16501_v62 = vpack.c.bf16 %v5324_v54, %v5321_v30 }
 0x246   : > { %15872 = vmatpush3.msra.mxu0 %v5129_v36  ;;  %6925 = vrot.lane.b32.xlu0 %v20086_v59, %s18973_s5  ;;  %v5327_v13 = vsel %vm1678_vm7, %v5314_v19, %v5316_v57 }
 0x247   : > { %15873 = vmatprep.mubr.msk.f32.mxu0 %vm302_vm0, %v19959_v61  ;;  %16500 = vmatprep.subr.bf16.mxu0 %v16499_v7  ;;  %v5323_v61 = vsel %vm1678_vm7, %v17787_v46, %v17788_v6  ;;  %v20441_v6 = vld [vmem:[#allocation5 + $0x88] sm:$0xff] }
 0x248   : > { %6927 = vrot.lane.b32.xlu1 %v20099_v33, %s18973_s5  ;;  %v16503_v26 = vpack.c.bf16 %v5326_v63, %v5323_v61 }
 0x249   : > { %15874 = vmatmul.mubr.msk.f32.vlgmr.msra.gmra.mrb[14].mxu0 %vm302_vm0, %v20375_v4  ;;  %v5318_v1 = vpop.permute.xlu1 %5317  ;;  %v5320_v2 = vpop.permute.xlu0 %5319 }
 0x24a   : > { %6929 = vrot.lane.b32.xlu0 %v20108_v15, %s18973_s5  ;;  %16502 = vmatpush1.bf16.msra.mxu0 %v16501_v62  ;;  %v5328_v3 = vsel %vm1678_vm7, %v5316_v57, %v5318_v1  ;;  %v5329_v37 = vsel %vm1678_vm7, %v5318_v1, %v5320_v2 }
 0x24b   : > { %5343 = vmatprep.subr.mxu0 %v5328_v3  ;;  %5403 = vmatprep.mubr.f32.mxu0 %v18968_v16 }
 0x24c   : > { %17940 = vrot.lane.b32.xlu1 %v20037_v18, %s18974_s10 }
 0x24d   : > { %v17801_v31 = vpop.permute.xlu1 %17800  ;;  %v17806_v35 = vpop.permute.xlu0 %17805 }
 0x24e   : > { %17945 = vrot.lane.b32.xlu0 %v20049_v56, %s18974_s10  ;;  %5344 = vmatpush1.msra.mxu0 %v5327_v13  ;;  %v17803_v47 = vunpack.i.h.bf16 %v17801_v31  ;;  %v17802_v39 = vunpack.i.l.bf16 %v17801_v31  ;;  %v17807_v44 = vunpack.i.l.bf16 %v17806_v35  ;;  %v17808_v60 = vunpack.i.h.bf16 %v17806_v35 }
 0x24f   : > { %16504 = vmatprep.subr.bf16.mxu0 %v16503_v26  ;;  %15022 = vmatmul.mubr.msk.f32.vlgmr.msra.gmra.mrb[10].mxu0 %vm302_vm0, %v19996_v40 }
 0x250   : > { %16506 = vmatpush3.bf16.msra.mxu0 %v16503_v26  ;;  %17950 = vrot.lane.b32.xlu1 %v20057_v14, %s18974_s10  ;;  %v5521_v58 = vsel %vm1885_vm8, %v17802_v39, %v17803_v47  ;;  %v5522_v28 = vsel %vm1885_vm8, %v17803_v47, %v17807_v44  ;;  %v5523_v51 = vsel %vm1885_vm8, %v17807_v44, %v17808_v60  ;;  %v15085_v47 = vld [vmem:[%s19142_s9 + $0x88] sm:$0xff]  ;;  %v15086_v44 = vld [vmem:[%s19142_s9 + $0x90] sm:$0xff] }
 0x251   : > { %15880 = vmatprep.subr.mxu0 %v5329_v37  ;;  %v17811_v41 = vpop.permute.xlu1 %17810  ;;  %v17816_v43 = vpop.permute.xlu0 %17815  ;;  %5409 = vmatprep.mubr.f32.mxu0 %v18968_v16 }
 0x252   : > { %17955 = vrot.lane.b32.xlu0 %v20065_v38, %s18974_s10  ;;  %v17813_v45 = vunpack.i.h.bf16 %v17811_v41  ;;  %v17812_v17 = vunpack.i.l.bf16 %v17811_v41  ;;  %v17817_v29 = vunpack.i.l.bf16 %v17816_v43  ;;  %v17818_v27 = vunpack.i.h.bf16 %v17816_v43 }
 0x253   : > { %15023 = vmatmul.mubr.msk.f32.gmra.mrb[12].mxu0 %vm302_vm0, %v20407_v48 }
 0x254   : > { %v5524_v11 = vsel %vm1885_vm8, %v17812_v17, %v17813_v45  ;;  %15881 = vmatpush3.msra.mxu0 %v5329_v37  ;;  %7123 = vrot.lane.b32.xlu1 %v20079_v20, %s18974_s10  ;;  %v5525_v0 = vsel %vm1885_vm8, %v17813_v45, %v17817_v29  ;;  %v5526_v36 = vsel %vm1885_vm8, %v17817_v29, %v17818_v27  ;;  %v15087_v37 = vld [vmem:[%s19142_s9 + $0x98] sm:$0xff] }
 0x255   : > { %v5514_v53 = vpop.permute.xlu1 %5513  ;;  %v5516_v46 = vpop.permute.xlu0 %5515  ;;  %15882 = vmatprep.mubr.msk.f32.mxu0 %vm302_vm0, %v19996_v40  ;;  %v16507_v34 = vpack.c.bf16 %v5525_v0, %v5522_v28  ;;  %v16509_v50 = vpack.c.bf16 %v5524_v11, %v5521_v58  ;;  %v16511_v21 = vpack.c.bf16 %v5526_v36, %v5523_v51  ;;  %v20471_v29 = vpack.i.bf16 %v15087_v37, %v15086_v44  ;;  %v20512_v51 = vld [vmem:[%s19142_s9 + $0xc8] sm:$0xff] }
 0x256   : > { %7125 = vrot.lane.b32.xlu0 %v20086_v59, %s18974_s10  ;;  %v5527_v54 = vsel %vm1885_vm8, %v5514_v53, %v5516_v46  ;;  %v20480_v0 = vpack.i.bf16 %v20086_v59, %v20079_v20 }
 0x257   : > { %16508 = vmatprep.subr.bf16.mxu0 %v16507_v34  ;;  %15883 = vmatmul.mubr.msk.f32.vlgmr.msra.gmra.mrb[14].mxu0 %vm302_vm0, %v20407_v48  ;;  %v20492_v34 = vpack.i.bf16 %v20108_v15, %v20099_v33 }
 0x258   : > { %7127 = vrot.lane.b32.xlu1 %v20099_v33, %s18974_s10  ;;  %16510 = vmatpush1.bf16.msra.mxu0 %v16509_v50  ;;  %v18744_v50 = vld [vmem:[%s19142_s9 + $0x68] sm:$0xff] }
 0x259   : > { %v5518_v49 = vpop.permute.xlu1 %5517  ;;  %v5520_v52 = vpop.permute.xlu0 %5519  ;;  %5603 = vmatprep.mubr.f32.mxu0 %v18968_v16 }
 0x25a   : > { %7129 = vrot.lane.b32.xlu0 %v20108_v15, %s18974_s10  ;;  %v5528_v40 = vsel %vm1885_vm8, %v5516_v46, %v5518_v49  ;;  %v5529_v19 = vsel %vm1885_vm8, %v5518_v49, %v5520_v52  ;;  %v18746_v52 = vld [vmem:[%s19142_s9 + $0x60] sm:$0xff] }
 0x25b   : > { %5543 = vmatprep.subr.mxu0 %v5528_v40 }
 0x25c   : > { %17960 = vrot.lane.b32.xlu1 %v20037_v18, %s18975_s11  ;;  %5544 = vmatpush1.msra.mxu0 %v5527_v54 }
 0x25d   : > { %v17821_v42 = vpop.permute.xlu1 %17820  ;;  %v17826_v30 = vpop.permute.xlu0 %17825  ;;  %15026 = vmatmul.mubr.msk.f32.vlgmr.msra.gmra.mrb[10].mxu0 %vm302_vm0, %v20033_v55  ;;  %16512 = vmatprep.subr.bf16.mxu0 %v16511_v21 }
 0x25e   : > { %17965 = vrot.lane.b32.xlu0 %v20049_v56, %s18975_s11  ;;  %16514 = vmatpush3.bf16.msra.mxu0 %v16511_v21  ;;  %v17823_v57 = vunpack.i.h.bf16 %v17821_v42  ;;  %v17822_v7 = vunpack.i.l.bf16 %v17821_v42  ;;  %v17827_v8 = vunpack.i.l.bf16 %v17826_v30  ;;  %v17828_v39 = vunpack.i.h.bf16 %v17826_v30  ;;  %v20525_v42 = vld [vmem:[%s19142_s9 + $0xd0] sm:$0xff]  ;;  %v20530_v30 = vld [vmem:[%s19142_s9 + $0xd8] sm:$0xff] }
 0x25f   : > { %15889 = vmatprep.subr.mxu0 %v5529_v19  ;;  %5609 = vmatprep.mubr.f32.mxu0 %v18968_v16 }
 0x260   : > { %17970 = vrot.lane.b32.xlu1 %v20057_v14, %s18975_s11  ;;  %v5785_v3 = vsel %vm283_vm1, %v17822_v7, %v17823_v57  ;;  %v5787_v11 = vsel %vm283_vm1, %v17827_v8, %v17828_v39 }
 0x261   : > { %v17831_v18 = vpop.permute.xlu1 %17830  ;;  %v17836_v62 = vpop.permute.xlu0 %17835  ;;  %15027 = vmatmul.mubr.msk.f32.gmra.mrb[12].mxu0 %vm302_vm0, %v20441_v6 }
 0x262   : > { %17975 = vrot.lane.b32.xlu0 %v20065_v38, %s18975_s11  ;;  %v17833_v56 = vunpack.i.h.bf16 %v17831_v18  ;;  %v17832_v1 = vunpack.i.l.bf16 %v17831_v18  ;;  %v17837_v2 = vunpack.i.l.bf16 %v17836_v62  ;;  %15890 = vmatpush3.msra.mxu0 %v5529_v19  ;;  %v17838_v63 = vunpack.i.h.bf16 %v17836_v62  ;;  %v18748_v19 = vld [vmem:[%s19142_s9 + $0x90] sm:$0xff] }
 0x263   : > { %15891 = vmatprep.mubr.msk.f32.mxu0 %vm302_vm0, %v20033_v55  ;;  %v5786_v38 = vsel %vm283_vm1, %v17823_v57, %v17827_v8  ;;  %v15084_v55 = vld [vmem:[%s19142_s9 + $0x80] sm:$0xff]  ;;  %v18749_v57 = vld [vmem:[%s19142_s9 + $0x70] sm:$0xff] }
 0x264   : > { %v5788_v14 = vsel %vm283_vm1, %v17832_v1, %v17833_v56  ;;  %7323 = vrot.lane.b32.xlu1 %v20079_v20, %s18975_s11  ;;  %v5789_v61 = vsel %vm283_vm1, %v17833_v56, %v17837_v2  ;;  %v20466_v41 = vpack.i.bf16 %v15085_v47, %v15084_v55  ;;  %v5790_v43 = vsel %vm283_vm1, %v17837_v2, %v17838_v63  ;;  %v20551_v2 = vld [vmem:[%s19142_s9 + $0xa0] sm:$0xff]  ;;  %v20575_v55 = vld [vmem:[#allocation5 + $0x8] sm:$0xff] }
 0x265   : > { %v5778_v13 = vpop.permute.xlu1 %5777  ;;  %v5780_v31 = vpop.permute.xlu0 %5779  ;;  %15892 = vmatmul.mubr.msk.f32.vlgmr.msra.gmra.mrb[14].mxu0 %vm302_vm0, %v20441_v6  ;;  %v16515_v35 = vpack.c.bf16 %v5789_v61, %v5786_v38  ;;  %v16517_v26 = vpack.c.bf16 %v5788_v14, %v5785_v3  ;;  %v16519_v28 = vpack.c.bf16 %v5790_v43, %v5787_v11  ;;  %v16527_v7 = vpack.c.bf16 %v18748_v19, %v18749_v57  ;;  %v20554_v14 = vld [vmem:[#allocation5] sm:$0xff] }
 0x266   : > { %7325 = vrot.lane.b32.xlu0 %v20086_v59, %s18975_s11  ;;  %7677 = vmatprep.mubr.f32.mxu0 %v18968_v16  ;;  %v5791_v27 = vsel %vm283_vm1, %v5778_v13, %v5780_v31  ;;  %v18743_v59 = vld [vmem:[%s19142_s9 + $0x88] sm:$0xff]  ;;  %v20566_v13 = vld [vmem:[%s19142_s9 + $0xb0] sm:$0xff]  ;;  %v20616_v57 = vld [vmem:[#allocation5 + $0x20] sm:$0xff] }
 0x267   : > { %16516 = vmatprep.subr.bf16.mxu1 %v16515_v35  ;;  %v16523_v60 = vpack.c.bf16 %v18743_v59, %v18744_v50 }
 0x268   : > { %7327 = vrot.lane.b32.xlu1 %v20099_v33, %s18975_s11  ;;  %16518 = vmatpush1.bf16.msra.mxu1 %v16517_v26  ;;  %v20505_v33 = vld [vmem:[%s19142_s9 + $0xc0] sm:$0xff] }
 0x269   : > { %v5782_v45 = vpop.permute.xlu1 %5781  ;;  %v5784_v17 = vpop.permute.xlu0 %5783 }
 0x26a   : > { %7329 = vrot.lane.b32.xlu0 %v20108_v15, %s18975_s11  ;;  %v5792_v58 = vsel %vm283_vm1, %v5780_v31, %v5782_v45  ;;  %v5793_v20 = vsel %vm283_vm1, %v5782_v45, %v5784_v17  ;;  %v18745_v15 = vld [vmem:[%s19142_s9 + $0x80] sm:$0xff] }
 0x26b   : > { %5807 = vmatprep.subr.mxu1 %v5792_v58  ;;  %v16525_v40 = vpack.c.bf16 %v18745_v15, %v18746_v52 }
 0x26c   : > { %17980 = vrot.lane.b32.xlu1 %v20466_v41, %s18966_s18  ;;  %5808 = vmatpush1.msra.mxu1 %v5791_v27 }
 0x26d   : > { %v20482_v53 = vpop.permute.xlu1 %17840  ;;  %v20484_v46 = vpop.permute.xlu0 %17845  ;;  %15045 = vmatmul.mubr.msk.f32.vlgmr.msra.gmra.mrb[8].mxu1 %vm302_vm0, %v20074_v22  ;;  %16520 = vmatprep.subr.bf16.mxu1 %v16519_v28 }
 0x26e   : > { %17985 = vrot.lane.b32.xlu0 %v20471_v29, %s18966_s18  ;;  %16522 = vmatpush3.bf16.msra.mxu1 %v16519_v28  ;;  %v17843_v56 = vunpack.i.h.bf16 %v20482_v53  ;;  %v17847_v1 = vunpack.i.l.bf16 %v20484_v46  ;;  %v17842_v38 = vunpack.i.l.bf16 %v20482_v53  ;;  %v17848_v43 = vunpack.i.h.bf16 %v20484_v46 }
 0x26f   : > { %15898 = vmatprep.subr.mxu1 %v5793_v20  ;;  %5873 = vmatprep.mubr.f32.mxu1 %v18968_v16 }
 0x270   : > { %17990 = vrot.lane.b32.xlu1 %v20480_v0, %s18966_s18  ;;  %v6132_v35 = vsel %vm643_vm2, %v17843_v56, %v17847_v1  ;;  %v6131_v44 = vsel %vm643_vm2, %v17842_v38, %v17843_v56  ;;  %v6133_v50 = vsel %vm643_vm2, %v17847_v1, %v17848_v43 }
 0x271   : > { %v17851_v36 = vpop.permute.xlu1 %17850  ;;  %v20500_v49 = vpop.permute.xlu0 %17855  ;;  %15046 = vmatmul.mubr.msk.f32.gmra.mrb[10].mxu1 %vm302_vm0, %v20094_v10 }
 0x272   : > { %17995 = vrot.lane.b32.xlu0 %v20492_v34, %s18966_s18  ;;  %15899 = vmatpush3.msra.mxu1 %v5793_v20  ;;  %v17853_v8 = vunpack.i.h.bf16 %v17851_v36  ;;  %v17852_v3 = vunpack.i.l.bf16 %v17851_v36  ;;  %v17858_v39 = vunpack.i.h.bf16 %v20500_v49 }
 0x273   : > { %15900 = vmatprep.mubr.msk.f32.mxu1 %vm302_vm0, %v20074_v22  ;;  %16524 = vmatprep.subr.bf16.mxu1 %v16523_v60  ;;  %v20533_v22 = vld [vmem:[%s19142_s9 + $0xa8] sm:$0xff] }
 0x274   : > { %7587 = vrot.lane.b32.xlu1 %v20505_v33, %s18966_s18  ;;  %v6134_v26 = vsel %vm643_vm2, %v17852_v3, %v17853_v8 }
 0x275   : > { %v20518_v54 = vpop.permute.xlu1 %6123  ;;  %v20520_v21 = vpop.permute.xlu0 %6125  ;;  %15901 = vmatmul.mubr.msk.f32.vlgmr.msra.gmra.mrb[12].mxu1 %vm302_vm0, %v20094_v10  ;;  %v17857_v10 = vunpack.i.l.bf16 %v20500_v49  ;;  %v16533_v17 = vpack.c.bf16 %v6134_v26, %v6131_v44 }
 0x276   : > { %7589 = vrot.lane.b32.xlu0 %v20512_v51, %s18966_s18  ;;  %16526 = vmatpush1.bf16.msra.mxu1 %v16525_v40  ;;  %v6137_v36 = vsel %vm643_vm2, %v20518_v54, %v20520_v21 }
 0x277   : > { %5959 = vmatprep.subr.mxu1 %v20533_v22  ;;  %6019 = vmatprep.mubr.f32.mxu1 %v18968_v16  ;;  %v6135_v63 = vsel %vm643_vm2, %v17853_v8, %v17857_v10  ;;  %v6136_v28 = vsel %vm643_vm2, %v17857_v10, %v17858_v39 }
 0x278   : > { %7591 = vrot.lane.b32.xlu1 %v20525_v42, %s18966_s18  ;;  %v16531_v47 = vpack.c.bf16 %v6135_v63, %v6132_v35  ;;  %v16535_v49 = vpack.c.bf16 %v6136_v28, %v6133_v50 }
 0x279   : > { %v20542_v18 = vpop.permute.xlu1 %6127  ;;  %v20544_v62 = vpop.permute.xlu0 %6129 }
 0x27a   : > { %7593 = vrot.lane.b32.xlu0 %v20530_v30, %s18966_s18  ;;  %5960 = vmatpush1.msra.mxu1 %v20551_v2  ;;  %v6138_v27 = vsel %vm643_vm2, %v20520_v21, %v20542_v18  ;;  %v6139_v21 = vsel %vm643_vm2, %v20542_v18, %v20544_v62 }
 0x27b   : > { %15049 = vmatmul.mubr.msk.f32.vlgmr.msra.gmra.mrb[8].mxu1 %vm302_vm0, %v20554_v14  ;;  %16528 = vmatprep.subr.bf16.mxu1 %v16527_v7 }
 0x27c   : > { %18000 = vrot.lane.b32.xlu1 %v20466_v41, %s18969_s20  ;;  %16530 = vmatpush3.bf16.msra.mxu1 %v16527_v7 }
 0x27d   : > { %v20562_v61 = vpop.permute.xlu1 %17860  ;;  %6025 = vmatprep.mubr.f32.mxu1 %v18968_v16  ;;  %15907 = vmatprep.subr.mxu1 %v20566_v13 }
 0x27e   : > { %18005 = vrot.lane.b32.xlu0 %v20471_v29, %s18969_s20  ;;  %v20571_v31 = vpop.permute.xlu0 %17865  ;;  %v17863_v52 = vunpack.i.h.bf16 %v20562_v61  ;;  %v17862_v8 = vunpack.i.l.bf16 %v20562_v61 }
 0x27f   : > { %15050 = vmatmul.mubr.msk.f32.gmra.mrb[10].mxu1 %vm302_vm0, %v20575_v55  ;;  %v17867_v40 = vunpack.i.l.bf16 %v20571_v31  ;;  %v17868_v61 = vunpack.i.h.bf16 %v20571_v31 }
 0x280   : > { %18010 = vrot.lane.b32.xlu1 %v20480_v0, %s18969_s20  ;;  %15908 = vmatpush3.msra.mxu1 %v20566_v13  ;;  %v6331_v63 = vsel %vm850_vm3, %v17862_v8, %v17863_v52 }
 0x281   : > { %16532 = vmatprep.subr.bf16.mxu1 %v16531_v47  ;;  %v17871_v37 = vpop.permute.xlu1 %17870  ;;  %15909 = vmatprep.mubr.msk.f32.mxu1 %vm302_vm0, %v20554_v14  ;;  %v6332_v56 = vsel %vm850_vm3, %v17863_v52, %v17867_v40 }
 0x282   : > { %18015 = vrot.lane.b32.xlu0 %v20492_v34, %s18969_s20  ;;  %v17876_v45 = vpop.permute.xlu0 %17875  ;;  %v20589_v58 = vpop.f32.mrb[6].mxu0  ;;  %v17873_v46 = vunpack.i.h.bf16 %v17871_v37  ;;  %v17872_v19 = vunpack.i.l.bf16 %v17871_v37 }
 0x283   : > { %15910 = vmatmul.mubr.msk.f32.vlgmr.msra.gmra.mrb[12].mxu1 %vm302_vm0, %v20575_v55  ;;  %v20593_v11 = vpop.f32.mrb[7].mxu0  ;;  %v17877_v20 = vunpack.i.l.bf16 %v17876_v45  ;;  %v17878_v18 = vunpack.i.h.bf16 %v17876_v45 }
 0x284   : > { %16534 = vmatpush1.bf16.msra.mxu1 %v16533_v17  ;;  %7933 = vrot.lane.b32.xlu1 %v20505_v33, %s18969_s20  ;;  %v6334_v1 = vsel %vm850_vm3, %v17872_v19, %v17873_v46 }
 0x285   : > { %6153 = vmatprep.subr.mxu1 %v6138_v27  ;;  %v6324_v53 = vpop.permute.xlu1 %6323  ;;  %6213 = vmatprep.mubr.f32.mxu1 %v18968_v16  ;;  %v6335_v7 = vsel %vm850_vm3, %v17873_v46, %v17877_v20  ;;  %v16541_v35 = vpack.c.bf16 %v6334_v1, %v6331_v63  ;;  %v6336_v39 = vsel %vm850_vm3, %v17877_v20, %v17878_v18 }
 0x286   : > { %7935 = vrot.lane.b32.xlu0 %v20512_v51, %s18969_s20  ;;  %v6326_v59 = vpop.permute.xlu0 %6325  ;;  %v20605_v60 = vpop.f32.mrb[8].mxu0  ;;  %v16539_v3 = vpack.c.bf16 %v6335_v7, %v6332_v56  ;;  %v20675_v7 = vld [vmem:[#allocation5 + $0x30] sm:$0xff] }
 0x287   : > { %v20610_v15 = vpop.f32.mrb[9].mxu0  ;;  %v6337_v43 = vsel %vm850_vm3, %v6324_v53, %v6326_v59 }
 0x288   : > { %6154 = vmatpush1.msra.mxu1 %v6137_v36  ;;  %7937 = vrot.lane.b32.xlu1 %v20525_v42, %s18969_s20 }
 0x289   : > { %15053 = vmatmul.mubr.msk.f32.vlgmr.msra.gmra.mrb[8].mxu1 %vm302_vm0, %v20616_v57  ;;  %16536 = vmatprep.subr.bf16.mxu1 %v16535_v49 }
 0x28a   : > { %7939 = vrot.lane.b32.xlu0 %v20530_v30, %s18969_s20  ;;  %16538 = vmatpush3.bf16.msra.mxu1 %v16535_v49  ;;  %v6328_v54 = vpop.permute.xlu1 %6327 }
 0x28b   : > { %v6330_v10 = vpop.permute.xlu0 %6329  ;;  %15916 = vmatprep.subr.mxu1 %v6139_v21  ;;  %6219 = vmatprep.mubr.f32.mxu1 %v18968_v16  ;;  %v6338_v26 = vsel %vm850_vm3, %v6326_v59, %v6328_v54 }
 0x28c   : > { %18020 = vrot.lane.b32.xlu1 %v20466_v41, %s18970_s4  ;;  %v6339_v50 = vsel %vm850_vm3, %v6328_v54, %v6330_v10 }
 0x28d   : > { %15054 = vmatmul.mubr.msk.f32.gmra.mrb[10].mxu1 %vm302_vm0, %v20181_v25 }
 0x28e   : > { %18025 = vrot.lane.b32.xlu0 %v20471_v29, %s18970_s4  ;;  %15917 = vmatpush3.msra.mxu1 %v6139_v21  ;;  %v17881_v62 = vpop.permute.xlu1 %17880 }
 0x28f   : > { %v20637_v38 = vpop.permute.xlu0 %17885  ;;  %16540 = vmatprep.subr.bf16.mxu1 %v16539_v3  ;;  %15918 = vmatprep.mubr.msk.f32.mxu1 %vm302_vm0, %v20616_v57  ;;  %v17883_v17 = vunpack.i.h.bf16 %v17881_v62  ;;  %v17882_v59 = vunpack.i.l.bf16 %v17881_v62 }
 0x290   : > { %18030 = vrot.lane.b32.xlu1 %v20480_v0, %s18970_s4  ;;  %v17887_v27 = vunpack.i.l.bf16 %v20637_v38  ;;  %v17888_v21 = vunpack.i.h.bf16 %v20637_v38 }
 0x291   : > { %15919 = vmatmul.mubr.msk.f32.vlgmr.msra.gmra.mrb[12].mxu1 %vm302_vm0, %v20181_v25  ;;  %v6333_v25 = vsel %vm850_vm3, %v17867_v40, %v17868_v61  ;;  %v6531_v54 = vsel %vm1057_vm4, %v17882_v59, %v17883_v17 }
 0x292   : > { %18035 = vrot.lane.b32.xlu0 %v20492_v34, %s18970_s4  ;;  %16542 = vmatpush1.bf16.msra.mxu1 %v16541_v35  ;;  %v17891_v47 = vpop.permute.xlu1 %17890  ;;  %v16543_v45 = vpack.c.bf16 %v6336_v39, %v6333_v25  ;;  %v6533_v18 = vsel %vm1057_vm4, %v17887_v27, %v17888_v21 }
 0x293   : > { %6353 = vmatprep.subr.mxu1 %v6338_v26  ;;  %v17896_v44 = vpop.permute.xlu0 %17895  ;;  %6413 = vmatprep.mubr.f32.mxu1 %v18968_v16  ;;  %v17893_v31 = vunpack.i.h.bf16 %v17891_v47  ;;  %v17892_v46 = vunpack.i.l.bf16 %v17891_v47 }
 0x294   : > { %v17897_v37 = vunpack.i.l.bf16 %v17896_v44  ;;  %8133 = vrot.lane.b32.xlu1 %v20505_v33, %s18970_s4  ;;  %v17898_v52 = vunpack.i.h.bf16 %v17896_v44  ;;  %v20694_v44 = vld [vmem:[#allocation5 + $0x40] sm:$0xff] }
 0x295   : > { %v6534_v49 = vsel %vm1057_vm4, %v17892_v46, %v17893_v31 }
 0x296   : > { %8135 = vrot.lane.b32.xlu0 %v20512_v51, %s18970_s4  ;;  %6354 = vmatpush1.msra.mxu1 %v6337_v43  ;;  %v6524_v28 = vpop.permute.xlu1 %6523  ;;  %v6535_v53 = vsel %vm1057_vm4, %v17893_v31, %v17897_v37  ;;  %v16549_v8 = vpack.c.bf16 %v6534_v49, %v6531_v54  ;;  %v6536_v56 = vsel %vm1057_vm4, %v17897_v37, %v17898_v52 }
 0x297   : > { %15057 = vmatmul.mubr.msk.f32.vlgmr.msra.gmra.mrb[8].mxu1 %vm302_vm0, %v20207_v5  ;;  %16544 = vmatprep.subr.bf16.mxu1 %v16543_v45  ;;  %v6532_v5 = vsel %vm1057_vm4, %v17883_v17, %v17887_v27  ;;  %v16551_v63 = vpack.c.bf16 %v6536_v56, %v6533_v18 }
 0x298   : > { %v6526_v20 = vpop.permute.xlu0 %6525  ;;  %16546 = vmatpush3.bf16.msra.mxu1 %v16543_v45  ;;  %8137 = vrot.lane.b32.xlu1 %v20525_v42, %s18970_s4  ;;  %v16547_v40 = vpack.c.bf16 %v6535_v53, %v6532_v5 }
 0x299   : > { %15925 = vmatprep.subr.mxu1 %v6339_v50  ;;  %6419 = vmatprep.mubr.f32.mxu1 %v18968_v16  ;;  %v6537_v61 = vsel %vm1057_vm4, %v6524_v28, %v6526_v20 }
 0x29a   : > { %8139 = vrot.lane.b32.xlu0 %v20530_v30, %s18970_s4  ;;  %v6528_v36 = vpop.permute.xlu1 %6527 }
 0x29b   : > { %15058 = vmatmul.mubr.msk.f32.gmra.mrb[10].mxu1 %vm302_vm0, %v20222_v9  ;;  %v6538_v3 = vsel %vm1057_vm4, %v6526_v20, %v6528_v36 }
 0x29c   : > { %v6530_v19 = vpop.permute.xlu0 %6529  ;;  %15926 = vmatpush3.msra.mxu1 %v6339_v50  ;;  %18040 = vrot.lane.b32.xlu1 %v20466_v41, %s18971_s22 }
 0x29d   : > { %16548 = vmatprep.subr.bf16.mxu1 %v16547_v40  ;;  %15927 = vmatprep.mubr.msk.f32.mxu1 %vm302_vm0, %v20675_v7  ;;  %v6539_v31 = vsel %vm1057_vm4, %v6528_v36, %v6530_v19 }
 0x29e   : > { %18045 = vrot.lane.b32.xlu0 %v20471_v29, %s18971_s22  ;;  %v17901_v10 = vpop.permute.xlu1 %17900 }
 0x29f   : > { %15928 = vmatmul.mubr.msk.f32.vlgmr.msra.gmra.mrb[12].mxu1 %vm302_vm0, %v20222_v9  ;;  %v17903_v9 = vunpack.i.h.bf16 %v17901_v10  ;;  %v17902_v25 = vunpack.i.l.bf16 %v17901_v10 }
 0x2a0   : > { %16550 = vmatpush1.bf16.msra.mxu1 %v16549_v8  ;;  %v17906_v1 = vpop.permute.xlu0 %17905  ;;  %18050 = vrot.lane.b32.xlu1 %v20480_v0, %s18971_s22 }
 0x2a1   : > { %6553 = vmatprep.subr.mxu1 %v6538_v3  ;;  %6613 = vmatprep.mubr.f32.mxu1 %v18968_v16  ;;  %v17907_v38 = vunpack.i.l.bf16 %v17906_v1  ;;  %v6731_v50 = vsel %vm1264_vm5, %v17902_v25, %v17903_v9  ;;  %v17908_v53 = vunpack.i.h.bf16 %v17906_v1 }
 0x2a2   : > { %18055 = vrot.lane.b32.xlu0 %v20492_v34, %s18971_s22  ;;  %v17911_v62 = vpop.permute.xlu1 %17910 }
 0x2a3   : > { %v17913_v35 = vunpack.i.h.bf16 %v17911_v62  ;;  %v17912_v47 = vunpack.i.l.bf16 %v17911_v62  ;;  %v6732_v43 = vsel %vm1264_vm5, %v17903_v9, %v17907_v38  ;;  %v6733_v19 = vsel %vm1264_vm5, %v17907_v38, %v17908_v53 }
 0x2a4   : > { %6554 = vmatpush1.msra.mxu1 %v6537_v61  ;;  %v17916_v26 = vpop.permute.xlu0 %17915  ;;  %8333 = vrot.lane.b32.xlu1 %v20505_v33, %s18971_s22 }
 0x2a5   : > { %v17917_v39 = vunpack.i.l.bf16 %v17916_v26  ;;  %15061 = vmatmul.mubr.msk.f32.vlgmr.msra.gmra.mrb[8].mxu1 %vm302_vm0, %v20694_v44  ;;  %16552 = vmatprep.subr.bf16.mxu1 %v16551_v63  ;;  %v6734_v28 = vsel %vm1264_vm5, %v17912_v47, %v17913_v35  ;;  %v17918_v46 = vunpack.i.h.bf16 %v17916_v26 }
 0x2a6   : > { %16554 = vmatpush3.bf16.msra.mxu1 %v16551_v63  ;;  %8335 = vrot.lane.b32.xlu0 %v20512_v51, %s18971_s22  ;;  %v6724_v37 = vpop.permute.xlu1 %6723  ;;  %v16557_v36 = vpack.c.bf16 %v6734_v28, %v6731_v50  ;;  %v20734_v63 = vld [vmem:[#allocation5 + $0x50] sm:$0xff] }
 0x2a7   : > { %15934 = vmatprep.subr.mxu1 %v6539_v31  ;;  %6619 = vmatprep.mubr.f32.mxu1 %v18968_v16  ;;  %v6735_v45 = vsel %vm1264_vm5, %v17913_v35, %v17917_v39  ;;  %v6736_v52 = vsel %vm1264_vm5, %v17917_v39, %v17918_v46 }
 0x2a8   : > { %v6726_v17 = vpop.permute.xlu0 %6725  ;;  %8337 = vrot.lane.b32.xlu1 %v20525_v42, %s18971_s22  ;;  %v16555_v27 = vpack.c.bf16 %v6735_v45, %v6732_v43  ;;  %v16559_v21 = vpack.c.bf16 %v6736_v52, %v6733_v19 }
 0x2a9   : > { %15062 = vmatmul.mubr.msk.f32.gmra.mrb[10].mxu1 %vm302_vm0, %v20278_v32 }
 0x2aa   : > { %15935 = vmatpush3.msra.mxu1 %v6539_v31  ;;  %8339 = vrot.lane.b32.xlu0 %v20530_v30, %s18971_s22  ;;  %v6728_v20 = vpop.permute.xlu1 %6727 }
 0x2ab   : > { %16556 = vmatprep.subr.bf16.mxu1 %v16555_v27  ;;  %15936 = vmatprep.mubr.msk.f32.mxu1 %vm302_vm0, %v20694_v44  ;;  %v6738_v5 = vsel %vm1264_vm5, %v6726_v17, %v6728_v20 }
 0x2ac   : > { %v6730_v59 = vpop.permute.xlu0 %6729  ;;  %18060 = vrot.lane.b32.xlu1 %v20466_v41, %s18972_s26 }
 0x2ad   : > { %15937 = vmatmul.mubr.msk.f32.vlgmr.msra.gmra.mrb[12].mxu1 %vm302_vm0, %v20278_v32  ;;  %v6737_v32 = vsel %vm1264_vm5, %v6724_v37, %v6726_v17  ;;  %v6739_v38 = vsel %vm1264_vm5, %v6728_v20, %v6730_v59 }
 0x2ae   : > { %16558 = vmatpush1.bf16.msra.mxu1 %v16557_v36  ;;  %18065 = vrot.lane.b32.xlu0 %v20471_v29, %s18972_s26  ;;  %v17921_v49 = vpop.permute.xlu1 %17920 }
 0x2af   : > { %6753 = vmatprep.subr.mxu1 %v6738_v5  ;;  %6813 = vmatprep.mubr.f32.mxu1 %v18968_v16  ;;  %v17923_v56 = vunpack.i.h.bf16 %v17921_v49  ;;  %v17922_v1 = vunpack.i.l.bf16 %v17921_v49 }
 0x2b0   : > { %v20723_v40 = vpop.permute.xlu0 %17925  ;;  %18070 = vrot.lane.b32.xlu1 %v20480_v0, %s18972_s26  ;;  %v3795_v54 = vpop.f32.mrb[4].mxu1 }
 0x2b1   : > { %v16877_v8 = vadd.f32 %v3795_v54, %v20589_v58  ;;  %v3797_v10 = vpop.f32.mrb[5].mxu1  ;;  %v17927_v62 = vunpack.i.l.bf16 %v20723_v40  ;;  %v6931_v39 = vsel %vm1471_vm6, %v17922_v1, %v17923_v56  ;;  %v17928_v59 = vunpack.i.h.bf16 %v20723_v40 }
 0x2b2   : > { %6754 = vmatpush1.msra.mxu1 %v6737_v32  ;;  %18075 = vrot.lane.b32.xlu0 %v20492_v34, %s18972_s26  ;;  %v17931_v3 = vpop.permute.xlu1 %17930  ;;  %v16878_v18 = vadd.f32 %v3797_v10, %v20593_v11 }
 0x2b3   : > { %16560 = vmatprep.subr.bf16.mxu1 %v16559_v21  ;;  %15065 = vmatmul.mubr.msk.f32.vlgmr.msra.gmra.mrb[8].mxu1 %vm302_vm0, %v20734_v63  ;;  %v17933_v9 = vunpack.i.h.bf16 %v17931_v3  ;;  %v17932_v58 = vunpack.i.l.bf16 %v17931_v3  ;;  %v6932_v43 = vsel %vm1471_vm6, %v17923_v56, %v17927_v62  ;;  %v3887_v32 = vadd.f32 %v16877_v8, %v19675_v24 }
 0x2b4   : > { %16562 = vmatpush3.bf16.msra.mxu1 %v16559_v21  ;;  %v17936_v61 = vpop.permute.xlu0 %17935  ;;  %8533 = vrot.lane.b32.xlu1 %v20505_v33, %s18972_s26  ;;  %v3801_v35 = vpop.f32.mrb[6].mxu1  ;;  %v6933_v21 = vsel %vm1471_vm6, %v17927_v62, %v17928_v59  ;;  %v3888_v10 = vadd.f32 %v16878_v18, %v19675_v24 }
 0x2b5   : > { %15943 = vmatprep.subr.mxu1 %v6739_v38  ;;  %v6934_v11 = vsel %vm1471_vm6, %v17932_v58, %v17933_v9  ;;  %v17937_v26 = vunpack.i.l.bf16 %v17936_v61  ;;  %6819 = vmatprep.mubr.f32.mxu1 %v18968_v16  ;;  %v3803_v47 = vpop.f32.mrb[7].mxu1  ;;  %v16879_v31 = vadd.f32 %v3801_v35, %v20605_v60  ;;  %v17938_v27 = vunpack.i.h.bf16 %v17936_v61 }
 0x2b6   : > { %8535 = vrot.lane.b32.xlu0 %v20512_v51, %s18972_s26  ;;  %v6924_v37 = vpop.permute.xlu1 %6923  ;;  %v16880_v25 = vadd.f32 %v3803_v47, %v20610_v15  ;;  %v16565_v17 = vpack.c.bf16 %v6934_v11, %v6931_v39 }
 0x2b7   : > { %15066 = vmatmul.mubr.msk.f32.gmra.mrb[10].mxu1 %vm302_vm0, %v20329_v12  ;;  %v6935_v45 = vsel %vm1471_vm6, %v17933_v9, %v17937_v26  ;;  %v3890_v28 = vadd.f32 %v16879_v31, %v19673_v23  ;;  %v6936_v40 = vsel %vm1471_vm6, %v17937_v26, %v17938_v27  ;;  %v20780_v9 = vld [vmem:[#allocation5 + $0x60] sm:$0xff] }
 0x2b8   : > { %15944 = vmatpush3.msra.mxu1 %v6739_v38  ;;  %v6926_v46 = vpop.permute.xlu0 %6925  ;;  %v3891_v20 = vadd.f32 %v16880_v25, %v19673_v23  ;;  %8537 = vrot.lane.b32.xlu1 %v20525_v42, %s18972_s26  ;;  %v16563_v60 = vpack.c.bf16 %v6935_v45, %v6932_v43  ;;  %v15812_v15 = vpop.f32.mrb[2].mxu1  ;;  %v16567_v1 = vpack.c.bf16 %v6936_v40, %v6933_v21 }
 0x2b9   : > { %15945 = vmatprep.mubr.msk.f32.mxu1 %vm302_vm0, %v20734_v63  ;;  %v3892_v50 = vadd.f32 %v15812_v15, %v19673_v23  ;;  %v3872_v53 = vpop.f32.mrb[3].mxu1  ;;  %v3896_v36 = vmul.f32 0.5, %v3890_v28  ;;  %v6937_v56 = vsel %vm1471_vm6, %v6924_v37, %v6926_v46 }
 0x2ba   : > { %v3897_v5 = vmul.f32 0.5, %v3891_v20  ;;  %8539 = vrot.lane.b32.xlu0 %v20530_v30, %s18972_s26  ;;  %16564 = vmatprep.subr.bf16.mxu1 %v16563_v60  ;;  %v6928_v49 = vpop.permute.xlu1 %6927  ;;  %v3889_v3 = vadd.f32 %v3872_v53, %v19675_v24 }
 0x2bb   : > { %v3898_v52 = vmul.f32 0.5, %v3892_v50  ;;  %15946 = vmatmul.mubr.msk.f32.vlgmr.msra.gmra.mrb[12].mxu1 %vm302_vm0, %v20329_v12  ;;  %v6938_v19 = vsel %vm1471_vm6, %v6926_v46, %v6928_v49  ;;  %18631 = vtanh.f32 %v3896_v36 }
 0x2bc   : > { %16566 = vmatpush1.bf16.msra.mxu1 %v16565_v17  ;;  %v6930_v54 = vpop.permute.xlu0 %6929  ;;  %18080 = vrot.lane.b32.xlu1 %v20466_v41, %s18973_s5  ;;  %18633 = vtanh.f32 %v3897_v5 }
 0x2bd   : > { %6953 = vmatprep.subr.mxu1 %v6938_v19  ;;  %7013 = vmatprep.mubr.f32.mxu1 %v18968_v16  ;;  %18635 = vtanh.f32 %v3898_v52  ;;  %v6939_v38 = vsel %vm1471_vm6, %v6928_v49, %v6930_v54 }
 0x2be   : > { %18085 = vrot.lane.b32.xlu0 %v20471_v29, %s18973_s5  ;;  %v17941_v12 = vpop.permute.xlu1 %17940  ;;  %18637 = vtanh.f32 %v3887_v32 }
 0x2bf   : > { %v17943_v62 = vunpack.i.h.bf16 %v17941_v12  ;;  %v17942_v18 = vunpack.i.l.bf16 %v17941_v12  ;;  %18639 = vtanh.f32 %v3888_v10  ;;  %v18759_v10 = vld [vmem:[%s20346_s25] sm:$0xff] }
 0x2c0   : > { %6954 = vmatpush1.msra.mxu1 %v6937_v56  ;;  %v20776_v8 = vpop.permute.xlu0 %17945  ;;  %18090 = vrot.lane.b32.xlu1 %v20480_v0, %s18973_s5  ;;  %18641 = vtanh.f32 %v3889_v3 }
 0x2c1   : > { %16568 = vmatprep.subr.bf16.mxu1 %v16567_v1  ;;  %15069 = vmatmul.mubr.msk.f32.vlgmr.msra.gmra.mrb[8].mxu1 %vm302_vm0, %v20780_v9  ;;  %v17947_v58 = vunpack.i.l.bf16 %v20776_v8  ;;  %v7131_v37 = vsel %vm1678_vm7, %v17942_v18, %v17943_v62  ;;  %v17948_v36 = vunpack.i.h.bf16 %v20776_v8  ;;  %v18760_v18 = vld [vmem:[%s20346_s25 + $0x8] sm:$0xff] }
 0x2c2   : > { %16570 = vmatpush3.bf16.msra.mxu1 %v16567_v1  ;;  %18095 = vrot.lane.b32.xlu0 %v20492_v34, %s18973_s5  ;;  %v17951_v61 = vpop.permute.xlu1 %17950 }
 0x2c3   : > { %15952 = vmatprep.subr.mxu1 %v6939_v38  ;;  %v17953_v35 = vunpack.i.h.bf16 %v17951_v61  ;;  %v17952_v11 = vunpack.i.l.bf16 %v17951_v61  ;;  %7019 = vmatprep.mubr.f32.mxu1 %v18968_v16  ;;  %v7132_v43 = vsel %vm1678_vm7, %v17943_v62, %v17947_v58  ;;  %v7133_v3 = vsel %vm1678_vm7, %v17947_v58, %v17948_v36 }
 0x2c4   : > { %v17956_v26 = vpop.permute.xlu0 %17955  ;;  %8733 = vrot.lane.b32.xlu1 %v20505_v33, %s18973_s5 }
 0x2c5   : > { %v7134_v47 = vsel %vm1678_vm7, %v17952_v11, %v17953_v35  ;;  %v17957_v39 = vunpack.i.l.bf16 %v17956_v26  ;;  %15070 = vmatmul.mubr.msk.f32.gmra.mrb[10].mxu1 %vm302_vm0, %v20375_v4  ;;  %v18632_v31 = vpop.eup %18631  ;;  %v17958_v27 = vunpack.i.h.bf16 %v17956_v26 }
 0x2c6   : > { %15953 = vmatpush3.msra.mxu1 %v6939_v38  ;;  %8735 = vrot.lane.b32.xlu0 %v20512_v51, %s18973_s5  ;;  %v7124_v25 = vpop.permute.xlu1 %7123  ;;  %v18634_v45 = vpop.eup %18633  ;;  %v3902_v17 = vadd.f32 1.0, %v18632_v31  ;;  %v16573_v46 = vpack.c.bf16 %v7134_v47, %v7131_v37  ;;  %v18761_v47 = vld [vmem:[%s20346_s25 + $0x10] sm:$0xff] }
 0x2c7   : > { %15954 = vmatprep.mubr.msk.f32.mxu1 %vm302_vm0, %v20780_v9  ;;  %v7135_v28 = vsel %vm1678_vm7, %v17953_v35, %v17957_v39  ;;  %v18636_v20 = vpop.eup %18635  ;;  %v3903_v60 = vadd.f32 1.0, %v18634_v45  ;;  %v7136_v32 = vsel %vm1678_vm7, %v17957_v39, %v17958_v27 }
 0x2c8   : > { %v7126_v15 = vpop.permute.xlu0 %7125  ;;  %8737 = vrot.lane.b32.xlu1 %v20525_v42, %s18973_s5  ;;  %v16571_v50 = vpack.c.bf16 %v7135_v28, %v7132_v43  ;;  %v3905_v53 = vmul.f32 0.5, %v3902_v17  ;;  %v3904_v59 = vadd.f32 1.0, %v18636_v20  ;;  %v18638_v52 = vpop.eup %18637  ;;  %v16575_v11 = vpack.c.bf16 %v7136_v32, %v7133_v3  ;;  %v20822_v43 = vld [vmem:[#allocation5 + $0x70] sm:$0xff]  ;;  %v20854_v32 = vld [vmem:[#allocation5 + $0x78] sm:$0xff] }
 0x2c9   : > { %15955 = vmatmul.mubr.msk.f32.vlgmr.msra.gmra.mrb[12].mxu1 %vm302_vm0, %v20375_v4  ;;  %v3906_v5 = vmul.f32 0.5, %v3903_v60  ;;  %v18640_v21 = vpop.eup %18639  ;;  %v7137_v61 = vsel %vm1678_vm7, %v7124_v25, %v7126_v15 }
 0x2ca   : > { %8739 = vrot.lane.b32.xlu0 %v20530_v30, %s18973_s5  ;;  %16572 = vmatprep.subr.bf16.mxu1 %v16571_v50  ;;  %v7128_v49 = vpop.permute.xlu1 %7127  ;;  %v3911_v19 = vsub.f32 1.0, %v3905_v53  ;;  %v3907_v54 = vmul.f32 0.5, %v3904_v59  ;;  %v3908_v56 = vmul.f32 %v18759_v10, %v3905_v53  ;;  %v18642_v62 = vpop.eup %18641 }
 0x2cb   : > { %16574 = vmatpush1.bf16.msra.mxu1 %v16573_v46  ;;  %v7138_v40 = vsel %vm1678_vm7, %v7126_v15, %v7128_v49  ;;  %7213 = vmatprep.mubr.f32.mxu1 %v18968_v16  ;;  %v3912_v12 = vsub.f32 1.0, %v3906_v5  ;;  %v3909_v38 = vmul.f32 %v18760_v18, %v3906_v5 }
 0x2cc   : > { %v7130_v4 = vpop.permute.xlu0 %7129  ;;  %18100 = vrot.lane.b32.xlu1 %v20466_v41, %s18974_s10  ;;  %7153 = vmatprep.subr.mxu1 %v7138_v40  ;;  %v3913_v1 = vsub.f32 1.0, %v3907_v54  ;;  %v3914_v8 = vmul.f32 %v18638_v52, %v3911_v19  ;;  %v3910_v39 = vmul.f32 %v18761_v47, %v3907_v54 }
 0x2cd   : > { %v3915_v26 = vmul.f32 %v18640_v21, %v3912_v12  ;;  %v7139_v25 = vsel %vm1678_vm7, %v7128_v49, %v7130_v4 }
 0x2ce   : > { %18105 = vrot.lane.b32.xlu0 %v20471_v29, %s18974_s10  ;;  %v17961_v35 = vpop.permute.xlu1 %17960  ;;  %v20820_v31 = vadd.f32 %v3914_v8, %v3908_v56  ;;  %v3916_v37 = vmul.f32 %v18642_v62, %v3913_v1 }
 0x2cf   : > { %7154 = vmatpush1.msra.mxu1 %v7137_v61  ;;  %v20826_v45 = vadd.f32 %v3915_v26, %v3909_v38  ;;  %v17963_v27 = vunpack.i.h.bf16 %v17961_v35  ;;  %v17962_v28 = vunpack.i.l.bf16 %v17961_v35  ;;  %v20871_v38 = vld [vmem:[#allocation5 + $0x80] sm:$0xff] }
 0x2d0   : > { %v17966_v58 = vpop.permute.xlu0 %17965  ;;  %16576 = vmatprep.subr.bf16.mxu1 %v16575_v11  ;;  %15073 = vmatmul.mubr.msk.f32.vlgmr.msra.gmra.mrb[8].mxu1 %vm302_vm0, %v20822_v43  ;;  %14979 = vst [vmem:[%s20346_s25 + $0x18] sm:$0xff] %v20820_v31  ;;  %v20833_v17 = vadd.f32 %v3916_v37, %v3910_v39 }
 0x2d1   : > { %16578 = vmatpush3.bf16.msra.mxu1 %v16575_v11  ;;  %18110 = vrot.lane.b32.xlu1 %v20480_v0, %s18974_s10  ;;  %14980 = vst [vmem:[%s20346_s25 + $0x20] sm:$0xff] %v20826_v45  ;;  %v17967_v20 = vunpack.i.l.bf16 %v17966_v58  ;;  %v7331_v36 = vsel %vm1885_vm8, %v17962_v28, %v17963_v27  ;;  %v17968_v12 = vunpack.i.h.bf16 %v17966_v58 }
 0x2d2   : > { %18115 = vrot.lane.b32.xlu0 %v20492_v34, %s18974_s10  ;;  %15961 = vmatprep.subr.mxu1 %v7139_v25  ;;  %v17971_v46 = vpop.permute.xlu1 %17970  ;;  %14981 = vst [vmem:[%s20346_s25 + $0x28] sm:$0xff] %v20833_v17 }
 0x2d3   : > { %v17973_v60 = vunpack.i.h.bf16 %v17971_v46  ;;  %v17972_v15 = vunpack.i.l.bf16 %v17971_v46  ;;  %7219 = vmatprep.mubr.f32.mxu1 %v18968_v16  ;;  %v7332_v52 = vsel %vm1885_vm8, %v17963_v27, %v17967_v20  ;;  %v7333_v1 = vsel %vm1885_vm8, %v17967_v20, %v17968_v12 }
 0x2d4   : > { %v17976_v50 = vpop.permute.xlu0 %17975  ;;  %15074 = vmatmul.mubr.msk.f32.gmra.mrb[10].mxu1 %vm302_vm0, %v20407_v48  ;;  %v20929_v12 = vpack.i.bf16 %v20512_v51, %v20505_v33 }
 0x2d5   : > { %v7334_v53 = vsel %vm1885_vm8, %v17972_v15, %v17973_v60  ;;  %v17977_v59 = vunpack.i.l.bf16 %v17976_v50  ;;  %15962 = vmatpush3.msra.mxu1 %v7139_v25  ;;  %8933 = vrot.lane.b32.xlu1 %v20505_v33, %s18974_s10  ;;  %v17978_v49 = vunpack.i.h.bf16 %v17976_v50  ;;  %v20892_v25 = vld [vmem:[%s19142_s9 + $0xa0] sm:$0xff]  ;;  %v20903_v15 = vld [vmem:[%s19142_s9 + $0xb8] sm:$0xff] }
 0x2d6   : > { %8935 = vrot.lane.b32.xlu0 %v20512_v51, %s18974_s10  ;;  %v7324_v5 = vpop.permute.xlu1 %7323  ;;  %15963 = vmatprep.mubr.msk.f32.mxu1 %vm302_vm0, %v20822_v43  ;;  %v16581_v19 = vpack.c.bf16 %v7334_v53, %v7331_v36  ;;  %v20905_v53 = vld [vmem:[#allocation5 + $0x88] sm:$0xff] }
 0x2d7   : > { %v7335_v48 = vsel %vm1885_vm8, %v17973_v60, %v17977_v59  ;;  %v7336_v10 = vsel %vm1885_vm8, %v17977_v59, %v17978_v49  ;;  %v20900_v60 = vld [vmem:[%s19142_s9 + $0xb0] sm:$0xff] }
 0x2d8   : > { %v7326_v54 = vpop.permute.xlu0 %7325  ;;  %v16579_v40 = vpack.c.bf16 %v7335_v48, %v7332_v52  ;;  %15964 = vmatmul.mubr.msk.f32.vlgmr.msra.gmra.mrb[12].mxu1 %vm302_vm0, %v20854_v32  ;;  %v16583_v62 = vpack.c.bf16 %v7336_v10, %v7333_v1  ;;  %v20920_v52 = vpack.i.bf16 %v20903_v15, %v20900_v60 }
 0x2d9   : > { %8937 = vrot.lane.b32.xlu1 %v20525_v42, %s18974_s10  ;;  %7413 = vmatprep.mubr.f32.mxu1 %v18968_v16  ;;  %v7337_v3 = vsel %vm1885_vm8, %v7324_v5, %v7326_v54 }
 0x2da   : > { %8939 = vrot.lane.b32.xlu0 %v20530_v30, %s18974_s10  ;;  %16580 = vmatprep.subr.bf16.mxu1 %v16579_v40  ;;  %v7328_v4 = vpop.permute.xlu1 %7327 }
 0x2db   : > { %16582 = vmatpush1.bf16.msra.mxu1 %v16581_v19  ;;  %v7338_v21 = vsel %vm1885_vm8, %v7326_v54, %v7328_v4 }
 0x2dc   : > { %v7330_v56 = vpop.permute.xlu0 %7329  ;;  %7353 = vmatprep.subr.mxu1 %v7338_v21 }
 0x2dd   : > { %18120 = vrot.lane.b32.xlu1 %v20466_v41, %s18975_s11  ;;  %v7339_v41 = vsel %vm1885_vm8, %v7328_v4, %v7330_v56  ;;  %v20938_v56 = vpack.i.bf16 %v20530_v30, %v20525_v42 }
 0x2de   : > { %18125 = vrot.lane.b32.xlu0 %v20471_v29, %s18975_s11  ;;  %v17981_v8 = vpop.permute.xlu1 %17980 }
 0x2df   : > { %7354 = vmatpush1.msra.mxu1 %v7337_v3  ;;  %v17983_v61 = vunpack.i.h.bf16 %v17981_v8  ;;  %v17982_v29 = vunpack.i.l.bf16 %v17981_v8  ;;  %v20956_v3 = vld [vmem:[%s19142_s9 + $0xe8] sm:$0xff] }
 0x2e0   : > { %v17986_v18 = vpop.permute.xlu0 %17985  ;;  %15077 = vmatmul.mubr.msk.f32.vlgmr.msra.gmra.mrb[8].mxu1 %vm302_vm0, %v20871_v38  ;;  %16584 = vmatprep.subr.bf16.mxu1 %v16583_v62  ;;  %v18767_v8 = vld [vmem:[%s19142_s9 + $0x88] sm:$0xff] }
 0x2e1   : > { %16586 = vmatpush3.bf16.msra.mxu1 %v16583_v62  ;;  %18130 = vrot.lane.b32.xlu1 %v20480_v0, %s18975_s11  ;;  %v17987_v11 = vunpack.i.l.bf16 %v17986_v18  ;;  %v17988_v36 = vunpack.i.h.bf16 %v17986_v18  ;;  %v16595_v62 = vpack.c.bf16 %v20533_v22, %v18767_v8 }
 0x2e2   : > { %18135 = vrot.lane.b32.xlu0 %v20492_v34, %s18975_s11  ;;  %15970 = vmatprep.subr.mxu1 %v7339_v41  ;;  %v17991_v35 = vpop.permute.xlu1 %17990  ;;  %v7595_v34 = vsel %vm283_vm1, %v17982_v29, %v17983_v61 }
 0x2e3   : > { %7419 = vmatprep.mubr.f32.mxu1 %v18968_v16  ;;  %v17993_v26 = vunpack.i.h.bf16 %v17991_v35  ;;  %v17992_v47 = vunpack.i.l.bf16 %v17991_v35  ;;  %v7596_v28 = vsel %vm283_vm1, %v17983_v61, %v17987_v11  ;;  %v7597_v40 = vsel %vm283_vm1, %v17987_v11, %v17988_v36  ;;  %v18769_v61 = vld [vmem:[%s19142_s9 + $0x80] sm:$0xff]  ;;  %v20977_v35 = vld [vmem:[%s19142_s9 + $0xf0] sm:$0xff]  ;;  %v20980_v11 = vld [vmem:[%s19142_s9 + $0xf8] sm:$0xff] }
 0x2e4   : > { %v17996_v39 = vpop.permute.xlu0 %17995  ;;  %15078 = vmatmul.mubr.msk.f32.gmra.mrb[10].mxu1 %vm302_vm0, %v20441_v6  ;;  %v20895_v6 = vld [vmem:[%s19142_s9 + $0xa8] sm:$0xff]  ;;  %v16597_v29 = vpack.c.bf16 %v20551_v2, %v18769_v61 }
 0x2e5   : > { %v7598_v0 = vsel %vm283_vm1, %v17992_v47, %v17993_v26  ;;  %v17997_v37 = vunpack.i.l.bf16 %v17996_v39  ;;  %15971 = vmatpush3.msra.mxu1 %v7339_v41  ;;  %9133 = vrot.lane.b32.xlu1 %v20505_v33, %s18975_s11  ;;  %v17998_v27 = vunpack.i.h.bf16 %v17996_v39  ;;  %v20913_v5 = vpack.i.bf16 %v20895_v6, %v20892_v25  ;;  %v20942_v33 = vld [vmem:[#allocation5 + $0x10] sm:$0xff]  ;;  %v20962_v41 = vld [vmem:[#allocation5 + $0x18] sm:$0xff]  ;;  %v20991_v2 = vld [vmem:[%s19142_s9 + $0xc8] sm:$0xff] }
 0x2e6   : > { %9135 = vrot.lane.b32.xlu0 %v20512_v51, %s18975_s11  ;;  %15972 = vmatprep.mubr.msk.f32.mxu1 %vm302_vm0, %v20871_v38  ;;  %v7588_v58 = vpop.permute.xlu1 %7587  ;;  %v16589_v20 = vpack.c.bf16 %v7598_v0, %v7595_v34  ;;  %v18771_v39 = vld [vmem:[%s19142_s9 + $0x90] sm:$0xff] }
 0x2e7   : > { %v7599_v46 = vsel %vm283_vm1, %v17993_v26, %v17997_v37  ;;  %v7600_v19 = vsel %vm283_vm1, %v17997_v37, %v17998_v27  ;;  %v16599_v0 = vpack.c.bf16 %v20566_v13, %v18771_v39 }
 0x2e8   : > { %v7590_v50 = vpop.permute.xlu0 %7589  ;;  %15973 = vmatmul.mubr.msk.f32.vlgmr.msra.gmra.mrb[12].mxu1 %vm302_vm0, %v20905_v53  ;;  %v16587_v59 = vpack.c.bf16 %v7599_v46, %v7596_v28  ;;  %v16591_v10 = vpack.c.bf16 %v7600_v19, %v7597_v40  ;;  %v21003_v46 = vld [vmem:[%s19142_s9 + $0xc0] sm:$0xff] }
 0x2e9   : > { %9137 = vrot.lane.b32.xlu1 %v20525_v42, %s18975_s11  ;;  %9487 = vmatprep.mubr.f32.mxu1 %v18968_v16  ;;  %v7601_v4 = vsel %vm283_vm1, %v7588_v58, %v7590_v50 }
 0x2ea   : > { %9139 = vrot.lane.b32.xlu0 %v20530_v30, %s18975_s11  ;;  %16588 = vmatprep.subr.bf16.mxu0 %v16587_v59  ;;  %v7592_v49 = vpop.permute.xlu1 %7591  ;;  %v20952_v30 = vld [vmem:[%s19142_s9 + $0xe0] sm:$0xff] }
 0x2eb   : > { %16590 = vmatpush1.bf16.msra.mxu0 %v16589_v20  ;;  %v7602_v48 = vsel %vm283_vm1, %v7590_v50, %v7592_v49 }
 0x2ec   : > { %v7594_v54 = vpop.permute.xlu0 %7593  ;;  %7617 = vmatprep.subr.mxu0 %v7602_v48 }
 0x2ed   : > { %18140 = vrot.lane.b32.xlu1 %v20913_v5, %s18966_s18  ;;  %v7603_v51 = vsel %vm283_vm1, %v7592_v49, %v7594_v54  ;;  %v21020_v49 = vld [vmem:[%s19142_s9 + $0xd0] sm:$0xff] }
 0x2ee   : > { %18145 = vrot.lane.b32.xlu0 %v20920_v52, %s18966_s18  ;;  %v20934_v21 = vpop.permute.xlu1 %18000 }
 0x2ef   : > { %7618 = vmatpush1.msra.mxu0 %v7601_v4  ;;  %v18003_v27 = vunpack.i.h.bf16 %v20934_v21  ;;  %v18002_v59 = vunpack.i.l.bf16 %v20934_v21 }
 0x2f0   : > { %v20940_v1 = vpop.permute.xlu0 %18005  ;;  %15096 = vmatmul.mubr.msk.f32.vlgmr.msra.gmra.mrb[16].mxu0 %vm302_vm0, %v20942_v33  ;;  %16592 = vmatprep.subr.bf16.mxu0 %v16591_v10 }
 0x2f1   : > { %16594 = vmatpush3.bf16.msra.mxu0 %v16591_v10  ;;  %18150 = vrot.lane.b32.xlu1 %v20929_v12, %s18966_s18  ;;  %v18007_v28 = vunpack.i.l.bf16 %v20940_v1  ;;  %v7941_v4 = vsel %vm643_vm2, %v18002_v59, %v18003_v27  ;;  %v21036_v10 = vld [vmem:[#allocation5] sm:$0xff] }
 0x2f2   : > { %18155 = vrot.lane.b32.xlu0 %v20938_v56, %s18966_s18  ;;  %15979 = vmatprep.subr.mxu0 %v7603_v51  ;;  %v18011_v42 = vpop.permute.xlu1 %18010 }
 0x2f3   : > { %7683 = vmatprep.mubr.f32.mxu0 %v18968_v16  ;;  %v18013_v37 = vunpack.i.h.bf16 %v18011_v42  ;;  %v18012_v20 = vunpack.i.l.bf16 %v18011_v42  ;;  %v21043_v42 = vld [vmem:[#allocation5 + $0x8] sm:$0xff] }
 0x2f4   : > { %v20960_v18 = vpop.permute.xlu0 %18015  ;;  %15097 = vmatmul.mubr.msk.f32.gmra.mrb[18].mxu0 %vm302_vm0, %v20962_v41 }
 0x2f5   : > { %15980 = vmatpush3.msra.mxu0 %v7603_v51  ;;  %9397 = vrot.lane.b32.xlu1 %v20952_v30, %s18966_s18  ;;  %v18017_v34 = vunpack.i.l.bf16 %v20960_v18  ;;  %v7944_v48 = vsel %vm643_vm2, %v18012_v20, %v18013_v37  ;;  %v18018_v40 = vunpack.i.h.bf16 %v20960_v18 }
 0x2f6   : > { %9399 = vrot.lane.b32.xlu0 %v20956_v3, %s18966_s18  ;;  %15981 = vmatprep.mubr.msk.f32.mxu0 %vm302_vm0, %v20942_v33  ;;  %v20974_v22 = vpop.permute.xlu1 %7933  ;;  %v16605_v51 = vpack.c.bf16 %v7944_v48, %v7941_v4 }
 0x2f7   : > { %16596 = vmatprep.subr.bf16.mxu0 %v16595_v62  ;;  %v7945_v50 = vsel %vm643_vm2, %v18013_v37, %v18017_v34 }
 0x2f8   : > { %v20982_v26 = vpop.permute.xlu0 %7935  ;;  %15982 = vmatmul.mubr.msk.f32.vlgmr.msra.gmra.mrb[20].mxu0 %vm302_vm0, %v20962_v41 }
 0x2f9   : > { %16598 = vmatpush1.bf16.msra.mxu0 %v16597_v29  ;;  %9401 = vrot.lane.b32.xlu1 %v20977_v35, %s18966_s18 }
 0x2fa   : > { %9403 = vrot.lane.b32.xlu0 %v20980_v11, %s18966_s18  ;;  %7769 = vmatprep.subr.mxu0 %v20991_v2  ;;  %v20994_v47 = vpop.permute.xlu1 %7937 }
 0x2fb   : > { %7829 = vmatprep.mubr.f32.mxu0 %v18968_v16  ;;  %v7948_v62 = vsel %vm643_vm2, %v20982_v26, %v20994_v47 }
 0x2fc   : > { %v7940_v58 = vpop.permute.xlu0 %7939 }
 0x2fd   : > { %7770 = vmatpush1.msra.mxu0 %v21003_v46  ;;  %18160 = vrot.lane.b32.xlu1 %v20913_v5, %s18969_s20 }
 0x2fe   : > { %15100 = vmatmul.mubr.msk.f32.vlgmr.msra.gmra.mrb[16].mxu0 %vm302_vm0, %v20554_v14  ;;  %16600 = vmatprep.subr.bf16.mxu0 %v16599_v0  ;;  %v21010_v13 = vpop.permute.xlu1 %18020  ;;  %v7942_v14 = vsel %vm643_vm2, %v18003_v27, %v18007_v28 }
 0x2ff   : > { %18165 = vrot.lane.b32.xlu0 %v20920_v52, %s18969_s20  ;;  %16602 = vmatpush3.bf16.msra.mxu0 %v16599_v0  ;;  %v16603_v19 = vpack.c.bf16 %v7945_v50, %v7942_v14  ;;  %v7947_v0 = vsel %vm643_vm2, %v20974_v22, %v20982_v26  ;;  %v7949_v22 = vsel %vm643_vm2, %v20994_v47, %v7940_v58  ;;  %v18022_v59 = vunpack.i.l.bf16 %v21010_v13 }
 0x300   : > { %v21016_v36 = vpop.permute.xlu0 %18025  ;;  %7835 = vmatprep.mubr.f32.mxu0 %v18968_v16  ;;  %15988 = vmatprep.subr.mxu0 %v21020_v49 }
 0x301   : > { %18170 = vrot.lane.b32.xlu1 %v20929_v12, %s18969_s20  ;;  %v18027_v20 = vunpack.i.l.bf16 %v21016_v36 }
 0x302   : > { %15101 = vmatmul.mubr.msk.f32.gmra.mrb[18].mxu0 %vm302_vm0, %v20575_v55  ;;  %v18031_v54 = vpop.permute.xlu1 %18030  ;;  %v18008_v55 = vunpack.i.h.bf16 %v20940_v1  ;;  %v7946_v1 = vsel %vm643_vm2, %v18017_v34, %v18018_v40  ;;  %v18023_v34 = vunpack.i.h.bf16 %v21010_v13 }
 0x303   : > { %18175 = vrot.lane.b32.xlu0 %v20938_v56, %s18969_s20  ;;  %15989 = vmatpush3.msra.mxu0 %v21020_v49  ;;  %v18033_v61 = vunpack.i.h.bf16 %v18031_v54  ;;  %v18032_v50 = vunpack.i.l.bf16 %v18031_v54  ;;  %v21087_v54 = vld [vmem:[#allocation5 + $0x20] sm:$0xff] }
 0x304   : > { %16604 = vmatprep.subr.bf16.mxu0 %v16603_v19  ;;  %v21034_v21 = vpop.permute.xlu0 %18035  ;;  %15990 = vmatprep.mubr.msk.f32.mxu0 %vm302_vm0, %v21036_v10  ;;  %v7943_v39 = vsel %vm643_vm2, %v18007_v28, %v18008_v55  ;;  %v21080_v19 = vld [vmem:[#allocation5 + $0x28] sm:$0xff]  ;;  %v8141_v40 = vsel %vm850_vm3, %v18022_v59, %v18023_v34  ;;  %v18028_v55 = vunpack.i.h.bf16 %v21016_v36 }
 0x305   : > { %9743 = vrot.lane.b32.xlu1 %v20952_v30, %s18969_s20  ;;  %v18037_v29 = vunpack.i.l.bf16 %v21034_v21  ;;  %v16607_v37 = vpack.c.bf16 %v7946_v1, %v7943_v39  ;;  %v8144_v48 = vsel %vm850_vm3, %v18032_v50, %v18033_v61  ;;  %v18038_v13 = vunpack.i.h.bf16 %v21034_v21 }
 0x306   : > { %15991 = vmatmul.mubr.msk.f32.vlgmr.msra.gmra.mrb[20].mxu0 %vm302_vm0, %v21043_v42  ;;  %v21047_v8 = vpop.permute.xlu1 %8133 }
 0x307   : > { %16606 = vmatpush1.bf16.msra.mxu0 %v16605_v51  ;;  %9745 = vrot.lane.b32.xlu0 %v20956_v3, %s18969_s20  ;;  %v8145_v26 = vsel %vm850_vm3, %v18033_v61, %v18037_v29  ;;  %v16613_v51 = vpack.c.bf16 %v8144_v48, %v8141_v40  ;;  %v8146_v1 = vsel %vm850_vm3, %v18037_v29, %v18038_v13  ;;  %v21121_v13 = vld [vmem:[#allocation5 + $0x38] sm:$0xff] }
 0x308   : > { %7963 = vmatprep.subr.mxu0 %v7948_v62  ;;  %v8136_v18 = vpop.permute.xlu0 %8135  ;;  %8023 = vmatprep.mubr.f32.mxu0 %v18968_v16 }
 0x309   : > { %9747 = vrot.lane.b32.xlu1 %v20977_v35, %s18969_s20 }
 0x30a   : > { %v8138_v27 = vpop.permute.xlu1 %8137 }
 0x30b   : > { %7964 = vmatpush1.msra.mxu0 %v7947_v0  ;;  %9749 = vrot.lane.b32.xlu0 %v20980_v11, %s18969_s20  ;;  %v8148_v62 = vsel %vm850_vm3, %v8136_v18, %v8138_v27  ;;  %v8143_v0 = vsel %vm850_vm3, %v18027_v20, %v18028_v55 }
 0x30c   : > { %15104 = vmatmul.mubr.msk.f32.vlgmr.msra.gmra.mrb[16].mxu0 %vm302_vm0, %v20616_v57  ;;  %16608 = vmatprep.subr.bf16.mxu0 %v16607_v37  ;;  %v8140_v28 = vpop.permute.xlu0 %8139  ;;  %v8142_v57 = vsel %vm850_vm3, %v18023_v34, %v18027_v20  ;;  %v16615_v34 = vpack.c.bf16 %v8146_v1, %v8143_v0 }
 0x30d   : > { %16610 = vmatpush3.bf16.msra.mxu0 %v16607_v37  ;;  %8029 = vmatprep.mubr.f32.mxu0 %v18968_v16  ;;  %v16611_v58 = vpack.c.bf16 %v8145_v26, %v8142_v57  ;;  %v8147_v37 = vsel %vm850_vm3, %v21047_v8, %v8136_v18  ;;  %v8149_v57 = vsel %vm850_vm3, %v8138_v27, %v8140_v28 }
 0x30e   : > { %15997 = vmatprep.subr.mxu0 %v7949_v22  ;;  %18180 = vrot.lane.b32.xlu1 %v20913_v5, %s18970_s4  ;;  %v18041_v14 = vpop.permute.xlu1 %18040 }
 0x30f   : > { %18185 = vrot.lane.b32.xlu0 %v20920_v52, %s18970_s4  ;;  %v18042_v18 = vunpack.i.l.bf16 %v18041_v14 }
 0x310   : > { %15105 = vmatmul.mubr.msk.f32.gmra.mrb[18].mxu0 %vm302_vm0, %v21080_v19  ;;  %v21084_v47 = vpop.permute.xlu0 %18045 }
 0x311   : > { %15998 = vmatpush3.msra.mxu0 %v7949_v22  ;;  %15999 = vmatprep.mubr.msk.f32.mxu0 %vm302_vm0, %v21087_v54  ;;  %v18043_v22 = vunpack.i.h.bf16 %v18041_v14  ;;  %v18047_v29 = vunpack.i.l.bf16 %v21084_v47  ;;  %v18048_v55 = vunpack.i.h.bf16 %v21084_v47 }
 0x312   : > { %16612 = vmatprep.subr.bf16.mxu0 %v16611_v58  ;;  %18190 = vrot.lane.b32.xlu1 %v20929_v12, %s18970_s4  ;;  %v18051_v4 = vpop.permute.xlu1 %18050 }
 0x313   : > { %18195 = vrot.lane.b32.xlu0 %v20938_v56, %s18970_s4  ;;  %v18053_v61 = vunpack.i.h.bf16 %v18051_v4  ;;  %v18052_v26 = vunpack.i.l.bf16 %v18051_v4  ;;  %v8342_v48 = vsel %vm1057_vm4, %v18043_v22, %v18047_v29  ;;  %v8341_v14 = vsel %vm1057_vm4, %v18042_v18, %v18043_v22 }
 0x314   : > { %16000 = vmatmul.mubr.msk.f32.vlgmr.msra.gmra.mrb[20].mxu0 %vm302_vm0, %v21080_v19  ;;  %v18056_v21 = vpop.permute.xlu0 %18055 }
 0x315   : > { %16614 = vmatpush1.bf16.msra.mxu0 %v16613_v51  ;;  %8223 = vmatprep.mubr.f32.mxu0 %v18968_v16  ;;  %v18057_v39 = vunpack.i.l.bf16 %v18056_v21  ;;  %v8344_v58 = vsel %vm1057_vm4, %v18052_v26, %v18053_v61  ;;  %v18058_v40 = vunpack.i.h.bf16 %v18056_v21 }
 0x316   : > { %8163 = vmatprep.subr.mxu0 %v8148_v62  ;;  %9943 = vrot.lane.b32.xlu1 %v20952_v30, %s18970_s4  ;;  %v8334_v36 = vpop.permute.xlu1 %8333  ;;  %v16621_v51 = vpack.c.bf16 %v8344_v58, %v8341_v14 }
 0x317   : > { %9945 = vrot.lane.b32.xlu0 %v20956_v3, %s18970_s4  ;;  %v8345_v8 = vsel %vm1057_vm4, %v18053_v61, %v18057_v39  ;;  %v8346_v61 = vsel %vm1057_vm4, %v18057_v39, %v18058_v40 }
 0x318   : > { %v8336_v50 = vpop.permute.xlu0 %8335  ;;  %v16619_v27 = vpack.c.bf16 %v8345_v8, %v8342_v48 }
 0x319   : > { %8164 = vmatpush1.msra.mxu0 %v8147_v37  ;;  %v8347_v22 = vsel %vm1057_vm4, %v8334_v36, %v8336_v50 }
 0x31a   : > { %15108 = vmatmul.mubr.msk.f32.vlgmr.msra.gmra.mrb[16].mxu0 %vm302_vm0, %v20675_v7  ;;  %16616 = vmatprep.subr.bf16.mxu0 %v16615_v34  ;;  %v8338_v59 = vpop.permute.xlu1 %8337 }
 0x31b   : > { %16618 = vmatpush3.bf16.msra.mxu0 %v16615_v34  ;;  %9947 = vrot.lane.b32.xlu1 %v20977_v35, %s18970_s4  ;;  %v8348_v62 = vsel %vm1057_vm4, %v8336_v50, %v8338_v59  ;;  %v8343_v34 = vsel %vm1057_vm4, %v18047_v29, %v18048_v55 }
 0x31c   : > { %16006 = vmatprep.subr.mxu0 %v8149_v57  ;;  %9949 = vrot.lane.b32.xlu0 %v20980_v11, %s18970_s4  ;;  %v8340_v20 = vpop.permute.xlu0 %8339  ;;  %v16623_v26 = vpack.c.bf16 %v8346_v61, %v8343_v34 }
 0x31d   : > { %8229 = vmatprep.mubr.f32.mxu0 %v18968_v16  ;;  %v8349_v36 = vsel %vm1057_vm4, %v8338_v59, %v8340_v20 }
 0x31e   : > { %15109 = vmatmul.mubr.msk.f32.gmra.mrb[18].mxu0 %vm302_vm0, %v21121_v13  ;;  %v18061_v28 = vpop.permute.xlu1 %18060 }
 0x31f   : > { %16007 = vmatpush3.msra.mxu0 %v8149_v57  ;;  %18200 = vrot.lane.b32.xlu1 %v20913_v5, %s18971_s22  ;;  %v18062_v29 = vunpack.i.l.bf16 %v18061_v28 }
 0x320   : > { %16620 = vmatprep.subr.bf16.mxu0 %v16619_v27  ;;  %18205 = vrot.lane.b32.xlu0 %v20920_v52, %s18971_s22  ;;  %v21130_v4 = vpop.permute.xlu0 %18065  ;;  %v21160_v27 = vld [vmem:[#allocation5 + $0x48] sm:$0xff] }
 0x321   : > { %16008 = vmatprep.mubr.msk.f32.mxu0 %vm302_vm0, %v20675_v7  ;;  %v18063_v7 = vunpack.i.h.bf16 %v18061_v28  ;;  %v18067_v0 = vunpack.i.l.bf16 %v21130_v4  ;;  %v21167_v28 = vld [vmem:[#allocation5 + $0x40] sm:$0xff]  ;;  %v18068_v55 = vunpack.i.h.bf16 %v21130_v4 }
 0x322   : > { %16009 = vmatmul.mubr.msk.f32.vlgmr.msra.gmra.mrb[20].mxu0 %vm302_vm0, %v21121_v13  ;;  %v18071_v21 = vpop.permute.xlu1 %18070 }
 0x323   : > { %16622 = vmatpush1.bf16.msra.mxu0 %v16621_v51  ;;  %18210 = vrot.lane.b32.xlu1 %v20929_v12, %s18971_s22  ;;  %v18073_v1 = vunpack.i.h.bf16 %v18071_v21  ;;  %v18072_v8 = vunpack.i.l.bf16 %v18071_v21  ;;  %v8542_v50 = vsel %vm1264_vm5, %v18063_v7, %v18067_v0  ;;  %v8541_v20 = vsel %vm1264_vm5, %v18062_v29, %v18063_v7 }
 0x324   : > { %8363 = vmatprep.subr.mxu0 %v8348_v62  ;;  %18215 = vrot.lane.b32.xlu0 %v20938_v56, %s18971_s22  ;;  %v18076_v47 = vpop.permute.xlu0 %18075  ;;  %v8543_v34 = vsel %vm1264_vm5, %v18067_v0, %v18068_v55 }
 0x325   : > { %8423 = vmatprep.mubr.f32.mxu0 %v18968_v16  ;;  %v18077_v37 = vunpack.i.l.bf16 %v18076_v47  ;;  %v18078_v59 = vunpack.i.h.bf16 %v18076_v47 }
 0x326   : > { %v8534_v57 = vpop.permute.xlu1 %8533 }
 0x327   : > { %8364 = vmatpush1.msra.mxu0 %v8347_v22  ;;  %10143 = vrot.lane.b32.xlu1 %v20952_v30, %s18971_s22  ;;  %v8545_v39 = vsel %vm1264_vm5, %v18073_v1, %v18077_v37  ;;  %v8546_v61 = vsel %vm1264_vm5, %v18077_v37, %v18078_v59 }
 0x328   : > { %15112 = vmatmul.mubr.msk.f32.vlgmr.msra.gmra.mrb[16].mxu0 %vm302_vm0, %v20694_v44  ;;  %16624 = vmatprep.subr.bf16.mxu0 %v16623_v26  ;;  %v8536_v18 = vpop.permute.xlu0 %8535  ;;  %v16627_v48 = vpack.c.bf16 %v8545_v39, %v8542_v50  ;;  %v8544_v44 = vsel %vm1264_vm5, %v18072_v8, %v18073_v1  ;;  %v16631_v39 = vpack.c.bf16 %v8546_v61, %v8543_v34 }
 0x329   : > { %16626 = vmatpush3.bf16.msra.mxu0 %v16623_v26  ;;  %10145 = vrot.lane.b32.xlu0 %v20956_v3, %s18971_s22  ;;  %v16629_v51 = vpack.c.bf16 %v8544_v44, %v8541_v20  ;;  %v8547_v26 = vsel %vm1264_vm5, %v8534_v57, %v8536_v18 }
 0x32a   : > { %16015 = vmatprep.subr.mxu0 %v8349_v36  ;;  %8429 = vmatprep.mubr.f32.mxu0 %v18968_v16  ;;  %v8538_v58 = vpop.permute.xlu1 %8537 }
 0x32b   : > { %10147 = vrot.lane.b32.xlu1 %v20977_v35, %s18971_s22  ;;  %v8548_v21 = vsel %vm1264_vm5, %v8536_v18, %v8538_v58 }
 0x32c   : > { %15113 = vmatmul.mubr.msk.f32.gmra.mrb[18].mxu0 %vm302_vm0, %v21160_v27  ;;  %v8540_v40 = vpop.permute.xlu0 %8539 }
 0x32d   : > { %16016 = vmatpush3.msra.mxu0 %v8349_v36  ;;  %10149 = vrot.lane.b32.xlu0 %v20980_v11, %s18971_s22  ;;  %v8549_v57 = vsel %vm1264_vm5, %v8538_v58, %v8540_v40 }
 0x32e   : > { %16628 = vmatprep.subr.bf16.mxu0 %v16627_v48  ;;  %16017 = vmatprep.mubr.msk.f32.mxu0 %vm302_vm0, %v21167_v28  ;;  %v18081_v14 = vpop.permute.xlu1 %18080 }
 0x32f   : > { %18220 = vrot.lane.b32.xlu1 %v20913_v5, %s18972_s26  ;;  %v18083_v5 = vunpack.i.h.bf16 %v18081_v14  ;;  %v18082_v48 = vunpack.i.l.bf16 %v18081_v14 }
 0x330   : > { %16018 = vmatmul.mubr.msk.f32.vlgmr.msra.gmra.mrb[20].mxu0 %vm302_vm0, %v21160_v27  ;;  %v21177_v62 = vpop.permute.xlu0 %18085  ;;  %v5605_v1 = vpop.f32.mrb[10].mxu0 }
 0x331   : > { %16630 = vmatpush1.bf16.msra.mxu0 %v16629_v51  ;;  %18225 = vrot.lane.b32.xlu0 %v20920_v52, %s18972_s26  ;;  %v5607_v47 = vpop.f32.mrb[11].mxu0  ;;  %v18087_v7 = vunpack.i.l.bf16 %v21177_v62  ;;  %v8741_v51 = vsel %vm1471_vm6, %v18082_v48, %v18083_v5  ;;  %v5697_v34 = vadd.f32 %v5605_v1, %v19675_v24 }
 0x332   : > { %8563 = vmatprep.subr.mxu0 %v8548_v21  ;;  %8623 = vmatprep.mubr.f32.mxu0 %v18968_v16  ;;  %v18091_v4 = vpop.permute.xlu1 %18090  ;;  %v21207_v21 = vld [vmem:[#allocation5 + $0x58] sm:$0xff] }
 0x333   : > { %18230 = vrot.lane.b32.xlu1 %v20929_v12, %s18972_s26  ;;  %v18093_v22 = vunpack.i.h.bf16 %v18091_v4  ;;  %v18092_v52 = vunpack.i.l.bf16 %v18091_v4  ;;  %v21213_v4 = vpack.i.bf16 %v20900_v60, %v20895_v6  ;;  %v18088_v6 = vunpack.i.h.bf16 %v21177_v62 }
 0x334   : > { %v18096_v8 = vpop.permute.xlu0 %18095  ;;  %v5611_v37 = vpop.f32.mrb[12].mxu0  ;;  %v21228_v60 = vpack.i.bf16 %v21020_v49, %v20991_v2 }
 0x335   : > { %8564 = vmatpush1.msra.mxu0 %v8547_v26  ;;  %18235 = vrot.lane.b32.xlu0 %v20938_v56, %s18972_s26  ;;  %v18097_v36 = vunpack.i.l.bf16 %v18096_v8  ;;  %v5700_v50 = vadd.f32 %v5611_v37, %v19673_v23  ;;  %v5613_v29 = vpop.f32.mrb[13].mxu0  ;;  %v8742_v56 = vsel %vm1471_vm6, %v18083_v5, %v18087_v7  ;;  %v8744_v59 = vsel %vm1471_vm6, %v18092_v52, %v18093_v22  ;;  %v21219_v52 = vld [vmem:[#allocation5 + $0x50] sm:$0xff] }
 0x336   : > { %16632 = vmatprep.subr.bf16.mxu0 %v16631_v39  ;;  %15116 = vmatmul.mubr.msk.f32.vlgmr.msra.gmra.mrb[16].mxu0 %vm302_vm0, %v20734_v63  ;;  %v8734_v12 = vpop.permute.xlu1 %8733  ;;  %v5701_v0 = vadd.f32 %v5613_v29, %v19673_v23  ;;  %v16637_v5 = vpack.c.bf16 %v8744_v59, %v8741_v51  ;;  %v21239_v29 = vpack.i.bf16 %v21003_v46, %v20892_v25 }
 0x337   : > { %16634 = vmatpush3.bf16.msra.mxu0 %v16631_v39  ;;  %10343 = vrot.lane.b32.xlu1 %v20952_v30, %s18972_s26  ;;  %v5706_v18 = vmul.f32 0.5, %v5700_v50  ;;  %v8745_v44 = vsel %vm1471_vm6, %v18093_v22, %v18097_v36  ;;  %v18098_v22 = vunpack.i.h.bf16 %v18096_v8  ;;  %v5698_v39 = vadd.f32 %v5607_v47, %v19675_v24 }
 0x338   : > { %16024 = vmatprep.subr.mxu0 %v8549_v57  ;;  %8629 = vmatprep.mubr.f32.mxu0 %v18968_v16  ;;  %v8736_v63 = vpop.permute.xlu0 %8735  ;;  %v5707_v20 = vmul.f32 0.5, %v5701_v0  ;;  %v16635_v14 = vpack.c.bf16 %v8745_v44, %v8742_v56  ;;  %v15893_v55 = vpop.f32.mrb[14].mxu0  ;;  %v8743_v0 = vsel %vm1471_vm6, %v18087_v7, %v18088_v6 }
 0x339   : > { %10345 = vrot.lane.b32.xlu0 %v20956_v3, %s18972_s26  ;;  %18643 = vtanh.f32 %v5706_v18  ;;  %v5702_v58 = vadd.f32 %v15893_v55, %v19673_v23  ;;  %v5682_v40 = vpop.f32.mrb[15].mxu0  ;;  %v8746_v50 = vsel %vm1471_vm6, %v18097_v36, %v18098_v22 }
 0x33a   : > { %15117 = vmatmul.mubr.msk.f32.gmra.mrb[18].mxu0 %vm302_vm0, %v21207_v21  ;;  %18645 = vtanh.f32 %v5707_v20  ;;  %v8738_v61 = vpop.permute.xlu1 %8737  ;;  %v5699_v8 = vadd.f32 %v5682_v40, %v19675_v24  ;;  %v16639_v36 = vpack.c.bf16 %v8746_v50, %v8743_v0  ;;  %v18783_v40 = vld [vmem:[%s19142_s9 + $0xd8] sm:$0xff] }
 0x33b   : > { %16025 = vmatpush3.msra.mxu0 %v8549_v57  ;;  %10347 = vrot.lane.b32.xlu1 %v20977_v35, %s18972_s26  ;;  %v5708_v26 = vmul.f32 0.5, %v5702_v58  ;;  %v8748_v1 = vsel %vm1471_vm6, %v8736_v63, %v8738_v61  ;;  %v8747_v57 = vsel %vm1471_vm6, %v8734_v12, %v8736_v63  ;;  %v21260_v51 = vpack.i.bf16 %v18783_v40, %v20903_v15 }
 0x33c   : > { %16026 = vmatprep.mubr.msk.f32.mxu0 %vm302_vm0, %v21219_v52  ;;  %16636 = vmatprep.subr.bf16.mxu0 %v16635_v14  ;;  %v8740_v37 = vpop.permute.xlu0 %8739 }
 0x33d   : > { %10349 = vrot.lane.b32.xlu0 %v20980_v11, %s18972_s26  ;;  %18647 = vtanh.f32 %v5708_v26  ;;  %v8749_v55 = vsel %vm1471_vm6, %v8738_v61, %v8740_v37 }
 0x33e   : > { %16027 = vmatmul.mubr.msk.f32.vlgmr.msra.gmra.mrb[20].mxu0 %vm302_vm0, %v21207_v21  ;;  %v18101_v47 = vpop.permute.xlu1 %18100  ;;  %18649 = vtanh.f32 %v5697_v34 }
 0x33f   : > { %16638 = vmatpush1.bf16.msra.mxu0 %v16637_v5  ;;  %18240 = vrot.lane.b32.xlu1 %v21213_v4, %s18973_s5  ;;  %18651 = vtanh.f32 %v5698_v39  ;;  %v18103_v25 = vunpack.i.h.bf16 %v18101_v47  ;;  %v18102_v14 = vunpack.i.l.bf16 %v18101_v47 }
 0x340   : > { %8763 = vmatprep.subr.mxu0 %v8748_v1  ;;  %v21241_v48 = vpop.permute.xlu0 %18105  ;;  %8823 = vmatprep.mubr.f32.mxu0 %v18968_v16  ;;  %18653 = vtanh.f32 %v5699_v8  ;;  %v21271_v1 = vld [vmem:[#allocation5 + $0x68] sm:$0xff] }
 0x341   : > { %18245 = vrot.lane.b32.xlu0 %v21228_v60, %s18973_s5  ;;  %v18107_v56 = vunpack.i.l.bf16 %v21241_v48  ;;  %v8941_v6 = vsel %vm1678_vm7, %v18102_v14, %v18103_v25 }
 0x343   : > { %v18644_v18 = vpop.eup %18643  ;;  %8764 = vmatpush1.msra.mxu0 %v8747_v57  ;;  %18250 = vrot.lane.b32.xlu1 %v21239_v29, %s18973_s5  ;;  %v18111_v44 = vpop.permute.xlu1 %18110  ;;  %v8942_v61 = vsel %vm1678_vm7, %v18103_v25, %v18107_v56 }
 0x344   : > { %v18646_v59 = vpop.eup %18645  ;;  %v5712_v20 = vadd.f32 1.0, %v18644_v18  ;;  %16640 = vmatprep.subr.bf16.mxu0 %v16639_v36  ;;  %15120 = vmatmul.mubr.msk.f32.vlgmr.msra.gmra.mrb[16].mxu0 %vm302_vm0, %v20780_v9  ;;  %v18113_v62 = vunpack.i.h.bf16 %v18111_v44  ;;  %v18112_v7 = vunpack.i.l.bf16 %v18111_v44  ;;  %v18116_v12 = vpop.permute.xlu0 %18115 }
 0x345   : > { %v5713_v63 = vadd.f32 1.0, %v18646_v59  ;;  %16642 = vmatpush3.bf16.msra.mxu0 %v16639_v36  ;;  %10545 = vrot.lane.b32.xlu0 %v20956_v3, %s18973_s5  ;;  %v18117_v58 = vunpack.i.l.bf16 %v18116_v12  ;;  %v18118_v57 = vunpack.i.h.bf16 %v18116_v12 }
 0x346   : > { %v5715_v34 = vmul.f32 0.5, %v5712_v20  ;;  %16033 = vmatprep.subr.mxu0 %v8749_v55  ;;  %v8944_v22 = vsel %vm1678_vm7, %v18112_v7, %v18113_v62  ;;  %8829 = vmatprep.mubr.f32.mxu0 %v18968_v16  ;;  %v21278_v20 = vld [vmem:[#allocation5 + $0x60] sm:$0xff]  ;;  %v18108_v7 = vunpack.i.h.bf16 %v21241_v48 }
 0x347   : > { %v18648_v9 = vpop.eup %18647  ;;  %v5716_v26 = vmul.f32 0.5, %v5713_v63  ;;  %10547 = vrot.lane.b32.xlu1 %v20977_v35, %s18973_s5  ;;  %v8934_v5 = vpop.permute.xlu1 %8933  ;;  %v8945_v39 = vsel %vm1678_vm7, %v18113_v62, %v18117_v58  ;;  %v16645_v36 = vpack.c.bf16 %v8944_v22, %v8941_v6 }
 0x348   : > { %v5721_v15 = vsub.f32 1.0, %v5715_v34  ;;  %v5714_v37 = vadd.f32 1.0, %v18648_v9  ;;  %15121 = vmatmul.mubr.msk.f32.gmra.mrb[18].mxu0 %vm302_vm0, %v21271_v1  ;;  %v8936_v47 = vpop.permute.xlu0 %8935  ;;  %v16643_v8 = vpack.c.bf16 %v8945_v39, %v8942_v61  ;;  %v18650_v50 = vpop.eup %18649  ;;  %v5718_v44 = vmul.f32 %v5715_v34, %v20820_v31 }
 0x349   : > { %v5722_v0 = vsub.f32 1.0, %v5716_v26  ;;  %16034 = vmatpush3.msra.mxu0 %v8749_v55  ;;  %18255 = vrot.lane.b32.xlu0 %v21260_v51, %s18973_s5  ;;  %v18652_v18 = vpop.eup %18651  ;;  %v5719_v14 = vmul.f32 %v5716_v26, %v20826_v45  ;;  %v8946_v45 = vsel %vm1678_vm7, %v18117_v58, %v18118_v57  ;;  %v8943_v39 = vsel %vm1678_vm7, %v18107_v56, %v18108_v7  ;;  %v21330_v7 = vld [vmem:[#allocation5 + $0x70] sm:$0xff] }
 0x34a   : > { %v5724_v59 = vmul.f32 %v18650_v50, %v5721_v15  ;;  %v5717_v25 = vmul.f32 0.5, %v5714_v37  ;;  %16035 = vmatprep.mubr.msk.f32.mxu0 %vm302_vm0, %v21278_v20  ;;  %16644 = vmatprep.subr.bf16.mxu0 %v16643_v8  ;;  %v18654_v34 = vpop.eup %18653  ;;  %v8947_v58 = vsel %vm1678_vm7, %v8934_v5, %v8936_v47  ;;  %v16647_v15 = vpack.c.bf16 %v8946_v45, %v8943_v39 }
 0x34b   : > { %v5725_v62 = vmul.f32 %v18652_v18, %v5722_v0  ;;  %10543 = vrot.lane.b32.xlu1 %v20952_v30, %s18973_s5  ;;  %v8938_v12 = vpop.permute.xlu1 %8937 }
 0x34c   : > { %v5723_v63 = vsub.f32 1.0, %v5717_v25  ;;  %16036 = vmatmul.mubr.msk.f32.vlgmr.msra.gmra.mrb[20].mxu0 %vm302_vm0, %v21271_v1  ;;  %v8940_v31 = vpop.permute.xlu0 %8939  ;;  %v8948_v55 = vsel %vm1678_vm7, %v8936_v47, %v8938_v12  ;;  %v21289_v40 = vadd.f32 %v5724_v59, %v5718_v44  ;;  %v5720_v9 = vmul.f32 %v5717_v25, %v20833_v17 }
 0x34d   : > { %10549 = vrot.lane.b32.xlu0 %v20980_v11, %s18973_s5  ;;  %16646 = vmatpush1.bf16.msra.mxu0 %v16645_v36  ;;  %v21294_v22 = vadd.f32 %v5725_v62, %v5719_v14  ;;  %v8949_v56 = vsel %vm1678_vm7, %v8938_v12, %v8940_v31 }
 0x34e   : > { %8963 = vmatprep.subr.mxu0 %v8948_v55  ;;  %9023 = vmatprep.mubr.f32.mxu0 %v18968_v16  ;;  %15030 = vst [vmem:[%s20346_s25 + $0x30] sm:$0xff] %v21289_v40  ;;  %v5726_v26 = vmul.f32 %v18654_v34, %v5723_v63 }
 0x34f   : > { %18260 = vrot.lane.b32.xlu1 %v21213_v4, %s18974_s10  ;;  %v18121_v61 = vpop.permute.xlu1 %18120  ;;  %15031 = vst [vmem:[%s20346_s25 + $0x38] sm:$0xff] %v21294_v22 }
 0x350   : > { %v18126_v17 = vpop.permute.xlu0 %18125  ;;  %v21308_v37 = vadd.f32 %v5726_v26, %v5720_v9  ;;  %v18123_v6 = vunpack.i.h.bf16 %v18121_v61  ;;  %v18122_v8 = vunpack.i.l.bf16 %v18121_v61 }
 0x351   : > { %18265 = vrot.lane.b32.xlu0 %v21228_v60, %s18974_s10  ;;  %8964 = vmatpush1.msra.mxu0 %v8947_v58  ;;  %v18127_v48 = vunpack.i.l.bf16 %v18126_v17  ;;  %v18128_v63 = vunpack.i.h.bf16 %v18126_v17 }
 0x352   : > { %16648 = vmatprep.subr.bf16.mxu0 %v16647_v15  ;;  %15124 = vmatmul.mubr.msk.f32.vlgmr.msra.gmra.mrb[16].mxu0 %vm302_vm0, %v20822_v43  ;;  %15032 = vst [vmem:[%s20346_s25 + $0x40] sm:$0xff] %v21308_v37  ;;  %v9141_v57 = vsel %vm1885_vm8, %v18122_v8, %v18123_v6 }
 0x353   : > { %16650 = vmatpush3.bf16.msra.mxu0 %v16647_v15  ;;  %18270 = vrot.lane.b32.xlu1 %v21239_v29, %s18974_s10  ;;  %v18131_v5 = vpop.permute.xlu1 %18130  ;;  %v9142_v59 = vsel %vm1885_vm8, %v18123_v6, %v18127_v48  ;;  %v9143_v9 = vsel %vm1885_vm8, %v18127_v48, %v18128_v63 }
 0x354   : > { %16042 = vmatprep.subr.mxu0 %v8949_v56  ;;  %v18133_v47 = vunpack.i.h.bf16 %v18131_v5  ;;  %v18132_v50 = vunpack.i.l.bf16 %v18131_v5  ;;  %v18136_v0 = vpop.permute.xlu0 %18135  ;;  %9029 = vmatprep.mubr.f32.mxu0 %v18968_v16 }
 0x355   : > { %10745 = vrot.lane.b32.xlu0 %v20956_v3, %s18974_s10  ;;  %v18137_v43 = vunpack.i.l.bf16 %v18136_v0  ;;  %v18138_v18 = vunpack.i.h.bf16 %v18136_v0 }
 0x356   : > { %v9144_v36 = vsel %vm1885_vm8, %v18132_v50, %v18133_v47  ;;  %15125 = vmatmul.mubr.msk.f32.gmra.mrb[18].mxu0 %vm302_vm0, %v20854_v32  ;;  %v15188_v50 = vld [vmem:[%s19142_s9 + $0xd0] sm:$0xff] }
 0x357   : > { %16043 = vmatpush3.msra.mxu0 %v8949_v56  ;;  %10747 = vrot.lane.b32.xlu1 %v20977_v35, %s18974_s10  ;;  %v9134_v44 = vpop.permute.xlu1 %9133  ;;  %v9145_v25 = vsel %vm1885_vm8, %v18133_v47, %v18137_v43  ;;  %v16653_v14 = vpack.c.bf16 %v9144_v36, %v9141_v57  ;;  %v9146_v55 = vsel %vm1885_vm8, %v18137_v43, %v18138_v18 }
 0x358   : > { %v9136_v62 = vpop.permute.xlu0 %9135  ;;  %16044 = vmatprep.mubr.msk.f32.mxu0 %vm302_vm0, %v21330_v7  ;;  %v16651_v12 = vpack.c.bf16 %v9145_v25, %v9142_v59  ;;  %v16655_v26 = vpack.c.bf16 %v9146_v55, %v9143_v9  ;;  %v21404_v9 = vld [vmem:[%s19142_s9 + $0x108] sm:$0xff] }
 0x359   : > { %18275 = vrot.lane.b32.xlu0 %v21260_v51, %s18974_s10 }
 0x35a   : > { %16652 = vmatprep.subr.bf16.mxu0 %v16651_v12  ;;  %16045 = vmatmul.mubr.msk.f32.vlgmr.msra.gmra.mrb[20].mxu0 %vm302_vm0, %v20854_v32  ;;  %v9147_v32 = vsel %vm1885_vm8, %v9134_v44, %v9136_v62 }
 0x35b   : > { %10743 = vrot.lane.b32.xlu1 %v20952_v30, %s18974_s10  ;;  %16654 = vmatpush1.bf16.msra.mxu0 %v16653_v14  ;;  %v9138_v31 = vpop.permute.xlu1 %9137  ;;  %v21379_v14 = vld [vmem:[%s19142_s9 + $0xc0] sm:$0xff] }
 0x35c   : > { %v9140_v34 = vpop.permute.xlu0 %9139  ;;  %v9148_v45 = vsel %vm1885_vm8, %v9136_v62, %v9138_v31  ;;  %9223 = vmatprep.mubr.f32.mxu0 %v18968_v16 }
 0x35d   : > { %10749 = vrot.lane.b32.xlu0 %v20980_v11, %s18974_s10  ;;  %9163 = vmatprep.subr.mxu0 %v9148_v45  ;;  %v9149_v58 = vsel %vm1885_vm8, %v9138_v31, %v9140_v34  ;;  %v21393_v31 = vpack.i.bf16 %v20952_v30, %v21379_v14 }
 0x35f   : > { %18280 = vrot.lane.b32.xlu1 %v21213_v4, %s18975_s11  ;;  %9164 = vmatpush1.msra.mxu0 %v9147_v32  ;;  %v18141_v61 = vpop.permute.xlu1 %18140  ;;  %v21407_v32 = vld [vmem:[%s19142_s9 + $0x110] sm:$0xff] }
 0x360   : > { %v18146_v39 = vpop.permute.xlu0 %18145  ;;  %15128 = vmatmul.mubr.msk.f32.vlgmr.msra.gmra.mrb[16].mxu0 %vm302_vm0, %v20871_v38  ;;  %16656 = vmatprep.subr.bf16.mxu0 %v16655_v26  ;;  %v18143_v17 = vunpack.i.h.bf16 %v18141_v61  ;;  %v18142_v15 = vunpack.i.l.bf16 %v18141_v61 }
 0x361   : > { %18285 = vrot.lane.b32.xlu0 %v21228_v60, %s18975_s11  ;;  %16658 = vmatpush3.bf16.msra.mxu0 %v16655_v26  ;;  %v18147_v4 = vunpack.i.l.bf16 %v18146_v39  ;;  %v18148_v25 = vunpack.i.h.bf16 %v18146_v39  ;;  %v21416_v39 = vld [vmem:[%s19142_s9 + $0x100] sm:$0xff] }
 0x362   : > { %16051 = vmatprep.subr.mxu0 %v9149_v58  ;;  %9229 = vmatprep.mubr.f32.mxu0 %v18968_v16  ;;  %v9405_v5 = vsel %vm283_vm1, %v18142_v15, %v18143_v17 }
 0x363   : > { %18290 = vrot.lane.b32.xlu1 %v21239_v29, %s18975_s11  ;;  %v18151_v6 = vpop.permute.xlu1 %18150  ;;  %v15187_v29 = vld [vmem:[%s19142_s9 + $0xc8] sm:$0xff]  ;;  %v9406_v57 = vsel %vm283_vm1, %v18143_v17, %v18147_v4  ;;  %v9407_v55 = vsel %vm283_vm1, %v18147_v4, %v18148_v25  ;;  %v21424_v4 = vpack.i.bf16 %v21407_v32, %v21404_v9  ;;  %v21490_v25 = vld [vmem:[%s19142_s9 + $0x118] sm:$0xff] }
 0x364   : > { %v18153_v8 = vunpack.i.h.bf16 %v18151_v6  ;;  %v18152_v48 = vunpack.i.l.bf16 %v18151_v6  ;;  %v18156_v56 = vpop.permute.xlu0 %18155  ;;  %15129 = vmatmul.mubr.msk.f32.gmra.mrb[18].mxu0 %vm302_vm0, %v20905_v53 }
 0x365   : > { %10945 = vrot.lane.b32.xlu0 %v20956_v3, %s18975_s11  ;;  %v18157_v60 = vunpack.i.l.bf16 %v18156_v56  ;;  %16052 = vmatpush3.msra.mxu0 %v9149_v58  ;;  %v18158_v0 = vunpack.i.h.bf16 %v18156_v56  ;;  %v18787_v58 = vld [vmem:[%s19142_s9 + $0xa8] sm:$0xff]  ;;  %v15189_v56 = vld [vmem:[%s19142_s9 + $0xd8] sm:$0xff] }
 0x366   : > { %v9408_v47 = vsel %vm283_vm1, %v18152_v48, %v18153_v8  ;;  %16053 = vmatprep.mubr.msk.f32.mxu0 %vm302_vm0, %v20871_v38  ;;  %v21375_v38 = vpack.i.bf16 %v15188_v50, %v15187_v29  ;;  %v16667_v17 = vpack.c.bf16 %v20991_v2, %v18787_v58  ;;  %v21434_v2 = vpack.i.bf16 %v21416_v39, %v20952_v30 }
 0x367   : > { %10947 = vrot.lane.b32.xlu1 %v20977_v35, %s18975_s11  ;;  %v9398_v43 = vpop.permute.xlu1 %9397  ;;  %v9409_v36 = vsel %vm283_vm1, %v18153_v8, %v18157_v60  ;;  %v16661_v18 = vpack.c.bf16 %v9408_v47, %v9405_v5 }
 0x368   : > { %v9400_v44 = vpop.permute.xlu0 %9399  ;;  %16054 = vmatmul.mubr.msk.f32.vlgmr.msra.gmra.mrb[20].mxu0 %vm302_vm0, %v20905_v53  ;;  %v16659_v59 = vpack.c.bf16 %v9409_v36, %v9406_v57  ;;  %v21385_v53 = vpack.i.bf16 %v20977_v35, %v20956_v3 }
 0x369   : > { %18295 = vrot.lane.b32.xlu0 %v21260_v51, %s18975_s11  ;;  %11297 = vmatprep.mubr.f32.mxu0 %v18968_v16  ;;  %v9410_v51 = vsel %vm283_vm1, %v18157_v60, %v18158_v0  ;;  %v9411_v35 = vsel %vm283_vm1, %v9398_v43, %v9400_v44  ;;  %v15193_v60 = vld [vmem:[%s19142_s9 + $0xf8] sm:$0xff]  ;;  %v21470_v0 = vld [vmem:[%s19142_s9 + $0xe0] sm:$0xff] }
 0x36a   : > { %16660 = vmatprep.subr.bf16.mxu1 %v16659_v59  ;;  %v16663_v34 = vpack.c.bf16 %v9410_v51, %v9407_v55  ;;  %v21461_v29 = vpack.i.bf16 %v15193_v60, %v15189_v56  ;;  %v21487_v59 = vld [vmem:[%s19142_s9 + $0x128] sm:$0xff] }
 0x36b   : > { %10943 = vrot.lane.b32.xlu1 %v20952_v30, %s18975_s11  ;;  %16662 = vmatpush1.bf16.msra.mxu1 %v16661_v18  ;;  %v9402_v62 = vpop.permute.xlu1 %9401 }
 0x36c   : > { %v9404_v12 = vpop.permute.xlu0 %9403  ;;  %v9412_v63 = vsel %vm283_vm1, %v9400_v44, %v9402_v62  ;;  %v21483_v44 = vld [vmem:[%s19142_s9 + $0xf0] sm:$0xff] }
 0x36d   : > { %18300 = vrot.lane.b32.xlu0 %v21375_v38, %s18966_s18  ;;  %9427 = vmatprep.subr.mxu1 %v9412_v63  ;;  %v9413_v61 = vsel %vm283_vm1, %v9402_v62, %v9404_v12  ;;  %v21501_v63 = vld [vmem:[%s19142_s9 + $0x130] sm:$0xff] }
 0x36f   : > { %18305 = vrot.lane.b32.xlu1 %v21385_v53, %s18966_s18  ;;  %9428 = vmatpush1.msra.mxu1 %v9411_v35  ;;  %v21399_v45 = vpop.permute.xlu1 %18160 }
 0x370   : > { %15147 = vmatmul.mubr.msk.f32.vlgmr.msra.gmra.mrb[14].mxu1 %vm302_vm0, %v20942_v33  ;;  %16664 = vmatprep.subr.bf16.mxu1 %v16663_v34  ;;  %v18163_v50 = vunpack.i.h.bf16 %v21399_v45  ;;  %v18162_v36 = vunpack.i.l.bf16 %v21399_v45 }
 0x371   : > { %18310 = vrot.lane.b32.xlu0 %v21393_v31, %s18966_s18  ;;  %v21411_v26 = vpop.permute.xlu0 %18165  ;;  %16666 = vmatpush3.bf16.msra.mxu1 %v16663_v34  ;;  %v21508_v34 = vpack.i.bf16 %v21490_v25, %v15193_v60 }
 0x372   : > { %16060 = vmatprep.subr.mxu1 %v9413_v61  ;;  %9493 = vmatprep.mubr.f32.mxu1 %v18968_v16  ;;  %v9751_v45 = vsel %vm643_vm2, %v18162_v36, %v18163_v50  ;;  %v18168_v58 = vunpack.i.h.bf16 %v21411_v26 }
 0x373   : > { %10949 = vrot.lane.b32.xlu1 %v20980_v11, %s18975_s11  ;;  %v18171_v15 = vpop.permute.xlu1 %18170  ;;  %v18788_v11 = vld [vmem:[%s19142_s9 + $0xa0] sm:$0xff] }
 0x374   : > { %15148 = vmatmul.mubr.msk.f32.gmra.mrb[16].mxu1 %vm302_vm0, %v20962_v41  ;;  %v16669_v8 = vpack.c.bf16 %v21003_v46, %v18788_v11  ;;  %v18173_v5 = vunpack.i.h.bf16 %v18171_v15  ;;  %v18172_v43 = vunpack.i.l.bf16 %v18171_v15 }
 0x375   : > { %18315 = vrot.lane.b32.xlu0 %v21385_v53, %s18966_s18  ;;  %v21430_v6 = vpop.permute.xlu0 %18175  ;;  %16061 = vmatpush3.msra.mxu1 %v9413_v61 }
 0x376   : > { %16062 = vmatprep.mubr.msk.f32.mxu1 %vm302_vm0, %v20942_v33  ;;  %16668 = vmatprep.subr.bf16.mxu1 %v16667_v17  ;;  %v18789_v33 = vld [vmem:[%s19142_s9 + $0xb0] sm:$0xff]  ;;  %v18177_v47 = vunpack.i.l.bf16 %v21430_v6  ;;  %v9754_v12 = vsel %vm643_vm2, %v18172_v43, %v18173_v5  ;;  %v18178_v35 = vunpack.i.h.bf16 %v21430_v6  ;;  %v21519_v6 = vld [vmem:[%s19142_s9 + $0x120] sm:$0xff] }
 0x377   : > { %18320 = vrot.lane.b32.xlu1 %v21424_v4, %s18966_s18  ;;  %v21442_v48 = vpop.permute.xlu1 %9743  ;;  %v16671_v46 = vpack.c.bf16 %v21020_v49, %v18789_v33  ;;  %v16677_v15 = vpack.c.bf16 %v9754_v12, %v9751_v45 }
 0x378   : > { %16063 = vmatmul.mubr.msk.f32.vlgmr.msra.gmra.mrb[18].mxu1 %vm302_vm0, %v20962_v41  ;;  %v9755_v57 = vsel %vm643_vm2, %v18173_v5, %v18177_v47 }
 0x379   : > { %18325 = vrot.lane.b32.xlu0 %v21434_v2, %s18966_s18  ;;  %v21450_v30 = vpop.permute.xlu0 %9745  ;;  %16670 = vmatpush1.bf16.msra.mxu1 %v16669_v8 }
 0x37a   : > { %9579 = vmatprep.subr.mxu1 %v20956_v3  ;;  %9639 = vmatprep.mubr.f32.mxu1 %v18968_v16  ;;  %v18167_v3 = vunpack.i.l.bf16 %v21411_v26  ;;  %v9756_v26 = vsel %vm643_vm2, %v18177_v47, %v18178_v35  ;;  %v9757_v33 = vsel %vm643_vm2, %v21442_v48, %v21450_v30 }
 0x37b   : > { %11209 = vrot.lane.b32.xlu1 %v21404_v9, %s18966_s18  ;;  %v21459_v41 = vpop.permute.xlu1 %9747 }
 0x37c   : > { %v9752_v51 = vsel %vm643_vm2, %v18163_v50, %v18167_v3  ;;  %v9753_v60 = vsel %vm643_vm2, %v18167_v3, %v18168_v58 }
 0x37d   : > { %11211 = vrot.lane.b32.xlu0 %v21407_v32, %s18966_s18  ;;  %v21467_v49 = vpop.permute.xlu0 %9749  ;;  %9580 = vmatpush1.msra.mxu1 %v21470_v0  ;;  %v16675_v55 = vpack.c.bf16 %v9755_v57, %v9752_v51  ;;  %v16679_v5 = vpack.c.bf16 %v9756_v26, %v9753_v60 }
 0x37e   : > { %15151 = vmatmul.mubr.msk.f32.vlgmr.msra.gmra.mrb[14].mxu1 %vm302_vm0, %v21036_v10  ;;  %16672 = vmatprep.subr.bf16.mxu1 %v16671_v46 }
 0x37f   : > { %18330 = vrot.lane.b32.xlu1 %v21461_v29, %s18966_s18  ;;  %16674 = vmatpush3.bf16.msra.mxu1 %v16671_v46  ;;  %v21535_v46 = vld [vmem:[%s19142_s9 + $0x138] sm:$0xff] }
 0x380   : > { %v21479_v18 = vpop.permute.xlu1 %18180  ;;  %9645 = vmatprep.mubr.f32.mxu1 %v18968_v16  ;;  %16069 = vmatprep.subr.mxu1 %v21483_v44 }
 0x381   : > { %11207 = vrot.lane.b32.xlu0 %v21416_v39, %s18966_s18  ;;  %v21494_v62 = vpop.permute.xlu0 %18185  ;;  %v18183_v47 = vunpack.i.h.bf16 %v21479_v18  ;;  %v18182_v57 = vunpack.i.l.bf16 %v21479_v18 }
 0x382   : > { %15152 = vmatmul.mubr.msk.f32.gmra.mrb[16].mxu1 %vm302_vm0, %v21043_v42  ;;  %v18187_v50 = vunpack.i.l.bf16 %v21494_v62  ;;  %v18188_v45 = vunpack.i.h.bf16 %v21494_v62 }
 0x383   : > { %13019 = vrot.lane.b32.xlu1 %v21487_v59, %s18966_s18  ;;  %16070 = vmatpush3.msra.mxu1 %v21483_v44  ;;  %v9951_v18 = vsel %vm850_vm3, %v18182_v57, %v18183_v47 }
 0x384   : > { %16676 = vmatprep.subr.bf16.mxu1 %v16675_v55  ;;  %v18191_v61 = vpop.permute.xlu1 %18190  ;;  %16071 = vmatprep.mubr.msk.f32.mxu1 %vm302_vm0, %v21036_v10  ;;  %v9758_v10 = vsel %vm643_vm2, %v21450_v30, %v21459_v41  ;;  %v9759_v30 = vsel %vm643_vm2, %v21459_v41, %v21467_v49  ;;  %v9952_v51 = vsel %vm850_vm3, %v18183_v47, %v18187_v50  ;;  %v18792_v47 = vld [vmem:[#allocation5 + $0x30] sm:$0xff] }
 0x385   : > { %13021 = vrot.lane.b32.xlu0 %v21501_v63, %s18966_s18  ;;  %v18196_v17 = vpop.permute.xlu0 %18195  ;;  %v18193_v8 = vunpack.i.h.bf16 %v18191_v61  ;;  %v18192_v43 = vunpack.i.l.bf16 %v18191_v61 }
 0x386   : > { %16072 = vmatmul.mubr.msk.f32.vlgmr.msra.gmra.mrb[18].mxu1 %vm302_vm0, %v21043_v42  ;;  %v18197_v56 = vunpack.i.l.bf16 %v18196_v17  ;;  %v18198_v41 = vunpack.i.h.bf16 %v18196_v17 }
 0x387   : > { %16678 = vmatpush1.bf16.msra.mxu1 %v16677_v15  ;;  %18335 = vrot.lane.b32.xlu1 %v21508_v34, %s18966_s18  ;;  %v9954_v12 = vsel %vm850_vm3, %v18192_v43, %v18193_v8 }
 0x388   : > { %9773 = vmatprep.subr.mxu1 %v9758_v10  ;;  %v9944_v11 = vpop.permute.xlu1 %9943  ;;  %9833 = vmatprep.mubr.f32.mxu1 %v18968_v16  ;;  %v9955_v3 = vsel %vm850_vm3, %v18193_v8, %v18197_v56  ;;  %v16685_v61 = vpack.c.bf16 %v9954_v12, %v9951_v18  ;;  %v9956_v15 = vsel %vm850_vm3, %v18197_v56, %v18198_v41 }
 0x389   : > { %13017 = vrot.lane.b32.xlu0 %v21519_v6, %s18966_s18  ;;  %v9946_v42 = vpop.permute.xlu0 %9945  ;;  %v16683_v55 = vpack.c.bf16 %v9955_v3, %v9952_v51 }
 0x38a   : > { %v9957_v26 = vsel %vm850_vm3, %v9944_v11, %v9946_v42 }
 0x38b   : > { %9774 = vmatpush1.msra.mxu1 %v9757_v33  ;;  %11213 = vrot.lane.b32.xlu1 %v21490_v25, %s18966_s18 }
 0x38c   : > { %15155 = vmatmul.mubr.msk.f32.vlgmr.msra.gmra.mrb[14].mxu1 %vm302_vm0, %v21087_v54  ;;  %16680 = vmatprep.subr.bf16.mxu1 %v16679_v5 }
 0x38d   : > { %13023 = vrot.lane.b32.xlu0 %v21535_v46, %s18966_s18  ;;  %16682 = vmatpush3.bf16.msra.mxu1 %v16679_v5  ;;  %v9948_v48 = vpop.permute.xlu1 %9947 }
 0x38e   : > { %v9950_v36 = vpop.permute.xlu0 %9949  ;;  %16078 = vmatprep.subr.mxu1 %v9759_v30  ;;  %9839 = vmatprep.mubr.f32.mxu1 %v18968_v16  ;;  %v9958_v58 = vsel %vm850_vm3, %v9946_v42, %v9948_v48 }
 0x38f   : > { %18340 = vrot.lane.b32.xlu1 %v21375_v38, %s18969_s20 }
 0x390   : > { %15156 = vmatmul.mubr.msk.f32.gmra.mrb[16].mxu1 %vm302_vm0, %v21080_v19 }
 0x391   : > { %18345 = vrot.lane.b32.xlu0 %v21385_v53, %s18969_s20  ;;  %16079 = vmatpush3.msra.mxu1 %v9759_v30  ;;  %v18201_v49 = vpop.permute.xlu1 %18200 }
 0x392   : > { %v21560_v35 = vpop.permute.xlu0 %18205  ;;  %16684 = vmatprep.subr.bf16.mxu1 %v16683_v55  ;;  %16080 = vmatprep.mubr.msk.f32.mxu1 %vm302_vm0, %v21087_v54  ;;  %v18203_v60 = vunpack.i.h.bf16 %v18201_v49  ;;  %v18202_v42 = vunpack.i.l.bf16 %v18201_v49 }
 0x393   : > { %18350 = vrot.lane.b32.xlu1 %v21393_v31, %s18969_s20  ;;  %v18207_v33 = vunpack.i.l.bf16 %v21560_v35  ;;  %v18208_v55 = vunpack.i.h.bf16 %v21560_v35 }
 0x394   : > { %16081 = vmatmul.mubr.msk.f32.vlgmr.msra.gmra.mrb[18].mxu1 %vm302_vm0, %v21080_v19  ;;  %v9953_v19 = vsel %vm850_vm3, %v18187_v50, %v18188_v45  ;;  %v9959_v50 = vsel %vm850_vm3, %v9948_v48, %v9950_v36  ;;  %v10151_v12 = vsel %vm1057_vm4, %v18202_v42, %v18203_v60 }
 0x395   : > { %18355 = vrot.lane.b32.xlu0 %v21385_v53, %s18969_s20  ;;  %16686 = vmatpush1.bf16.msra.mxu1 %v16685_v61  ;;  %v18211_v17 = vpop.permute.xlu1 %18210  ;;  %v16687_v8 = vpack.c.bf16 %v9956_v15, %v9953_v19  ;;  %v10152_v3 = vsel %vm1057_vm4, %v18203_v60, %v18207_v33  ;;  %v10153_v35 = vsel %vm1057_vm4, %v18207_v33, %v18208_v55 }
 0x396   : > { %9973 = vmatprep.subr.mxu1 %v9958_v58  ;;  %v18216_v54 = vpop.permute.xlu0 %18215  ;;  %10033 = vmatprep.mubr.f32.mxu1 %v18968_v16  ;;  %v18213_v62 = vunpack.i.h.bf16 %v18211_v17  ;;  %v18212_v5 = vunpack.i.l.bf16 %v18211_v17 }
 0x397   : > { %v18217_v10 = vunpack.i.l.bf16 %v18216_v54  ;;  %18360 = vrot.lane.b32.xlu1 %v21424_v4, %s18969_s20  ;;  %v18218_v51 = vunpack.i.h.bf16 %v18216_v54 }
 0x398   : > { %v10154_v57 = vsel %vm1057_vm4, %v18212_v5, %v18213_v62 }
 0x399   : > { %18365 = vrot.lane.b32.xlu0 %v21434_v2, %s18969_s20  ;;  %9974 = vmatpush1.msra.mxu1 %v9957_v26  ;;  %v10144_v56 = vpop.permute.xlu1 %10143  ;;  %v10155_v11 = vsel %vm1057_vm4, %v18213_v62, %v18217_v10  ;;  %v16693_v41 = vpack.c.bf16 %v10154_v57, %v10151_v12  ;;  %v10156_v18 = vsel %vm1057_vm4, %v18217_v10, %v18218_v51 }
 0x39a   : > { %15159 = vmatmul.mubr.msk.f32.vlgmr.msra.gmra.mrb[14].mxu1 %vm302_vm0, %v18792_v47  ;;  %16688 = vmatprep.subr.bf16.mxu1 %v16687_v8  ;;  %v16691_v48 = vpack.c.bf16 %v10155_v11, %v10152_v3  ;;  %v16695_v17 = vpack.c.bf16 %v10156_v18, %v10153_v35 }
 0x39b   : > { %v10146_v43 = vpop.permute.xlu0 %10145  ;;  %16690 = vmatpush3.bf16.msra.mxu1 %v16687_v8  ;;  %11555 = vrot.lane.b32.xlu1 %v21404_v9, %s18969_s20 }
 0x39c   : > { %16087 = vmatprep.subr.mxu1 %v9959_v50  ;;  %10039 = vmatprep.mubr.f32.mxu1 %v18968_v16  ;;  %v10157_v54 = vsel %vm1057_vm4, %v10144_v56, %v10146_v43 }
 0x39d   : > { %11557 = vrot.lane.b32.xlu0 %v21407_v32, %s18969_s20  ;;  %v10148_v30 = vpop.permute.xlu1 %10147 }
 0x39e   : > { %15160 = vmatmul.mubr.msk.f32.gmra.mrb[16].mxu1 %vm302_vm0, %v21121_v13  ;;  %v10158_v61 = vsel %vm1057_vm4, %v10146_v43, %v10148_v30 }
 0x39f   : > { %v10150_v36 = vpop.permute.xlu0 %10149  ;;  %16088 = vmatpush3.msra.mxu1 %v9959_v50  ;;  %18370 = vrot.lane.b32.xlu1 %v21461_v29, %s18969_s20 }
 0x3a0   : > { %16692 = vmatprep.subr.bf16.mxu1 %v16691_v48  ;;  %16089 = vmatprep.mubr.msk.f32.mxu1 %vm302_vm0, %v18792_v47  ;;  %v10159_v8 = vsel %vm1057_vm4, %v10148_v30, %v10150_v36 }
 0x3a1   : > { %11553 = vrot.lane.b32.xlu0 %v21416_v39, %s18969_s20  ;;  %v18221_v49 = vpop.permute.xlu1 %18220 }
 0x3a2   : > { %16090 = vmatmul.mubr.msk.f32.vlgmr.msra.gmra.mrb[18].mxu1 %vm302_vm0, %v21121_v13  ;;  %v18223_v13 = vunpack.i.h.bf16 %v18221_v49  ;;  %v18222_v33 = vunpack.i.l.bf16 %v18221_v49 }
 0x3a3   : > { %16694 = vmatpush1.bf16.msra.mxu1 %v16693_v41  ;;  %v18226_v45 = vpop.permute.xlu0 %18225  ;;  %13365 = vrot.lane.b32.xlu1 %v21487_v59, %s18969_s20 }
 0x3a4   : > { %10173 = vmatprep.subr.mxu1 %v10158_v61  ;;  %10233 = vmatprep.mubr.f32.mxu1 %v18968_v16  ;;  %v18227_v15 = vunpack.i.l.bf16 %v18226_v45  ;;  %v10351_v30 = vsel %vm1264_vm5, %v18222_v33, %v18223_v13  ;;  %v18228_v3 = vunpack.i.h.bf16 %v18226_v45 }
 0x3a5   : > { %13367 = vrot.lane.b32.xlu0 %v21501_v63, %s18969_s20  ;;  %v18231_v58 = vpop.permute.xlu1 %18230 }
 0x3a6   : > { %v18233_v62 = vunpack.i.h.bf16 %v18231_v58  ;;  %v18232_v19 = vunpack.i.l.bf16 %v18231_v58  ;;  %v10352_v56 = vsel %vm1264_vm5, %v18223_v13, %v18227_v15  ;;  %v10353_v41 = vsel %vm1264_vm5, %v18227_v15, %v18228_v3 }
 0x3a7   : > { %10174 = vmatpush1.msra.mxu1 %v10157_v54  ;;  %v18236_v10 = vpop.permute.xlu0 %18235  ;;  %18375 = vrot.lane.b32.xlu1 %v21508_v34, %s18969_s20 }
 0x3a8   : > { %v18237_v26 = vunpack.i.l.bf16 %v18236_v10  ;;  %15163 = vmatmul.mubr.msk.f32.vlgmr.msra.gmra.mrb[14].mxu1 %vm302_vm0, %v21167_v28  ;;  %16696 = vmatprep.subr.bf16.mxu1 %v16695_v17  ;;  %v10354_v50 = vsel %vm1264_vm5, %v18232_v19, %v18233_v62  ;;  %v18238_v11 = vunpack.i.h.bf16 %v18236_v10 }
 0x3a9   : > { %16698 = vmatpush3.bf16.msra.mxu1 %v16695_v17  ;;  %13363 = vrot.lane.b32.xlu0 %v21519_v6, %s18969_s20  ;;  %v10344_v60 = vpop.permute.xlu1 %10343  ;;  %v16701_v51 = vpack.c.bf16 %v10354_v50, %v10351_v30 }
 0x3aa   : > { %16096 = vmatprep.subr.mxu1 %v10159_v8  ;;  %10239 = vmatprep.mubr.f32.mxu1 %v18968_v16  ;;  %v10355_v5 = vsel %vm1264_vm5, %v18233_v62, %v18237_v26  ;;  %v10356_v36 = vsel %vm1264_vm5, %v18237_v26, %v18238_v11 }
 0x3ab   : > { %v10346_v47 = vpop.permute.xlu0 %10345  ;;  %11559 = vrot.lane.b32.xlu1 %v21490_v25, %s18969_s20  ;;  %v16699_v43 = vpack.c.bf16 %v10355_v5, %v10352_v56  ;;  %v16703_v18 = vpack.c.bf16 %v10356_v36, %v10353_v41 }
 0x3ac   : > { %15164 = vmatmul.mubr.msk.f32.gmra.mrb[16].mxu1 %vm302_vm0, %v21160_v27  ;;  %v10357_v35 = vsel %vm1264_vm5, %v10344_v60, %v10346_v47 }
 0x3ad   : > { %16097 = vmatpush3.msra.mxu1 %v10159_v8  ;;  %18380 = vrot.lane.b32.xlu0 %v21375_v38, %s18970_s4  ;;  %v10348_v42 = vpop.permute.xlu1 %10347 }
 0x3ae   : > { %16700 = vmatprep.subr.bf16.mxu1 %v16699_v43  ;;  %16098 = vmatprep.mubr.msk.f32.mxu1 %vm302_vm0, %v21167_v28  ;;  %v10358_v48 = vsel %vm1264_vm5, %v10346_v47, %v10348_v42 }
 0x3af   : > { %v10350_v57 = vpop.permute.xlu0 %10349  ;;  %18385 = vrot.lane.b32.xlu1 %v21385_v53, %s18970_s4 }
 0x3b0   : > { %16099 = vmatmul.mubr.msk.f32.vlgmr.msra.gmra.mrb[18].mxu1 %vm302_vm0, %v21160_v27  ;;  %v10359_v10 = vsel %vm1264_vm5, %v10348_v42, %v10350_v57 }
 0x3b1   : > { %16702 = vmatpush1.bf16.msra.mxu1 %v16701_v51  ;;  %18390 = vrot.lane.b32.xlu0 %v21393_v31, %s18970_s4  ;;  %v18241_v12 = vpop.permute.xlu1 %18240 }
 0x3b2   : > { %10373 = vmatprep.subr.mxu1 %v10358_v48  ;;  %v18243_v55 = vunpack.i.h.bf16 %v18241_v12  ;;  %v18242_v28 = vunpack.i.l.bf16 %v18241_v12  ;;  %10433 = vmatprep.mubr.f32.mxu1 %v18968_v16 }
 0x3b3   : > { %v18246_v49 = vpop.permute.xlu0 %18245  ;;  %13369 = vrot.lane.b32.xlu1 %v21535_v46, %s18969_s20  ;;  %v7415_v27 = vpop.f32.mrb[8].mxu1  ;;  %s22526_s20 = scalar_lea.hbm %s22576_s3, %s17263_s7 }
 0x3b4   : > { %v18248_v45 = vunpack.i.h.bf16 %v18246_v49  ;;  %v18247_v61 = vunpack.i.l.bf16 %v18246_v49  ;;  %v7417_v58 = vpop.f32.mrb[9].mxu1  ;;  %v10552_v17 = vsel %vm1471_vm6, %v18242_v28, %v18243_v55 }
 0x3b5   : > { %10374 = vmatpush1.msra.mxu1 %v10357_v35  ;;  %18395 = vrot.lane.b32.xlu0 %v21385_v53, %s18970_s4  ;;  %v18251_v13 = vpop.permute.xlu1 %18250 }
 0x3b6   : > { %16704 = vmatprep.subr.bf16.mxu1 %v16703_v18  ;;  %15167 = vmatmul.mubr.msk.f32.vlgmr.msra.gmra.mrb[14].mxu1 %vm302_vm0, %v21219_v52  ;;  %v18253_v15 = vunpack.i.h.bf16 %v18251_v13  ;;  %v18252_v54 = vunpack.i.l.bf16 %v18251_v13  ;;  %v10555_v62 = vsel %vm1471_vm6, %v18247_v61, %v18248_v45 }
 0x3b7   : > { %16706 = vmatpush3.bf16.msra.mxu1 %v16703_v18  ;;  %v10546_v19 = vpop.permute.xlu0 %10545  ;;  %10439 = vmatprep.mubr.f32.mxu1 %v18968_v16  ;;  %v7421_v26 = vpop.f32.mrb[10].mxu1  ;;  %v16707_v8 = vpack.c.bf16 %v10555_v62, %v10552_v17 }
 0x3b8   : > { %16105 = vmatprep.subr.mxu1 %v10359_v10  ;;  %v10551_v60 = vsel %vm1471_vm6, %v18252_v54, %v18242_v28  ;;  %v10554_v33 = vsel %vm1471_vm6, %v18253_v15, %v18247_v61  ;;  %18400 = vrot.lane.b32.xlu1 %v21424_v4, %s18970_s4  ;;  %v7510_v56 = vadd.f32 %v7421_v26, %v19673_v23  ;;  %v7423_v5 = vpop.f32.mrb[11].mxu1 }
 0x3b9   : > { %18405 = vrot.lane.b32.xlu0 %v21434_v2, %s18970_s4  ;;  %v10548_v47 = vpop.permute.xlu1 %10547  ;;  %v7511_v43 = vadd.f32 %v7423_v5, %v19673_v23  ;;  %v16709_v30 = vpack.c.bf16 %v10554_v33, %v10551_v60  ;;  %v7508_v61 = vadd.f32 %v7417_v58, %v19675_v24 }
 0x3ba   : > { %15168 = vmatmul.mubr.msk.f32.gmra.mrb[16].mxu1 %vm302_vm0, %v21207_v21  ;;  %v7516_v50 = vmul.f32 0.5, %v7510_v56  ;;  %v10558_v12 = vsel %vm1471_vm6, %v10546_v19, %v10548_v47 }
 0x3bb   : > { %16106 = vmatpush3.msra.mxu1 %v10359_v10  ;;  %v18256_v11 = vpop.permute.xlu0 %18255  ;;  %v7517_v42 = vmul.f32 0.5, %v7511_v43  ;;  %16107 = vmatprep.mubr.msk.f32.mxu1 %vm302_vm0, %v21219_v52  ;;  %v15974_v3 = vpop.f32.mrb[12].mxu1  ;;  %v7507_v52 = vadd.f32 %v7415_v27, %v19675_v24 }
 0x3bc   : > { %18655 = vtanh.f32 %v7516_v50  ;;  %16708 = vmatprep.subr.bf16.mxu1 %v16707_v8  ;;  %v18258_v57 = vunpack.i.h.bf16 %v18256_v11  ;;  %v18257_v51 = vunpack.i.l.bf16 %v18256_v11  ;;  %11755 = vrot.lane.b32.xlu1 %v21404_v9, %s18970_s4  ;;  %v7512_v48 = vadd.f32 %v15974_v3, %v19673_v23  ;;  %v7492_v36 = vpop.f32.mrb[13].mxu1 }
 0x3bd   : > { %18657 = vtanh.f32 %v7517_v42  ;;  %11757 = vrot.lane.b32.xlu0 %v21407_v32, %s18970_s4  ;;  %v10544_v28 = vpop.permute.xlu1 %10543 }
 0x3be   : > { %16108 = vmatmul.mubr.msk.f32.vlgmr.msra.gmra.mrb[18].mxu1 %vm302_vm0, %v21207_v21  ;;  %v7518_v41 = vmul.f32 0.5, %v7512_v48  ;;  %v10553_v49 = vsel %vm1471_vm6, %v18243_v55, %v18257_v51  ;;  %v10556_v18 = vsel %vm1471_vm6, %v18248_v45, %v18258_v57  ;;  %v10557_v17 = vsel %vm1471_vm6, %v10544_v28, %v10546_v19 }
 0x3bf   : > { %16710 = vmatpush1.bf16.msra.mxu1 %v16709_v30  ;;  %v10550_v35 = vpop.permute.xlu0 %10549  ;;  %10633 = vmatprep.mubr.f32.mxu1 %v18968_v16  ;;  %v16711_v27 = vpack.c.bf16 %v10556_v18, %v10553_v49  ;;  %v7509_v55 = vadd.f32 %v7492_v36, %v19675_v24 }
 0x3c0   : > { %18659 = vtanh.f32 %v7518_v41  ;;  %10573 = vmatprep.subr.mxu1 %v10558_v12  ;;  %18410 = vrot.lane.b32.xlu1 %v21461_v29, %s18970_s4  ;;  %v10559_v10 = vsel %vm1471_vm6, %v10548_v47, %v10550_v35 }
 0x3c1   : > { %11753 = vrot.lane.b32.xlu0 %v21416_v39, %s18970_s4  ;;  %v21682_v21 = vpop.permute.xlu1 %18260  ;;  %18661 = vtanh.f32 %v7507_v52 }
 0x3c2   : > { %v18263_v45 = vunpack.i.h.bf16 %v21682_v21  ;;  %v18262_v58 = vunpack.i.l.bf16 %v21682_v21  ;;  %18663 = vtanh.f32 %v7508_v61 }
 0x3c3   : > { %10574 = vmatpush1.msra.mxu1 %v10557_v17  ;;  %v21687_v13 = vpop.permute.xlu0 %18265  ;;  %18665 = vtanh.f32 %v7509_v55 }
 0x3c4   : > { %16712 = vmatprep.subr.bf16.mxu1 %v16711_v27  ;;  %v18268_v15 = vunpack.i.h.bf16 %v21687_v13  ;;  %v18267_v54 = vunpack.i.l.bf16 %v21687_v13  ;;  %15171 = vmatmul.mubr.msk.f32.vlgmr.msra.gmra.mrb[14].mxu1 %vm302_vm0, %v21278_v20  ;;  %v10752_v62 = vsel %vm1678_vm7, %v18262_v58, %v18263_v45 }
 0x3c5   : > { %16714 = vmatpush3.bf16.msra.mxu1 %v16711_v27  ;;  %13565 = vrot.lane.b32.xlu1 %v21487_v59, %s18970_s4  ;;  %v18271_v19 = vpop.permute.xlu1 %18270 }
 0x3c6   : > { %v18656_v26 = vpop.eup %18655  ;;  %16114 = vmatprep.subr.mxu1 %v10559_v10  ;;  %13567 = vrot.lane.b32.xlu0 %v21501_v63, %s18970_s4  ;;  %v18273_v8 = vunpack.i.h.bf16 %v18271_v19  ;;  %v18272_v60 = vunpack.i.l.bf16 %v18271_v19  ;;  %v10755_v33 = vsel %vm1678_vm7, %v18267_v54, %v18268_v15 }
 0x3c7   : > { %v18658_v56 = vpop.eup %18657  ;;  %v7522_v5 = vadd.f32 1.0, %v18656_v26  ;;  %v10746_v43 = vpop.permute.xlu0 %10745  ;;  %10639 = vmatprep.mubr.f32.mxu1 %v18968_v16  ;;  %v16715_v47 = vpack.c.bf16 %v10755_v33, %v10752_v62 }
 0x3c8   : > { %v7523_v50 = vadd.f32 1.0, %v18658_v56  ;;  %v10751_v11 = vsel %vm1678_vm7, %v18272_v60, %v18262_v58  ;;  %v10754_v42 = vsel %vm1678_vm7, %v18273_v8, %v18267_v54  ;;  %15172 = vmatmul.mubr.msk.f32.gmra.mrb[16].mxu1 %vm302_vm0, %v21271_v1 }
 0x3c9   : > { %v7525_v30 = vmul.f32 0.5, %v7522_v5  ;;  %16115 = vmatpush3.msra.mxu1 %v10559_v10  ;;  %18415 = vrot.lane.b32.xlu1 %v21508_v34, %s18970_s4  ;;  %v10748_v3 = vpop.permute.xlu1 %10747  ;;  %v16717_v57 = vpack.c.bf16 %v10754_v42, %v10751_v11 }
 0x3ca   : > { %v18660_v51 = vpop.eup %18659  ;;  %v7526_v48 = vmul.f32 0.5, %v7523_v50  ;;  %13563 = vrot.lane.b32.xlu0 %v21519_v6, %s18970_s4  ;;  %16716 = vmatprep.subr.bf16.mxu1 %v16715_v47  ;;  %v10758_v52 = vsel %vm1678_vm7, %v10746_v43, %v10748_v3 }
 0x3cb   : > { %v7531_v36 = vsub.f32 1.0, %v7525_v30  ;;  %v7524_v12 = vadd.f32 1.0, %v18660_v51  ;;  %v18276_v28 = vpop.permute.xlu0 %18275  ;;  %16116 = vmatprep.mubr.msk.f32.mxu1 %vm302_vm0, %v21278_v20  ;;  %v18662_v41 = vpop.eup %18661  ;;  %v7528_v17 = vmul.f32 %v7525_v30, %v21289_v40 }
 0x3cc   : > { %v7532_v49 = vsub.f32 1.0, %v7526_v48  ;;  %v18278_v18 = vunpack.i.h.bf16 %v18276_v28  ;;  %v18277_v61 = vunpack.i.l.bf16 %v18276_v28  ;;  %16117 = vmatmul.mubr.msk.f32.vlgmr.msra.gmra.mrb[18].mxu1 %vm302_vm0, %v21271_v1  ;;  %v18664_v35 = vpop.eup %18663  ;;  %v7529_v21 = vmul.f32 %v7526_v48, %v21294_v22 }
 0x3cd   : > { %v7534_v27 = vmul.f32 %v18662_v41, %v7531_v36  ;;  %v7527_v55 = vmul.f32 0.5, %v7524_v12  ;;  %11759 = vrot.lane.b32.xlu1 %v21490_v25, %s18970_s4  ;;  %16718 = vmatpush1.bf16.msra.mxu1 %v16717_v57  ;;  %v10744_v20 = vpop.permute.xlu1 %10743  ;;  %v18666_v10 = vpop.eup %18665 }
 0x3ce   : > { %v7535_v58 = vmul.f32 %v18664_v35, %v7532_v49  ;;  %18420 = vrot.lane.b32.xlu0 %v21375_v38, %s18971_s22  ;;  %10773 = vmatprep.subr.mxu1 %v10758_v52  ;;  %v10757_v1 = vsel %vm1678_vm7, %v10744_v20, %v10746_v43  ;;  %v10753_v13 = vsel %vm1678_vm7, %v18263_v45, %v18277_v61 }
 0x3cf   : > { %v7533_v40 = vsub.f32 1.0, %v7527_v55  ;;  %v10750_v54 = vpop.permute.xlu0 %10749  ;;  %10833 = vmatprep.mubr.f32.mxu1 %v18968_v16  ;;  %v10756_v22 = vsel %vm1678_vm7, %v18268_v15, %v18278_v18  ;;  %v21724_v62 = vadd.f32 %v7534_v27, %v7528_v17  ;;  %v7530_v8 = vmul.f32 %v7527_v55, %v21308_v37 }
 0x3d0   : > { %v16719_v19 = vpack.c.bf16 %v10756_v22, %v10753_v13  ;;  %v21726_v26 = vadd.f32 %v7535_v58, %v7529_v21  ;;  %v10759_v47 = vsel %vm1678_vm7, %v10748_v3, %v10750_v54  ;;  %v18793_v3 = vld [vmem:[#allocation5 + $0x78] sm:$0xff] }
 0x3d1   : > { %18425 = vrot.lane.b32.xlu1 %v21385_v53, %s18971_s22  ;;  %10774 = vmatpush1.msra.mxu1 %v10757_v1  ;;  %v18281_v45 = vpop.permute.xlu1 %18280  ;;  %15081 = vst [vmem:[%s20346_s25 + $0x48] sm:$0xff] %v21724_v62  ;;  %v7536_v60 = vmul.f32 %v18666_v10, %v7533_v40 }
 0x3d2   : > { %18430 = vrot.lane.b32.xlu0 %v21393_v31, %s18971_s22  ;;  %16720 = vmatprep.subr.bf16.mxu1 %v16719_v19  ;;  %v18283_v15 = vunpack.i.h.bf16 %v18281_v45  ;;  %v18282_v33 = vunpack.i.l.bf16 %v18281_v45  ;;  %15082 = vst [vmem:[%s20346_s25 + $0x50] sm:$0xff] %v21726_v26 }
 0x3d3   : > { %v18286_v56 = vpop.permute.xlu0 %18285  ;;  %15175 = vmatmul.mubr.msk.f32.vlgmr.msra.gmra.mrb[14].mxu1 %vm302_vm0, %v21330_v7  ;;  %v21739_v37 = vadd.f32 %v7536_v60, %v7530_v8 }
 0x3d4   : > { %v18288_v5 = vunpack.i.h.bf16 %v18286_v56  ;;  %v18287_v43 = vunpack.i.l.bf16 %v18286_v56  ;;  %16722 = vmatpush3.bf16.msra.mxu1 %v16719_v19  ;;  %10839 = vmatprep.mubr.f32.mxu1 %v18968_v16  ;;  %v10952_v31 = vsel %vm1885_vm8, %v18282_v33, %v18283_v15 }
 0x3d5   : > { %16123 = vmatprep.subr.mxu1 %v10759_v47  ;;  %13569 = vrot.lane.b32.xlu1 %v21535_v46, %s18970_s4  ;;  %v18291_v50 = vpop.permute.xlu1 %18290  ;;  %15083 = vst [vmem:[%s20346_s25 + $0x58] sm:$0xff] %v21739_v37  ;;  %s18888_s4 = scalar_lea.vmem %s22528_s8, 3072 }
 0x3d6   : > { %18435 = vrot.lane.b32.xlu0 %v21385_v53, %s18971_s22  ;;  %v18293_v11 = vunpack.i.h.bf16 %v18291_v50  ;;  %v18292_v42 = vunpack.i.l.bf16 %v18291_v50  ;;  %v10955_v30 = vsel %vm1885_vm8, %v18287_v43, %v18288_v5  ;;  %p18889_p4 = scmp.ne.s32.totalorder %s22528_s8, %s18888_s4 }
 0x3d7   : > { %v10946_v57 = vpop.permute.xlu0 %10945  ;;  %15176 = vmatmul.mubr.msk.f32.gmra.mrb[16].mxu1 %vm302_vm0, %v18793_v3  ;;  %v16723_v51 = vpack.c.bf16 %v10955_v30, %v10952_v31 }
 0x3d8   : > { %v10951_v48 = vsel %vm1885_vm8, %v18292_v42, %v18282_v33  ;;  %v10954_v36 = vsel %vm1885_vm8, %v18293_v11, %v18287_v43  ;;  %16124 = vmatpush3.msra.mxu1 %v10759_v47  ;;  %16125 = vmatprep.mubr.msk.f32.mxu1 %vm302_vm0, %v21330_v7  ;;  %p18890_p6 = pnand %p18889_p4, %p19090_p12 }
 0x3d9   : > { %18440 = vrot.lane.b32.xlu1 %v21424_v4, %s18971_s22  ;;  %16724 = vmatprep.subr.bf16.mxu1 %v16723_v51  ;;  %v10948_v53 = vpop.permute.xlu1 %10947  ;;  %v16725_v12 = vpack.c.bf16 %v10954_v36, %v10951_v48  ;;  %v21816_v51 = vld [vmem:[%s19142_s9 + $0xe8] sm:$0xff] }
 0x3da   : > { %18445 = vrot.lane.b32.xlu0 %v21434_v2, %s18971_s22  ;;  %v10958_v28 = vsel %vm1885_vm8, %v10946_v57, %v10948_v53  ;;  %v21820_v48 = vpack.i.bf16 %v21483_v44, %v21816_v51  ;;  %p18891_p8 = pneg %p18890_p6 }
 0x3db   : > { %v18296_v52 = vpop.permute.xlu0 %18295  ;;  %16126 = vmatmul.mubr.msk.f32.vlgmr.msra.gmra.mrb[18].mxu1 %vm302_vm0, %v18793_v3 }
 0x3dc   : > { %v18298_v41 = vunpack.i.h.bf16 %v18296_v52  ;;  %v18297_v49 = vunpack.i.l.bf16 %v18296_v52  ;;  %16726 = vmatpush1.bf16.msra.mxu1 %v16725_v12  ;;  %11033 = vmatprep.mubr.f32.mxu1 %v18968_v16 }
 0x3dd   : > { %11955 = vrot.lane.b32.xlu1 %v21404_v9, %s18971_s22  ;;  %10973 = vmatprep.subr.mxu1 %v10958_v28  ;;  %v10944_v7 = vpop.permute.xlu1 %10943  ;;  %v18794_v9 = vld [vmem:[#allocation5 + $0x80] sm:$0xff]  ;;  %v21828_v28 = vpack.i.bf16 %v21470_v0, %v21379_v14 }
 0x3de   : > { %11957 = vrot.lane.b32.xlu0 %v21407_v32, %s18971_s22  ;;  %v10957_v18 = vsel %vm1885_vm8, %v10944_v7, %v10946_v57  ;;  %v10953_v61 = vsel %vm1885_vm8, %v18283_v15, %v18297_v49  ;;  %v10956_v35 = vsel %vm1885_vm8, %v18288_v5, %v18298_v41 }
 0x3df   : > { %v21770_v17 = vpop.permute.xlu0 %18300  ;;  %v16727_v27 = vpack.c.bf16 %v10956_v35, %v10953_v61 }
 0x3e0   : > { %v18303_v21 = vunpack.i.h.bf16 %v21770_v17  ;;  %v18302_v55 = vunpack.i.l.bf16 %v21770_v17  ;;  %10974 = vmatpush1.msra.mxu1 %v10957_v18 }
 0x3e1   : > { %18450 = vrot.lane.b32.xlu1 %v21461_v29, %s18971_s22  ;;  %15179 = vmatmul.mubr.msk.f32.vlgmr.msra.gmra.mrb[14].mxu1 %vm302_vm0, %v18794_v9  ;;  %v21777_v32 = vpop.permute.xlu1 %18305 }
 0x3e2   : > { %11953 = vrot.lane.b32.xlu0 %v21416_v39, %s18971_s22  ;;  %16728 = vmatprep.subr.bf16.mxu1 %v16727_v27  ;;  %v18308_v20 = vunpack.i.h.bf16 %v21777_v32  ;;  %v18307_v58 = vunpack.i.l.bf16 %v21777_v32  ;;  %v11216_v54 = vsel %vm283_vm1, %v18302_v55, %v18303_v21  ;;  %v18795_v39 = vld [vmem:[#allocation5 + $0x88] sm:$0xff] }
 0x3e3   : > { %v18311_v1 = vpop.permute.xlu0 %18310  ;;  %16730 = vmatpush3.bf16.msra.mxu1 %v16727_v27  ;;  %11039 = vmatprep.mubr.f32.mxu1 %v18968_v16 }
 0x3e4   : > { %v18313_v13 = vunpack.i.h.bf16 %v18311_v1  ;;  %v18312_v40 = vunpack.i.l.bf16 %v18311_v1  ;;  %v11219_v22 = vsel %vm283_vm1, %v18307_v58, %v18308_v20 }
 0x3e5   : > { %13765 = vrot.lane.b32.xlu1 %v21487_v59, %s18971_s22  ;;  %15180 = vmatmul.mubr.msk.f32.gmra.mrb[16].mxu1 %vm302_vm0, %v18795_v39  ;;  %v10950_v10 = vpop.permute.xlu1 %10949  ;;  %v16731_v19 = vpack.c.bf16 %v11219_v22, %v11216_v54  ;;  %v21861_v54 = vld [vmem:[%s19142_s9 + $0x108] sm:$0xff] }
 0x3e6   : > { %v11218_v8 = vsel %vm283_vm1, %v18313_v13, %v18307_v58  ;;  %v11215_v45 = vsel %vm283_vm1, %v18312_v40, %v18302_v55  ;;  %13767 = vrot.lane.b32.xlu0 %v21501_v63, %s18971_s22  ;;  %v10959_v60 = vsel %vm1885_vm8, %v10948_v53, %v10950_v10  ;;  %16134 = vmatprep.mubr.msk.f32.mxu1 %vm302_vm0, %v18794_v9  ;;  %v18797_v9 = vld [vmem:[#allocation5 + $0x10] sm:$0xff] }
 0x3e7   : > { %v21799_v15 = vpop.permute.xlu0 %18315  ;;  %16132 = vmatprep.subr.mxu1 %v10959_v60  ;;  %16732 = vmatprep.subr.bf16.mxu0 %v16731_v19  ;;  %v16733_v33 = vpack.c.bf16 %v11218_v8, %v11215_v45  ;;  %v21868_v19 = vld [vmem:[%s19142_s9 + $0x110] sm:$0xff] }
 0x3e8   : > { %v18318_v56 = vunpack.i.h.bf16 %v21799_v15  ;;  %v18317_v5 = vunpack.i.l.bf16 %v21799_v15  ;;  %16133 = vmatpush3.msra.mxu1 %v10959_v60  ;;  %v18802_v60 = vld [vmem:[%s19142_s9 + $0xc0] sm:$0xff] }
 0x3e9   : > { %18455 = vrot.lane.b32.xlu1 %v21508_v34, %s18971_s22  ;;  %16734 = vmatpush1.bf16.msra.mxu0 %v16733_v33  ;;  %v18321_v43 = vpop.permute.xlu1 %18320  ;;  %v16741_v15 = vpack.c.bf16 %v21470_v0, %v18802_v60 }
 0x3ea   : > { %13763 = vrot.lane.b32.xlu0 %v21519_v6, %s18971_s22  ;;  %v18323_v47 = vunpack.i.h.bf16 %v18321_v43  ;;  %v18322_v31 = vunpack.i.l.bf16 %v18321_v43  ;;  %16135 = vmatmul.mubr.msk.f32.vlgmr.msra.gmra.mrb[18].mxu1 %vm302_vm0, %v18795_v39  ;;  %v13026_v30 = vsel %vm283_vm1, %v18317_v5, %v18318_v56  ;;  %v18800_v39 = vld [vmem:[%s19142_s9 + $0xc8] sm:$0xff] }
 0x3eb   : > { %v18326_v50 = vpop.permute.xlu0 %18325  ;;  %13107 = vmatprep.mubr.f32.mxu1 %v18968_v16  ;;  %v16739_v10 = vpack.c.bf16 %v21816_v51, %v18800_v39 }
 0x3ec   : > { %v18328_v11 = vunpack.i.h.bf16 %v18326_v50  ;;  %v18327_v42 = vunpack.i.l.bf16 %v18326_v50  ;;  %v13029_v57 = vsel %vm283_vm1, %v18322_v31, %v18323_v47 }
 0x3ed   : > { %11959 = vrot.lane.b32.xlu1 %v21490_v25, %s18971_s22  ;;  %v11210_v3 = vpop.permute.xlu1 %11209  ;;  %v16803_v36 = vpack.c.bf16 %v13029_v57, %v13026_v30  ;;  %v21918_v57 = vld [vmem:[#allocation5] sm:$0xff] }
 0x3ee   : > { %v13028_v53 = vsel %vm283_vm1, %v18328_v11, %v18322_v31  ;;  %v13025_v12 = vsel %vm283_vm1, %v18327_v42, %v18317_v5  ;;  %18460 = vrot.lane.b32.xlu0 %v21375_v38, %s18972_s26  ;;  %v18804_v11 = vld [vmem:[%s19142_s9 + $0xd0] sm:$0xff] }
 0x3ef   : > { %v11212_v25 = vpop.permute.xlu0 %11211  ;;  %16804 = vmatprep.subr.bf16.mxu1 %v16803_v36  ;;  %v16805_v52 = vpack.c.bf16 %v13028_v53, %v13025_v12  ;;  %v16743_v42 = vpack.c.bf16 %v21483_v44, %v18804_v11  ;;  %v21925_v36 = vld [vmem:[%s19142_s9 + $0x128] sm:$0xff] }
 0x3f0   : > { %v11222_v41 = vsel %vm283_vm1, %v11210_v3, %v11212_v25 }
 0x3f1   : > { %18465 = vrot.lane.b32.xlu1 %v21820_v48, %s18972_s26  ;;  %11237 = vmatprep.subr.mxu0 %v11222_v41  ;;  %v18331_v49 = vpop.permute.xlu1 %18330 }
 0x3f2   : > { %18470 = vrot.lane.b32.xlu0 %v21828_v28, %s18972_s26  ;;  %16806 = vmatpush1.bf16.msra.mxu1 %v16805_v52  ;;  %v18333_v7 = vunpack.i.h.bf16 %v18331_v49  ;;  %v18332_v38 = vunpack.i.l.bf16 %v18331_v49 }
 0x3f3   : > { %v11208_v18 = vpop.permute.xlu0 %11207 }
 0x3f4   : > { %v11221_v14 = vsel %vm283_vm1, %v11208_v18, %v11210_v3  ;;  %v11217_v61 = vsel %vm283_vm1, %v18303_v21, %v18332_v38  ;;  %v11220_v35 = vsel %vm283_vm1, %v18308_v20, %v18333_v7  ;;  %v18798_v20 = vld [vmem:[#allocation5 + $0x18] sm:$0xff] }
 0x3f5   : > { %13769 = vrot.lane.b32.xlu1 %v21535_v46, %s18971_s22  ;;  %11238 = vmatpush1.msra.mxu0 %v11221_v14  ;;  %v13020_v27 = vpop.permute.xlu1 %13019  ;;  %v16735_v55 = vpack.c.bf16 %v11220_v35, %v11217_v61  ;;  %v21940_v7 = vld [vmem:[%s19142_s9 + $0x118] sm:$0xff]  ;;  %v18809_v14 = vld [vmem:[#allocation5 + $0x8] sm:$0xff]  ;;  %s18976_s22 = smov [#allocation7]  }
 0x3f6   : > { %18475 = vrot.lane.b32.xlu0 %v21820_v48, %s18972_s26  ;;  %15198 = vmatmul.mubr.msk.f32.vlgmr.msra.gmra.mrb[22].mxu0 %vm302_vm0, %v18797_v9 }
 0x3f7   : > { %v13022_v58 = vpop.permute.xlu0 %13021  ;;  %16736 = vmatprep.subr.bf16.mxu0 %v16735_v55  ;;  %11303 = vmatprep.mubr.f32.mxu0 %v18968_v16 }
 0x3f8   : > { %v13032_v17 = vsel %vm283_vm1, %v13020_v27, %v13022_v58  ;;  %16738 = vmatpush3.bf16.msra.mxu0 %v16735_v55 }
 0x3f9   : > { %18480 = vrot.lane.b32.xlu1 %v21424_v4, %s18972_s26  ;;  %13047 = vmatprep.subr.mxu1 %v13032_v17  ;;  %v18336_v46 = vpop.permute.xlu1 %18335 }
 0x3fa   : > { %18485 = vrot.lane.b32.xlu0 %v21434_v2, %s18972_s26  ;;  %v18338_v21 = vunpack.i.h.bf16 %v18336_v46  ;;  %v18337_v32 = vunpack.i.l.bf16 %v18336_v46  ;;  %15199 = vmatmul.mubr.msk.f32.gmra.mrb[24].mxu0 %vm302_vm0, %v18798_v20 }
 0x3fb   : > { %v13018_v1 = vpop.permute.xlu0 %13017  ;;  %16143 = vmatprep.mubr.msk.f32.mxu0 %vm302_vm0, %v18797_v9 }
 0x3fc   : > { %v13031_v13 = vsel %vm283_vm1, %v13018_v1, %v13020_v27  ;;  %v13027_v4 = vsel %vm283_vm1, %v18318_v56, %v18337_v32  ;;  %v13030_v40 = vsel %vm283_vm1, %v18323_v47, %v18338_v21  ;;  %v21881_v56 = vld [vmem:[%s19142_s9 + $0x100] sm:$0xff] }
 0x3fd   : > { %12155 = vrot.lane.b32.xlu1 %v21861_v54, %s18972_s26  ;;  %13048 = vmatpush1.msra.mxu1 %v13031_v13  ;;  %v11214_v2 = vpop.permute.xlu1 %11213  ;;  %v16807_v22 = vpack.c.bf16 %v13030_v40, %v13027_v4  ;;  %v16813_v31 = vpack.c.bf16 %v21881_v56, %v21470_v0 }
 0x3fe   : > { %12157 = vrot.lane.b32.xlu0 %v21868_v19, %s18972_s26  ;;  %15249 = vmatmul.mubr.msk.f32.vlgmr.msra.gmra.mrb[20].mxu1 %vm302_vm0, %v18797_v9  ;;  %v11223_v8 = vsel %vm283_vm1, %v11212_v25, %v11214_v2 }
 0x3ff   : > { %v13024_v45 = vpop.permute.xlu0 %13023  ;;  %16141 = vmatprep.subr.mxu0 %v11223_v8  ;;  %16808 = vmatprep.subr.bf16.mxu1 %v16807_v22 }
 0x400   : > { %16142 = vmatpush3.msra.mxu0 %v11223_v8  ;;  %16810 = vmatpush3.bf16.msra.mxu1 %v16807_v22  ;;  %v13033_v5 = vsel %vm283_vm1, %v13022_v58, %v13024_v45  ;;  %v21983_v45 = vld [vmem:[%s19142_s9 + $0x130] sm:$0xff] }
 0x401   : > { %18490 = vrot.lane.b32.xlu1 %v21461_v29, %s18972_s26  ;;  %v21878_v33 = vpop.permute.xlu1 %18340  ;;  %16740 = vmatprep.subr.bf16.mxu0 %v16739_v10  ;;  %v16811_v29 = vpack.c.bf16 %v21861_v54, %v21816_v51  ;;  %v21922_v51 = vpack.i.bf16 %v18804_v11, %v18800_v39 }
 0x402   : > { %12153 = vrot.lane.b32.xlu0 %v21881_v56, %s18972_s26  ;;  %13113 = vmatprep.mubr.f32.mxu1 %v18968_v16 }
 0x403   : > { %v21887_v43 = vpop.permute.xlu0 %18345  ;;  %16222 = vmatprep.subr.mxu1 %v13033_v5  ;;  %16144 = vmatmul.mubr.msk.f32.vlgmr.msra.gmra.mrb[26].mxu0 %vm302_vm0, %v18798_v20 }
 0x404   : > { %16742 = vmatpush1.bf16.msra.mxu0 %v16741_v15  ;;  %15250 = vmatmul.mubr.msk.f32.gmra.mrb[22].mxu1 %vm302_vm0, %v18798_v20  ;;  %v18348_v0 = vunpack.i.h.bf16 %v21887_v43  ;;  %v18347_v30 = vunpack.i.l.bf16 %v21887_v43 }
 0x405   : > { %13965 = vrot.lane.b32.xlu1 %v21487_v59, %s18972_s26  ;;  %16223 = vmatpush3.msra.mxu1 %v13033_v5  ;;  %v18351_v47 = vpop.permute.xlu1 %18350  ;;  %v18343_v59 = vunpack.i.h.bf16 %v21878_v33  ;;  %v21994_v5 = vpack.i.bf16 %v21868_v19, %v21861_v54 }
 0x406   : > { %13967 = vrot.lane.b32.xlu0 %v21501_v63, %s18972_s26  ;;  %11389 = vmatprep.subr.mxu0 %v21861_v54  ;;  %v18342_v63 = vunpack.i.l.bf16 %v21878_v33  ;;  %v18353_v12 = vunpack.i.h.bf16 %v18351_v47  ;;  %v18352_v25 = vunpack.i.l.bf16 %v18351_v47  ;;  %v11565_v49 = vsel %vm643_vm2, %v18347_v30, %v18348_v0 }
 0x407   : > { %v21900_v50 = vpop.permute.xlu0 %18355  ;;  %16224 = vmatprep.mubr.msk.f32.mxu1 %vm302_vm0, %v18797_v9  ;;  %16812 = vmatprep.subr.bf16.mxu1 %v16811_v29  ;;  %v21997_v29 = vld [vmem:[%s19142_s9 + $0x138] sm:$0xff] }
 0x408   : > { %11390 = vmatpush1.msra.mxu0 %v21881_v56  ;;  %11449 = vmatprep.mubr.f32.mxu0 %v18968_v16  ;;  %v11562_v41 = vsel %vm643_vm2, %v18342_v63, %v18343_v59  ;;  %v11561_v35 = vsel %vm643_vm2, %v18352_v25, %v18342_v63  ;;  %v11564_v27 = vsel %vm643_vm2, %v18353_v12, %v18347_v30  ;;  %v18358_v55 = vunpack.i.h.bf16 %v21900_v50  ;;  %v18813_v12 = vld [vmem:[#allocation5 + $0x20] sm:$0xff] }
 0x409   : > { %16225 = vmatmul.mubr.msk.f32.vlgmr.msra.gmra.mrb[24].mxu1 %vm302_vm0, %v18798_v20  ;;  %18495 = vrot.lane.b32.xlu1 %v21508_v34, %s18972_s26  ;;  %v21914_v44 = vpop.permute.xlu1 %18360  ;;  %v18807_v34 = vld [vmem:[%s19142_s9 + $0xf0] sm:$0xff]  ;;  %v18357_v9 = vunpack.i.l.bf16 %v21900_v50  ;;  %v16749_v13 = vpack.c.bf16 %v11564_v27, %v11561_v35 }
 0x40a   : > { %16814 = vmatpush1.bf16.msra.mxu1 %v16813_v31  ;;  %13963 = vrot.lane.b32.xlu0 %v21519_v6, %s18972_s26  ;;  %v16815_v53 = vpack.c.bf16 %v21868_v19, %v18807_v34  ;;  %v18363_v38 = vunpack.i.h.bf16 %v21914_v44  ;;  %v18362_v18 = vunpack.i.l.bf16 %v21914_v44  ;;  %v18812_v31 = vld [vmem:[%s19142_s9 + $0xe0] sm:$0xff] }
 0x40b   : > { %15202 = vmatmul.mubr.msk.f32.vlgmr.msra.gmra.mrb[22].mxu0 %vm302_vm0, %v21918_v57  ;;  %16744 = vmatprep.subr.bf16.mxu0 %v16743_v42  ;;  %v18366_v3 = vpop.permute.xlu0 %18365  ;;  %v13372_v40 = vsel %vm643_vm2, %v18357_v9, %v18358_v55  ;;  %v22005_v50 = vpack.i.bf16 %v21881_v56, %v18812_v31 }
 0x40c   : > { %16746 = vmatpush3.bf16.msra.mxu0 %v16743_v42  ;;  %13199 = vmatprep.subr.mxu1 %v21925_v36  ;;  %v18368_v17 = vunpack.i.h.bf16 %v18366_v3  ;;  %v18367_v46 = vunpack.i.l.bf16 %v18366_v3  ;;  %v13375_v1 = vsel %vm643_vm2, %v18362_v18, %v18363_v38 }
 0x40d   : > { %11455 = vmatprep.mubr.f32.mxu0 %v18968_v16  ;;  %13259 = vmatprep.mubr.f32.mxu1 %v18968_v16  ;;  %v11556_v52 = vpop.permute.xlu1 %11555  ;;  %v16819_v60 = vpack.c.bf16 %v13375_v1, %v13372_v40 }
 0x40e   : > { %13200 = vmatpush1.msra.mxu1 %v21519_v6  ;;  %12159 = vrot.lane.b32.xlu1 %v21940_v7, %s18972_s26  ;;  %v16747_v6 = vpack.c.bf16 %v11565_v49, %v11562_v41  ;;  %v13374_v10 = vsel %vm643_vm2, %v18368_v17, %v18362_v18  ;;  %v13371_v8 = vsel %vm643_vm2, %v18367_v46, %v18357_v9  ;;  %v18814_v49 = vld [vmem:[%s19142_s9 + $0xd8] sm:$0xff]  ;;  %v18816_v9 = vld [vmem:[#allocation5 + $0x28] sm:$0xff] }
 0x40f   : > { %18500 = vrot.lane.b32.xlu0 %v21922_v51, %s18973_s5  ;;  %15203 = vmatmul.mubr.msk.f32.gmra.mrb[24].mxu0 %vm302_vm0, %v18809_v14  ;;  %v21949_v61 = vpop.permute.xlu0 %11557  ;;  %v16821_v47 = vpack.c.bf16 %v13374_v10, %v13371_v8 }
 0x410   : > { %16150 = vmatprep.subr.mxu0 %v21868_v19  ;;  %15253 = vmatmul.mubr.msk.f32.vlgmr.msra.gmra.mrb[20].mxu1 %vm302_vm0, %v21918_v57  ;;  %v11568_v4 = vsel %vm643_vm2, %v11556_v52, %v21949_v61 }
 0x411   : > { %16816 = vmatprep.subr.bf16.mxu1 %v16815_v53  ;;  %16151 = vmatpush3.msra.mxu0 %v21868_v19  ;;  %v18371_v58 = vpop.permute.xlu1 %18370 }
 0x412   : > { %16818 = vmatpush3.bf16.msra.mxu1 %v16815_v53  ;;  %16748 = vmatprep.subr.bf16.mxu0 %v16747_v6  ;;  %v18373_v21 = vunpack.i.h.bf16 %v18371_v58  ;;  %v18372_v32 = vunpack.i.l.bf16 %v18371_v58 }
 0x413   : > { %16152 = vmatprep.mubr.msk.f32.mxu0 %vm302_vm0, %v21918_v57  ;;  %13265 = vmatprep.mubr.f32.mxu1 %v18968_v16  ;;  %v11554_v20 = vpop.permute.xlu0 %11553 }
 0x414   : > { %18505 = vrot.lane.b32.xlu1 %v21820_v48, %s18973_s5  ;;  %18510 = vrot.lane.b32.xlu0 %v21828_v28, %s18973_s5  ;;  %v11563_v22 = vsel %vm643_vm2, %v18343_v59, %v18372_v32  ;;  %v11566_v39 = vsel %vm643_vm2, %v18348_v0, %v18373_v21  ;;  %v11567_v15 = vsel %vm643_vm2, %v11554_v20, %v11556_v52 }
 0x415   : > { %16153 = vmatmul.mubr.msk.f32.vlgmr.msra.gmra.mrb[26].mxu0 %vm302_vm0, %v18809_v14  ;;  %15254 = vmatmul.mubr.msk.f32.gmra.mrb[22].mxu1 %vm302_vm0, %v18809_v14  ;;  %v13366_v2 = vpop.permute.xlu1 %13365  ;;  %v16751_v43 = vpack.c.bf16 %v11566_v39, %v11563_v22 }
 0x416   : > { %16750 = vmatpush1.bf16.msra.mxu0 %v16749_v13  ;;  %16231 = vmatprep.subr.mxu1 %v21983_v45 }
 0x417   : > { %11583 = vmatprep.subr.mxu0 %v11568_v4  ;;  %16232 = vmatpush3.msra.mxu1 %v21983_v45  ;;  %v21988_v33 = vpop.permute.xlu0 %13367 }
 0x418   : > { %16820 = vmatprep.subr.bf16.mxu1 %v16819_v60  ;;  %16233 = vmatprep.mubr.msk.f32.mxu1 %vm302_vm0, %v21918_v57  ;;  %v13378_v11 = vsel %vm643_vm2, %v13366_v2, %v21988_v33 }
 0x419   : > { %13969 = vrot.lane.b32.xlu1 %v21997_v29, %s18972_s26  ;;  %18515 = vrot.lane.b32.xlu0 %v21820_v48, %s18973_s5  ;;  %v18376_v42 = vpop.permute.xlu1 %18375  ;;  %s18892_s26 = sshll.u32 %s18976_s22, 4  ;;  %s18893_s26 = int_to_ptr.vmem [resolvable:$false] %s18892_s26 }
 0x41a   : > { %11584 = vmatpush1.msra.mxu0 %v11567_v15  ;;  %16234 = vmatmul.mubr.msk.f32.vlgmr.msra.gmra.mrb[24].mxu1 %vm302_vm0, %v18809_v14  ;;  %v18378_v59 = vunpack.i.h.bf16 %v18376_v42  ;;  %v18377_v63 = vunpack.i.l.bf16 %v18376_v42  ;;  %p18895_p10 = scmp.lt.s32.totalorder %s22528_s8, %s18893_s26 }
 0x41b   : > { %16822 = vmatpush1.bf16.msra.mxu1 %v16821_v47  ;;  %11643 = vmatprep.mubr.f32.mxu0 %v18968_v16  ;;  %v13364_v0 = vpop.permute.xlu0 %13363 }
 0x41c   : > { %16752 = vmatprep.subr.bf16.mxu0 %v16751_v43  ;;  %13393 = vmatprep.subr.mxu1 %v13378_v11  ;;  %v13377_v30 = vsel %vm643_vm2, %v13364_v0, %v13366_v2  ;;  %v13373_v57 = vsel %vm643_vm2, %v18358_v55, %v18377_v63  ;;  %v13376_v3 = vsel %vm643_vm2, %v18363_v38, %v18378_v59  ;;  %v18815_v38 = vld [vmem:[%s19142_s9 + $0xf8] sm:$0xff] }
 0x41d   : > { %18520 = vrot.lane.b32.xlu1 %v21994_v5, %s18973_s5  ;;  %18525 = vrot.lane.b32.xlu0 %v22005_v50, %s18973_s5  ;;  %v11560_v34 = vpop.permute.xlu1 %11559  ;;  %v16823_v53 = vpack.c.bf16 %v13376_v3, %v13373_v57  ;;  %v22034_v18 = vpack.i.bf16 %v18815_v38, %v18814_v49  ;;  %v22070_v22 = vpack.i.bf16 %v21940_v7, %v18815_v38 }
 0x41e   : > { %15206 = vmatmul.mubr.msk.f32.vlgmr.msra.gmra.mrb[22].mxu0 %vm302_vm0, %v18813_v12  ;;  %v11569_v25 = vsel %vm643_vm2, %v21949_v61, %v11560_v34  ;;  %13453 = vmatprep.mubr.f32.mxu1 %v18968_v16 }
 0x41f   : > { %16754 = vmatpush3.bf16.msra.mxu0 %v16751_v43  ;;  %13394 = vmatpush1.msra.mxu1 %v13377_v30  ;;  %v22024_v44 = vpop.permute.xlu0 %18380  ;;  %v22083_v43 = vld [vmem:[%s19142_s9 + $0x120] sm:$0xff] }
 0x420   : > { %v18383_v52 = vunpack.i.h.bf16 %v22024_v44  ;;  %v18382_v41 = vunpack.i.l.bf16 %v22024_v44  ;;  %16159 = vmatprep.subr.mxu0 %v11569_v25  ;;  %16824 = vmatprep.subr.bf16.mxu1 %v16823_v53 }
 0x421   : > { %12355 = vrot.lane.b32.xlu1 %v21861_v54, %s18973_s5  ;;  %12357 = vrot.lane.b32.xlu0 %v21868_v19, %s18973_s5  ;;  %v22036_v14 = vpop.permute.xlu1 %18385 }
 0x422   : > { %15257 = vmatmul.mubr.msk.f32.vlgmr.msra.gmra.mrb[20].mxu1 %vm302_vm0, %v18813_v12  ;;  %v18388_v61 = vunpack.i.h.bf16 %v22036_v14  ;;  %v18387_v6 = vunpack.i.l.bf16 %v22036_v14  ;;  %11649 = vmatprep.mubr.f32.mxu0 %v18968_v16  ;;  %v11762_v58 = vsel %vm850_vm3, %v18382_v41, %v18383_v52 }
 0x423   : > { %16160 = vmatpush3.msra.mxu0 %v11569_v25  ;;  %16826 = vmatpush3.bf16.msra.mxu1 %v16823_v53  ;;  %v18391_v35 = vpop.permute.xlu0 %18390 }
 0x424   : > { %v18393_v27 = vunpack.i.h.bf16 %v18391_v35  ;;  %v18392_v55 = vunpack.i.l.bf16 %v18391_v35  ;;  %15207 = vmatmul.mubr.msk.f32.gmra.mrb[24].mxu0 %vm302_vm0, %v18816_v9  ;;  %v11765_v17 = vsel %vm850_vm3, %v18387_v6, %v18388_v61  ;;  %13459 = vmatprep.mubr.f32.mxu1 %v18968_v16 }
 0x425   : > { %18530 = vrot.lane.b32.xlu1 %v22034_v18, %s18973_s5  ;;  %12353 = vrot.lane.b32.xlu0 %v21881_v56, %s18973_s5  ;;  %v13370_v46 = vpop.permute.xlu1 %13369  ;;  %v16755_v21 = vpack.c.bf16 %v11765_v17, %v11762_v58 }
 0x426   : > { %v11764_v32 = vsel %vm850_vm3, %v18393_v27, %v18387_v6  ;;  %v11761_v20 = vsel %vm850_vm3, %v18392_v55, %v18382_v41  ;;  %16161 = vmatprep.mubr.msk.f32.mxu0 %vm302_vm0, %v18813_v12  ;;  %v13379_v1 = vsel %vm643_vm2, %v21988_v33, %v13370_v46  ;;  %15258 = vmatmul.mubr.msk.f32.gmra.mrb[22].mxu1 %vm302_vm0, %v18816_v9 }
 0x427   : > { %v16757_v13 = vpack.c.bf16 %v11764_v32, %v11761_v20  ;;  %v22060_v4 = vpop.permute.xlu0 %18395  ;;  %16756 = vmatprep.subr.bf16.mxu0 %v16755_v21  ;;  %16240 = vmatprep.subr.mxu1 %v13379_v1  ;;  %v22129_v20 = vld [vmem:[#allocation5 + $0x38] sm:$0xff] }
 0x428   : > { %16162 = vmatmul.mubr.msk.f32.vlgmr.msra.gmra.mrb[26].mxu0 %vm302_vm0, %v18816_v9  ;;  %16241 = vmatpush3.msra.mxu1 %v13379_v1  ;;  %v18398_v40 = vunpack.i.h.bf16 %v22060_v4  ;;  %v18397_v2 = vunpack.i.l.bf16 %v22060_v4 }
 0x429   : > { %14165 = vrot.lane.b32.xlu1 %v21925_v36, %s18973_s5  ;;  %14167 = vrot.lane.b32.xlu0 %v21983_v45, %s18973_s5 }
 0x42a   : > { %16758 = vmatpush1.bf16.msra.mxu0 %v16757_v13  ;;  %v22072_v39 = vpop.permute.xlu1 %18400  ;;  %16242 = vmatprep.mubr.msk.f32.mxu1 %vm302_vm0, %v18813_v12  ;;  %v13572_v47 = vsel %vm850_vm3, %v18397_v2, %v18398_v40 }
 0x42b   : > { %v18403_v10 = vunpack.i.h.bf16 %v22072_v39  ;;  %v18402_v8 = vunpack.i.l.bf16 %v22072_v39  ;;  %v18406_v60 = vpop.permute.xlu0 %18405  ;;  %16243 = vmatmul.mubr.msk.f32.vlgmr.msra.gmra.mrb[24].mxu1 %vm302_vm0, %v18816_v9  ;;  %11843 = vmatprep.mubr.f32.mxu0 %v18968_v16  ;;  %v22114_v9 = vld [vmem:[#allocation5 + $0x30] sm:$0xff] }
 0x42c   : > { %v18408_v15 = vunpack.i.h.bf16 %v18406_v60  ;;  %v18407_v33 = vunpack.i.l.bf16 %v18406_v60  ;;  %13653 = vmatprep.mubr.f32.mxu1 %v18968_v16 }
 0x42d   : > { %18535 = vrot.lane.b32.xlu1 %v22070_v22, %s18973_s5  ;;  %14163 = vrot.lane.b32.xlu0 %v22083_v43, %s18973_s5  ;;  %v13575_v31 = vsel %vm850_vm3, %v18402_v8, %v18403_v10 }
 0x42e   : > { %v13574_v11 = vsel %vm850_vm3, %v18408_v15, %v18402_v8  ;;  %v13571_v42 = vsel %vm850_vm3, %v18407_v33, %v18397_v2  ;;  %v11756_v59 = vpop.permute.xlu1 %11755  ;;  %v16827_v63 = vpack.c.bf16 %v13575_v31, %v13572_v47 }
 0x42f   : > { %v16829_v0 = vpack.c.bf16 %v13574_v11, %v13571_v42  ;;  %v22095_v30 = vpop.permute.xlu0 %11757 }
 0x430   : > { %v11768_v57 = vsel %vm850_vm3, %v11756_v59, %v22095_v30  ;;  %16828 = vmatprep.subr.bf16.mxu1 %v16827_v63 }
 0x431   : > { %12359 = vrot.lane.b32.xlu1 %v21940_v7, %s18973_s5  ;;  %18540 = vrot.lane.b32.xlu0 %v21922_v51, %s18974_s10 }
 0x432   : > { %11783 = vmatprep.subr.mxu0 %v11768_v57  ;;  %16830 = vmatpush1.bf16.msra.mxu1 %v16829_v0  ;;  %v18411_v3 = vpop.permute.xlu1 %18410 }
 0x433   : > { %v18413_v34 = vunpack.i.h.bf16 %v18411_v3  ;;  %v18412_v53 = vunpack.i.l.bf16 %v18411_v3  ;;  %v11754_v12 = vpop.permute.xlu0 %11753  ;;  %v9225_v25 = vpop.f32.mrb[16].mxu0 }
 0x434   : > { %v11767_v41 = vsel %vm850_vm3, %v11754_v12, %v11756_v59  ;;  %v9227_v49 = vpop.f32.mrb[17].mxu0  ;;  %v9317_v33 = vadd.f32 %v9225_v25, %v19675_v24 }
 0x435   : > { %18545 = vrot.lane.b32.xlu1 %v21820_v48, %s18974_s10  ;;  %18550 = vrot.lane.b32.xlu0 %v21828_v28, %s18974_s10  ;;  %v11763_v38 = vsel %vm850_vm3, %v18383_v52, %v18412_v53  ;;  %v11766_v6 = vsel %vm850_vm3, %v18388_v61, %v18413_v34  ;;  %v9318_v42 = vadd.f32 %v9227_v49, %v19675_v24 }
 0x436   : > { %11784 = vmatpush1.msra.mxu0 %v11767_v41  ;;  %v16759_v35 = vpack.c.bf16 %v11766_v6, %v11763_v38 }
 0x437   : > { %v13566_v27 = vpop.permute.xlu1 %13565  ;;  %v9231_v55 = vpop.f32.mrb[18].mxu0  ;;  %15210 = vmatmul.mubr.msk.f32.vlgmr.msra.gmra.mrb[22].mxu0 %vm302_vm0, %v22114_v9 }
 0x438   : > { %v22118_v58 = vpop.permute.xlu0 %13567  ;;  %16760 = vmatprep.subr.bf16.mxu0 %v16759_v35  ;;  %v9320_v44 = vadd.f32 %v9231_v55, %v19673_v23  ;;  %v9233_v17 = vpop.f32.mrb[19].mxu0  ;;  %11849 = vmatprep.mubr.f32.mxu0 %v18968_v16 }
 0x439   : > { %14169 = vrot.lane.b32.xlu1 %v21997_v29, %s18973_s5  ;;  %18555 = vrot.lane.b32.xlu0 %v21820_v48, %s18974_s10  ;;  %v13578_v52 = vsel %vm850_vm3, %v13566_v27, %v22118_v58  ;;  %v9321_v14 = vadd.f32 %v9233_v17, %v19673_v23  ;;  %s18894_s5 = scalar_lea.vmem %s18893_s26, 6144 }
 0x43a   : > { %13593 = vmatprep.subr.mxu1 %v13578_v52  ;;  %v9326_v61 = vmul.f32 0.5, %v9320_v44  ;;  %16762 = vmatpush3.bf16.msra.mxu0 %v16759_v35  ;;  %p18896_p13 = scmp.lt.s32.totalorder %s18894_s5, %s18888_s4 }
 0x43b   : > { %v18416_v46 = vpop.permute.xlu1 %18415  ;;  %v9327_v21 = vmul.f32 0.5, %v9321_v14  ;;  %v16055_v32 = vpop.f32.mrb[20].mxu0  ;;  %15211 = vmatmul.mubr.msk.f32.gmra.mrb[24].mxu0 %vm302_vm0, %v22129_v20 }
 0x43c   : > { %18667 = vtanh.f32 %v9326_v61  ;;  %v18418_v1 = vunpack.i.h.bf16 %v18416_v46  ;;  %v18417_v13 = vunpack.i.l.bf16 %v18416_v46  ;;  %v13564_v2 = vpop.permute.xlu0 %13563  ;;  %v9322_v8 = vadd.f32 %v16055_v32, %v19673_v23  ;;  %v9302_v60 = vpop.f32.mrb[21].mxu0  ;;  %16170 = vmatprep.mubr.msk.f32.mxu0 %vm302_vm0, %v22114_v9  ;;  %p18897_p3 = por %p18896_p13, %p18895_p10 }
 0x43d   : > { %18560 = vrot.lane.b32.xlu1 %v21994_v5, %s18974_s10  ;;  %18565 = vrot.lane.b32.xlu0 %v22005_v50, %s18974_s10  ;;  %v13577_v15 = vsel %vm850_vm3, %v13564_v2, %v13566_v27  ;;  %18669 = vtanh.f32 %v9327_v21  ;;  %v9319_v39 = vadd.f32 %v9302_v60, %v19675_v24 }
 0x43e   : > { %13594 = vmatpush1.msra.mxu1 %v13577_v15  ;;  %v9328_v47 = vmul.f32 0.5, %v9322_v8  ;;  %v13573_v31 = vsel %vm850_vm3, %v18398_v40, %v18417_v13  ;;  %v13576_v11 = vsel %vm850_vm3, %v18403_v10, %v18418_v1  ;;  %p18898_p7 = pnand %p18897_p3, %p18891_p8 }
 0x43f   : > { %v11760_v59 = vpop.permute.xlu1 %11759  ;;  %v16831_v63 = vpack.c.bf16 %v13576_v11, %v13573_v31  ;;  %15261 = vmatmul.mubr.msk.f32.vlgmr.msra.gmra.mrb[20].mxu1 %vm302_vm0, %v22114_v9 }
 0x440   : > { %18671 = vtanh.f32 %v9328_v47  ;;  %v22151_v0 = vpop.permute.xlu0 %18420  ;;  %v11769_v57 = vsel %vm850_vm3, %v22095_v30, %v11760_v59  ;;  %13659 = vmatprep.mubr.f32.mxu1 %v18968_v16 }
 0x441   : > { %12555 = vrot.lane.b32.xlu1 %v21861_v54, %s18974_s10  ;;  %12557 = vrot.lane.b32.xlu0 %v21868_v19, %s18974_s10  ;;  %18673 = vtanh.f32 %v9317_v33  ;;  %v18423_v4 = vunpack.i.h.bf16 %v22151_v0  ;;  %v18422_v40 = vunpack.i.l.bf16 %v22151_v0 }
 0x442   : > { %16168 = vmatprep.subr.mxu0 %v11769_v57  ;;  %16832 = vmatprep.subr.bf16.mxu1 %v16831_v63  ;;  %18675 = vtanh.f32 %v9318_v42 }
 0x443   : > { %16169 = vmatpush3.msra.mxu0 %v11769_v57  ;;  %16834 = vmatpush3.bf16.msra.mxu1 %v16831_v63  ;;  %v22163_v10 = vpop.permute.xlu1 %18425  ;;  %18677 = vtanh.f32 %v9319_v39  ;;  %v11962_v41 = vsel %vm1057_vm4, %v18422_v40, %v18423_v4 }
 0x444   : > { %v18428_v30 = vunpack.i.h.bf16 %v22163_v10  ;;  %v18427_v3 = vunpack.i.l.bf16 %v22163_v10  ;;  %v18431_v34 = vpop.permute.xlu0 %18430  ;;  %16171 = vmatmul.mubr.msk.f32.vlgmr.msra.gmra.mrb[26].mxu0 %vm302_vm0, %v22129_v20  ;;  %15262 = vmatmul.mubr.msk.f32.gmra.mrb[22].mxu1 %vm302_vm0, %v22129_v20 }
 0x445   : > { %18570 = vrot.lane.b32.xlu1 %v22034_v18, %s18974_s10  ;;  %12553 = vrot.lane.b32.xlu0 %v21881_v56, %s18974_s10  ;;  %v18433_v53 = vunpack.i.h.bf16 %v18431_v34  ;;  %v18432_v12 = vunpack.i.l.bf16 %v18431_v34 }
 0x446   : > { %v18668_v25 = vpop.eup %18667  ;;  %v11965_v49 = vsel %vm1057_vm4, %v18427_v3, %v18428_v30  ;;  %16251 = vmatprep.mubr.msk.f32.mxu1 %vm302_vm0, %v22114_v9  ;;  %12043 = vmatprep.mubr.f32.mxu0 %v18968_v16 }
 0x447   : > { %v18670_v38 = vpop.eup %18669  ;;  %v9332_v6 = vadd.f32 1.0, %v18668_v25  ;;  %v11964_v35 = vsel %vm1057_vm4, %v18433_v53, %v18427_v3  ;;  %v11961_v27 = vsel %vm1057_vm4, %v18432_v12, %v18422_v40  ;;  %v13570_v55 = vpop.permute.xlu1 %13569  ;;  %v16763_v44 = vpack.c.bf16 %v11965_v49, %v11962_v41 }
 0x448   : > { %v9333_v17 = vadd.f32 1.0, %v18670_v38  ;;  %v16765_v52 = vpack.c.bf16 %v11964_v35, %v11961_v27  ;;  %v22186_v14 = vpop.permute.xlu0 %18435  ;;  %v13579_v61 = vsel %vm850_vm3, %v22118_v58, %v13570_v55 }
 0x449   : > { %v9335_v46 = vmul.f32 0.5, %v9332_v6  ;;  %14365 = vrot.lane.b32.xlu1 %v21925_v36, %s18974_s10  ;;  %14367 = vrot.lane.b32.xlu0 %v21983_v45, %s18974_s10  ;;  %v18438_v13 = vunpack.i.h.bf16 %v22186_v14  ;;  %v18437_v2 = vunpack.i.l.bf16 %v22186_v14 }
 0x44a   : > { %v18672_v9 = vpop.eup %18671  ;;  %v9336_v21 = vmul.f32 0.5, %v9333_v17  ;;  %16764 = vmatprep.subr.bf16.mxu0 %v16763_v44  ;;  %16249 = vmatprep.subr.mxu1 %v13579_v61 }
 0x44b   : > { %v9341_v32 = vsub.f32 1.0, %v9335_v46  ;;  %v9334_v1 = vadd.f32 1.0, %v18672_v9  ;;  %16766 = vmatpush1.bf16.msra.mxu0 %v16765_v52  ;;  %16250 = vmatpush3.msra.mxu1 %v13579_v61  ;;  %v22196_v58 = vpop.permute.xlu1 %18440  ;;  %v18674_v8 = vpop.eup %18673  ;;  %v9338_v57 = vmul.f32 %v9335_v46, %v21724_v62  ;;  %v13772_v62 = vsel %vm1057_vm4, %v18437_v2, %v18438_v13 }
 0x44c   : > { %v9342_v60 = vsub.f32 1.0, %v9336_v21  ;;  %v18443_v15 = vunpack.i.h.bf16 %v22196_v58  ;;  %v18442_v33 = vunpack.i.l.bf16 %v22196_v58  ;;  %v18446_v47 = vpop.permute.xlu0 %18445  ;;  %16252 = vmatmul.mubr.msk.f32.vlgmr.msra.gmra.mrb[24].mxu1 %vm302_vm0, %v22129_v20  ;;  %v18676_v31 = vpop.eup %18675  ;;  %v9339_v40 = vmul.f32 %v9336_v21, %v21726_v26 }
 0x44d   : > { %v9344_v11 = vmul.f32 %v18674_v8, %v9341_v32  ;;  %v9337_v42 = vmul.f32 0.5, %v9334_v1  ;;  %18575 = vrot.lane.b32.xlu1 %v22070_v22, %s18974_s10  ;;  %14363 = vrot.lane.b32.xlu0 %v22083_v43, %s18974_s10  ;;  %v18448_v59 = vunpack.i.h.bf16 %v18446_v47  ;;  %v18447_v63 = vunpack.i.l.bf16 %v18446_v47  ;;  %v18678_v26 = vpop.eup %18677  ;;  %v18820_v1 = vld [vmem:[#allocation5 + $0x40] sm:$0xff]  ;;  %v18821_v8 = vld [vmem:[#allocation5 + $0x48] sm:$0xff] }
 0x44e   : > { %v9345_v39 = vmul.f32 %v18676_v31, %v9342_v60  ;;  %v13775_v20 = vsel %vm1057_vm4, %v18442_v33, %v18443_v15  ;;  %13853 = vmatprep.mubr.f32.mxu1 %v18968_v16 }
 0x44f   : > { %v9343_v3 = vsub.f32 1.0, %v9337_v42  ;;  %v13774_v34 = vsel %vm1057_vm4, %v18448_v59, %v18442_v33  ;;  %v13771_v53 = vsel %vm1057_vm4, %v18447_v63, %v18437_v2  ;;  %v11956_v12 = vpop.permute.xlu1 %11955  ;;  %v16835_v49 = vpack.c.bf16 %v13775_v20, %v13772_v62 }
 0x450   : > { %v16837_v25 = vpack.c.bf16 %v13774_v34, %v13771_v53  ;;  %v11958_v41 = vpop.permute.xlu0 %11957  ;;  %v22217_v38 = vadd.f32 %v9344_v11, %v9338_v57  ;;  %v22219_v6 = vadd.f32 %v9345_v39, %v9339_v40  ;;  %v9340_v35 = vmul.f32 %v9337_v42, %v21739_v37 }
 0x451   : > { %12559 = vrot.lane.b32.xlu1 %v21940_v7, %s18974_s10  ;;  %18580 = vrot.lane.b32.xlu0 %v21922_v51, %s18975_s11  ;;  %v11968_v27 = vsel %vm1057_vm4, %v11956_v12, %v11958_v41  ;;  %v9346_v55 = vmul.f32 %v18678_v26, %v9343_v3 }
 0x452   : > { %11983 = vmatprep.subr.mxu0 %v11968_v27  ;;  %16836 = vmatprep.subr.bf16.mxu1 %v16835_v49  ;;  %15132 = vst [vmem:[%s20346_s25 + $0x60] sm:$0xff] %v22217_v38  ;;  %15133 = vst [vmem:[%s20346_s25 + $0x68] sm:$0xff] %v22219_v6 }
 0x453   : > { %16838 = vmatpush1.bf16.msra.mxu1 %v16837_v25  ;;  %v18451_v44 = vpop.permute.xlu1 %18450  ;;  %v22231_v17 = vadd.f32 %v9346_v55, %v9340_v35 }
 0x454   : > { %v18453_v37 = vunpack.i.h.bf16 %v18451_v44  ;;  %v18452_v52 = vunpack.i.l.bf16 %v18451_v44  ;;  %v11954_v61 = vpop.permute.xlu0 %11953 }
 0x455   : > { %18585 = vrot.lane.b32.xlu1 %v21820_v48, %s18975_s11  ;;  %18590 = vrot.lane.b32.xlu0 %v21828_v28, %s18975_s11  ;;  %v11967_v51 = vsel %vm1057_vm4, %v11954_v61, %v11956_v12  ;;  %15134 = vst [vmem:[%s20346_s25 + $0x70] sm:$0xff] %v22231_v17 }
 0x456   : > { %11984 = vmatpush1.msra.mxu0 %v11967_v51  ;;  %v11963_v46 = vsel %vm1057_vm4, %v18423_v4, %v18452_v52  ;;  %v11966_v9 = vsel %vm1057_vm4, %v18428_v30, %v18453_v37 }
 0x457   : > { %v13766_v21 = vpop.permute.xlu1 %13765  ;;  %v16767_v32 = vpack.c.bf16 %v11966_v9, %v11963_v46  ;;  %15214 = vmatmul.mubr.msk.f32.vlgmr.msra.gmra.mrb[22].mxu0 %vm302_vm0, %v18820_v1 }
 0x458   : > { %v13768_v2 = vpop.permute.xlu0 %13767  ;;  %12049 = vmatprep.mubr.f32.mxu0 %v18968_v16 }
 0x459   : > { %14369 = vrot.lane.b32.xlu1 %v21997_v29, %s18974_s10  ;;  %18595 = vrot.lane.b32.xlu0 %v21820_v48, %s18975_s11  ;;  %v13778_v28 = vsel %vm1057_vm4, %v13766_v21, %v13768_v2 }
 0x45a   : > { %16768 = vmatprep.subr.bf16.mxu0 %v16767_v32  ;;  %13793 = vmatprep.subr.mxu1 %v13778_v28 }
 0x45b   : > { %16770 = vmatpush3.bf16.msra.mxu0 %v16767_v32  ;;  %v18456_v0 = vpop.permute.xlu1 %18455 }
 0x45c   : > { %v18458_v4 = vunpack.i.h.bf16 %v18456_v0  ;;  %v18457_v10 = vunpack.i.l.bf16 %v18456_v0  ;;  %v13764_v30 = vpop.permute.xlu0 %13763  ;;  %15215 = vmatmul.mubr.msk.f32.gmra.mrb[24].mxu0 %vm302_vm0, %v18821_v8 }
 0x45d   : > { %18600 = vrot.lane.b32.xlu1 %v21994_v5, %s18975_s11  ;;  %18605 = vrot.lane.b32.xlu0 %v22005_v50, %s18975_s11  ;;  %v13777_v48 = vsel %vm1057_vm4, %v13764_v30, %v13766_v21 }
 0x45e   : > { %13794 = vmatpush1.msra.mxu1 %v13777_v48  ;;  %v13773_v60 = vsel %vm1057_vm4, %v18438_v13, %v18457_v10  ;;  %v13776_v33 = vsel %vm1057_vm4, %v18443_v15, %v18458_v4  ;;  %16179 = vmatprep.mubr.msk.f32.mxu0 %vm302_vm0, %v18820_v1  ;;  %v18823_v4 = vld [vmem:[#allocation5 + $0x58] sm:$0xff] }
 0x45f   : > { %v11960_v47 = vpop.permute.xlu1 %11959  ;;  %v16839_v31 = vpack.c.bf16 %v13776_v33, %v13773_v60  ;;  %15265 = vmatmul.mubr.msk.f32.vlgmr.msra.gmra.mrb[20].mxu1 %vm302_vm0, %v18820_v1 }
 0x460   : > { %v22267_v5 = vpop.permute.xlu0 %18460  ;;  %v11969_v50 = vsel %vm1057_vm4, %v11958_v41, %v11960_v47  ;;  %13859 = vmatprep.mubr.f32.mxu1 %v18968_v16 }
 0x461   : > { %12755 = vrot.lane.b32.xlu1 %v21861_v54, %s18975_s11  ;;  %12757 = vrot.lane.b32.xlu0 %v21868_v19, %s18975_s11  ;;  %v18463_v14 = vunpack.i.h.bf16 %v22267_v5  ;;  %v18462_v13 = vunpack.i.l.bf16 %v22267_v5 }
 0x462   : > { %16177 = vmatprep.subr.mxu0 %v11969_v50  ;;  %16840 = vmatprep.subr.bf16.mxu1 %v16839_v31 }
 0x463   : > { %16178 = vmatpush3.msra.mxu0 %v11969_v50  ;;  %16842 = vmatpush3.bf16.msra.mxu1 %v16839_v31  ;;  %v18466_v58 = vpop.permute.xlu1 %18465  ;;  %v12162_v59 = vsel %vm1264_vm5, %v18462_v13, %v18463_v14 }
 0x464   : > { %v18468_v15 = vunpack.i.h.bf16 %v18466_v58  ;;  %v18467_v11 = vunpack.i.l.bf16 %v18466_v58  ;;  %v18471_v42 = vpop.permute.xlu0 %18470  ;;  %16180 = vmatmul.mubr.msk.f32.vlgmr.msra.gmra.mrb[26].mxu0 %vm302_vm0, %v18821_v8  ;;  %15266 = vmatmul.mubr.msk.f32.gmra.mrb[22].mxu1 %vm302_vm0, %v18821_v8 }
 0x465   : > { %12753 = vrot.lane.b32.xlu1 %v21881_v56, %s18975_s11  ;;  %18610 = vrot.lane.b32.xlu0 %v22034_v18, %s18975_s11  ;;  %v18473_v54 = vunpack.i.h.bf16 %v18471_v42  ;;  %v18472_v19 = vunpack.i.l.bf16 %v18471_v42 }
 0x466   : > { %v12165_v63 = vsel %vm1264_vm5, %v18467_v11, %v18468_v15  ;;  %16260 = vmatprep.mubr.msk.f32.mxu1 %vm302_vm0, %v18820_v1  ;;  %12243 = vmatprep.mubr.f32.mxu0 %v18968_v16  ;;  %v18822_v1 = vld [vmem:[#allocation5 + $0x50] sm:$0xff] }
 0x467   : > { %v12164_v57 = vsel %vm1264_vm5, %v18473_v54, %v18467_v11  ;;  %v12161_v40 = vsel %vm1264_vm5, %v18472_v19, %v18462_v13  ;;  %v13770_v56 = vpop.permute.xlu1 %13769  ;;  %v16771_v39 = vpack.c.bf16 %v12165_v63, %v12162_v59 }
 0x468   : > { %v16773_v20 = vpack.c.bf16 %v12164_v57, %v12161_v40  ;;  %v22291_v18 = vpop.permute.xlu0 %18475  ;;  %v13779_v3 = vsel %vm1057_vm4, %v13768_v2, %v13770_v56 }
 0x469   : > { %14565 = vrot.lane.b32.xlu1 %v21925_v36, %s18975_s11  ;;  %14567 = vrot.lane.b32.xlu0 %v21983_v45, %s18975_s11  ;;  %v18478_v34 = vunpack.i.h.bf16 %v22291_v18  ;;  %v18477_v53 = vunpack.i.l.bf16 %v22291_v18 }
 0x46a   : > { %16772 = vmatprep.subr.bf16.mxu0 %v16771_v39  ;;  %16258 = vmatprep.subr.mxu1 %v13779_v3 }
 0x46b   : > { %16774 = vmatpush1.bf16.msra.mxu0 %v16773_v20  ;;  %16259 = vmatpush3.msra.mxu1 %v13779_v3  ;;  %v18481_v12 = vpop.permute.xlu1 %18480  ;;  %v13972_v41 = vsel %vm1264_vm5, %v18477_v53, %v18478_v34 }
 0x46c   : > { %v18483_v62 = vunpack.i.h.bf16 %v18481_v12  ;;  %v18482_v26 = vunpack.i.l.bf16 %v18481_v12  ;;  %v18486_v25 = vpop.permute.xlu0 %18485  ;;  %16261 = vmatmul.mubr.msk.f32.vlgmr.msra.gmra.mrb[24].mxu1 %vm302_vm0, %v18821_v8 }
 0x46d   : > { %14563 = vrot.lane.b32.xlu1 %v22083_v43, %s18975_s11  ;;  %18615 = vrot.lane.b32.xlu0 %v22070_v22, %s18975_s11  ;;  %v18488_v36 = vunpack.i.h.bf16 %v18486_v25  ;;  %v18487_v45 = vunpack.i.l.bf16 %v18486_v25 }
 0x46e   : > { %v13975_v49 = vsel %vm1264_vm5, %v18482_v26, %v18483_v62  ;;  %14053 = vmatprep.mubr.f32.mxu1 %v18968_v16 }
 0x46f   : > { %v13974_v35 = vsel %vm1264_vm5, %v18488_v36, %v18482_v26  ;;  %v13971_v27 = vsel %vm1264_vm5, %v18487_v45, %v18477_v53  ;;  %v12156_v55 = vpop.permute.xlu1 %12155  ;;  %v16843_v44 = vpack.c.bf16 %v13975_v49, %v13972_v41 }
 0x470   : > { %v16845_v37 = vpack.c.bf16 %v13974_v35, %v13971_v27  ;;  %v12158_v52 = vpop.permute.xlu0 %12157 }
 0x471   : > { %12759 = vrot.lane.b32.xlu1 %v21940_v7, %s18975_s11  ;;  %14569 = vrot.lane.b32.xlu0 %v21997_v29, %s18975_s11  ;;  %v12168_v22 = vsel %vm1264_vm5, %v12156_v55, %v12158_v52 }
 0x472   : > { %12183 = vmatprep.subr.mxu0 %v12168_v22  ;;  %16844 = vmatprep.subr.bf16.mxu1 %v16843_v44 }
 0x473   : > { %16846 = vmatpush1.bf16.msra.mxu1 %v16845_v37  ;;  %v18491_v43 = vpop.permute.xlu1 %18490 }
 0x474   : > { %v18493_v61 = vunpack.i.h.bf16 %v18491_v43  ;;  %v18492_v51 = vunpack.i.l.bf16 %v18491_v43  ;;  %v12154_v46 = vpop.permute.xlu0 %12153 }
 0x475   : > { %v12167_v9 = vsel %vm1264_vm5, %v12154_v46, %v12156_v55 }
 0x476   : > { %12184 = vmatpush1.msra.mxu0 %v12167_v9  ;;  %v12163_v21 = vsel %vm1264_vm5, %v18463_v14, %v18492_v51  ;;  %v12166_v7 = vsel %vm1264_vm5, %v18468_v15, %v18493_v61 }
 0x477   : > { %v13966_v32 = vpop.permute.xlu1 %13965  ;;  %v16775_v29 = vpack.c.bf16 %v12166_v7, %v12163_v21  ;;  %15218 = vmatmul.mubr.msk.f32.vlgmr.msra.gmra.mrb[22].mxu0 %vm302_vm0, %v18822_v1 }
 0x478   : > { %v13968_v2 = vpop.permute.xlu0 %13967  ;;  %12249 = vmatprep.mubr.f32.mxu0 %v18968_v16 }
 0x479   : > { %16776 = vmatprep.subr.bf16.mxu0 %v16775_v29  ;;  %v13978_v28 = vsel %vm1264_vm5, %v13966_v32, %v13968_v2 }
 0x47a   : > { %13993 = vmatprep.subr.mxu1 %v13978_v28  ;;  %16778 = vmatpush3.bf16.msra.mxu0 %v16775_v29 }
 0x47b   : > { %v18496_v0 = vpop.permute.xlu1 %18495  ;;  %15219 = vmatmul.mubr.msk.f32.gmra.mrb[24].mxu0 %vm302_vm0, %v18823_v4 }
 0x47c   : > { %v18498_v10 = vunpack.i.h.bf16 %v18496_v0  ;;  %v18497_v30 = vunpack.i.l.bf16 %v18496_v0  ;;  %v13964_v8 = vpop.permute.xlu0 %13963  ;;  %16188 = vmatprep.mubr.msk.f32.mxu0 %vm302_vm0, %v18822_v1 }
 0x47d   : > { %v13977_v48 = vsel %vm1264_vm5, %v13964_v8, %v13966_v32  ;;  %v18824_v32 = vld [vmem:[#allocation5 + $0x60] sm:$0xff] }
 0x47e   : > { %13994 = vmatpush1.msra.mxu1 %v13977_v48  ;;  %v13973_v60 = vsel %vm1264_vm5, %v18478_v34, %v18497_v30  ;;  %v13976_v33 = vsel %vm1264_vm5, %v18483_v62, %v18498_v10  ;;  %v18825_v10 = vld [vmem:[#allocation5 + $0x68] sm:$0xff] }
 0x47f   : > { %v16847_v47 = vpack.c.bf16 %v13976_v33, %v13973_v60  ;;  %15269 = vmatmul.mubr.msk.f32.vlgmr.msra.gmra.mrb[20].mxu1 %vm302_vm0, %v18822_v1 }
 0x480   : > { %v12160_v31 = vpop.permute.xlu1 %12159  ;;  %14059 = vmatprep.mubr.f32.mxu1 %v18968_v16 }
 0x481   : > { %v18501_v5 = vpop.permute.xlu0 %18500  ;;  %v12169_v50 = vsel %vm1264_vm5, %v12158_v52, %v12160_v31  ;;  %16848 = vmatprep.subr.bf16.mxu1 %v16847_v47 }
 0x482   : > { %16186 = vmatprep.subr.mxu0 %v12169_v50  ;;  %16850 = vmatpush3.bf16.msra.mxu1 %v16847_v47  ;;  %v18503_v14 = vunpack.i.h.bf16 %v18501_v5  ;;  %v18502_v13 = vunpack.i.l.bf16 %v18501_v5 }
 0x483   : > { %16187 = vmatpush3.msra.mxu0 %v12169_v50  ;;  %15270 = vmatmul.mubr.msk.f32.gmra.mrb[22].mxu1 %vm302_vm0, %v18823_v4 }
 0x484   : > { %16189 = vmatmul.mubr.msk.f32.vlgmr.msra.gmra.mrb[26].mxu0 %vm302_vm0, %v18823_v4  ;;  %16269 = vmatprep.mubr.msk.f32.mxu1 %vm302_vm0, %v18822_v1  ;;  %v12362_v57 = vsel %vm1471_vm6, %v18502_v13, %v18503_v14 }
 0x485   : > { %12443 = vmatprep.mubr.f32.mxu0 %v18968_v16 }
 0x486   : > { %v18506_v58 = vpop.permute.xlu1 %18505  ;;  %v18511_v15 = vpop.permute.xlu0 %18510 }
 0x487   : > { %v18508_v11 = vunpack.i.h.bf16 %v18506_v58  ;;  %v18507_v42 = vunpack.i.l.bf16 %v18506_v58  ;;  %v18513_v54 = vunpack.i.h.bf16 %v18511_v15  ;;  %v18512_v19 = vunpack.i.l.bf16 %v18511_v15 }
 0x489   : > { %v12364_v59 = vsel %vm1471_vm6, %v18513_v54, %v18507_v42  ;;  %v12361_v63 = vsel %vm1471_vm6, %v18512_v19, %v18502_v13  ;;  %v12365_v40 = vsel %vm1471_vm6, %v18507_v42, %v18508_v11 }
 0x48a   : > { %v16781_v56 = vpack.c.bf16 %v12364_v59, %v12361_v63  ;;  %v16779_v39 = vpack.c.bf16 %v12365_v40, %v12362_v57 }
 0x48b   : > { %v13970_v20 = vpop.permute.xlu1 %13969  ;;  %v18516_v18 = vpop.permute.xlu0 %18515 }
 0x48c   : > { %16780 = vmatprep.subr.bf16.mxu0 %v16779_v39  ;;  %v13979_v3 = vsel %vm1264_vm5, %v13968_v2, %v13970_v20  ;;  %v18518_v34 = vunpack.i.h.bf16 %v18516_v18  ;;  %v18517_v53 = vunpack.i.l.bf16 %v18516_v18 }
 0x48d   : > { %16267 = vmatprep.subr.mxu1 %v13979_v3  ;;  %16782 = vmatpush1.bf16.msra.mxu0 %v16781_v56 }
 0x48e   : > { %16268 = vmatpush3.msra.mxu1 %v13979_v3  ;;  %v14172_v35 = vsel %vm1471_vm6, %v18517_v53, %v18518_v34 }
 0x48f   : > { %v18521_v12 = vpop.permute.xlu1 %18520  ;;  %v18526_v62 = vpop.permute.xlu0 %18525  ;;  %16270 = vmatmul.mubr.msk.f32.vlgmr.msra.gmra.mrb[24].mxu1 %vm302_vm0, %v18823_v4 }
 0x490   : > { %v18523_v26 = vunpack.i.h.bf16 %v18521_v12  ;;  %v18522_v25 = vunpack.i.l.bf16 %v18521_v12  ;;  %v18528_v36 = vunpack.i.h.bf16 %v18526_v62  ;;  %v18527_v45 = vunpack.i.l.bf16 %v18526_v62  ;;  %14253 = vmatprep.mubr.f32.mxu1 %v18968_v16 }
 0x492   : > { %v14174_v41 = vsel %vm1471_vm6, %v18528_v36, %v18522_v25  ;;  %v14171_v49 = vsel %vm1471_vm6, %v18527_v45, %v18517_v53  ;;  %v14175_v27 = vsel %vm1471_vm6, %v18522_v25, %v18523_v26 }
 0x493   : > { %v16853_v55 = vpack.c.bf16 %v14174_v41, %v14171_v49  ;;  %v12356_v44 = vpop.permute.xlu1 %12355  ;;  %v12358_v37 = vpop.permute.xlu0 %12357  ;;  %v16851_v52 = vpack.c.bf16 %v14175_v27, %v14172_v35 }
 0x494   : > { %v12368_v22 = vsel %vm1471_vm6, %v12356_v44, %v12358_v37 }
 0x495   : > { %12383 = vmatprep.subr.mxu0 %v12368_v22  ;;  %16852 = vmatprep.subr.bf16.mxu1 %v16851_v52 }
 0x496   : > { %16854 = vmatpush1.bf16.msra.mxu1 %v16853_v55 }
 0x497   : > { %v18531_v43 = vpop.permute.xlu1 %18530  ;;  %v12354_v61 = vpop.permute.xlu0 %12353 }
 0x498   : > { %v18533_v51 = vunpack.i.h.bf16 %v18531_v43  ;;  %v18532_v46 = vunpack.i.l.bf16 %v18531_v43  ;;  %v12367_v9 = vsel %vm1471_vm6, %v12354_v61, %v12356_v44 }
 0x499   : > { %12384 = vmatpush1.msra.mxu0 %v12367_v9 }
 0x49a   : > { %v12363_v21 = vsel %vm1471_vm6, %v18503_v14, %v18532_v46  ;;  %v12366_v7 = vsel %vm1471_vm6, %v18508_v11, %v18533_v51  ;;  %15222 = vmatmul.mubr.msk.f32.vlgmr.msra.gmra.mrb[22].mxu0 %vm302_vm0, %v18824_v32 }
 0x49b   : > { %v14166_v29 = vpop.permute.xlu1 %14165  ;;  %v14168_v1 = vpop.permute.xlu0 %14167  ;;  %v16783_v2 = vpack.c.bf16 %v12366_v7, %v12363_v21  ;;  %12449 = vmatprep.mubr.f32.mxu0 %v18968_v16 }
 0x49c   : > { %v14178_v28 = vsel %vm1471_vm6, %v14166_v29, %v14168_v1 }
 0x49d   : > { %16784 = vmatprep.subr.bf16.mxu0 %v16783_v2  ;;  %14193 = vmatprep.subr.mxu1 %v14178_v28 }
 0x49e   : > { %16786 = vmatpush3.bf16.msra.mxu0 %v16783_v2 }
 0x49f   : > { %v18536_v0 = vpop.permute.xlu1 %18535  ;;  %v14164_v4 = vpop.permute.xlu0 %14163  ;;  %15223 = vmatmul.mubr.msk.f32.gmra.mrb[24].mxu0 %vm302_vm0, %v18825_v10 }
 0x4a0   : > { %v18538_v30 = vunpack.i.h.bf16 %v18536_v0  ;;  %v18537_v8 = vunpack.i.l.bf16 %v18536_v0  ;;  %v14177_v48 = vsel %vm1471_vm6, %v14164_v4, %v14166_v29  ;;  %16197 = vmatprep.mubr.msk.f32.mxu0 %vm302_vm0, %v18824_v32  ;;  %v18826_v4 = vld [vmem:[#allocation5 + $0x70] sm:$0xff] }
 0x4a1   : > { %14194 = vmatpush1.msra.mxu1 %v14177_v48 }
 0x4a2   : > { %v14173_v60 = vsel %vm1471_vm6, %v18518_v34, %v18537_v8  ;;  %v14176_v33 = vsel %vm1471_vm6, %v18523_v26, %v18538_v30  ;;  %15273 = vmatmul.mubr.msk.f32.vlgmr.msra.gmra.mrb[20].mxu1 %vm302_vm0, %v18824_v32 }
 0x4a3   : > { %v12360_v47 = vpop.permute.xlu1 %12359  ;;  %v22359_v31 = vpop.permute.xlu0 %18540  ;;  %v16855_v5 = vpack.c.bf16 %v14176_v33, %v14173_v60  ;;  %14259 = vmatprep.mubr.f32.mxu1 %v18968_v16 }
 0x4a4   : > { %v12369_v50 = vsel %vm1471_vm6, %v12358_v37, %v12360_v47  ;;  %v18543_v14 = vunpack.i.h.bf16 %v22359_v31  ;;  %v18542_v13 = vunpack.i.l.bf16 %v22359_v31 }
 0x4a5   : > { %16195 = vmatprep.subr.mxu0 %v12369_v50  ;;  %16856 = vmatprep.subr.bf16.mxu1 %v16855_v5 }
 0x4a6   : > { %16196 = vmatpush3.msra.mxu0 %v12369_v50  ;;  %16858 = vmatpush3.bf16.msra.mxu1 %v16855_v5  ;;  %v12562_v57 = vsel %vm1678_vm7, %v18542_v13, %v18543_v14 }
 0x4a7   : > { %v18546_v58 = vpop.permute.xlu1 %18545  ;;  %v18551_v15 = vpop.permute.xlu0 %18550  ;;  %16198 = vmatmul.mubr.msk.f32.vlgmr.msra.gmra.mrb[26].mxu0 %vm302_vm0, %v18825_v10  ;;  %15274 = vmatmul.mubr.msk.f32.gmra.mrb[22].mxu1 %vm302_vm0, %v18825_v10 }
 0x4a8   : > { %v18548_v11 = vunpack.i.h.bf16 %v18546_v58  ;;  %v18547_v42 = vunpack.i.l.bf16 %v18546_v58  ;;  %v18553_v54 = vunpack.i.h.bf16 %v18551_v15  ;;  %v18552_v19 = vunpack.i.l.bf16 %v18551_v15  ;;  %16278 = vmatprep.mubr.msk.f32.mxu1 %vm302_vm0, %v18824_v32  ;;  %12643 = vmatprep.mubr.f32.mxu0 %v18968_v16  ;;  %v22407_v15 = vld [vmem:[#allocation5 + $0x78] sm:$0xff] }
 0x4aa   : > { %v12564_v59 = vsel %vm1678_vm7, %v18553_v54, %v18547_v42  ;;  %v12561_v63 = vsel %vm1678_vm7, %v18552_v19, %v18542_v13  ;;  %v12565_v40 = vsel %vm1678_vm7, %v18547_v42, %v18548_v11 }
 0x4ab   : > { %v16789_v56 = vpack.c.bf16 %v12564_v59, %v12561_v63  ;;  %v14170_v39 = vpop.permute.xlu1 %14169  ;;  %v22373_v20 = vpop.permute.xlu0 %18555  ;;  %v16787_v18 = vpack.c.bf16 %v12565_v40, %v12562_v57 }
 0x4ac   : > { %v14179_v3 = vsel %vm1471_vm6, %v14168_v1, %v14170_v39  ;;  %v18558_v34 = vunpack.i.h.bf16 %v22373_v20  ;;  %v18557_v53 = vunpack.i.l.bf16 %v22373_v20 }
 0x4ad   : > { %16788 = vmatprep.subr.bf16.mxu0 %v16787_v18  ;;  %16276 = vmatprep.subr.mxu1 %v14179_v3 }
 0x4ae   : > { %16790 = vmatpush1.bf16.msra.mxu0 %v16789_v56  ;;  %16277 = vmatpush3.msra.mxu1 %v14179_v3  ;;  %v14372_v35 = vsel %vm1678_vm7, %v18557_v53, %v18558_v34 }
 0x4af   : > { %v22378_v12 = vpop.permute.xlu1 %18560  ;;  %v18566_v62 = vpop.permute.xlu0 %18565  ;;  %16279 = vmatmul.mubr.msk.f32.vlgmr.msra.gmra.mrb[24].mxu1 %vm302_vm0, %v18825_v10 }
 0x4b0   : > { %v18563_v26 = vunpack.i.h.bf16 %v22378_v12  ;;  %v18562_v25 = vunpack.i.l.bf16 %v22378_v12  ;;  %v18568_v36 = vunpack.i.h.bf16 %v18566_v62  ;;  %v18567_v45 = vunpack.i.l.bf16 %v18566_v62  ;;  %14453 = vmatprep.mubr.f32.mxu1 %v18968_v16 }
 0x4b2   : > { %v14374_v41 = vsel %vm1678_vm7, %v18568_v36, %v18562_v25  ;;  %v14371_v49 = vsel %vm1678_vm7, %v18567_v45, %v18557_v53  ;;  %v14375_v27 = vsel %vm1678_vm7, %v18562_v25, %v18563_v26 }
 0x4b3   : > { %v16861_v55 = vpack.c.bf16 %v14374_v41, %v14371_v49  ;;  %v12556_v44 = vpop.permute.xlu1 %12555  ;;  %v12558_v37 = vpop.permute.xlu0 %12557  ;;  %v16859_v52 = vpack.c.bf16 %v14375_v27, %v14372_v35 }
 0x4b4   : > { %v12568_v22 = vsel %vm1678_vm7, %v12556_v44, %v12558_v37  ;;  %v11035_v43 = vpop.f32.mrb[14].mxu1 }
 0x4b5   : > { %12583 = vmatprep.subr.mxu0 %v12568_v22  ;;  %16860 = vmatprep.subr.bf16.mxu1 %v16859_v52  ;;  %v11037_v61 = vpop.f32.mrb[15].mxu1  ;;  %v11127_v50 = vadd.f32 %v11035_v43, %v19675_v24 }
 0x4b6   : > { %16862 = vmatpush1.bf16.msra.mxu1 %v16861_v55 }
 0x4b7   : > { %v18571_v51 = vpop.permute.xlu1 %18570  ;;  %v12554_v46 = vpop.permute.xlu0 %12553 }
 0x4b8   : > { %v18573_v9 = vunpack.i.h.bf16 %v18571_v51  ;;  %v18572_v21 = vunpack.i.l.bf16 %v18571_v51  ;;  %v12567_v7 = vsel %vm1678_vm7, %v12554_v46, %v12556_v44  ;;  %v11041_v32 = vpop.f32.mrb[16].mxu1 }
 0x4b9   : > { %12584 = vmatpush1.msra.mxu0 %v12567_v7  ;;  %v11130_v29 = vadd.f32 %v11041_v32, %v19673_v23  ;;  %v11043_v1 = vpop.f32.mrb[17].mxu1 }
 0x4ba   : > { %v12563_v2 = vsel %vm1678_vm7, %v18543_v14, %v18572_v21  ;;  %v12566_v28 = vsel %vm1678_vm7, %v18548_v11, %v18573_v9  ;;  %v11131_v0 = vadd.f32 %v11043_v1, %v19673_v23  ;;  %15226 = vmatmul.mubr.msk.f32.vlgmr.msra.gmra.mrb[22].mxu0 %vm302_vm0, %v18826_v4  ;;  %v11128_v14 = vadd.f32 %v11037_v61, %v19675_v24 }
 0x4bb   : > { %v14366_v10 = vpop.permute.xlu1 %14365  ;;  %v22399_v30 = vpop.permute.xlu0 %14367  ;;  %v11136_v8 = vmul.f32 0.5, %v11130_v29  ;;  %v16791_v48 = vpack.c.bf16 %v12566_v28, %v12563_v2  ;;  %12649 = vmatprep.mubr.f32.mxu0 %v18968_v16 }
 0x4bc   : > { %v14378_v60 = vsel %vm1678_vm7, %v14366_v10, %v22399_v30  ;;  %v11137_v33 = vmul.f32 0.5, %v11131_v0 }
 0x4bd   : > { %18679 = vtanh.f32 %v11136_v8  ;;  %16792 = vmatprep.subr.bf16.mxu0 %v16791_v48  ;;  %14393 = vmatprep.subr.mxu1 %v14378_v60  ;;  %v16136_v47 = vpop.f32.mrb[18].mxu1 }
 0x4be   : > { %18681 = vtanh.f32 %v11137_v33  ;;  %16794 = vmatpush3.bf16.msra.mxu0 %v16791_v48  ;;  %v11132_v31 = vadd.f32 %v16136_v47, %v19673_v23  ;;  %v11112_v5 = vpop.f32.mrb[19].mxu1 }
 0x4bf   : > { %v18576_v13 = vpop.permute.xlu1 %18575  ;;  %v14364_v58 = vpop.permute.xlu0 %14363  ;;  %15227 = vmatmul.mubr.msk.f32.gmra.mrb[24].mxu0 %vm302_vm0, %v22407_v15  ;;  %v11129_v56 = vadd.f32 %v11112_v5, %v19675_v24 }
 0x4c0   : > { %v18578_v11 = vunpack.i.h.bf16 %v18576_v13  ;;  %v18577_v42 = vunpack.i.l.bf16 %v18576_v13  ;;  %v14377_v54 = vsel %vm1678_vm7, %v14364_v58, %v14366_v10  ;;  %v11138_v19 = vmul.f32 0.5, %v11132_v31  ;;  %16206 = vmatprep.mubr.msk.f32.mxu0 %vm302_vm0, %v18826_v4 }
 0x4c1   : > { %14394 = vmatpush1.msra.mxu1 %v14377_v54 }
 0x4c2   : > { %18683 = vtanh.f32 %v11138_v19  ;;  %v14373_v59 = vsel %vm1678_vm7, %v18558_v34, %v18577_v42  ;;  %v14376_v63 = vsel %vm1678_vm7, %v18563_v26, %v18578_v11  ;;  %15277 = vmatmul.mubr.msk.f32.vlgmr.msra.gmra.mrb[20].mxu1 %vm302_vm0, %v18826_v4 }
 0x4c3   : > { %18685 = vtanh.f32 %v11127_v50  ;;  %v12560_v57 = vpop.permute.xlu1 %12559  ;;  %v22420_v40 = vpop.permute.xlu0 %18580  ;;  %v16863_v39 = vpack.c.bf16 %v14376_v63, %v14373_v59  ;;  %14459 = vmatprep.mubr.f32.mxu1 %v18968_v16 }
 0x4c4   : > { %18687 = vtanh.f32 %v11128_v14  ;;  %v12569_v20 = vsel %vm1678_vm7, %v12558_v37, %v12560_v57  ;;  %v18583_v18 = vunpack.i.h.bf16 %v22420_v40  ;;  %v18582_v3 = vunpack.i.l.bf16 %v22420_v40 }
 0x4c5   : > { %16204 = vmatprep.subr.mxu0 %v12569_v20  ;;  %16864 = vmatprep.subr.bf16.mxu1 %v16863_v39  ;;  %18689 = vtanh.f32 %v11129_v56 }
 0x4c6   : > { %16205 = vmatpush3.msra.mxu0 %v12569_v20  ;;  %16866 = vmatpush3.bf16.msra.mxu1 %v16863_v39  ;;  %v12762_v55 = vsel %vm1885_vm8, %v18582_v3, %v18583_v18 }
 0x4c7   : > { %v18680_v34 = vpop.eup %18679  ;;  %v22427_v53 = vpop.permute.xlu1 %18585  ;;  %16207 = vmatmul.mubr.msk.f32.vlgmr.msra.gmra.mrb[26].mxu0 %vm302_vm0, %v22407_v15  ;;  %15278 = vmatmul.mubr.msk.f32.gmra.mrb[22].mxu1 %vm302_vm0, %v22407_v15 }
 0x4c8   : > { %v18591_v12 = vpop.permute.xlu0 %18590  ;;  %v18682_v62 = vpop.eup %18681  ;;  %v11142_v26 = vadd.f32 1.0, %v18680_v34  ;;  %v18588_v25 = vunpack.i.h.bf16 %v22427_v53  ;;  %v18587_v36 = vunpack.i.l.bf16 %v22427_v53  ;;  %16287 = vmatprep.mubr.msk.f32.mxu1 %vm302_vm0, %v18826_v4  ;;  %12843 = vmatprep.mubr.f32.mxu0 %v18968_v16 }
 0x4c9   : > { %v18593_v45 = vunpack.i.h.bf16 %v18591_v12  ;;  %v11143_v41 = vadd.f32 1.0, %v18682_v62  ;;  %v18592_v49 = vunpack.i.l.bf16 %v18591_v12  ;;  %v18828_v62 = vld [vmem:[#allocation5 + $0x80] sm:$0xff] }
 0x4ca   : > { %v11145_v35 = vmul.f32 0.5, %v11142_v26  ;;  %v12765_v44 = vsel %vm1885_vm8, %v18587_v36, %v18588_v25 }
 0x4cb   : > { %v12764_v27 = vsel %vm1885_vm8, %v18593_v45, %v18587_v36  ;;  %v11146_v37 = vmul.f32 0.5, %v11143_v41  ;;  %v12761_v52 = vsel %vm1885_vm8, %v18592_v49, %v18582_v3  ;;  %v14370_v22 = vpop.permute.xlu1 %14369  ;;  %v16795_v61 = vpack.c.bf16 %v12765_v44, %v12762_v55 }
 0x4cc   : > { %v22445_v43 = vpop.permute.xlu0 %18595  ;;  %v18684_v51 = vpop.eup %18683  ;;  %v11151_v46 = vsub.f32 1.0, %v11145_v35  ;;  %v16797_v9 = vpack.c.bf16 %v12764_v27, %v12761_v52  ;;  %v14379_v0 = vsel %vm1678_vm7, %v22399_v30, %v14370_v22  ;;  %v11148_v4 = vmul.f32 %v11145_v35, %v22217_v38  ;;  %v18829_v27 = vld [vmem:[#allocation5 + $0x88] sm:$0xff] }
 0x4cd   : > { %v18686_v21 = vpop.eup %18685  ;;  %v11152_v7 = vsub.f32 1.0, %v11146_v37  ;;  %v11144_v32 = vadd.f32 1.0, %v18684_v51  ;;  %16796 = vmatprep.subr.bf16.mxu0 %v16795_v61  ;;  %v18598_v2 = vunpack.i.h.bf16 %v22445_v43  ;;  %v18597_v28 = vunpack.i.l.bf16 %v22445_v43  ;;  %16285 = vmatprep.subr.mxu1 %v14379_v0 }
 0x4ce   : > { %v18688_v29 = vpop.eup %18687  ;;  %v11154_v1 = vmul.f32 %v18686_v21, %v11151_v46  ;;  %16798 = vmatpush1.bf16.msra.mxu0 %v16797_v9  ;;  %v11149_v10 = vmul.f32 %v11146_v37, %v22219_v6  ;;  %16286 = vmatpush3.msra.mxu1 %v14379_v0 }
 0x4cf   : > { %v11155_v8 = vmul.f32 %v18688_v29, %v11152_v7  ;;  %v11147_v48 = vmul.f32 0.5, %v11144_v32  ;;  %v18601_v60 = vpop.permute.xlu1 %18600  ;;  %v18690_v14 = vpop.eup %18689  ;;  %16288 = vmatmul.mubr.msk.f32.vlgmr.msra.gmra.mrb[24].mxu1 %vm302_vm0, %v22407_v15  ;;  %v14572_v11 = vsel %vm1885_vm8, %v18597_v28, %v18598_v2 }
 0x4d0   : > { %v18606_v33 = vpop.permute.xlu0 %18605  ;;  %v18603_v47 = vunpack.i.h.bf16 %v18601_v60  ;;  %v18602_v31 = vunpack.i.l.bf16 %v18601_v60  ;;  %v22455_v38 = vadd.f32 %v11154_v1, %v11148_v4  ;;  %14653 = vmatprep.mubr.f32.mxu1 %v18968_v16 }
 0x4d1   : > { %v18608_v5 = vunpack.i.h.bf16 %v18606_v33  ;;  %v18607_v50 = vunpack.i.l.bf16 %v18606_v33  ;;  %v11153_v13 = vsub.f32 1.0, %v11147_v48  ;;  %v22457_v6 = vadd.f32 %v11155_v8, %v11149_v10 }
 0x4d2   : > { %v14575_v42 = vsel %vm1885_vm8, %v18602_v31, %v18603_v47  ;;  %v11150_v54 = vmul.f32 %v11147_v48, %v22231_v17  ;;  %15183 = vst [vmem:[%s20346_s25 + $0x78] sm:$0xff] %v22455_v38 }
 0x4d3   : > { %v14574_v30 = vsel %vm1885_vm8, %v18608_v5, %v18602_v31  ;;  %v14571_v58 = vsel %vm1885_vm8, %v18607_v50, %v18597_v28  ;;  %v12756_v19 = vpop.permute.xlu1 %12755  ;;  %v16867_v63 = vpack.c.bf16 %v14575_v42, %v14572_v11  ;;  %15184 = vst [vmem:[%s20346_s25 + $0x80] sm:$0xff] %v22457_v6  ;;  %v11156_v57 = vmul.f32 %v18690_v14, %v11153_v13 }
 0x4d4   : > { %v16869_v15 = vpack.c.bf16 %v14574_v30, %v14571_v58  ;;  %v12758_v59 = vpop.permute.xlu0 %12757 }
 0x4d5   : > { %v12768_v56 = vsel %vm1885_vm8, %v12756_v19, %v12758_v59  ;;  %16868 = vmatprep.subr.bf16.mxu1 %v16867_v63  ;;  %v22472_v39 = vadd.f32 %v11156_v57, %v11150_v54 }
 0x4d6   : > { %12783 = vmatprep.subr.mxu0 %v12768_v56  ;;  %16870 = vmatpush1.bf16.msra.mxu1 %v16869_v15 }
 0x4d7   : > { %v12754_v20 = vpop.permute.xlu1 %12753  ;;  %15185 = vst [vmem:[%s20346_s25 + $0x88] sm:$0xff] %v22472_v39 }
 0x4d8   : > { %v18611_v3 = vpop.permute.xlu0 %18610  ;;  %v12767_v17 = vsel %vm1885_vm8, %v12754_v20, %v12756_v19 }
 0x4d9   : > { %v18613_v34 = vunpack.i.h.bf16 %v18611_v3  ;;  %v18612_v12 = vunpack.i.l.bf16 %v18611_v3  ;;  %12784 = vmatpush1.msra.mxu0 %v12767_v17 }
 0x4da   : > { %15230 = vmatmul.mubr.msk.f32.vlgmr.msra.gmra.mrb[22].mxu0 %vm302_vm0, %v18828_v62 }
 0x4db   : > { %v12763_v26 = vsel %vm1885_vm8, %v18583_v18, %v18612_v12  ;;  %v12766_v36 = vsel %vm1885_vm8, %v18588_v25, %v18613_v34  ;;  %v14566_v45 = vpop.permute.xlu1 %14565  ;;  %12849 = vmatprep.mubr.f32.mxu0 %v18968_v16 }
 0x4dc   : > { %v14568_v41 = vpop.permute.xlu0 %14567  ;;  %v16799_v49 = vpack.c.bf16 %v12766_v36, %v12763_v26 }
 0x4dd   : > { %v14578_v35 = vsel %vm1885_vm8, %v14566_v45, %v14568_v41 }
 0x4de   : > { %16800 = vmatprep.subr.bf16.mxu0 %v16799_v49  ;;  %14593 = vmatprep.subr.mxu1 %v14578_v35 }
 0x4df   : > { %15231 = vmatmul.mubr.msk.f32.gmra.mrb[24].mxu0 %vm302_vm0, %v18829_v27  ;;  %v14564_v40 = vpop.permute.xlu1 %14563 }
 0x4e0   : > { %16802 = vmatpush3.bf16.msra.mxu0 %v16799_v49  ;;  %v18616_v55 = vpop.permute.xlu0 %18615  ;;  %16215 = vmatprep.mubr.msk.f32.mxu0 %vm302_vm0, %v18828_v62  ;;  %v14577_v18 = vsel %vm1885_vm8, %v14564_v40, %v14566_v45 }
 0x4e1   : > { %v18618_v53 = vunpack.i.h.bf16 %v18616_v55  ;;  %v18617_v25 = vunpack.i.l.bf16 %v18616_v55  ;;  %14594 = vmatpush1.msra.mxu1 %v14577_v18 }
 0x4e2   : > { %15281 = vmatmul.mubr.msk.f32.vlgmr.msra.gmra.mrb[20].mxu1 %vm302_vm0, %v18828_v62 }
 0x4e3   : > { %v14573_v44 = vsel %vm1885_vm8, %v18598_v2, %v18617_v25  ;;  %v14576_v37 = vsel %vm1885_vm8, %v18603_v47, %v18618_v53  ;;  %v12760_v52 = vpop.permute.xlu1 %12759  ;;  %14659 = vmatprep.mubr.f32.mxu1 %v18968_v16 }
 0x4e4   : > { %v16871_v22 = vpack.c.bf16 %v14576_v37, %v14573_v44  ;;  %v14570_v61 = vpop.permute.xlu0 %14569  ;;  %v12769_v51 = vsel %vm1885_vm8, %v12758_v59, %v12760_v52 }
 0x4e5   : > { %16213 = vmatprep.subr.mxu0 %v12769_v51  ;;  %v14579_v43 = vsel %vm1885_vm8, %v14568_v41, %v14570_v61 }
 0x4e6   : > { %16872 = vmatprep.subr.bf16.mxu1 %v16871_v22  ;;  %16214 = vmatpush3.msra.mxu0 %v12769_v51 }
 0x4e7   : > { %15282 = vmatmul.mubr.msk.f32.gmra.mrb[22].mxu1 %vm302_vm0, %v18829_v27  ;;  %16216 = vmatmul.mubr.msk.f32.vlgmr.msra.gmra.mrb[26].mxu0 %vm302_vm0, %v18829_v27 }
 0x4e8   : > { %16874 = vmatpush3.bf16.msra.mxu1 %v16871_v22  ;;  %16296 = vmatprep.mubr.msk.f32.mxu1 %vm302_vm0, %v18828_v62 }
 0x4e9   : > { %16294 = vmatprep.subr.mxu1 %v14579_v43 }
 0x4ec   : > { %16295 = vmatpush3.msra.mxu1 %v14579_v43 }
 0x4ed   : > { %16297 = vmatmul.mubr.msk.f32.vlgmr.msra.gmra.mrb[24].mxu1 %vm302_vm0, %v18829_v27 }
 0x5ad   : > { %v12845_v16 = vpop.f32.mrb[22].mxu0 }
 0x5ae   : > { %v12847_v46 = vpop.f32.mrb[23].mxu0  ;;  %v12937_v0 = vadd.f32 %v12845_v16, %v19675_v24 }
 0x5af   : > { %v12938_v4 = vadd.f32 %v12847_v46, %v19675_v24 }
 0x5b2   : > { %v12851_v9 = vpop.f32.mrb[24].mxu0 }
 0x5b3   : > { %v12940_v21 = vadd.f32 %v12851_v9, %v19673_v23  ;;  %v12853_v7 = vpop.f32.mrb[25].mxu0 }
 0x5b4   : > { %v12941_v32 = vadd.f32 %v12853_v7, %v19673_v23 }
 0x5b5   : > { %v12946_v29 = vmul.f32 0.5, %v12940_v21  ;;  %v14655_v2 = vpop.f32.mrb[20].mxu1 }
 0x5b6   : > { %v12947_v1 = vmul.f32 0.5, %v12941_v32  ;;  %v14657_v28 = vpop.f32.mrb[21].mxu1  ;;  %v14747_v13 = vadd.f32 %v14655_v2, %v19675_v24 }
 0x5b7   : > { %18691 = vtanh.f32 %v12946_v29  ;;  %v14748_v63 = vadd.f32 %v14657_v28, %v19675_v24 }
 0x5b8   : > { %18693 = vtanh.f32 %v12947_v1 }
 0x5b9   : > { %18695 = vtanh.f32 %v12937_v0 }
 0x5ba   : > { %v14661_v10 = vpop.f32.mrb[22].mxu1  ;;  %v16217_v48 = vpop.f32.mrb[26].mxu0  ;;  %18697 = vtanh.f32 %v12938_v4 }
 0x5bb   : > { %v14750_v8 = vadd.f32 %v14661_v10, %v19673_v23  ;;  %v14663_v60 = vpop.f32.mrb[23].mxu1  ;;  %v12942_v33 = vadd.f32 %v16217_v48, %v19673_v23  ;;  %v12922_v31 = vpop.f32.mrb[27].mxu0 }
 0x5bc   : > { %v14751_v47 = vadd.f32 %v14663_v60, %v19673_v23  ;;  %v12939_v19 = vadd.f32 %v12922_v31, %v19675_v24 }
 0x5bd   : > { %v14756_v5 = vmul.f32 0.5, %v14750_v8  ;;  %v12948_v50 = vmul.f32 0.5, %v12942_v33 }
 0x5be   : > { %v14757_v14 = vmul.f32 0.5, %v14751_v47 }
 0x5bf   : > { %18699 = vtanh.f32 %v14756_v5 }
 0x5c0   : > { %18701 = vtanh.f32 %v12948_v50  ;;  %v16298_v30 = vpop.f32.mrb[24].mxu1 }
 0x5c1   : > { %v18692_v58 = vpop.eup %18691  ;;  %18703 = vtanh.f32 %v14757_v14  ;;  %v14752_v11 = vadd.f32 %v16298_v30, %v19673_v23  ;;  %v14732_v42 = vpop.f32.mrb[25].mxu1 }
 0x5c2   : > { %v18694_v54 = vpop.eup %18693  ;;  %v12952_v15 = vadd.f32 1.0, %v18692_v58  ;;  %18705 = vtanh.f32 %v14747_v13  ;;  %v14749_v23 = vadd.f32 %v14732_v42, %v19675_v24 }
 0x5c3   : > { %v12953_v59 = vadd.f32 1.0, %v18694_v54  ;;  %v14758_v57 = vmul.f32 0.5, %v14752_v11  ;;  %v18696_v17 = vpop.eup %18695 }
 0x5c4   : > { %v12955_v56 = vmul.f32 0.5, %v12952_v15  ;;  %v18698_v12 = vpop.eup %18697 }
 0x5c5   : > { %v12956_v20 = vmul.f32 0.5, %v12953_v59  ;;  %18707 = vtanh.f32 %v14758_v57 }
 0x5c6   : > { %v12961_v3 = vsub.f32 1.0, %v12955_v56  ;;  %18709 = vtanh.f32 %v12939_v19  ;;  %v12958_v62 = vmul.f32 %v12955_v56, %v22455_v38 }
 0x5c7   : > { %v12962_v34 = vsub.f32 1.0, %v12956_v20  ;;  %18711 = vtanh.f32 %v14748_v63  ;;  %v12959_v45 = vmul.f32 %v12956_v20, %v22457_v6 }
 0x5c8   : > { %v12964_v26 = vmul.f32 %v18696_v17, %v12961_v3  ;;  %18713 = vtanh.f32 %v14749_v23 }
 0x5c9   : > { %v18700_v36 = vpop.eup %18699  ;;  %v12965_v41 = vmul.f32 %v18698_v12, %v12962_v34 }
 0x5ca   : > { %v18702_v49 = vpop.eup %18701  ;;  %v12967_v35 = vadd.f32 %v12964_v26, %v12958_v62  ;;  %v14762_v27 = vadd.f32 1.0, %v18700_v36 }
 0x5cb   : > { %v18704_v40 = vpop.eup %18703  ;;  %v12954_v55 = vadd.f32 1.0, %v18702_v49  ;;  %v12968_v18 = vadd.f32 %v12965_v41, %v12959_v45 }
 0x5cc   : > { %15234 = vst [vmem:[%s20346_s25 + $0x90] sm:$0xff] %v12967_v35  ;;  %v14765_v53 = vmul.f32 0.5, %v14762_v27  ;;  %v14763_v25 = vadd.f32 1.0, %v18704_v40  ;;  %v18706_v44 = vpop.eup %18705 }
 0x5cd   : > { %v12957_v24 = vmul.f32 0.5, %v12954_v55  ;;  %15235 = vst [vmem:[%s20346_s25 + $0x98] sm:$0xff] %v12968_v18 }
 0x5ce   : > { %v14768_v38 = vmul.f32 %v14765_v53, %v12967_v35  ;;  %v14771_v37 = vsub.f32 1.0, %v14765_v53  ;;  %v14766_v52 = vmul.f32 0.5, %v14763_v25 }
 0x5cf   : > { %v18708_v6 = vpop.eup %18707  ;;  %v12963_v22 = vsub.f32 1.0, %v12957_v24  ;;  %v12960_v21 = vmul.f32 %v12957_v24, %v22472_v39 }
 0x5d0   : > { %v18710_v61 = vpop.eup %18709  ;;  %v14774_v51 = vmul.f32 %v18706_v44, %v14771_v37  ;;  %v14769_v43 = vmul.f32 %v14766_v52, %v12968_v18  ;;  %v14772_v16 = vsub.f32 1.0, %v14766_v52  ;;  %v14764_v46 = vadd.f32 1.0, %v18708_v6 }
 0x5d1   : > { %v18712_v9 = vpop.eup %18711  ;;  %v12966_v7 = vmul.f32 %v18710_v61, %v12963_v22 }
 0x5d2   : > { %v14777_v32 = vadd.f32 %v14774_v51, %v14768_v38  ;;  %v14775_v29 = vmul.f32 %v18712_v9, %v14772_v16  ;;  %v14767_v1 = vmul.f32 0.5, %v14764_v46  ;;  %v18714_v4 = vpop.eup %18713 }
 0x5d3   : > { %v12969_v2 = vadd.f32 %v12966_v7, %v12960_v21 }
 0x5d4   : > { %15285 = vst [vmem:[%s20346_s25 + $0xa8] sm:$0xff] %v14777_v32  ;;  %v14778_v28 = vadd.f32 %v14775_v29, %v14769_v43  ;;  %v14773_v0 = vsub.f32 1.0, %v14767_v1 }
 0x5d5   : > { %15236 = vst [vmem:[%s20346_s25 + $0xa0] sm:$0xff] %v12969_v2  ;;  %v14770_v10 = vmul.f32 %v14767_v1, %v12969_v2 }
 0x5d6   : > { %15286 = vst [vmem:[%s20346_s25 + $0xb0] sm:$0xff] %v14778_v28  ;;  %v14776_v8 = vmul.f32 %v18714_v4, %v14773_v0 }
 0x5d8   : > { %v14779_v39 = vadd.f32 %v14776_v8, %v14770_v10 }
 0x5da   : > { %15287 = vst [vmem:[%s20346_s25 + $0xb8] sm:$0xff] %v14779_v39 }
 0x5db   : > { %18901 = shalt.err (!%p18898_p7)
}
 0x5dc   : > { %s18902_s10 = scalar_lea.hbm %s22526_s20, 3072  ;;  %s18906_s28 = scalar_lea.hbm %s22576_s3, 6144 }
 0x5dd   : > { %p18903_p9 = scmp.ne.s32.totalorder %s22526_s20, %s18902_s10  ;;  %p18907_p5 = scmp.lt.u32.totalorder %s22526_s20, %s22576_s3 }
 0x5de   : > { %p18908_p11 = scmp.lt.u32.totalorder %s18906_s28, %s18902_s10  ;;  %p18910_p4 = scmp.lt.u32.totalorder %s18902_s10, %s22526_s20 }
 0x5df   : > { %p18904_p2 = pnand %p18903_p9, %p19090_p12 }
 0x5e0   : > { %p18909_p1 = por %p18908_p11, %p18907_p5 }
 0x5e1   : > { %p18905_p0 = pneg %p18904_p2 }
 0x5e2   : > { %p18911_p6 = por %p18910_p4, %p18909_p1 }
 0x5e4   : > { %p18912_p8 = pnand %p18911_p6, %p18905_p0 }
 0x5e6   : > { %18915 = shalt.err (!%p18912_p8)
}
 0x5e7   : > { %s18977_s30 = smov 384   ;;  %s18978_s25 = smov 24  }
 0x5e8   : > { %17270 = dma.vmem_to_hbm [thread:$0]  (%p19090_p12), %s22528_s8, 3072, %s22526_s20, %s14785_s16, %s18977_s30, %s18977_s30, %s18978_s25  }
 0x5e9 PF: > { %s14813_s7 = sand.u32 1, %s18946_s12   ;;  %p22591_p10 = scmp.ne.s32.totalorder %s22581_s19, 0 }
 0x5ea   : > { %p22592_p13 = scmp.ge.s32.totalorder %s18958_s15, 2  ;;  %s14814_s9 = scalar_lea.sflag [#allocation4], %s14813_s7 }
 0x5ec   : > { %p17281_p3 = pnand %p22592_p13, %p22591_p10 }
 0x5ee   : > { %18941 = dma.done.wait (!%p17281_p3), %s14814_s9, 3072  }
 0x5ef   : > { %18943 = vsyncadd (!%p17281_p3), %s14814_s9, 4294964224  ;;  %p17_p7 = scmp.ge.s32.totalorder %s19055_s24, 4   ;;  %s22593_s12 = smov %s18950_s13 }
 0x5f0   : > { %s22594_s13 = smov %s18954_s14  ;;  %s22595_s14 = smov %s19086_s17 }
 0x5f1   : > { %s22596_s15 = smov %s19055_s24  ;;  %19 = sbr.rel (!%p17_p7) target bundleno = 6 (0x6), region = 104 }
 0x5f8   :  { %14819 = vsyncpa [#allocation3], 1 }
 0x5f9   :  { %14821 = vsyncpa [#allocation3 + $0x1], 1 }
 0x5fa   :  { %14822 = vsyncpa [#allocation6], 1 }
 0x5fb   :  { %14823 = vsyncpa [#allocation4], 1 }
 0x5fc   :  { %14825 = vsyncpa [#allocation4 + $0x1], 1 }

</bundles_post_ra>
